<compile_context>
chip_gen: v6e
topology: v6e:2x2x1
jax: 0.10.0
libtpu: 0.0.40
codegen_flags: <defaults>
</compile_context>

<pallas_src>
import functools
import math

import jax
import jax.numpy as jnp
from jax.experimental import pallas as pl
from jax.experimental.pallas import tpu as pltpu


def _round_up(x, m):
    return (x + m - 1) // m * m


def _pick_tile(total, candidates):
    for c in candidates:
        if total % c == 0:
            return c
    return total


# ------------------------- Pallas kernels -------------------------

def _mm_stats_kernel(a_ref, b_ref, y_ref, sum_ref, sq_ref, acc_ref):
    """One (tm,tn) tile of A@B.  bf16 operands on the MXU, f32 accumulation in a VMEM
    scratch.  On the last K step the bf16 output tile is stored and the per-tile column
    sum / sum-of-squares needed by training-mode BatchNorm are emitted from the f32
    accumulator, so BN never re-reads the conv output just to compute statistics."""
    k = pl.program_id(2)

    @pl.when(k == 0)
    def _():
        acc_ref[...] = jnp.zeros_like(acc_ref)

    acc_ref[...] += jnp.dot(a_ref[...], b_ref[...], preferred_element_type=jnp.float32)

    @pl.when(k == pl.num_programs(2) - 1)
    def _():
        y = acc_ref[...]
        y_ref[...] = y.astype(y_ref.dtype)
        sum_ref[...] = jnp.sum(y, axis=0)[None, None, :]
        sq_ref[...] = jnp.sum(y * y, axis=0)[None, None, :]


def matmul_stats(a, b, out_dtype=jnp.bfloat16):
    """y = a @ b plus per-(M-tile) per-column partial sums / sums-of-squares.

    a: (M, K) activations/patches (cast to bf16 here, M padded to the tile).
    b: (Kp, Np) weights, already transposed / zero-padded / bf16 at init time
       (Kp, Np multiples of 128).
    Returns y (Mp, Np) out_dtype, psum (Mp//tm, 1, Np) f32, psumsq (Mp//tm, 1, Np) f32.
    """
    M, K = a.shape
    Kp, Np = b.shape
    tm = min(256, _round_up(M, 16))                 # bf16 min sublane tile is 16
    Mp = _round_up(M, tm)
    tn = _pick_tile(Np, (256, 128))
    tk = _pick_tile(Kp, (512, 384, 256, 128))

    a = a.astype(jnp.bfloat16)
    if Mp != M or Kp != K:
        a = jnp.pad(a, ((0, Mp - M), (0, Kp - K)))
    nmt = Mp // tm

    y, psum, psq = pl.pallas_call(
        _mm_stats_kernel,
        out_shape=(jax.ShapeDtypeStruct((Mp, Np), out_dtype),
                   jax.ShapeDtypeStruct((nmt, 1, Np), jnp.float32),
                   jax.ShapeDtypeStruct((nmt, 1, Np), jnp.float32)),
        grid_spec=pltpu.PrefetchScalarGridSpec(
            num_scalar_prefetch=0,
            grid=(nmt, Np // tn, Kp // tk),
            in_specs=[pl.BlockSpec((tm, tk), lambda i, j, k: (i, k)),
                      pl.BlockSpec((tk, tn), lambda i, j, k: (k, j))],
            out_specs=[pl.BlockSpec((tm, tn), lambda i, j, k: (i, j)),
                       pl.BlockSpec((1, 1, tn), lambda i, j, k: (i, 0, j)),
                       pl.BlockSpec((1, 1, tn), lambda i, j, k: (i, 0, j))],
            scratch_shapes=[pltpu.VMEM((tm, tn), jnp.float32)]),
        compiler_params=pltpu.CompilerParams(
            dimension_semantics=("parallel", "parallel", "arbitrary"),
            vmem_limit_bytes=32 * 1024 * 1024),
    )(a, b)
    return y, psum, psq


def _mm_bias_kernel(a_ref, b_ref, bias_ref, y_ref, acc_ref):
    """Plain tiled matmul with the bias add fused into the epilogue (fc layer)."""
    k = pl.program_id(2)

    @pl.when(k == 0)
    def _():
        acc_ref[...] = jnp.zeros_like(acc_ref)

    acc_ref[...] += jnp.dot(a_ref[...], b_ref[...], preferred_element_type=jnp.float32)

    @pl.when(k == pl.num_programs(2) - 1)
    def _():
        y_ref[...] = (acc_ref[...] + bias_ref[...]).astype(y_ref.dtype)


def matmul_bias(a, b, bias, out_dtype=jnp.float32):
    """y = a @ b + bias.  a: (M,K); b: (Kp,Np) bf16 pre-padded; bias: (1,Np) f32."""
    M, K = a.shape
    Kp, Np = b.shape
    tm = min(256, _round_up(M, 16))
    Mp = _round_up(M, tm)
    tn = _pick_tile(Np, (256, 128))
    tk = _pick_tile(Kp, (512, 384, 256, 128))

    a = a.astype(jnp.bfloat16)
    if Mp != M or Kp != K:
        a = jnp.pad(a, ((0, Mp - M), (0, Kp - K)))

    return pl.pallas_call(
        _mm_bias_kernel,
        out_shape=jax.ShapeDtypeStruct((Mp, Np), out_dtype),
        grid_spec=pltpu.PrefetchScalarGridSpec(
            num_scalar_prefetch=0,
            grid=(Mp // tm, Np // tn, Kp // tk),
            in_specs=[pl.BlockSpec((tm, tk), lambda i, j, k: (i, k)),
                      pl.BlockSpec((tk, tn), lambda i, j, k: (k, j)),
                      pl.BlockSpec((1, tn), lambda i, j, k: (0, j))],
            out_specs=pl.BlockSpec((tm, tn), lambda i, j, k: (i, j)),
            scratch_shapes=[pltpu.VMEM((tm, tn), jnp.float32)]),
        compiler_params=pltpu.CompilerParams(
            dimension_semantics=("parallel", "parallel", "arbitrary"),
            vmem_limit_bytes=32 * 1024 * 1024),
    )(a, b, bias)


def _scale_shift_kernel(y_ref, s_ref, t_ref, o_ref, *, relu, post_scale):
    # Fused folded-BatchNorm affine + ReLU (+ residual scaling); math in f32,
    # stored in the (bf16) activation dtype.
    v = y_ref[...].astype(jnp.float32) * s_ref[...] + t_ref[...]
    if relu:
        v = jnp.maximum(v, 0.0)
    if post_scale != 1.0:
        v = v * post_scale
    o_ref[...] = v.astype(o_ref.dtype)


def scale_shift_act(y, scale, shift, *, relu=True, post_scale=1.0, out_dtype=jnp.bfloat16):
    """Row-tiled per-channel affine + optional ReLU.  y: (Mp, Np) bf16; scale/shift (1, Np).
    When dtypes match, the conv output buffer is aliased and updated in place."""
    Mp, Np = y.shape
    tmb = Mp if Mp <= 512 else _pick_tile(Mp, (512, 256, 128, 64, 32, 16))
    kern = functools.partial(_scale_shift_kernel, relu=relu, post_scale=post_scale)
    aliases = {0: 0} if y.dtype == out_dtype else {}
    return pl.pallas_call(
        kern,
        out_shape=jax.ShapeDtypeStruct((Mp, Np), out_dtype),
        grid=(Mp // tmb,),
        in_specs=[pl.BlockSpec((tmb, Np), lambda i: (i, 0)),
                  pl.BlockSpec((1, Np), lambda i: (0, 0)),
                  pl.BlockSpec((1, Np), lambda i: (0, 0))],
        out_specs=pl.BlockSpec((tmb, Np), lambda i: (i, 0)),
        input_output_aliases=aliases,
        compiler_params=pltpu.CompilerParams(
            dimension_semantics=("parallel",),
            vmem_limit_bytes=32 * 1024 * 1024),
    )(y, scale, shift)


def _gap_kernel(x_ref, o_ref, *, denom):
    s = jnp.sum(x_ref[...].astype(jnp.float32), axis=1, keepdims=True)
    o_ref[...] = (s * (1.0 / denom)).astype(o_ref.dtype)


def global_avgpool(x):
    """x: (N, H, W, C) -> (N, C).  C stays on the lane axis and HW is reduced
    in-kernel (no transpose, no HW-major copy); one grid step per sample."""
    N, H, W, C = x.shape
    x3 = x.reshape(N, H * W, C)
    out = pl.pallas_call(
        functools.partial(_gap_kernel, denom=float(H * W)),
        out_shape=jax.ShapeDtypeStruct((N, 1, C), jnp.bfloat16),
        grid=(N,),
        in_specs=[pl.BlockSpec((1, H * W, C), lambda i: (i, 0, 0))],
        out_specs=pl.BlockSpec((1, 1, C), lambda i: (i, 0, 0)),
        compiler_params=pltpu.CompilerParams(dimension_semantics=("parallel",)),
    )(x3)
    return out.reshape(N, C)


# ------------------------- wrappers (glue) -------------------------

def _im2col(x, kh, kw, stride, pad):
    # bf16 patch matrix built by XLA indexing (halves patch HBM traffic vs. f32).
    # TODO(synk): implicit-GEMM (in-kernel im2col from a VMEM-resident input slab)
    # would remove the kh*kw patch materialization entirely; kept XLA-side for robustness.
    if pad:
        x = jnp.pad(x, ((0, 0), (pad, pad), (pad, pad), (0, 0)))
    N, H, W, C = x.shape
    Ho = (H - kh) // stride + 1
    Wo = (W - kw) // stride + 1
    cols = []
    for i in range(kh):
        for j in range(kw):
            cols.append(x[:, i:i + stride * (Ho - 1) + 1:stride,
                           j:j + stride * (Wo - 1) + 1:stride, :])
    patches = jnp.concatenate(cols, axis=-1)
    return patches.reshape(N * Ho * Wo, kh * kw * C), Ho, Wo


def conv_bn_act(x, p, *, stride, pad, post_scale=1.0, eps=1e-5):
    """conv (bias dropped: training-mode BN cancels it exactly) -> BatchNorm (batch
    statistics from the matmul epilogue) -> ReLU, all fused into matmul + one tiled
    in-place normalize pass."""
    N = x.shape[0]
    kh, kw = p["kh"], p["kw"]
    if kh == 1 and kw == 1 and pad == 0 and stride == 1:
        Ho, Wo = x.shape[1], x.shape[2]
        a = x.reshape(N * Ho * Wo, x.shape[3])          # 1x1 conv: no im2col at all
    else:
        a, Ho, Wo = _im2col(x, kh, kw, stride, pad)
    M = N * Ho * Wo

    y, psum, psq = matmul_stats(a, p["w"])
    Np = y.shape[1]

    # Fold batch statistics into one per-channel scale/shift (tiny (1,C) math).
    mean = jnp.sum(psum, axis=0) / float(M)                              # (1, Np)
    var = jnp.maximum(jnp.sum(psq, axis=0) / float(M) - mean * mean, 0.0)
    scale = p["gamma"] * jax.lax.rsqrt(var + eps)
    shift = p["beta"] - mean * scale

    out = scale_shift_act(y, scale, shift, relu=True, post_scale=post_scale)
    return out[:M].reshape(N, Ho, Wo, Np)


def maxpool2d(x, k, stride):
    # Running maximum over the k*k shifted strided views (pure elementwise, fused by
    # XLA) instead of materializing a k*k-times larger stacked tensor in HBM.
    N, H, W, C = x.shape
    Ho = (H - k) // stride + 1
    Wo = (W - k) // stride + 1
    out = None
    for i in range(k):
        for j in range(k):
            win = x[:, i:i + stride * (Ho - 1) + 1:stride,
                     j:j + stride * (Wo - 1) + 1:stride, :]
            out = win if out is None else jnp.maximum(out, win)
    return out


# ------------------------- model -------------------------

def block_forward(x, bp, stride):
    # Mirrors block.forward: x = relu(bn1(conv1(x))); relu(bn1(conv2(x))); relu(bn1(conv1(x)))
    y = conv_bn_act(x, bp["c1"], stride=1, pad=0)
    # TODO(synk): reference declares conv2 = Conv2d(in_ch, out_ch) but applies it to an
    # out_ch-channel tensor (not executable in PyTorch); implemented as out_ch -> out_ch.
    y = conv_bn_act(y, bp["c2"], stride=stride, pad=1)
    # TODO(synk): reference reuses self.conv1 for the third conv; weights are shared only
    # when in_ch == out_ch (the only executable case), otherwise an out_ch -> out_ch 1x1 is used.
    # TODO(synk): reference identity_downsample applied post-conv is shape-incompatible with
    # `x += identity`; identity = y is used, i.e. relu(y + y) = 2*y, folded into the third
    # conv's epilogue as post_scale=2 (y is already non-negative after ReLU).
    y = conv_bn_act(y, bp["c3"], stride=1, pad=0, post_scale=2.0)
    return y


def resnet_forward(params, x_nchw):
    x = jnp.transpose(x_nchw, (0, 2, 3, 1)).astype(jnp.bfloat16)   # NCHW -> NHWC, bf16 activations
    x = conv_bn_act(x, params["stem"], stride=3, pad=2)            # faithful stride=3, pad=2 stem
    x = maxpool2d(x, 3, 2)
    for stage in params["stages"]:
        for i, bp in enumerate(stage["blocks"]):
            x = block_forward(x, bp, stage["stride"] if i == 0 else 1)
    feats = global_avgpool(x)                                      # (N, C_pad) bf16
    fc = params["fc"]
    logits = matmul_bias(feats, fc["w"], fc["bias"], out_dtype=jnp.float32)
    return logits[:feats.shape[0], :fc["num_classes"]]


# ------------------------- params -------------------------

def _prep_conv(key, cout, cin, kh, kw, cin_pad, cout_pad):
    # Transpose to (kh*kw*cin_pad, cout_pad), zero-pad to lane/tile-aligned shapes and
    # cast to bf16 ONCE at init — never per forward call.
    w = jax.random.normal(key, (cout, cin, kh, kw), jnp.float32) / math.sqrt(cin * kh * kw)
    wt = jnp.transpose(w, (2, 3, 1, 0))                    # (kh, kw, cin, cout)
    wt = jnp.pad(wt, ((0, 0), (0, 0), (0, cin_pad - cin), (0, cout_pad - cout)))
    wmat = wt.reshape(kh * kw * cin_pad, cout_pad)
    kp = _round_up(wmat.shape[0], 128)
    wmat = jnp.pad(wmat, ((0, kp - wmat.shape[0]), (0, 0)))
    return wmat.astype(jnp.bfloat16)


def _bn_params(cout, cout_pad):
    gamma = jnp.pad(jnp.ones((1, cout), jnp.float32), ((0, 0), (0, cout_pad - cout)))
    beta = jnp.zeros((1, cout_pad), jnp.float32)
    return gamma, beta


def init_params(key, img_channels=3, layers=(1, 1, 1, 1), num_classes=1000):
    keys = iter(jax.random.split(key, 64))
    params = {}
    c_pad = lambda c: _round_up(c, 128)

    stem_out, stem_out_p = 64, c_pad(64)
    g, b = _bn_params(stem_out, stem_out_p)
    params["stem"] = dict(
        w=_prep_conv(next(keys), stem_out, img_channels, 7, 7, img_channels, stem_out_p),
        kh=7, kw=7, gamma=g, beta=b)

    stages = []
    in_ch, in_ch_p = stem_out, stem_out_p
    for n_blocks, out_ch, stride in zip(layers, (64, 128, 256, 524), (1, 2, 2, 2)):
        out_p = c_pad(out_ch)
        blocks = []
        cin, cin_p = in_ch, in_ch_p
        for _ in range(n_blocks):
            gamma, beta = _bn_params(out_ch, out_p)        # single bn1 reused by all three convs
            w1 = _prep_conv(next(keys), out_ch, cin, 1, 1, cin_p, out_p)
            w2 = _prep_conv(next(keys), out_ch, out_ch, 3, 3, out_p, out_p)
            if cin == out_ch:
                w3 = w1                                    # faithful reuse of conv1
            else:
                w3 = _prep_conv(next(keys), out_ch, out_ch, 1, 1, out_p, out_p)
            blocks.append(dict(
                c1=dict(w=w1, kh=1, kw=1, gamma=gamma, beta=beta),
                c2=dict(w=w2, kh=3, kw=3, gamma=gamma, beta=beta),
                c3=dict(w=w3, kh=1, kw=1, gamma=gamma, beta=beta)))
            cin, cin_p = out_ch, out_p
        stages.append(dict(blocks=blocks, stride=stride))
        in_ch, in_ch_p = out_ch, out_p
    params["stages"] = stages

    # TODO(synk): reference declares nn.Linear(2048, 1000) but the flattened features have
    # 524 dims (layer4 out_channels=524 as written); fc is sized to the actual feature width.
    feat, feat_p = in_ch, in_ch_p
    ncls_p = _round_up(num_classes, 128)
    kf1, kf2 = jax.random.split(next(keys))
    fw = jax.random.normal(kf1, (feat, num_classes), jnp.float32) / math.sqrt(feat)
    fw = jnp.pad(fw, ((0, feat_p - feat), (0, ncls_p - num_classes))).astype(jnp.bfloat16)
    fb = 0.01 * jax.random.normal(kf2, (1, num_classes), jnp.float32)
    fb = jnp.pad(fb, ((0, 0), (0, ncls_p - num_classes)))
    params["fc"] = dict(w=fw, bias=fb, num_classes=num_classes)
    return params


if __name__ == "__main__":
    key = jax.random.PRNGKey(0)
    pkey, xkey = jax.random.split(key)
    params = init_params(pkey, img_channels=3, layers=(1, 1, 1, 1), num_classes=1000)
    x = jax.random.normal(xkey, (2, 3, 64, 64), jnp.float32)   # NCHW, like PyTorch

    fwd = jax.jit(lambda inp: resnet_forward(params, inp))     # params closed over: static ints stay static
    out = jax.block_until_ready(fwd(x))
    assert out.shape == (2, 1000), out.shape
    assert bool(jnp.all(jnp.isfinite(out)))
    print("KERNEL_OK")
</pallas_src>

<mosaic_0001>
module attributes {stable_mosaic.version = 11 : i64} {
  func.func @_mm_stats_kernel(%arg0: i32, %arg1: i32, %arg2: i32, %arg3: memref<256x256xbf16, #tpu.memory_space<vmem>>, %arg4: memref<256x128xbf16, #tpu.memory_space<vmem>>, %arg5: memref<256x128xbf16, #tpu.memory_space<vmem>>, %arg6: memref<1x1x128xf32, #tpu.memory_space<vmem>>, %arg7: memref<1x1x128xf32, #tpu.memory_space<vmem>>, %arg8: memref<256x128xf32, #tpu.memory_space<vmem>>) attributes {dimension_semantics = [#tpu.dimension_semantics<parallel>, #tpu.dimension_semantics<parallel>, #tpu.dimension_semantics<arbitrary>], iteration_bounds = array<i64: 4, 1, 1>, scalar_prefetch = 0 : i64, scratch_operands = 1 : i64, tpu.core_type = #tpu.core_type<tc>, window_params = [{transform_indices = @transform_0, window_bounds = array<i64: 256, 256>}, {transform_indices = @transform_1, window_bounds = array<i64: 256, 128>}, {transform_indices = @transform_2, window_bounds = array<i64: 256, 128>}, {transform_indices = @transform_3, window_bounds = array<i64: 1, 1, 128>}, {transform_indices = @transform_4, window_bounds = array<i64: 1, 1, 128>}]} {
    %c0_i32 = arith.constant 0 : i32
    %0 = arith.cmpi eq, %arg2, %c0_i32 : i32
    %1 = arith.extui %0 : i1 to i32
    %c0_i32_0 = arith.constant 0 : i32
    %2 = arith.cmpi ne, %1, %c0_i32_0 : i32
    scf.if %2 {
      %cst_10 = arith.constant 0.000000e+00 : f32
      %12 = vector.broadcast %cst_10 : f32 to vector<256x128xf32>
      %c0_11 = arith.constant 0 : index
      %c0_12 = arith.constant 0 : index
      %13 = vector.load %arg8[%c0_11, %c0_12] : memref<256x128xf32, #tpu.memory_space<vmem>>, vector<256x128xf32>
      tpu.vector_store %arg8[%c0_11, %c0_12], %12 {strides = array<i32>} : memref<256x128xf32, #tpu.memory_space<vmem>>, vector<256x128xf32>,
    } else {
    }
    %c0 = arith.constant 0 : index
    %c0_1 = arith.constant 0 : index
    %3 = vector.load %arg8[%c0, %c0_1] : memref<256x128xf32, #tpu.memory_space<vmem>>, vector<256x128xf32>
    %c0_2 = arith.constant 0 : index
    %c0_3 = arith.constant 0 : index
    %4 = vector.load %arg3[%c0_2, %c0_3] : memref<256x256xbf16, #tpu.memory_space<vmem>>, vector<256x256xbf16>
    %c0_4 = arith.constant 0 : index
    %c0_5 = arith.constant 0 : index
    %5 = vector.load %arg4[%c0_4, %c0_5] : memref<256x128xbf16, #tpu.memory_space<vmem>>, vector<256x128xbf16>
    %cst = arith.constant dense<0.000000e+00> : vector<256x128xf32>
    %6 = tpu.matmul %4, %5, %cst {dimension_numbers = #tpu.dot_dimension_numbers<[1], [0], [0], [1], [0, 0, 1, 1], [], []>} : vector<256x256xbf16>, vector<256x128xbf16>, vector<256x128xf32> -> vector<256x128xf32>
    %7 = arith.addf %3, %6 : vector<256x128xf32>
    %c0_6 = arith.constant 0 : index
    %c0_7 = arith.constant 0 : index
    %8 = vector.load %arg8[%c0_6, %c0_7] : memref<256x128xf32, #tpu.memory_space<vmem>>, vector<256x128xf32>
    tpu.vector_store %arg8[%c0_6, %c0_7], %7 {strides = array<i32>} : memref<256x128xf32, #tpu.memory_space<vmem>>, vector<256x128xf32>,
    %c0_i32_8 = arith.constant 0 : i32
    %9 = arith.cmpi eq, %arg2, %c0_i32_8 : i32
    %10 = arith.extui %9 : i1 to i32
    %c0_i32_9 = arith.constant 0 : i32
    %11 = arith.cmpi ne, %10, %c0_i32_9 : i32
    scf.if %11 {
      %c0_10 = arith.constant 0 : index
      %c0_11 = arith.constant 0 : index
      %12 = vector.load %arg8[%c0_10, %c0_11] : memref<256x128xf32, #tpu.memory_space<vmem>>, vector<256x128xf32>
      %13 = arith.truncf %12 : vector<256x128xf32> to vector<256x128xbf16>
      %c0_12 = arith.constant 0 : index
      %c0_13 = arith.constant 0 : index
      %14 = vector.load %arg5[%c0_12, %c0_13] : memref<256x128xbf16, #tpu.memory_space<vmem>>, vector<256x128xbf16>
      tpu.vector_store %arg5[%c0_12, %c0_13], %13 {strides = array<i32>} : memref<256x128xbf16, #tpu.memory_space<vmem>>, vector<256x128xbf16>,
      %cst_14 = arith.constant dense<0.000000e+00> : vector<128xf32>
      %15 = vector.multi_reduction <add>, %12, %cst_14 [0] : vector<256x128xf32> to vector<128xf32>
      %16 = vector.shape_cast %15 : vector<128xf32> to vector<1x1x128xf32>
      %c0_15 = arith.constant 0 : index
      %c0_16 = arith.constant 0 : index
      %c0_17 = arith.constant 0 : index
      %17 = vector.load %arg6[%c0_15, %c0_16, %c0_17] : memref<1x1x128xf32, #tpu.memory_space<vmem>>, vector<1x1x128xf32>
      tpu.vector_store %arg6[%c0_15, %c0_16, %c0_17], %16 {strides = array<i32>} : memref<1x1x128xf32, #tpu.memory_space<vmem>>, vector<1x1x128xf32>,
      %18 = arith.mulf %12, %12 : vector<256x128xf32>
      %cst_18 = arith.constant dense<0.000000e+00> : vector<128xf32>
      %19 = vector.multi_reduction <add>, %18, %cst_18 [0] : vector<256x128xf32> to vector<128xf32>
      %20 = vector.shape_cast %19 : vector<128xf32> to vector<1x1x128xf32>
      %c0_19 = arith.constant 0 : index
      %c0_20 = arith.constant 0 : index
      %c0_21 = arith.constant 0 : index
      %21 = vector.load %arg7[%c0_19, %c0_20, %c0_21] : memref<1x1x128xf32, #tpu.memory_space<vmem>>, vector<1x1x128xf32>
      tpu.vector_store %arg7[%c0_19, %c0_20, %c0_21], %20 {strides = array<i32>} : memref<1x1x128xf32, #tpu.memory_space<vmem>>, vector<1x1x128xf32>,
    } else {
    }
    return
  }
  func.func @transform_0(%arg0: i32, %arg1: i32, %arg2: i32) -> (i32, i32) {
    %c0_i32 = arith.constant 0 : i32
    return %arg0, %arg2 : i32, i32
  }
  func.func @transform_1(%arg0: i32, %arg1: i32, %arg2: i32) -> (i32, i32) {
    %c0_i32 = arith.constant 0 : i32
    return %arg2, %arg1 : i32, i32
  }
  func.func @transform_2(%arg0: i32, %arg1: i32, %arg2: i32) -> (i32, i32) {
    %c0_i32 = arith.constant 0 : i32
    return %arg0, %arg1 : i32, i32
  }
  func.func @transform_3(%arg0: i32, %arg1: i32, %arg2: i32) -> (i32, i32, i32) {
    %c0_i32 = arith.constant 0 : i32
    %c0_i32_0 = arith.constant 0 : i32
    return %arg0, %c0_i32, %arg1 : i32, i32, i32
  }
  func.func @transform_4(%arg0: i32, %arg1: i32, %arg2: i32) -> (i32, i32, i32) {
    %c0_i32 = arith.constant 0 : i32
    %c0_i32_0 = arith.constant 0 : i32
    return %arg0, %c0_i32, %arg1 : i32, i32, i32
  }
}

module attributes {stable_mosaic.version = 11 : i64} {
  func.func @_scale_shift_kernel(%arg0: i32, %arg1: memref<512x128xbf16, #tpu.memory_space<vmem>>, %arg2: memref<1x128xf32, #tpu.memory_space<vmem>>, %arg3: memref<1x128xf32, #tpu.memory_space<vmem>>, %arg4: memref<512x128xbf16, #tpu.memory_space<vmem>>) attributes {dimension_semantics = [#tpu.dimension_semantics<parallel>], iteration_bounds = array<i64: 2>, scalar_prefetch = 0 : i64, scratch_operands = 0 : i64, tpu.core_type = #tpu.core_type<tc>, window_params = [{transform_indices = @transform_0, window_bounds = array<i64: 512, 128>}, {pipeline_mode = #tpu.pipeline_mode<synchronous>, transform_indices = @transform_1, window_bounds = array<i64: 1, 128>}, {pipeline_mode = #tpu.pipeline_mode<synchronous>, transform_indices = @transform_2, window_bounds = array<i64: 1, 128>}, {transform_indices = @transform_3, window_bounds = array<i64: 512, 128>}]} {
    %c0 = arith.constant 0 : index
    %c0_0 = arith.constant 0 : index
    %0 = vector.load %arg1[%c0, %c0_0] : memref<512x128xbf16, #tpu.memory_space<vmem>>, vector<512x128xbf16>
    %1 = arith.extf %0 : vector<512x128xbf16> to vector<512x128xf32>
    %c0_1 = arith.constant 0 : index
    %c0_2 = arith.constant 0 : index
    %2 = vector.load %arg2[%c0_1, %c0_2] : memref<1x128xf32, #tpu.memory_space<vmem>>, vector<1x128xf32>
    %3 = vector.broadcast %2 : vector<1x128xf32> to vector<512x128xf32>
    %4 = arith.mulf %1, %3 : vector<512x128xf32>
    %c0_3 = arith.constant 0 : index
    %c0_4 = arith.constant 0 : index
    %5 = vector.load %arg3[%c0_3, %c0_4] : memref<1x128xf32, #tpu.memory_space<vmem>>, vector<1x128xf32>
    %6 = vector.broadcast %5 : vector<1x128xf32> to vector<512x128xf32>
    %7 = arith.addf %4, %6 : vector<512x128xf32>
    %cst = arith.constant 0.000000e+00 : f32
    %8 = vector.broadcast %cst : f32 to vector<512x128xf32>
    %9 = arith.maximumf %7, %8 : vector<512x128xf32>
    %10 = arith.truncf %9 : vector<512x128xf32> to vector<512x128xbf16>
    %c0_5 = arith.constant 0 : index
    %c0_6 = arith.constant 0 : index
    %11 = vector.load %arg4[%c0_5, %c0_6] : memref<512x128xbf16, #tpu.memory_space<vmem>>, vector<512x128xbf16>
    tpu.vector_store %arg4[%c0_5, %c0_6], %10 {strides = array<i32>} : memref<512x128xbf16, #tpu.memory_space<vmem>>, vector<512x128xbf16>,
    return
  }
  func.func @transform_0(%arg0: i32) -> (i32, i32) {
    %c0_i32 = arith.constant 0 : i32
    %c0_i32_0 = arith.constant 0 : i32
    return %arg0, %c0_i32 : i32, i32
  }
  func.func @transform_1(%arg0: i32) -> (i32, i32) {
    %c0_i32 = arith.constant 0 : i32
    %c0_i32_0 = arith.constant 0 : i32
    %c0_i32_1 = arith.constant 0 : i32
    return %c0_i32, %c0_i32_0 : i32, i32
  }
  func.func @transform_2(%arg0: i32) -> (i32, i32) {
    %c0_i32 = arith.constant 0 : i32
    %c0_i32_0 = arith.constant 0 : i32
    %c0_i32_1 = arith.constant 0 : i32
    return %c0_i32, %c0_i32_0 : i32, i32
  }
  func.func @transform_3(%arg0: i32) -> (i32, i32) {
    %c0_i32 = arith.constant 0 : i32
    %c0_i32_0 = arith.constant 0 : i32
    return %arg0, %c0_i32 : i32, i32
  }
}

module attributes {stable_mosaic.version = 11 : i64} {
  func.func @_mm_stats_kernel(%arg0: i32, %arg1: i32, %arg2: i32, %arg3: memref<208x128xbf16, #tpu.memory_space<vmem>>, %arg4: memref<128x128xbf16, #tpu.memory_space<vmem>>, %arg5: memref<208x128xbf16, #tpu.memory_space<vmem>>, %arg6: memref<1x1x128xf32, #tpu.memory_space<vmem>>, %arg7: memref<1x1x128xf32, #tpu.memory_space<vmem>>, %arg8: memref<208x128xf32, #tpu.memory_space<vmem>>) attributes {dimension_semantics = [#tpu.dimension_semantics<parallel>, #tpu.dimension_semantics<parallel>, #tpu.dimension_semantics<arbitrary>], iteration_bounds = array<i64: 1, 1, 1>, scalar_prefetch = 0 : i64, scratch_operands = 1 : i64, tpu.core_type = #tpu.core_type<tc>, window_params = [{transform_indices = @transform_0, window_bounds = array<i64: 208, 128>}, {transform_indices = @transform_1, window_bounds = array<i64: 128, 128>}, {transform_indices = @transform_2, window_bounds = array<i64: 208, 128>}, {transform_indices = @transform_3, window_bounds = array<i64: 1, 1, 128>}, {transform_indices = @transform_4, window_bounds = array<i64: 1, 1, 128>}]} {
    %c0_i32 = arith.constant 0 : i32
    %0 = arith.cmpi eq, %arg2, %c0_i32 : i32
    %1 = arith.extui %0 : i1 to i32
    %c0_i32_0 = arith.constant 0 : i32
    %2 = arith.cmpi ne, %1, %c0_i32_0 : i32
    scf.if %2 {
      %cst_10 = arith.constant 0.000000e+00 : f32
      %12 = vector.broadcast %cst_10 : f32 to vector<208x128xf32>
      %c0_11 = arith.constant 0 : index
      %c0_12 = arith.constant 0 : index
      %13 = vector.load %arg8[%c0_11, %c0_12] : memref<208x128xf32, #tpu.memory_space<vmem>>, vector<208x128xf32>
      tpu.vector_store %arg8[%c0_11, %c0_12], %12 {strides = array<i32>} : memref<208x128xf32, #tpu.memory_space<vmem>>, vector<208x128xf32>,
    } else {
    }
    %c0 = arith.constant 0 : index
    %c0_1 = arith.constant 0 : index
    %3 = vector.load %arg8[%c0, %c0_1] : memref<208x128xf32, #tpu.memory_space<vmem>>, vector<208x128xf32>
    %c0_2 = arith.constant 0 : index
    %c0_3 = arith.constant 0 : index
    %4 = vector.load %arg3[%c0_2, %c0_3] : memref<208x128xbf16, #tpu.memory_space<vmem>>, vector<208x128xbf16>
    %c0_4 = arith.constant 0 : index
    %c0_5 = arith.constant 0 : index
    %5 = vector.load %arg4[%c0_4, %c0_5] : memref<128x128xbf16, #tpu.memory_space<vmem>>, vector<128x128xbf16>
    %cst = arith.constant dense<0.000000e+00> : vector<208x128xf32>
    %6 = tpu.matmul %4, %5, %cst {dimension_numbers = #tpu.dot_dimension_numbers<[1], [0], [0], [1], [0, 0, 1, 1], [], []>} : vector<208x128xbf16>, vector<128x128xbf16>, vector<208x128xf32> -> vector<208x128xf32>
    %7 = arith.addf %3, %6 : vector<208x128xf32>
    %c0_6 = arith.constant 0 : index
    %c0_7 = arith.constant 0 : index
    %8 = vector.load %arg8[%c0_6, %c0_7] : memref<208x128xf32, #tpu.memory_space<vmem>>, vector<208x128xf32>
    tpu.vector_store %arg8[%c0_6, %c0_7], %7 {strides = array<i32>} : memref<208x128xf32, #tpu.memory_space<vmem>>, vector<208x128xf32>,
    %c0_i32_8 = arith.constant 0 : i32
    %9 = arith.cmpi eq, %arg2, %c0_i32_8 : i32
    %10 = arith.extui %9 : i1 to i32
    %c0_i32_9 = arith.constant 0 : i32
    %11 = arith.cmpi ne, %10, %c0_i32_9 : i32
    scf.if %11 {
      %c0_10 = arith.constant 0 : index
      %c0_11 = arith.constant 0 : index
      %12 = vector.load %arg8[%c0_10, %c0_11] : memref<208x128xf32, #tpu.memory_space<vmem>>, vector<208x128xf32>
      %13 = arith.truncf %12 : vector<208x128xf32> to vector<208x128xbf16>
      %c0_12 = arith.constant 0 : index
      %c0_13 = arith.constant 0 : index
      %14 = vector.load %arg5[%c0_12, %c0_13] : memref<208x128xbf16, #tpu.memory_space<vmem>>, vector<208x128xbf16>
      tpu.vector_store %arg5[%c0_12, %c0_13], %13 {strides = array<i32>} : memref<208x128xbf16, #tpu.memory_space<vmem>>, vector<208x128xbf16>,
      %cst_14 = arith.constant dense<0.000000e+00> : vector<128xf32>
      %15 = vector.multi_reduction <add>, %12, %cst_14 [0] : vector<208x128xf32> to vector<128xf32>
      %16 = vector.shape_cast %15 : vector<128xf32> to vector<1x1x128xf32>
      %c0_15 = arith.constant 0 : index
      %c0_16 = arith.constant 0 : index
      %c0_17 = arith.constant 0 : index
      %17 = vector.load %arg6[%c0_15, %c0_16, %c0_17] : memref<1x1x128xf32, #tpu.memory_space<vmem>>, vector<1x1x128xf32>
      tpu.vector_store %arg6[%c0_15, %c0_16, %c0_17], %16 {strides = array<i32>} : memref<1x1x128xf32, #tpu.memory_space<vmem>>, vector<1x1x128xf32>,
      %18 = arith.mulf %12, %12 : vector<208x128xf32>
      %cst_18 = arith.constant dense<0.000000e+00> : vector<128xf32>
      %19 = vector.multi_reduction <add>, %18, %cst_18 [0] : vector<208x128xf32> to vector<128xf32>
      %20 = vector.shape_cast %19 : vector<128xf32> to vector<1x1x128xf32>
      %c0_19 = arith.constant 0 : index
      %c0_20 = arith.constant 0 : index
      %c0_21 = arith.constant 0 : index
      %21 = vector.load %arg7[%c0_19, %c0_20, %c0_21] : memref<1x1x128xf32, #tpu.memory_space<vmem>>, vector<1x1x128xf32>
      tpu.vector_store %arg7[%c0_19, %c0_20, %c0_21], %20 {strides = array<i32>} : memref<1x1x128xf32, #tpu.memory_space<vmem>>, vector<1x1x128xf32>,
    } else {
    }
    return
  }
  func.func @transform_0(%arg0: i32, %arg1: i32, %arg2: i32) -> (i32, i32) {
    %c0_i32 = arith.constant 0 : i32
    return %arg0, %arg2 : i32, i32
  }
  func.func @transform_1(%arg0: i32, %arg1: i32, %arg2: i32) -> (i32, i32) {
    %c0_i32 = arith.constant 0 : i32
    return %arg2, %arg1 : i32, i32
  }
  func.func @transform_2(%arg0: i32, %arg1: i32, %arg2: i32) -> (i32, i32) {
    %c0_i32 = arith.constant 0 : i32
    return %arg0, %arg1 : i32, i32
  }
  func.func @transform_3(%arg0: i32, %arg1: i32, %arg2: i32) -> (i32, i32, i32) {
    %c0_i32 = arith.constant 0 : i32
    %c0_i32_0 = arith.constant 0 : i32
    return %arg0, %c0_i32, %arg1 : i32, i32, i32
  }
  func.func @transform_4(%arg0: i32, %arg1: i32, %arg2: i32) -> (i32, i32, i32) {
    %c0_i32 = arith.constant 0 : i32
    %c0_i32_0 = arith.constant 0 : i32
    return %arg0, %c0_i32, %arg1 : i32, i32, i32
  }
}

module attributes {stable_mosaic.version = 11 : i64} {
  func.func @_scale_shift_kernel(%arg0: i32, %arg1: memref<208x128xbf16, #tpu.memory_space<vmem>>, %arg2: memref<1x128xf32, #tpu.memory_space<vmem>>, %arg3: memref<1x128xf32, #tpu.memory_space<vmem>>, %arg4: memref<208x128xbf16, #tpu.memory_space<vmem>>) attributes {dimension_semantics = [#tpu.dimension_semantics<parallel>], iteration_bounds = array<i64: 1>, scalar_prefetch = 0 : i64, scratch_operands = 0 : i64, tpu.core_type = #tpu.core_type<tc>, window_params = [{transform_indices = @transform_0, window_bounds = array<i64: 208, 128>}, {pipeline_mode = #tpu.pipeline_mode<synchronous>, transform_indices = @transform_1, window_bounds = array<i64: 1, 128>}, {pipeline_mode = #tpu.pipeline_mode<synchronous>, transform_indices = @transform_2, window_bounds = array<i64: 1, 128>}, {transform_indices = @transform_3, window_bounds = array<i64: 208, 128>}]} {
    %c0 = arith.constant 0 : index
    %c0_0 = arith.constant 0 : index
    %0 = vector.load %arg1[%c0, %c0_0] : memref<208x128xbf16, #tpu.memory_space<vmem>>, vector<208x128xbf16>
    %1 = arith.extf %0 : vector<208x128xbf16> to vector<208x128xf32>
    %c0_1 = arith.constant 0 : index
    %c0_2 = arith.constant 0 : index
    %2 = vector.load %arg2[%c0_1, %c0_2] : memref<1x128xf32, #tpu.memory_space<vmem>>, vector<1x128xf32>
    %3 = vector.broadcast %2 : vector<1x128xf32> to vector<208x128xf32>
    %4 = arith.mulf %1, %3 : vector<208x128xf32>
    %c0_3 = arith.constant 0 : index
    %c0_4 = arith.constant 0 : index
    %5 = vector.load %arg3[%c0_3, %c0_4] : memref<1x128xf32, #tpu.memory_space<vmem>>, vector<1x128xf32>
    %6 = vector.broadcast %5 : vector<1x128xf32> to vector<208x128xf32>
    %7 = arith.addf %4, %6 : vector<208x128xf32>
    %cst = arith.constant 0.000000e+00 : f32
    %8 = vector.broadcast %cst : f32 to vector<208x128xf32>
    %9 = arith.maximumf %7, %8 : vector<208x128xf32>
    %10 = arith.truncf %9 : vector<208x128xf32> to vector<208x128xbf16>
    %c0_5 = arith.constant 0 : index
    %c0_6 = arith.constant 0 : index
    %11 = vector.load %arg4[%c0_5, %c0_6] : memref<208x128xbf16, #tpu.memory_space<vmem>>, vector<208x128xbf16>
    tpu.vector_store %arg4[%c0_5, %c0_6], %10 {strides = array<i32>} : memref<208x128xbf16, #tpu.memory_space<vmem>>, vector<208x128xbf16>,
    return
  }
  func.func @transform_0(%arg0: i32) -> (i32, i32) {
    %c0_i32 = arith.constant 0 : i32
    %c0_i32_0 = arith.constant 0 : i32
    return %arg0, %c0_i32 : i32, i32
  }
  func.func @transform_1(%arg0: i32) -> (i32, i32) {
    %c0_i32 = arith.constant 0 : i32
    %c0_i32_0 = arith.constant 0 : i32
    %c0_i32_1 = arith.constant 0 : i32
    return %c0_i32, %c0_i32_0 : i32, i32
  }
  func.func @transform_2(%arg0: i32) -> (i32, i32) {
    %c0_i32 = arith.constant 0 : i32
    %c0_i32_0 = arith.constant 0 : i32
    %c0_i32_1 = arith.constant 0 : i32
    return %c0_i32, %c0_i32_0 : i32, i32
  }
  func.func @transform_3(%arg0: i32) -> (i32, i32) {
    %c0_i32 = arith.constant 0 : i32
    %c0_i32_0 = arith.constant 0 : i32
    return %arg0, %c0_i32 : i32, i32
  }
}

module attributes {stable_mosaic.version = 11 : i64} {
  func.func @_mm_stats_kernel(%arg0: i32, %arg1: i32, %arg2: i32, %arg3: memref<208x384xbf16, #tpu.memory_space<vmem>>, %arg4: memref<384x128xbf16, #tpu.memory_space<vmem>>, %arg5: memref<208x128xbf16, #tpu.memory_space<vmem>>, %arg6: memref<1x1x128xf32, #tpu.memory_space<vmem>>, %arg7: memref<1x1x128xf32, #tpu.memory_space<vmem>>, %arg8: memref<208x128xf32, #tpu.memory_space<vmem>>) attributes {dimension_semantics = [#tpu.dimension_semantics<parallel>, #tpu.dimension_semantics<parallel>, #tpu.dimension_semantics<arbitrary>], iteration_bounds = array<i64: 1, 1, 3>, scalar_prefetch = 0 : i64, scratch_operands = 1 : i64, tpu.core_type = #tpu.core_type<tc>, window_params = [{transform_indices = @transform_0, window_bounds = array<i64: 208, 384>}, {transform_indices = @transform_1, window_bounds = array<i64: 384, 128>}, {transform_indices = @transform_2, window_bounds = array<i64: 208, 128>}, {transform_indices = @transform_3, window_bounds = array<i64: 1, 1, 128>}, {transform_indices = @transform_4, window_bounds = array<i64: 1, 1, 128>}]} {
    %c0_i32 = arith.constant 0 : i32
    %0 = arith.cmpi eq, %arg2, %c0_i32 : i32
    %1 = arith.extui %0 : i1 to i32
    %c0_i32_0 = arith.constant 0 : i32
    %2 = arith.cmpi ne, %1, %c0_i32_0 : i32
    scf.if %2 {
      %cst_9 = arith.constant 0.000000e+00 : f32
      %12 = vector.broadcast %cst_9 : f32 to vector<208x128xf32>
      %c0_10 = arith.constant 0 : index
      %c0_11 = arith.constant 0 : index
      %13 = vector.load %arg8[%c0_10, %c0_11] : memref<208x128xf32, #tpu.memory_space<vmem>>, vector<208x128xf32>
      tpu.vector_store %arg8[%c0_10, %c0_11], %12 {strides = array<i32>} : memref<208x128xf32, #tpu.memory_space<vmem>>, vector<208x128xf32>,
    } else {
    }
    %c0 = arith.constant 0 : index
    %c0_1 = arith.constant 0 : index
    %3 = vector.load %arg8[%c0, %c0_1] : memref<208x128xf32, #tpu.memory_space<vmem>>, vector<208x128xf32>
    %c0_2 = arith.constant 0 : index
    %c0_3 = arith.constant 0 : index
    %4 = vector.load %arg3[%c0_2, %c0_3] : memref<208x384xbf16, #tpu.memory_space<vmem>>, vector<208x384xbf16>
    %c0_4 = arith.constant 0 : index
    %c0_5 = arith.constant 0 : index
    %5 = vector.load %arg4[%c0_4, %c0_5] : memref<384x128xbf16, #tpu.memory_space<vmem>>, vector<384x128xbf16>
    %cst = arith.constant dense<0.000000e+00> : vector<208x128xf32>
    %6 = tpu.matmul %4, %5, %cst {dimension_numbers = #tpu.dot_dimension_numbers<[1], [0], [0], [1], [0, 0, 1, 1], [], []>} : vector<208x384xbf16>, vector<384x128xbf16>, vector<208x128xf32> -> vector<208x128xf32>
    %7 = arith.addf %3, %6 : vector<208x128xf32>
    %c0_6 = arith.constant 0 : index
    %c0_7 = arith.constant 0 : index
    %8 = vector.load %arg8[%c0_6, %c0_7] : memref<208x128xf32, #tpu.memory_space<vmem>>, vector<208x128xf32>
    tpu.vector_store %arg8[%c0_6, %c0_7], %7 {strides = array<i32>} : memref<208x128xf32, #tpu.memory_space<vmem>>, vector<208x128xf32>,
    %c2_i32 = arith.constant 2 : i32
    %9 = arith.cmpi eq, %arg2, %c2_i32 : i32
    %10 = arith.extui %9 : i1 to i32
    %c0_i32_8 = arith.constant 0 : i32
    %11 = arith.cmpi ne, %10, %c0_i32_8 : i32
    scf.if %11 {
      %c0_9 = arith.constant 0 : index
      %c0_10 = arith.constant 0 : index
      %12 = vector.load %arg8[%c0_9, %c0_10] : memref<208x128xf32, #tpu.memory_space<vmem>>, vector<208x128xf32>
      %13 = arith.truncf %12 : vector<208x128xf32> to vector<208x128xbf16>
      %c0_11 = arith.constant 0 : index
      %c0_12 = arith.constant 0 : index
      %14 = vector.load %arg5[%c0_11, %c0_12] : memref<208x128xbf16, #tpu.memory_space<vmem>>, vector<208x128xbf16>
      tpu.vector_store %arg5[%c0_11, %c0_12], %13 {strides = array<i32>} : memref<208x128xbf16, #tpu.memory_space<vmem>>, vector<208x128xbf16>,
      %cst_13 = arith.constant dense<0.000000e+00> : vector<128xf32>
      %15 = vector.multi_reduction <add>, %12, %cst_13 [0] : vector<208x128xf32> to vector<128xf32>
      %16 = vector.shape_cast %15 : vector<128xf32> to vector<1x1x128xf32>
      %c0_14 = arith.constant 0 : index
      %c0_15 = arith.constant 0 : index
      %c0_16 = arith.constant 0 : index
      %17 = vector.load %arg6[%c0_14, %c0_15, %c0_16] : memref<1x1x128xf32, #tpu.memory_space<vmem>>, vector<1x1x128xf32>
      tpu.vector_store %arg6[%c0_14, %c0_15, %c0_16], %16 {strides = array<i32>} : memref<1x1x128xf32, #tpu.memory_space<vmem>>, vector<1x1x128xf32>,
      %18 = arith.mulf %12, %12 : vector<208x128xf32>
      %cst_17 = arith.constant dense<0.000000e+00> : vector<128xf32>
      %19 = vector.multi_reduction <add>, %18, %cst_17 [0] : vector<208x128xf32> to vector<128xf32>
      %20 = vector.shape_cast %19 : vector<128xf32> to vector<1x1x128xf32>
      %c0_18 = arith.constant 0 : index
      %c0_19 = arith.constant 0 : index
      %c0_20 = arith.constant 0 : index
      %21 = vector.load %arg7[%c0_18, %c0_19, %c0_20] : memref<1x1x128xf32, #tpu.memory_space<vmem>>, vector<1x1x128xf32>
      tpu.vector_store %arg7[%c0_18, %c0_19, %c0_20], %20 {strides = array<i32>} : memref<1x1x128xf32, #tpu.memory_space<vmem>>, vector<1x1x128xf32>,
    } else {
    }
    return
  }
  func.func @transform_0(%arg0: i32, %arg1: i32, %arg2: i32) -> (i32, i32) {
    %c0_i32 = arith.constant 0 : i32
    return %arg0, %arg2 : i32, i32
  }
  func.func @transform_1(%arg0: i32, %arg1: i32, %arg2: i32) -> (i32, i32) {
    %c0_i32 = arith.constant 0 : i32
    return %arg2, %arg1 : i32, i32
  }
  func.func @transform_2(%arg0: i32, %arg1: i32, %arg2: i32) -> (i32, i32) {
    %c0_i32 = arith.constant 0 : i32
    return %arg0, %arg1 : i32, i32
  }
  func.func @transform_3(%arg0: i32, %arg1: i32, %arg2: i32) -> (i32, i32, i32) {
    %c0_i32 = arith.constant 0 : i32
    %c0_i32_0 = arith.constant 0 : i32
    return %arg0, %c0_i32, %arg1 : i32, i32, i32
  }
  func.func @transform_4(%arg0: i32, %arg1: i32, %arg2: i32) -> (i32, i32, i32) {
    %c0_i32 = arith.constant 0 : i32
    %c0_i32_0 = arith.constant 0 : i32
    return %arg0, %c0_i32, %arg1 : i32, i32, i32
  }
}

module attributes {stable_mosaic.version = 11 : i64} {
  func.func @_scale_shift_kernel(%arg0: i32, %arg1: memref<208x128xbf16, #tpu.memory_space<vmem>>, %arg2: memref<1x128xf32, #tpu.memory_space<vmem>>, %arg3: memref<1x128xf32, #tpu.memory_space<vmem>>, %arg4: memref<208x128xbf16, #tpu.memory_space<vmem>>) attributes {dimension_semantics = [#tpu.dimension_semantics<parallel>], iteration_bounds = array<i64: 1>, scalar_prefetch = 0 : i64, scratch_operands = 0 : i64, tpu.core_type = #tpu.core_type<tc>, window_params = [{transform_indices = @transform_0, window_bounds = array<i64: 208, 128>}, {pipeline_mode = #tpu.pipeline_mode<synchronous>, transform_indices = @transform_1, window_bounds = array<i64: 1, 128>}, {pipeline_mode = #tpu.pipeline_mode<synchronous>, transform_indices = @transform_2, window_bounds = array<i64: 1, 128>}, {transform_indices = @transform_3, window_bounds = array<i64: 208, 128>}]} {
    %c0 = arith.constant 0 : index
    %c0_0 = arith.constant 0 : index
    %0 = vector.load %arg1[%c0, %c0_0] : memref<208x128xbf16, #tpu.memory_space<vmem>>, vector<208x128xbf16>
    %1 = arith.extf %0 : vector<208x128xbf16> to vector<208x128xf32>
    %c0_1 = arith.constant 0 : index
    %c0_2 = arith.constant 0 : index
    %2 = vector.load %arg2[%c0_1, %c0_2] : memref<1x128xf32, #tpu.memory_space<vmem>>, vector<1x128xf32>
    %3 = vector.broadcast %2 : vector<1x128xf32> to vector<208x128xf32>
    %4 = arith.mulf %1, %3 : vector<208x128xf32>
    %c0_3 = arith.constant 0 : index
    %c0_4 = arith.constant 0 : index
    %5 = vector.load %arg3[%c0_3, %c0_4] : memref<1x128xf32, #tpu.memory_space<vmem>>, vector<1x128xf32>
    %6 = vector.broadcast %5 : vector<1x128xf32> to vector<208x128xf32>
    %7 = arith.addf %4, %6 : vector<208x128xf32>
    %cst = arith.constant 0.000000e+00 : f32
    %8 = vector.broadcast %cst : f32 to vector<208x128xf32>
    %9 = arith.maximumf %7, %8 : vector<208x128xf32>
    %cst_5 = arith.constant 2.000000e+00 : f32
    %10 = vector.broadcast %cst_5 : f32 to vector<208x128xf32>
    %11 = arith.mulf %9, %10 : vector<208x128xf32>
    %12 = arith.truncf %11 : vector<208x128xf32> to vector<208x128xbf16>
    %c0_6 = arith.constant 0 : index
    %c0_7 = arith.constant 0 : index
    %13 = vector.load %arg4[%c0_6, %c0_7] : memref<208x128xbf16, #tpu.memory_space<vmem>>, vector<208x128xbf16>
    tpu.vector_store %arg4[%c0_6, %c0_7], %12 {strides = array<i32>} : memref<208x128xbf16, #tpu.memory_space<vmem>>, vector<208x128xbf16>,
    return
  }
  func.func @transform_0(%arg0: i32) -> (i32, i32) {
    %c0_i32 = arith.constant 0 : i32
    %c0_i32_0 = arith.constant 0 : i32
    return %arg0, %c0_i32 : i32, i32
  }
  func.func @transform_1(%arg0: i32) -> (i32, i32) {
    %c0_i32 = arith.constant 0 : i32
    %c0_i32_0 = arith.constant 0 : i32
    %c0_i32_1 = arith.constant 0 : i32
    return %c0_i32, %c0_i32_0 : i32, i32
  }
  func.func @transform_2(%arg0: i32) -> (i32, i32) {
    %c0_i32 = arith.constant 0 : i32
    %c0_i32_0 = arith.constant 0 : i32
    %c0_i32_1 = arith.constant 0 : i32
    return %c0_i32, %c0_i32_0 : i32, i32
  }
  func.func @transform_3(%arg0: i32) -> (i32, i32) {
    %c0_i32 = arith.constant 0 : i32
    %c0_i32_0 = arith.constant 0 : i32
    return %arg0, %c0_i32 : i32, i32
  }
}

module attributes {stable_mosaic.version = 11 : i64} {
  func.func @_mm_stats_kernel(%arg0: i32, %arg1: i32, %arg2: i32, %arg3: memref<64x384xbf16, #tpu.memory_space<vmem>>, %arg4: memref<384x128xbf16, #tpu.memory_space<vmem>>, %arg5: memref<64x128xbf16, #tpu.memory_space<vmem>>, %arg6: memref<1x1x128xf32, #tpu.memory_space<vmem>>, %arg7: memref<1x1x128xf32, #tpu.memory_space<vmem>>, %arg8: memref<64x128xf32, #tpu.memory_space<vmem>>) attributes {dimension_semantics = [#tpu.dimension_semantics<parallel>, #tpu.dimension_semantics<parallel>, #tpu.dimension_semantics<arbitrary>], iteration_bounds = array<i64: 1, 1, 3>, scalar_prefetch = 0 : i64, scratch_operands = 1 : i64, tpu.core_type = #tpu.core_type<tc>, window_params = [{transform_indices = @transform_0, window_bounds = array<i64: 64, 384>}, {transform_indices = @transform_1, window_bounds = array<i64: 384, 128>}, {transform_indices = @transform_2, window_bounds = array<i64: 64, 128>}, {transform_indices = @transform_3, window_bounds = array<i64: 1, 1, 128>}, {transform_indices = @transform_4, window_bounds = array<i64: 1, 1, 128>}]} {
    %c0_i32 = arith.constant 0 : i32
    %0 = arith.cmpi eq, %arg2, %c0_i32 : i32
    %1 = arith.extui %0 : i1 to i32
    %c0_i32_0 = arith.constant 0 : i32
    %2 = arith.cmpi ne, %1, %c0_i32_0 : i32
    scf.if %2 {
      %cst_9 = arith.constant 0.000000e+00 : f32
      %12 = vector.broadcast %cst_9 : f32 to vector<64x128xf32>
      %c0_10 = arith.constant 0 : index
      %c0_11 = arith.constant 0 : index
      %13 = vector.load %arg8[%c0_10, %c0_11] : memref<64x128xf32, #tpu.memory_space<vmem>>, vector<64x128xf32>
      tpu.vector_store %arg8[%c0_10, %c0_11], %12 {strides = array<i32>} : memref<64x128xf32, #tpu.memory_space<vmem>>, vector<64x128xf32>,
    } else {
    }
    %c0 = arith.constant 0 : index
    %c0_1 = arith.constant 0 : index
    %3 = vector.load %arg8[%c0, %c0_1] : memref<64x128xf32, #tpu.memory_space<vmem>>, vector<64x128xf32>
    %c0_2 = arith.constant 0 : index
    %c0_3 = arith.constant 0 : index
    %4 = vector.load %arg3[%c0_2, %c0_3] : memref<64x384xbf16, #tpu.memory_space<vmem>>, vector<64x384xbf16>
    %c0_4 = arith.constant 0 : index
    %c0_5 = arith.constant 0 : index
    %5 = vector.load %arg4[%c0_4, %c0_5] : memref<384x128xbf16, #tpu.memory_space<vmem>>, vector<384x128xbf16>
    %cst = arith.constant dense<0.000000e+00> : vector<64x128xf32>
    %6 = tpu.matmul %4, %5, %cst {dimension_numbers = #tpu.dot_dimension_numbers<[1], [0], [0], [1], [0, 0, 1, 1], [], []>} : vector<64x384xbf16>, vector<384x128xbf16>, vector<64x128xf32> -> vector<64x128xf32>
    %7 = arith.addf %3, %6 : vector<64x128xf32>
    %c0_6 = arith.constant 0 : index
    %c0_7 = arith.constant 0 : index
    %8 = vector.load %arg8[%c0_6, %c0_7] : memref<64x128xf32, #tpu.memory_space<vmem>>, vector<64x128xf32>
    tpu.vector_store %arg8[%c0_6, %c0_7], %7 {strides = array<i32>} : memref<64x128xf32, #tpu.memory_space<vmem>>, vector<64x128xf32>,
    %c2_i32 = arith.constant 2 : i32
    %9 = arith.cmpi eq, %arg2, %c2_i32 : i32
    %10 = arith.extui %9 : i1 to i32
    %c0_i32_8 = arith.constant 0 : i32
    %11 = arith.cmpi ne, %10, %c0_i32_8 : i32
    scf.if %11 {
      %c0_9 = arith.constant 0 : index
      %c0_10 = arith.constant 0 : index
      %12 = vector.load %arg8[%c0_9, %c0_10] : memref<64x128xf32, #tpu.memory_space<vmem>>, vector<64x128xf32>
      %13 = arith.truncf %12 : vector<64x128xf32> to vector<64x128xbf16>
      %c0_11 = arith.constant 0 : index
      %c0_12 = arith.constant 0 : index
      %14 = vector.load %arg5[%c0_11, %c0_12] : memref<64x128xbf16, #tpu.memory_space<vmem>>, vector<64x128xbf16>
      tpu.vector_store %arg5[%c0_11, %c0_12], %13 {strides = array<i32>} : memref<64x128xbf16, #tpu.memory_space<vmem>>, vector<64x128xbf16>,
      %cst_13 = arith.constant dense<0.000000e+00> : vector<128xf32>
      %15 = vector.multi_reduction <add>, %12, %cst_13 [0] : vector<64x128xf32> to vector<128xf32>
      %16 = vector.shape_cast %15 : vector<128xf32> to vector<1x1x128xf32>
      %c0_14 = arith.constant 0 : index
      %c0_15 = arith.constant 0 : index
      %c0_16 = arith.constant 0 : index
      %17 = vector.load %arg6[%c0_14, %c0_15, %c0_16] : memref<1x1x128xf32, #tpu.memory_space<vmem>>, vector<1x1x128xf32>
      tpu.vector_store %arg6[%c0_14, %c0_15, %c0_16], %16 {strides = array<i32>} : memref<1x1x128xf32, #tpu.memory_space<vmem>>, vector<1x1x128xf32>,
      %18 = arith.mulf %12, %12 : vector<64x128xf32>
      %cst_17 = arith.constant dense<0.000000e+00> : vector<128xf32>
      %19 = vector.multi_reduction <add>, %18, %cst_17 [0] : vector<64x128xf32> to vector<128xf32>
      %20 = vector.shape_cast %19 : vector<128xf32> to vector<1x1x128xf32>
      %c0_18 = arith.constant 0 : index
      %c0_19 = arith.constant 0 : index
      %c0_20 = arith.constant 0 : index
      %21 = vector.load %arg7[%c0_18, %c0_19, %c0_20] : memref<1x1x128xf32, #tpu.memory_space<vmem>>, vector<1x1x128xf32>
      tpu.vector_store %arg7[%c0_18, %c0_19, %c0_20], %20 {strides = array<i32>} : memref<1x1x128xf32, #tpu.memory_space<vmem>>, vector<1x1x128xf32>,
    } else {
    }
    return
  }
  func.func @transform_0(%arg0: i32, %arg1: i32, %arg2: i32) -> (i32, i32) {
    %c0_i32 = arith.constant 0 : i32
    return %arg0, %arg2 : i32, i32
  }
  func.func @transform_1(%arg0: i32, %arg1: i32, %arg2: i32) -> (i32, i32) {
    %c0_i32 = arith.constant 0 : i32
    return %arg2, %arg1 : i32, i32
  }
  func.func @transform_2(%arg0: i32, %arg1: i32, %arg2: i32) -> (i32, i32) {
    %c0_i32 = arith.constant 0 : i32
    return %arg0, %arg1 : i32, i32
  }
  func.func @transform_3(%arg0: i32, %arg1: i32, %arg2: i32) -> (i32, i32, i32) {
    %c0_i32 = arith.constant 0 : i32
    %c0_i32_0 = arith.constant 0 : i32
    return %arg0, %c0_i32, %arg1 : i32, i32, i32
  }
  func.func @transform_4(%arg0: i32, %arg1: i32, %arg2: i32) -> (i32, i32, i32) {
    %c0_i32 = arith.constant 0 : i32
    %c0_i32_0 = arith.constant 0 : i32
    return %arg0, %c0_i32, %arg1 : i32, i32, i32
  }
}

module attributes {stable_mosaic.version = 11 : i64} {
  func.func @_scale_shift_kernel(%arg0: i32, %arg1: memref<64x128xbf16, #tpu.memory_space<vmem>>, %arg2: memref<1x128xf32, #tpu.memory_space<vmem>>, %arg3: memref<1x128xf32, #tpu.memory_space<vmem>>, %arg4: memref<64x128xbf16, #tpu.memory_space<vmem>>) attributes {dimension_semantics = [#tpu.dimension_semantics<parallel>], iteration_bounds = array<i64: 1>, scalar_prefetch = 0 : i64, scratch_operands = 0 : i64, tpu.core_type = #tpu.core_type<tc>, window_params = [{transform_indices = @transform_0, window_bounds = array<i64: 64, 128>}, {pipeline_mode = #tpu.pipeline_mode<synchronous>, transform_indices = @transform_1, window_bounds = array<i64: 1, 128>}, {pipeline_mode = #tpu.pipeline_mode<synchronous>, transform_indices = @transform_2, window_bounds = array<i64: 1, 128>}, {transform_indices = @transform_3, window_bounds = array<i64: 64, 128>}]} {
    %c0 = arith.constant 0 : index
    %c0_0 = arith.constant 0 : index
    %0 = vector.load %arg1[%c0, %c0_0] : memref<64x128xbf16, #tpu.memory_space<vmem>>, vector<64x128xbf16>
    %1 = arith.extf %0 : vector<64x128xbf16> to vector<64x128xf32>
    %c0_1 = arith.constant 0 : index
    %c0_2 = arith.constant 0 : index
    %2 = vector.load %arg2[%c0_1, %c0_2] : memref<1x128xf32, #tpu.memory_space<vmem>>, vector<1x128xf32>
    %3 = vector.broadcast %2 : vector<1x128xf32> to vector<64x128xf32>
    %4 = arith.mulf %1, %3 : vector<64x128xf32>
    %c0_3 = arith.constant 0 : index
    %c0_4 = arith.constant 0 : index
    %5 = vector.load %arg3[%c0_3, %c0_4] : memref<1x128xf32, #tpu.memory_space<vmem>>, vector<1x128xf32>
    %6 = vector.broadcast %5 : vector<1x128xf32> to vector<64x128xf32>
    %7 = arith.addf %4, %6 : vector<64x128xf32>
    %cst = arith.constant 0.000000e+00 : f32
    %8 = vector.broadcast %cst : f32 to vector<64x128xf32>
    %9 = arith.maximumf %7, %8 : vector<64x128xf32>
    %10 = arith.truncf %9 : vector<64x128xf32> to vector<64x128xbf16>
    %c0_5 = arith.constant 0 : index
    %c0_6 = arith.constant 0 : index
    %11 = vector.load %arg4[%c0_5, %c0_6] : memref<64x128xbf16, #tpu.memory_space<vmem>>, vector<64x128xbf16>
    tpu.vector_store %arg4[%c0_5, %c0_6], %10 {strides = array<i32>} : memref<64x128xbf16, #tpu.memory_space<vmem>>, vector<64x128xbf16>,
    return
  }
  func.func @transform_0(%arg0: i32) -> (i32, i32) {
    %c0_i32 = arith.constant 0 : i32
    %c0_i32_0 = arith.constant 0 : i32
    return %arg0, %c0_i32 : i32, i32
  }
  func.func @transform_1(%arg0: i32) -> (i32, i32) {
    %c0_i32 = arith.constant 0 : i32
    %c0_i32_0 = arith.constant 0 : i32
    %c0_i32_1 = arith.constant 0 : i32
    return %c0_i32, %c0_i32_0 : i32, i32
  }
  func.func @transform_2(%arg0: i32) -> (i32, i32) {
    %c0_i32 = arith.constant 0 : i32
    %c0_i32_0 = arith.constant 0 : i32
    %c0_i32_1 = arith.constant 0 : i32
    return %c0_i32, %c0_i32_0 : i32, i32
  }
  func.func @transform_3(%arg0: i32) -> (i32, i32) {
    %c0_i32 = arith.constant 0 : i32
    %c0_i32_0 = arith.constant 0 : i32
    return %arg0, %c0_i32 : i32, i32
  }
}

module attributes {stable_mosaic.version = 11 : i64} {
  func.func @_scale_shift_kernel(%arg0: i32, %arg1: memref<64x128xbf16, #tpu.memory_space<vmem>>, %arg2: memref<1x128xf32, #tpu.memory_space<vmem>>, %arg3: memref<1x128xf32, #tpu.memory_space<vmem>>, %arg4: memref<64x128xbf16, #tpu.memory_space<vmem>>) attributes {dimension_semantics = [#tpu.dimension_semantics<parallel>], iteration_bounds = array<i64: 1>, scalar_prefetch = 0 : i64, scratch_operands = 0 : i64, tpu.core_type = #tpu.core_type<tc>, window_params = [{transform_indices = @transform_0, window_bounds = array<i64: 64, 128>}, {pipeline_mode = #tpu.pipeline_mode<synchronous>, transform_indices = @transform_1, window_bounds = array<i64: 1, 128>}, {pipeline_mode = #tpu.pipeline_mode<synchronous>, transform_indices = @transform_2, window_bounds = array<i64: 1, 128>}, {transform_indices = @transform_3, window_bounds = array<i64: 64, 128>}]} {
    %c0 = arith.constant 0 : index
    %c0_0 = arith.constant 0 : index
    %0 = vector.load %arg1[%c0, %c0_0] : memref<64x128xbf16, #tpu.memory_space<vmem>>, vector<64x128xbf16>
    %1 = arith.extf %0 : vector<64x128xbf16> to vector<64x128xf32>
    %c0_1 = arith.constant 0 : index
    %c0_2 = arith.constant 0 : index
    %2 = vector.load %arg2[%c0_1, %c0_2] : memref<1x128xf32, #tpu.memory_space<vmem>>, vector<1x128xf32>
    %3 = vector.broadcast %2 : vector<1x128xf32> to vector<64x128xf32>
    %4 = arith.mulf %1, %3 : vector<64x128xf32>
    %c0_3 = arith.constant 0 : index
    %c0_4 = arith.constant 0 : index
    %5 = vector.load %arg3[%c0_3, %c0_4] : memref<1x128xf32, #tpu.memory_space<vmem>>, vector<1x128xf32>
    %6 = vector.broadcast %5 : vector<1x128xf32> to vector<64x128xf32>
    %7 = arith.addf %4, %6 : vector<64x128xf32>
    %cst = arith.constant 0.000000e+00 : f32
    %8 = vector.broadcast %cst : f32 to vector<64x128xf32>
    %9 = arith.maximumf %7, %8 : vector<64x128xf32>
    %cst_5 = arith.constant 2.000000e+00 : f32
    %10 = vector.broadcast %cst_5 : f32 to vector<64x128xf32>
    %11 = arith.mulf %9, %10 : vector<64x128xf32>
    %12 = arith.truncf %11 : vector<64x128xf32> to vector<64x128xbf16>
    %c0_6 = arith.constant 0 : index
    %c0_7 = arith.constant 0 : index
    %13 = vector.load %arg4[%c0_6, %c0_7] : memref<64x128xbf16, #tpu.memory_space<vmem>>, vector<64x128xbf16>
    tpu.vector_store %arg4[%c0_6, %c0_7], %12 {strides = array<i32>} : memref<64x128xbf16, #tpu.memory_space<vmem>>, vector<64x128xbf16>,
    return
  }
  func.func @transform_0(%arg0: i32) -> (i32, i32) {
    %c0_i32 = arith.constant 0 : i32
    %c0_i32_0 = arith.constant 0 : i32
    return %arg0, %c0_i32 : i32, i32
  }
  func.func @transform_1(%arg0: i32) -> (i32, i32) {
    %c0_i32 = arith.constant 0 : i32
    %c0_i32_0 = arith.constant 0 : i32
    %c0_i32_1 = arith.constant 0 : i32
    return %c0_i32, %c0_i32_0 : i32, i32
  }
  func.func @transform_2(%arg0: i32) -> (i32, i32) {
    %c0_i32 = arith.constant 0 : i32
    %c0_i32_0 = arith.constant 0 : i32
    %c0_i32_1 = arith.constant 0 : i32
    return %c0_i32, %c0_i32_0 : i32, i32
  }
  func.func @transform_3(%arg0: i32) -> (i32, i32) {
    %c0_i32 = arith.constant 0 : i32
    %c0_i32_0 = arith.constant 0 : i32
    return %arg0, %c0_i32 : i32, i32
  }
}

module attributes {stable_mosaic.version = 11 : i64} {
  func.func @_mm_stats_kernel(%arg0: i32, %arg1: i32, %arg2: i32, %arg3: memref<64x128xbf16, #tpu.memory_space<vmem>>, %arg4: memref<128x128xbf16, #tpu.memory_space<vmem>>, %arg5: memref<64x128xbf16, #tpu.memory_space<vmem>>, %arg6: memref<1x1x128xf32, #tpu.memory_space<vmem>>, %arg7: memref<1x1x128xf32, #tpu.memory_space<vmem>>, %arg8: memref<64x128xf32, #tpu.memory_space<vmem>>) attributes {dimension_semantics = [#tpu.dimension_semantics<parallel>, #tpu.dimension_semantics<parallel>, #tpu.dimension_semantics<arbitrary>], iteration_bounds = array<i64: 1, 1, 1>, scalar_prefetch = 0 : i64, scratch_operands = 1 : i64, tpu.core_type = #tpu.core_type<tc>, window_params = [{transform_indices = @transform_0, window_bounds = array<i64: 64, 128>}, {transform_indices = @transform_1, window_bounds = array<i64: 128, 128>}, {transform_indices = @transform_2, window_bounds = array<i64: 64, 128>}, {transform_indices = @transform_3, window_bounds = array<i64: 1, 1, 128>}, {transform_indices = @transform_4, window_bounds = array<i64: 1, 1, 128>}]} {
    %c0_i32 = arith.constant 0 : i32
    %0 = arith.cmpi eq, %arg2, %c0_i32 : i32
    %1 = arith.extui %0 : i1 to i32
    %c0_i32_0 = arith.constant 0 : i32
    %2 = arith.cmpi ne, %1, %c0_i32_0 : i32
    scf.if %2 {
      %cst_10 = arith.constant 0.000000e+00 : f32
      %12 = vector.broadcast %cst_10 : f32 to vector<64x128xf32>
      %c0_11 = arith.constant 0 : index
      %c0_12 = arith.constant 0 : index
      %13 = vector.load %arg8[%c0_11, %c0_12] : memref<64x128xf32, #tpu.memory_space<vmem>>, vector<64x128xf32>
      tpu.vector_store %arg8[%c0_11, %c0_12], %12 {strides = array<i32>} : memref<64x128xf32, #tpu.memory_space<vmem>>, vector<64x128xf32>,
    } else {
    }
    %c0 = arith.constant 0 : index
    %c0_1 = arith.constant 0 : index
    %3 = vector.load %arg8[%c0, %c0_1] : memref<64x128xf32, #tpu.memory_space<vmem>>, vector<64x128xf32>
    %c0_2 = arith.constant 0 : index
    %c0_3 = arith.constant 0 : index
    %4 = vector.load %arg3[%c0_2, %c0_3] : memref<64x128xbf16, #tpu.memory_space<vmem>>, vector<64x128xbf16>
    %c0_4 = arith.constant 0 : index
    %c0_5 = arith.constant 0 : index
    %5 = vector.load %arg4[%c0_4, %c0_5] : memref<128x128xbf16, #tpu.memory_space<vmem>>, vector<128x128xbf16>
    %cst = arith.constant dense<0.000000e+00> : vector<64x128xf32>
    %6 = tpu.matmul %4, %5, %cst {dimension_numbers = #tpu.dot_dimension_numbers<[1], [0], [0], [1], [0, 0, 1, 1], [], []>} : vector<64x128xbf16>, vector<128x128xbf16>, vector<64x128xf32> -> vector<64x128xf32>
    %7 = arith.addf %3, %6 : vector<64x128xf32>
    %c0_6 = arith.constant 0 : index
    %c0_7 = arith.constant 0 : index
    %8 = vector.load %arg8[%c0_6, %c0_7] : memref<64x128xf32, #tpu.memory_space<vmem>>, vector<64x128xf32>
    tpu.vector_store %arg8[%c0_6, %c0_7], %7 {strides = array<i32>} : memref<64x128xf32, #tpu.memory_space<vmem>>, vector<64x128xf32>,
    %c0_i32_8 = arith.constant 0 : i32
    %9 = arith.cmpi eq, %arg2, %c0_i32_8 : i32
    %10 = arith.extui %9 : i1 to i32
    %c0_i32_9 = arith.constant 0 : i32
    %11 = arith.cmpi ne, %10, %c0_i32_9 : i32
    scf.if %11 {
      %c0_10 = arith.constant 0 : index
      %c0_11 = arith.constant 0 : index
      %12 = vector.load %arg8[%c0_10, %c0_11] : memref<64x128xf32, #tpu.memory_space<vmem>>, vector<64x128xf32>
      %13 = arith.truncf %12 : vector<64x128xf32> to vector<64x128xbf16>
      %c0_12 = arith.constant 0 : index
      %c0_13 = arith.constant 0 : index
      %14 = vector.load %arg5[%c0_12, %c0_13] : memref<64x128xbf16, #tpu.memory_space<vmem>>, vector<64x128xbf16>
      tpu.vector_store %arg5[%c0_12, %c0_13], %13 {strides = array<i32>} : memref<64x128xbf16, #tpu.memory_space<vmem>>, vector<64x128xbf16>,
      %cst_14 = arith.constant dense<0.000000e+00> : vector<128xf32>
      %15 = vector.multi_reduction <add>, %12, %cst_14 [0] : vector<64x128xf32> to vector<128xf32>
      %16 = vector.shape_cast %15 : vector<128xf32> to vector<1x1x128xf32>
      %c0_15 = arith.constant 0 : index
      %c0_16 = arith.constant 0 : index
      %c0_17 = arith.constant 0 : index
      %17 = vector.load %arg6[%c0_15, %c0_16, %c0_17] : memref<1x1x128xf32, #tpu.memory_space<vmem>>, vector<1x1x128xf32>
      tpu.vector_store %arg6[%c0_15, %c0_16, %c0_17], %16 {strides = array<i32>} : memref<1x1x128xf32, #tpu.memory_space<vmem>>, vector<1x1x128xf32>,
      %18 = arith.mulf %12, %12 : vector<64x128xf32>
      %cst_18 = arith.constant dense<0.000000e+00> : vector<128xf32>
      %19 = vector.multi_reduction <add>, %18, %cst_18 [0] : vector<64x128xf32> to vector<128xf32>
      %20 = vector.shape_cast %19 : vector<128xf32> to vector<1x1x128xf32>
      %c0_19 = arith.constant 0 : index
      %c0_20 = arith.constant 0 : index
      %c0_21 = arith.constant 0 : index
      %21 = vector.load %arg7[%c0_19, %c0_20, %c0_21] : memref<1x1x128xf32, #tpu.memory_space<vmem>>, vector<1x1x128xf32>
      tpu.vector_store %arg7[%c0_19, %c0_20, %c0_21], %20 {strides = array<i32>} : memref<1x1x128xf32, #tpu.memory_space<vmem>>, vector<1x1x128xf32>,
    } else {
    }
    return
  }
  func.func @transform_0(%arg0: i32, %arg1: i32, %arg2: i32) -> (i32, i32) {
    %c0_i32 = arith.constant 0 : i32
    return %arg0, %arg2 : i32, i32
  }
  func.func @transform_1(%arg0: i32, %arg1: i32, %arg2: i32) -> (i32, i32) {
    %c0_i32 = arith.constant 0 : i32
    return %arg2, %arg1 : i32, i32
  }
  func.func @transform_2(%arg0: i32, %arg1: i32, %arg2: i32) -> (i32, i32) {
    %c0_i32 = arith.constant 0 : i32
    return %arg0, %arg1 : i32, i32
  }
  func.func @transform_3(%arg0: i32, %arg1: i32, %arg2: i32) -> (i32, i32, i32) {
    %c0_i32 = arith.constant 0 : i32
    %c0_i32_0 = arith.constant 0 : i32
    return %arg0, %c0_i32, %arg1 : i32, i32, i32
  }
  func.func @transform_4(%arg0: i32, %arg1: i32, %arg2: i32) -> (i32, i32, i32) {
    %c0_i32 = arith.constant 0 : i32
    %c0_i32_0 = arith.constant 0 : i32
    return %arg0, %c0_i32, %arg1 : i32, i32, i32
  }
}

module attributes {stable_mosaic.version = 11 : i64} {
  func.func @_mm_stats_kernel(%arg0: i32, %arg1: i32, %arg2: i32, %arg3: memref<64x128xbf16, #tpu.memory_space<vmem>>, %arg4: memref<128x256xbf16, #tpu.memory_space<vmem>>, %arg5: memref<64x256xbf16, #tpu.memory_space<vmem>>, %arg6: memref<1x1x256xf32, #tpu.memory_space<vmem>>, %arg7: memref<1x1x256xf32, #tpu.memory_space<vmem>>, %arg8: memref<64x256xf32, #tpu.memory_space<vmem>>) attributes {dimension_semantics = [#tpu.dimension_semantics<parallel>, #tpu.dimension_semantics<parallel>, #tpu.dimension_semantics<arbitrary>], iteration_bounds = array<i64: 1, 1, 1>, scalar_prefetch = 0 : i64, scratch_operands = 1 : i64, tpu.core_type = #tpu.core_type<tc>, window_params = [{transform_indices = @transform_0, window_bounds = array<i64: 64, 128>}, {transform_indices = @transform_1, window_bounds = array<i64: 128, 256>}, {transform_indices = @transform_2, window_bounds = array<i64: 64, 256>}, {transform_indices = @transform_3, window_bounds = array<i64: 1, 1, 256>}, {transform_indices = @transform_4, window_bounds = array<i64: 1, 1, 256>}]} {
    %c0_i32 = arith.constant 0 : i32
    %0 = arith.cmpi eq, %arg2, %c0_i32 : i32
    %1 = arith.extui %0 : i1 to i32
    %c0_i32_0 = arith.constant 0 : i32
    %2 = arith.cmpi ne, %1, %c0_i32_0 : i32
    scf.if %2 {
      %cst_10 = arith.constant 0.000000e+00 : f32
      %12 = vector.broadcast %cst_10 : f32 to vector<64x256xf32>
      %c0_11 = arith.constant 0 : index
      %c0_12 = arith.constant 0 : index
      %13 = vector.load %arg8[%c0_11, %c0_12] : memref<64x256xf32, #tpu.memory_space<vmem>>, vector<64x256xf32>
      tpu.vector_store %arg8[%c0_11, %c0_12], %12 {strides = array<i32>} : memref<64x256xf32, #tpu.memory_space<vmem>>, vector<64x256xf32>,
    } else {
    }
    %c0 = arith.constant 0 : index
    %c0_1 = arith.constant 0 : index
    %3 = vector.load %arg8[%c0, %c0_1] : memref<64x256xf32, #tpu.memory_space<vmem>>, vector<64x256xf32>
    %c0_2 = arith.constant 0 : index
    %c0_3 = arith.constant 0 : index
    %4 = vector.load %arg3[%c0_2, %c0_3] : memref<64x128xbf16, #tpu.memory_space<vmem>>, vector<64x128xbf16>
    %c0_4 = arith.constant 0 : index
    %c0_5 = arith.constant 0 : index
    %5 = vector.load %arg4[%c0_4, %c0_5] : memref<128x256xbf16, #tpu.memory_space<vmem>>, vector<128x256xbf16>
    %cst = arith.constant dense<0.000000e+00> : vector<64x256xf32>
    %6 = tpu.matmul %4, %5, %cst {dimension_numbers = #tpu.dot_dimension_numbers<[1], [0], [0], [1], [0, 0, 1, 1], [], []>} : vector<64x128xbf16>, vector<128x256xbf16>, vector<64x256xf32> -> vector<64x256xf32>
    %7 = arith.addf %3, %6 : vector<64x256xf32>
    %c0_6 = arith.constant 0 : index
    %c0_7 = arith.constant 0 : index
    %8 = vector.load %arg8[%c0_6, %c0_7] : memref<64x256xf32, #tpu.memory_space<vmem>>, vector<64x256xf32>
    tpu.vector_store %arg8[%c0_6, %c0_7], %7 {strides = array<i32>} : memref<64x256xf32, #tpu.memory_space<vmem>>, vector<64x256xf32>,
    %c0_i32_8 = arith.constant 0 : i32
    %9 = arith.cmpi eq, %arg2, %c0_i32_8 : i32
    %10 = arith.extui %9 : i1 to i32
    %c0_i32_9 = arith.constant 0 : i32
    %11 = arith.cmpi ne, %10, %c0_i32_9 : i32
    scf.if %11 {
      %c0_10 = arith.constant 0 : index
      %c0_11 = arith.constant 0 : index
      %12 = vector.load %arg8[%c0_10, %c0_11] : memref<64x256xf32, #tpu.memory_space<vmem>>, vector<64x256xf32>
      %13 = arith.truncf %12 : vector<64x256xf32> to vector<64x256xbf16>
      %c0_12 = arith.constant 0 : index
      %c0_13 = arith.constant 0 : index
      %14 = vector.load %arg5[%c0_12, %c0_13] : memref<64x256xbf16, #tpu.memory_space<vmem>>, vector<64x256xbf16>
      tpu.vector_store %arg5[%c0_12, %c0_13], %13 {strides = array<i32>} : memref<64x256xbf16, #tpu.memory_space<vmem>>, vector<64x256xbf16>,
      %cst_14 = arith.constant dense<0.000000e+00> : vector<256xf32>
      %15 = vector.multi_reduction <add>, %12, %cst_14 [0] : vector<64x256xf32> to vector<256xf32>
      %16 = vector.shape_cast %15 : vector<256xf32> to vector<1x1x256xf32>
      %c0_15 = arith.constant 0 : index
      %c0_16 = arith.constant 0 : index
      %c0_17 = arith.constant 0 : index
      %17 = vector.load %arg6[%c0_15, %c0_16, %c0_17] : memref<1x1x256xf32, #tpu.memory_space<vmem>>, vector<1x1x256xf32>
      tpu.vector_store %arg6[%c0_15, %c0_16, %c0_17], %16 {strides = array<i32>} : memref<1x1x256xf32, #tpu.memory_space<vmem>>, vector<1x1x256xf32>,
      %18 = arith.mulf %12, %12 : vector<64x256xf32>
      %cst_18 = arith.constant dense<0.000000e+00> : vector<256xf32>
      %19 = vector.multi_reduction <add>, %18, %cst_18 [0] : vector<64x256xf32> to vector<256xf32>
      %20 = vector.shape_cast %19 : vector<256xf32> to vector<1x1x256xf32>
      %c0_19 = arith.constant 0 : index
      %c0_20 = arith.constant 0 : index
      %c0_21 = arith.constant 0 : index
      %21 = vector.load %arg7[%c0_19, %c0_20, %c0_21] : memref<1x1x256xf32, #tpu.memory_space<vmem>>, vector<1x1x256xf32>
      tpu.vector_store %arg7[%c0_19, %c0_20, %c0_21], %20 {strides = array<i32>} : memref<1x1x256xf32, #tpu.memory_space<vmem>>, vector<1x1x256xf32>,
    } else {
    }
    return
  }
  func.func @transform_0(%arg0: i32, %arg1: i32, %arg2: i32) -> (i32, i32) {
    %c0_i32 = arith.constant 0 : i32
    return %arg0, %arg2 : i32, i32
  }
  func.func @transform_1(%arg0: i32, %arg1: i32, %arg2: i32) -> (i32, i32) {
    %c0_i32 = arith.constant 0 : i32
    return %arg2, %arg1 : i32, i32
  }
  func.func @transform_2(%arg0: i32, %arg1: i32, %arg2: i32) -> (i32, i32) {
    %c0_i32 = arith.constant 0 : i32
    return %arg0, %arg1 : i32, i32
  }
  func.func @transform_3(%arg0: i32, %arg1: i32, %arg2: i32) -> (i32, i32, i32) {
    %c0_i32 = arith.constant 0 : i32
    %c0_i32_0 = arith.constant 0 : i32
    return %arg0, %c0_i32, %arg1 : i32, i32, i32
  }
  func.func @transform_4(%arg0: i32, %arg1: i32, %arg2: i32) -> (i32, i32, i32) {
    %c0_i32 = arith.constant 0 : i32
    %c0_i32_0 = arith.constant 0 : i32
    return %arg0, %c0_i32, %arg1 : i32, i32, i32
  }
}

module attributes {stable_mosaic.version = 11 : i64} {
  func.func @_scale_shift_kernel(%arg0: i32, %arg1: memref<64x256xbf16, #tpu.memory_space<vmem>>, %arg2: memref<1x256xf32, #tpu.memory_space<vmem>>, %arg3: memref<1x256xf32, #tpu.memory_space<vmem>>, %arg4: memref<64x256xbf16, #tpu.memory_space<vmem>>) attributes {dimension_semantics = [#tpu.dimension_semantics<parallel>], iteration_bounds = array<i64: 1>, scalar_prefetch = 0 : i64, scratch_operands = 0 : i64, tpu.core_type = #tpu.core_type<tc>, window_params = [{transform_indices = @transform_0, window_bounds = array<i64: 64, 256>}, {pipeline_mode = #tpu.pipeline_mode<synchronous>, transform_indices = @transform_1, window_bounds = array<i64: 1, 256>}, {pipeline_mode = #tpu.pipeline_mode<synchronous>, transform_indices = @transform_2, window_bounds = array<i64: 1, 256>}, {transform_indices = @transform_3, window_bounds = array<i64: 64, 256>}]} {
    %c0 = arith.constant 0 : index
    %c0_0 = arith.constant 0 : index
    %0 = vector.load %arg1[%c0, %c0_0] : memref<64x256xbf16, #tpu.memory_space<vmem>>, vector<64x256xbf16>
    %1 = arith.extf %0 : vector<64x256xbf16> to vector<64x256xf32>
    %c0_1 = arith.constant 0 : index
    %c0_2 = arith.constant 0 : index
    %2 = vector.load %arg2[%c0_1, %c0_2] : memref<1x256xf32, #tpu.memory_space<vmem>>, vector<1x256xf32>
    %3 = vector.broadcast %2 : vector<1x256xf32> to vector<64x256xf32>
    %4 = arith.mulf %1, %3 : vector<64x256xf32>
    %c0_3 = arith.constant 0 : index
    %c0_4 = arith.constant 0 : index
    %5 = vector.load %arg3[%c0_3, %c0_4] : memref<1x256xf32, #tpu.memory_space<vmem>>, vector<1x256xf32>
    %6 = vector.broadcast %5 : vector<1x256xf32> to vector<64x256xf32>
    %7 = arith.addf %4, %6 : vector<64x256xf32>
    %cst = arith.constant 0.000000e+00 : f32
    %8 = vector.broadcast %cst : f32 to vector<64x256xf32>
    %9 = arith.maximumf %7, %8 : vector<64x256xf32>
    %10 = arith.truncf %9 : vector<64x256xf32> to vector<64x256xbf16>
    %c0_5 = arith.constant 0 : index
    %c0_6 = arith.constant 0 : index
    %11 = vector.load %arg4[%c0_5, %c0_6] : memref<64x256xbf16, #tpu.memory_space<vmem>>, vector<64x256xbf16>
    tpu.vector_store %arg4[%c0_5, %c0_6], %10 {strides = array<i32>} : memref<64x256xbf16, #tpu.memory_space<vmem>>, vector<64x256xbf16>,
    return
  }
  func.func @transform_0(%arg0: i32) -> (i32, i32) {
    %c0_i32 = arith.constant 0 : i32
    %c0_i32_0 = arith.constant 0 : i32
    return %arg0, %c0_i32 : i32, i32
  }
  func.func @transform_1(%arg0: i32) -> (i32, i32) {
    %c0_i32 = arith.constant 0 : i32
    %c0_i32_0 = arith.constant 0 : i32
    %c0_i32_1 = arith.constant 0 : i32
    return %c0_i32, %c0_i32_0 : i32, i32
  }
  func.func @transform_2(%arg0: i32) -> (i32, i32) {
    %c0_i32 = arith.constant 0 : i32
    %c0_i32_0 = arith.constant 0 : i32
    %c0_i32_1 = arith.constant 0 : i32
    return %c0_i32, %c0_i32_0 : i32, i32
  }
  func.func @transform_3(%arg0: i32) -> (i32, i32) {
    %c0_i32 = arith.constant 0 : i32
    %c0_i32_0 = arith.constant 0 : i32
    return %arg0, %c0_i32 : i32, i32
  }
}

module attributes {stable_mosaic.version = 11 : i64} {
  func.func @_mm_stats_kernel(%arg0: i32, %arg1: i32, %arg2: i32, %arg3: memref<32x384xbf16, #tpu.memory_space<vmem>>, %arg4: memref<384x256xbf16, #tpu.memory_space<vmem>>, %arg5: memref<32x256xbf16, #tpu.memory_space<vmem>>, %arg6: memref<1x1x256xf32, #tpu.memory_space<vmem>>, %arg7: memref<1x1x256xf32, #tpu.memory_space<vmem>>, %arg8: memref<32x256xf32, #tpu.memory_space<vmem>>) attributes {dimension_semantics = [#tpu.dimension_semantics<parallel>, #tpu.dimension_semantics<parallel>, #tpu.dimension_semantics<arbitrary>], iteration_bounds = array<i64: 1, 1, 6>, scalar_prefetch = 0 : i64, scratch_operands = 1 : i64, tpu.core_type = #tpu.core_type<tc>, window_params = [{transform_indices = @transform_0, window_bounds = array<i64: 32, 384>}, {transform_indices = @transform_1, window_bounds = array<i64: 384, 256>}, {transform_indices = @transform_2, window_bounds = array<i64: 32, 256>}, {transform_indices = @transform_3, window_bounds = array<i64: 1, 1, 256>}, {transform_indices = @transform_4, window_bounds = array<i64: 1, 1, 256>}]} {
    %c0_i32 = arith.constant 0 : i32
    %0 = arith.cmpi eq, %arg2, %c0_i32 : i32
    %1 = arith.extui %0 : i1 to i32
    %c0_i32_0 = arith.constant 0 : i32
    %2 = arith.cmpi ne, %1, %c0_i32_0 : i32
    scf.if %2 {
      %cst_9 = arith.constant 0.000000e+00 : f32
      %12 = vector.broadcast %cst_9 : f32 to vector<32x256xf32>
      %c0_10 = arith.constant 0 : index
      %c0_11 = arith.constant 0 : index
      %13 = vector.load %arg8[%c0_10, %c0_11] : memref<32x256xf32, #tpu.memory_space<vmem>>, vector<32x256xf32>
      tpu.vector_store %arg8[%c0_10, %c0_11], %12 {strides = array<i32>} : memref<32x256xf32, #tpu.memory_space<vmem>>, vector<32x256xf32>,
    } else {
    }
    %c0 = arith.constant 0 : index
    %c0_1 = arith.constant 0 : index
    %3 = vector.load %arg8[%c0, %c0_1] : memref<32x256xf32, #tpu.memory_space<vmem>>, vector<32x256xf32>
    %c0_2 = arith.constant 0 : index
    %c0_3 = arith.constant 0 : index
    %4 = vector.load %arg3[%c0_2, %c0_3] : memref<32x384xbf16, #tpu.memory_space<vmem>>, vector<32x384xbf16>
    %c0_4 = arith.constant 0 : index
    %c0_5 = arith.constant 0 : index
    %5 = vector.load %arg4[%c0_4, %c0_5] : memref<384x256xbf16, #tpu.memory_space<vmem>>, vector<384x256xbf16>
    %cst = arith.constant dense<0.000000e+00> : vector<32x256xf32>
    %6 = tpu.matmul %4, %5, %cst {dimension_numbers = #tpu.dot_dimension_numbers<[1], [0], [0], [1], [0, 0, 1, 1], [], []>} : vector<32x384xbf16>, vector<384x256xbf16>, vector<32x256xf32> -> vector<32x256xf32>
    %7 = arith.addf %3, %6 : vector<32x256xf32>
    %c0_6 = arith.constant 0 : index
    %c0_7 = arith.constant 0 : index
    %8 = vector.load %arg8[%c0_6, %c0_7] : memref<32x256xf32, #tpu.memory_space<vmem>>, vector<32x256xf32>
    tpu.vector_store %arg8[%c0_6, %c0_7], %7 {strides = array<i32>} : memref<32x256xf32, #tpu.memory_space<vmem>>, vector<32x256xf32>,
    %c5_i32 = arith.constant 5 : i32
    %9 = arith.cmpi eq, %arg2, %c5_i32 : i32
    %10 = arith.extui %9 : i1 to i32
    %c0_i32_8 = arith.constant 0 : i32
    %11 = arith.cmpi ne, %10, %c0_i32_8 : i32
    scf.if %11 {
      %c0_9 = arith.constant 0 : index
      %c0_10 = arith.constant 0 : index
      %12 = vector.load %arg8[%c0_9, %c0_10] : memref<32x256xf32, #tpu.memory_space<vmem>>, vector<32x256xf32>
      %13 = arith.truncf %12 : vector<32x256xf32> to vector<32x256xbf16>
      %c0_11 = arith.constant 0 : index
      %c0_12 = arith.constant 0 : index
      %14 = vector.load %arg5[%c0_11, %c0_12] : memref<32x256xbf16, #tpu.memory_space<vmem>>, vector<32x256xbf16>
      tpu.vector_store %arg5[%c0_11, %c0_12], %13 {strides = array<i32>} : memref<32x256xbf16, #tpu.memory_space<vmem>>, vector<32x256xbf16>,
      %cst_13 = arith.constant dense<0.000000e+00> : vector<256xf32>
      %15 = vector.multi_reduction <add>, %12, %cst_13 [0] : vector<32x256xf32> to vector<256xf32>
      %16 = vector.shape_cast %15 : vector<256xf32> to vector<1x1x256xf32>
      %c0_14 = arith.constant 0 : index
      %c0_15 = arith.constant 0 : index
      %c0_16 = arith.constant 0 : index
      %17 = vector.load %arg6[%c0_14, %c0_15, %c0_16] : memref<1x1x256xf32, #tpu.memory_space<vmem>>, vector<1x1x256xf32>
      tpu.vector_store %arg6[%c0_14, %c0_15, %c0_16], %16 {strides = array<i32>} : memref<1x1x256xf32, #tpu.memory_space<vmem>>, vector<1x1x256xf32>,
      %18 = arith.mulf %12, %12 : vector<32x256xf32>
      %cst_17 = arith.constant dense<0.000000e+00> : vector<256xf32>
      %19 = vector.multi_reduction <add>, %18, %cst_17 [0] : vector<32x256xf32> to vector<256xf32>
      %20 = vector.shape_cast %19 : vector<256xf32> to vector<1x1x256xf32>
      %c0_18 = arith.constant 0 : index
      %c0_19 = arith.constant 0 : index
      %c0_20 = arith.constant 0 : index
      %21 = vector.load %arg7[%c0_18, %c0_19, %c0_20] : memref<1x1x256xf32, #tpu.memory_space<vmem>>, vector<1x1x256xf32>
      tpu.vector_store %arg7[%c0_18, %c0_19, %c0_20], %20 {strides = array<i32>} : memref<1x1x256xf32, #tpu.memory_space<vmem>>, vector<1x1x256xf32>,
    } else {
    }
    return
  }
  func.func @transform_0(%arg0: i32, %arg1: i32, %arg2: i32) -> (i32, i32) {
    %c0_i32 = arith.constant 0 : i32
    return %arg0, %arg2 : i32, i32
  }
  func.func @transform_1(%arg0: i32, %arg1: i32, %arg2: i32) -> (i32, i32) {
    %c0_i32 = arith.constant 0 : i32
    return %arg2, %arg1 : i32, i32
  }
  func.func @transform_2(%arg0: i32, %arg1: i32, %arg2: i32) -> (i32, i32) {
    %c0_i32 = arith.constant 0 : i32
    return %arg0, %arg1 : i32, i32
  }
  func.func @transform_3(%arg0: i32, %arg1: i32, %arg2: i32) -> (i32, i32, i32) {
    %c0_i32 = arith.constant 0 : i32
    %c0_i32_0 = arith.constant 0 : i32
    return %arg0, %c0_i32, %arg1 : i32, i32, i32
  }
  func.func @transform_4(%arg0: i32, %arg1: i32, %arg2: i32) -> (i32, i32, i32) {
    %c0_i32 = arith.constant 0 : i32
    %c0_i32_0 = arith.constant 0 : i32
    return %arg0, %c0_i32, %arg1 : i32, i32, i32
  }
}

module attributes {stable_mosaic.version = 11 : i64} {
  func.func @_scale_shift_kernel(%arg0: i32, %arg1: memref<32x256xbf16, #tpu.memory_space<vmem>>, %arg2: memref<1x256xf32, #tpu.memory_space<vmem>>, %arg3: memref<1x256xf32, #tpu.memory_space<vmem>>, %arg4: memref<32x256xbf16, #tpu.memory_space<vmem>>) attributes {dimension_semantics = [#tpu.dimension_semantics<parallel>], iteration_bounds = array<i64: 1>, scalar_prefetch = 0 : i64, scratch_operands = 0 : i64, tpu.core_type = #tpu.core_type<tc>, window_params = [{transform_indices = @transform_0, window_bounds = array<i64: 32, 256>}, {pipeline_mode = #tpu.pipeline_mode<synchronous>, transform_indices = @transform_1, window_bounds = array<i64: 1, 256>}, {pipeline_mode = #tpu.pipeline_mode<synchronous>, transform_indices = @transform_2, window_bounds = array<i64: 1, 256>}, {transform_indices = @transform_3, window_bounds = array<i64: 32, 256>}]} {
    %c0 = arith.constant 0 : index
    %c0_0 = arith.constant 0 : index
    %0 = vector.load %arg1[%c0, %c0_0] : memref<32x256xbf16, #tpu.memory_space<vmem>>, vector<32x256xbf16>
    %1 = arith.extf %0 : vector<32x256xbf16> to vector<32x256xf32>
    %c0_1 = arith.constant 0 : index
    %c0_2 = arith.constant 0 : index
    %2 = vector.load %arg2[%c0_1, %c0_2] : memref<1x256xf32, #tpu.memory_space<vmem>>, vector<1x256xf32>
    %3 = vector.broadcast %2 : vector<1x256xf32> to vector<32x256xf32>
    %4 = arith.mulf %1, %3 : vector<32x256xf32>
    %c0_3 = arith.constant 0 : index
    %c0_4 = arith.constant 0 : index
    %5 = vector.load %arg3[%c0_3, %c0_4] : memref<1x256xf32, #tpu.memory_space<vmem>>, vector<1x256xf32>
    %6 = vector.broadcast %5 : vector<1x256xf32> to vector<32x256xf32>
    %7 = arith.addf %4, %6 : vector<32x256xf32>
    %cst = arith.constant 0.000000e+00 : f32
    %8 = vector.broadcast %cst : f32 to vector<32x256xf32>
    %9 = arith.maximumf %7, %8 : vector<32x256xf32>
    %10 = arith.truncf %9 : vector<32x256xf32> to vector<32x256xbf16>
    %c0_5 = arith.constant 0 : index
    %c0_6 = arith.constant 0 : index
    %11 = vector.load %arg4[%c0_5, %c0_6] : memref<32x256xbf16, #tpu.memory_space<vmem>>, vector<32x256xbf16>
    tpu.vector_store %arg4[%c0_5, %c0_6], %10 {strides = array<i32>} : memref<32x256xbf16, #tpu.memory_space<vmem>>, vector<32x256xbf16>,
    return
  }
  func.func @transform_0(%arg0: i32) -> (i32, i32) {
    %c0_i32 = arith.constant 0 : i32
    %c0_i32_0 = arith.constant 0 : i32
    return %arg0, %c0_i32 : i32, i32
  }
  func.func @transform_1(%arg0: i32) -> (i32, i32) {
    %c0_i32 = arith.constant 0 : i32
    %c0_i32_0 = arith.constant 0 : i32
    %c0_i32_1 = arith.constant 0 : i32
    return %c0_i32, %c0_i32_0 : i32, i32
  }
  func.func @transform_2(%arg0: i32) -> (i32, i32) {
    %c0_i32 = arith.constant 0 : i32
    %c0_i32_0 = arith.constant 0 : i32
    %c0_i32_1 = arith.constant 0 : i32
    return %c0_i32, %c0_i32_0 : i32, i32
  }
  func.func @transform_3(%arg0: i32) -> (i32, i32) {
    %c0_i32 = arith.constant 0 : i32
    %c0_i32_0 = arith.constant 0 : i32
    return %arg0, %c0_i32 : i32, i32
  }
}

module attributes {stable_mosaic.version = 11 : i64} {
  func.func @_mm_stats_kernel(%arg0: i32, %arg1: i32, %arg2: i32, %arg3: memref<32x256xbf16, #tpu.memory_space<vmem>>, %arg4: memref<256x256xbf16, #tpu.memory_space<vmem>>, %arg5: memref<32x256xbf16, #tpu.memory_space<vmem>>, %arg6: memref<1x1x256xf32, #tpu.memory_space<vmem>>, %arg7: memref<1x1x256xf32, #tpu.memory_space<vmem>>, %arg8: memref<32x256xf32, #tpu.memory_space<vmem>>) attributes {dimension_semantics = [#tpu.dimension_semantics<parallel>, #tpu.dimension_semantics<parallel>, #tpu.dimension_semantics<arbitrary>], iteration_bounds = array<i64: 1, 1, 1>, scalar_prefetch = 0 : i64, scratch_operands = 1 : i64, tpu.core_type = #tpu.core_type<tc>, window_params = [{transform_indices = @transform_0, window_bounds = array<i64: 32, 256>}, {transform_indices = @transform_1, window_bounds = array<i64: 256, 256>}, {transform_indices = @transform_2, window_bounds = array<i64: 32, 256>}, {transform_indices = @transform_3, window_bounds = array<i64: 1, 1, 256>}, {transform_indices = @transform_4, window_bounds = array<i64: 1, 1, 256>}]} {
    %c0_i32 = arith.constant 0 : i32
    %0 = arith.cmpi eq, %arg2, %c0_i32 : i32
    %1 = arith.extui %0 : i1 to i32
    %c0_i32_0 = arith.constant 0 : i32
    %2 = arith.cmpi ne, %1, %c0_i32_0 : i32
    scf.if %2 {
      %cst_10 = arith.constant 0.000000e+00 : f32
      %12 = vector.broadcast %cst_10 : f32 to vector<32x256xf32>
      %c0_11 = arith.constant 0 : index
      %c0_12 = arith.constant 0 : index
      %13 = vector.load %arg8[%c0_11, %c0_12] : memref<32x256xf32, #tpu.memory_space<vmem>>, vector<32x256xf32>
      tpu.vector_store %arg8[%c0_11, %c0_12], %12 {strides = array<i32>} : memref<32x256xf32, #tpu.memory_space<vmem>>, vector<32x256xf32>,
    } else {
    }
    %c0 = arith.constant 0 : index
    %c0_1 = arith.constant 0 : index
    %3 = vector.load %arg8[%c0, %c0_1] : memref<32x256xf32, #tpu.memory_space<vmem>>, vector<32x256xf32>
    %c0_2 = arith.constant 0 : index
    %c0_3 = arith.constant 0 : index
    %4 = vector.load %arg3[%c0_2, %c0_3] : memref<32x256xbf16, #tpu.memory_space<vmem>>, vector<32x256xbf16>
    %c0_4 = arith.constant 0 : index
    %c0_5 = arith.constant 0 : index
    %5 = vector.load %arg4[%c0_4, %c0_5] : memref<256x256xbf16, #tpu.memory_space<vmem>>, vector<256x256xbf16>
    %cst = arith.constant dense<0.000000e+00> : vector<32x256xf32>
    %6 = tpu.matmul %4, %5, %cst {dimension_numbers = #tpu.dot_dimension_numbers<[1], [0], [0], [1], [0, 0, 1, 1], [], []>} : vector<32x256xbf16>, vector<256x256xbf16>, vector<32x256xf32> -> vector<32x256xf32>
    %7 = arith.addf %3, %6 : vector<32x256xf32>
    %c0_6 = arith.constant 0 : index
    %c0_7 = arith.constant 0 : index
    %8 = vector.load %arg8[%c0_6, %c0_7] : memref<32x256xf32, #tpu.memory_space<vmem>>, vector<32x256xf32>
    tpu.vector_store %arg8[%c0_6, %c0_7], %7 {strides = array<i32>} : memref<32x256xf32, #tpu.memory_space<vmem>>, vector<32x256xf32>,
    %c0_i32_8 = arith.constant 0 : i32
    %9 = arith.cmpi eq, %arg2, %c0_i32_8 : i32
    %10 = arith.extui %9 : i1 to i32
    %c0_i32_9 = arith.constant 0 : i32
    %11 = arith.cmpi ne, %10, %c0_i32_9 : i32
    scf.if %11 {
      %c0_10 = arith.constant 0 : index
      %c0_11 = arith.constant 0 : index
      %12 = vector.load %arg8[%c0_10, %c0_11] : memref<32x256xf32, #tpu.memory_space<vmem>>, vector<32x256xf32>
      %13 = arith.truncf %12 : vector<32x256xf32> to vector<32x256xbf16>
      %c0_12 = arith.constant 0 : index
      %c0_13 = arith.constant 0 : index
      %14 = vector.load %arg5[%c0_12, %c0_13] : memref<32x256xbf16, #tpu.memory_space<vmem>>, vector<32x256xbf16>
      tpu.vector_store %arg5[%c0_12, %c0_13], %13 {strides = array<i32>} : memref<32x256xbf16, #tpu.memory_space<vmem>>, vector<32x256xbf16>,
      %cst_14 = arith.constant dense<0.000000e+00> : vector<256xf32>
      %15 = vector.multi_reduction <add>, %12, %cst_14 [0] : vector<32x256xf32> to vector<256xf32>
      %16 = vector.shape_cast %15 : vector<256xf32> to vector<1x1x256xf32>
      %c0_15 = arith.constant 0 : index
      %c0_16 = arith.constant 0 : index
      %c0_17 = arith.constant 0 : index
      %17 = vector.load %arg6[%c0_15, %c0_16, %c0_17] : memref<1x1x256xf32, #tpu.memory_space<vmem>>, vector<1x1x256xf32>
      tpu.vector_store %arg6[%c0_15, %c0_16, %c0_17], %16 {strides = array<i32>} : memref<1x1x256xf32, #tpu.memory_space<vmem>>, vector<1x1x256xf32>,
      %18 = arith.mulf %12, %12 : vector<32x256xf32>
      %cst_18 = arith.constant dense<0.000000e+00> : vector<256xf32>
      %19 = vector.multi_reduction <add>, %18, %cst_18 [0] : vector<32x256xf32> to vector<256xf32>
      %20 = vector.shape_cast %19 : vector<256xf32> to vector<1x1x256xf32>
      %c0_19 = arith.constant 0 : index
      %c0_20 = arith.constant 0 : index
      %c0_21 = arith.constant 0 : index
      %21 = vector.load %arg7[%c0_19, %c0_20, %c0_21] : memref<1x1x256xf32, #tpu.memory_space<vmem>>, vector<1x1x256xf32>
      tpu.vector_store %arg7[%c0_19, %c0_20, %c0_21], %20 {strides = array<i32>} : memref<1x1x256xf32, #tpu.memory_space<vmem>>, vector<1x1x256xf32>,
    } else {
    }
    return
  }
  func.func @transform_0(%arg0: i32, %arg1: i32, %arg2: i32) -> (i32, i32) {
    %c0_i32 = arith.constant 0 : i32
    return %arg0, %arg2 : i32, i32
  }
  func.func @transform_1(%arg0: i32, %arg1: i32, %arg2: i32) -> (i32, i32) {
    %c0_i32 = arith.constant 0 : i32
    return %arg2, %arg1 : i32, i32
  }
  func.func @transform_2(%arg0: i32, %arg1: i32, %arg2: i32) -> (i32, i32) {
    %c0_i32 = arith.constant 0 : i32
    return %arg0, %arg1 : i32, i32
  }
  func.func @transform_3(%arg0: i32, %arg1: i32, %arg2: i32) -> (i32, i32, i32) {
    %c0_i32 = arith.constant 0 : i32
    %c0_i32_0 = arith.constant 0 : i32
    return %arg0, %c0_i32, %arg1 : i32, i32, i32
  }
  func.func @transform_4(%arg0: i32, %arg1: i32, %arg2: i32) -> (i32, i32, i32) {
    %c0_i32 = arith.constant 0 : i32
    %c0_i32_0 = arith.constant 0 : i32
    return %arg0, %c0_i32, %arg1 : i32, i32, i32
  }
}

module attributes {stable_mosaic.version = 11 : i64} {
  func.func @_mm_stats_kernel(%arg0: i32, %arg1: i32, %arg2: i32, %arg3: memref<32x256xbf16, #tpu.memory_space<vmem>>, %arg4: memref<256x128xbf16, #tpu.memory_space<vmem>>, %arg5: memref<32x128xbf16, #tpu.memory_space<vmem>>, %arg6: memref<1x1x128xf32, #tpu.memory_space<vmem>>, %arg7: memref<1x1x128xf32, #tpu.memory_space<vmem>>, %arg8: memref<32x128xf32, #tpu.memory_space<vmem>>) attributes {dimension_semantics = [#tpu.dimension_semantics<parallel>, #tpu.dimension_semantics<parallel>, #tpu.dimension_semantics<arbitrary>], iteration_bounds = array<i64: 1, 5, 1>, scalar_prefetch = 0 : i64, scratch_operands = 1 : i64, tpu.core_type = #tpu.core_type<tc>, window_params = [{transform_indices = @transform_0, window_bounds = array<i64: 32, 256>}, {transform_indices = @transform_1, window_bounds = array<i64: 256, 128>}, {transform_indices = @transform_2, window_bounds = array<i64: 32, 128>}, {transform_indices = @transform_3, window_bounds = array<i64: 1, 1, 128>}, {transform_indices = @transform_4, window_bounds = array<i64: 1, 1, 128>}]} {
    %c0_i32 = arith.constant 0 : i32
    %0 = arith.cmpi eq, %arg2, %c0_i32 : i32
    %1 = arith.extui %0 : i1 to i32
    %c0_i32_0 = arith.constant 0 : i32
    %2 = arith.cmpi ne, %1, %c0_i32_0 : i32
    scf.if %2 {
      %cst_10 = arith.constant 0.000000e+00 : f32
      %12 = vector.broadcast %cst_10 : f32 to vector<32x128xf32>
      %c0_11 = arith.constant 0 : index
      %c0_12 = arith.constant 0 : index
      %13 = vector.load %arg8[%c0_11, %c0_12] : memref<32x128xf32, #tpu.memory_space<vmem>>, vector<32x128xf32>
      tpu.vector_store %arg8[%c0_11, %c0_12], %12 {strides = array<i32>} : memref<32x128xf32, #tpu.memory_space<vmem>>, vector<32x128xf32>,
    } else {
    }
    %c0 = arith.constant 0 : index
    %c0_1 = arith.constant 0 : index
    %3 = vector.load %arg8[%c0, %c0_1] : memref<32x128xf32, #tpu.memory_space<vmem>>, vector<32x128xf32>
    %c0_2 = arith.constant 0 : index
    %c0_3 = arith.constant 0 : index
    %4 = vector.load %arg3[%c0_2, %c0_3] : memref<32x256xbf16, #tpu.memory_space<vmem>>, vector<32x256xbf16>
    %c0_4 = arith.constant 0 : index
    %c0_5 = arith.constant 0 : index
    %5 = vector.load %arg4[%c0_4, %c0_5] : memref<256x128xbf16, #tpu.memory_space<vmem>>, vector<256x128xbf16>
    %cst = arith.constant dense<0.000000e+00> : vector<32x128xf32>
    %6 = tpu.matmul %4, %5, %cst {dimension_numbers = #tpu.dot_dimension_numbers<[1], [0], [0], [1], [0, 0, 1, 1], [], []>} : vector<32x256xbf16>, vector<256x128xbf16>, vector<32x128xf32> -> vector<32x128xf32>
    %7 = arith.addf %3, %6 : vector<32x128xf32>
    %c0_6 = arith.constant 0 : index
    %c0_7 = arith.constant 0 : index
    %8 = vector.load %arg8[%c0_6, %c0_7] : memref<32x128xf32, #tpu.memory_space<vmem>>, vector<32x128xf32>
    tpu.vector_store %arg8[%c0_6, %c0_7], %7 {strides = array<i32>} : memref<32x128xf32, #tpu.memory_space<vmem>>, vector<32x128xf32>,
    %c0_i32_8 = arith.constant 0 : i32
    %9 = arith.cmpi eq, %arg2, %c0_i32_8 : i32
    %10 = arith.extui %9 : i1 to i32
    %c0_i32_9 = arith.constant 0 : i32
    %11 = arith.cmpi ne, %10, %c0_i32_9 : i32
    scf.if %11 {
      %c0_10 = arith.constant 0 : index
      %c0_11 = arith.constant 0 : index
      %12 = vector.load %arg8[%c0_10, %c0_11] : memref<32x128xf32, #tpu.memory_space<vmem>>, vector<32x128xf32>
      %13 = arith.truncf %12 : vector<32x128xf32> to vector<32x128xbf16>
      %c0_12 = arith.constant 0 : index
      %c0_13 = arith.constant 0 : index
      %14 = vector.load %arg5[%c0_12, %c0_13] : memref<32x128xbf16, #tpu.memory_space<vmem>>, vector<32x128xbf16>
      tpu.vector_store %arg5[%c0_12, %c0_13], %13 {strides = array<i32>} : memref<32x128xbf16, #tpu.memory_space<vmem>>, vector<32x128xbf16>,
      %cst_14 = arith.constant dense<0.000000e+00> : vector<128xf32>
      %15 = vector.multi_reduction <add>, %12, %cst_14 [0] : vector<32x128xf32> to vector<128xf32>
      %16 = vector.shape_cast %15 : vector<128xf32> to vector<1x1x128xf32>
      %c0_15 = arith.constant 0 : index
      %c0_16 = arith.constant 0 : index
      %c0_17 = arith.constant 0 : index
      %17 = vector.load %arg6[%c0_15, %c0_16, %c0_17] : memref<1x1x128xf32, #tpu.memory_space<vmem>>, vector<1x1x128xf32>
      tpu.vector_store %arg6[%c0_15, %c0_16, %c0_17], %16 {strides = array<i32>} : memref<1x1x128xf32, #tpu.memory_space<vmem>>, vector<1x1x128xf32>,
      %18 = arith.mulf %12, %12 : vector<32x128xf32>
      %cst_18 = arith.constant dense<0.000000e+00> : vector<128xf32>
      %19 = vector.multi_reduction <add>, %18, %cst_18 [0] : vector<32x128xf32> to vector<128xf32>
      %20 = vector.shape_cast %19 : vector<128xf32> to vector<1x1x128xf32>
      %c0_19 = arith.constant 0 : index
      %c0_20 = arith.constant 0 : index
      %c0_21 = arith.constant 0 : index
      %21 = vector.load %arg7[%c0_19, %c0_20, %c0_21] : memref<1x1x128xf32, #tpu.memory_space<vmem>>, vector<1x1x128xf32>
      tpu.vector_store %arg7[%c0_19, %c0_20, %c0_21], %20 {strides = array<i32>} : memref<1x1x128xf32, #tpu.memory_space<vmem>>, vector<1x1x128xf32>,
    } else {
    }
    return
  }
  func.func @transform_0(%arg0: i32, %arg1: i32, %arg2: i32) -> (i32, i32) {
    %c0_i32 = arith.constant 0 : i32
    return %arg0, %arg2 : i32, i32
  }
  func.func @transform_1(%arg0: i32, %arg1: i32, %arg2: i32) -> (i32, i32) {
    %c0_i32 = arith.constant 0 : i32
    return %arg2, %arg1 : i32, i32
  }
  func.func @transform_2(%arg0: i32, %arg1: i32, %arg2: i32) -> (i32, i32) {
    %c0_i32 = arith.constant 0 : i32
    return %arg0, %arg1 : i32, i32
  }
  func.func @transform_3(%arg0: i32, %arg1: i32, %arg2: i32) -> (i32, i32, i32) {
    %c0_i32 = arith.constant 0 : i32
    %c0_i32_0 = arith.constant 0 : i32
    return %arg0, %c0_i32, %arg1 : i32, i32, i32
  }
  func.func @transform_4(%arg0: i32, %arg1: i32, %arg2: i32) -> (i32, i32, i32) {
    %c0_i32 = arith.constant 0 : i32
    %c0_i32_0 = arith.constant 0 : i32
    return %arg0, %c0_i32, %arg1 : i32, i32, i32
  }
}

module attributes {stable_mosaic.version = 11 : i64} {
  func.func @_scale_shift_kernel(%arg0: i32, %arg1: memref<32x256xbf16, #tpu.memory_space<vmem>>, %arg2: memref<1x256xf32, #tpu.memory_space<vmem>>, %arg3: memref<1x256xf32, #tpu.memory_space<vmem>>, %arg4: memref<32x256xbf16, #tpu.memory_space<vmem>>) attributes {dimension_semantics = [#tpu.dimension_semantics<parallel>], iteration_bounds = array<i64: 1>, scalar_prefetch = 0 : i64, scratch_operands = 0 : i64, tpu.core_type = #tpu.core_type<tc>, window_params = [{transform_indices = @transform_0, window_bounds = array<i64: 32, 256>}, {pipeline_mode = #tpu.pipeline_mode<synchronous>, transform_indices = @transform_1, window_bounds = array<i64: 1, 256>}, {pipeline_mode = #tpu.pipeline_mode<synchronous>, transform_indices = @transform_2, window_bounds = array<i64: 1, 256>}, {transform_indices = @transform_3, window_bounds = array<i64: 32, 256>}]} {
    %c0 = arith.constant 0 : index
    %c0_0 = arith.constant 0 : index
    %0 = vector.load %arg1[%c0, %c0_0] : memref<32x256xbf16, #tpu.memory_space<vmem>>, vector<32x256xbf16>
    %1 = arith.extf %0 : vector<32x256xbf16> to vector<32x256xf32>
    %c0_1 = arith.constant 0 : index
    %c0_2 = arith.constant 0 : index
    %2 = vector.load %arg2[%c0_1, %c0_2] : memref<1x256xf32, #tpu.memory_space<vmem>>, vector<1x256xf32>
    %3 = vector.broadcast %2 : vector<1x256xf32> to vector<32x256xf32>
    %4 = arith.mulf %1, %3 : vector<32x256xf32>
    %c0_3 = arith.constant 0 : index
    %c0_4 = arith.constant 0 : index
    %5 = vector.load %arg3[%c0_3, %c0_4] : memref<1x256xf32, #tpu.memory_space<vmem>>, vector<1x256xf32>
    %6 = vector.broadcast %5 : vector<1x256xf32> to vector<32x256xf32>
    %7 = arith.addf %4, %6 : vector<32x256xf32>
    %cst = arith.constant 0.000000e+00 : f32
    %8 = vector.broadcast %cst : f32 to vector<32x256xf32>
    %9 = arith.maximumf %7, %8 : vector<32x256xf32>
    %cst_5 = arith.constant 2.000000e+00 : f32
    %10 = vector.broadcast %cst_5 : f32 to vector<32x256xf32>
    %11 = arith.mulf %9, %10 : vector<32x256xf32>
    %12 = arith.truncf %11 : vector<32x256xf32> to vector<32x256xbf16>
    %c0_6 = arith.constant 0 : index
    %c0_7 = arith.constant 0 : index
    %13 = vector.load %arg4[%c0_6, %c0_7] : memref<32x256xbf16, #tpu.memory_space<vmem>>, vector<32x256xbf16>
    tpu.vector_store %arg4[%c0_6, %c0_7], %12 {strides = array<i32>} : memref<32x256xbf16, #tpu.memory_space<vmem>>, vector<32x256xbf16>,
    return
  }
  func.func @transform_0(%arg0: i32) -> (i32, i32) {
    %c0_i32 = arith.constant 0 : i32
    %c0_i32_0 = arith.constant 0 : i32
    return %arg0, %c0_i32 : i32, i32
  }
  func.func @transform_1(%arg0: i32) -> (i32, i32) {
    %c0_i32 = arith.constant 0 : i32
    %c0_i32_0 = arith.constant 0 : i32
    %c0_i32_1 = arith.constant 0 : i32
    return %c0_i32, %c0_i32_0 : i32, i32
  }
  func.func @transform_2(%arg0: i32) -> (i32, i32) {
    %c0_i32 = arith.constant 0 : i32
    %c0_i32_0 = arith.constant 0 : i32
    %c0_i32_1 = arith.constant 0 : i32
    return %c0_i32, %c0_i32_0 : i32, i32
  }
  func.func @transform_3(%arg0: i32) -> (i32, i32) {
    %c0_i32 = arith.constant 0 : i32
    %c0_i32_0 = arith.constant 0 : i32
    return %arg0, %c0_i32 : i32, i32
  }
}

module attributes {stable_mosaic.version = 11 : i64} {
  func.func @_scale_shift_kernel(%arg0: i32, %arg1: memref<32x640xbf16, #tpu.memory_space<vmem>>, %arg2: memref<1x640xf32, #tpu.memory_space<vmem>>, %arg3: memref<1x640xf32, #tpu.memory_space<vmem>>, %arg4: memref<32x640xbf16, #tpu.memory_space<vmem>>) attributes {dimension_semantics = [#tpu.dimension_semantics<parallel>], iteration_bounds = array<i64: 1>, scalar_prefetch = 0 : i64, scratch_operands = 0 : i64, tpu.core_type = #tpu.core_type<tc>, window_params = [{transform_indices = @transform_0, window_bounds = array<i64: 32, 640>}, {pipeline_mode = #tpu.pipeline_mode<synchronous>, transform_indices = @transform_1, window_bounds = array<i64: 1, 640>}, {pipeline_mode = #tpu.pipeline_mode<synchronous>, transform_indices = @transform_2, window_bounds = array<i64: 1, 640>}, {transform_indices = @transform_3, window_bounds = array<i64: 32, 640>}]} {
    %c0 = arith.constant 0 : index
    %c0_0 = arith.constant 0 : index
    %0 = vector.load %arg1[%c0, %c0_0] : memref<32x640xbf16, #tpu.memory_space<vmem>>, vector<32x640xbf16>
    %1 = arith.extf %0 : vector<32x640xbf16> to vector<32x640xf32>
    %c0_1 = arith.constant 0 : index
    %c0_2 = arith.constant 0 : index
    %2 = vector.load %arg2[%c0_1, %c0_2] : memref<1x640xf32, #tpu.memory_space<vmem>>, vector<1x640xf32>
    %3 = vector.broadcast %2 : vector<1x640xf32> to vector<32x640xf32>
    %4 = arith.mulf %1, %3 : vector<32x640xf32>
    %c0_3 = arith.constant 0 : index
    %c0_4 = arith.constant 0 : index
    %5 = vector.load %arg3[%c0_3, %c0_4] : memref<1x640xf32, #tpu.memory_space<vmem>>, vector<1x640xf32>
    %6 = vector.broadcast %5 : vector<1x640xf32> to vector<32x640xf32>
    %7 = arith.addf %4, %6 : vector<32x640xf32>
    %cst = arith.constant 0.000000e+00 : f32
    %8 = vector.broadcast %cst : f32 to vector<32x640xf32>
    %9 = arith.maximumf %7, %8 : vector<32x640xf32>
    %10 = arith.truncf %9 : vector<32x640xf32> to vector<32x640xbf16>
    %c0_5 = arith.constant 0 : index
    %c0_6 = arith.constant 0 : index
    %11 = vector.load %arg4[%c0_5, %c0_6] : memref<32x640xbf16, #tpu.memory_space<vmem>>, vector<32x640xbf16>
    tpu.vector_store %arg4[%c0_5, %c0_6], %10 {strides = array<i32>} : memref<32x640xbf16, #tpu.memory_space<vmem>>, vector<32x640xbf16>,
    return
  }
  func.func @transform_0(%arg0: i32) -> (i32, i32) {
    %c0_i32 = arith.constant 0 : i32
    %c0_i32_0 = arith.constant 0 : i32
    return %arg0, %c0_i32 : i32, i32
  }
  func.func @transform_1(%arg0: i32) -> (i32, i32) {
    %c0_i32 = arith.constant 0 : i32
    %c0_i32_0 = arith.constant 0 : i32
    %c0_i32_1 = arith.constant 0 : i32
    return %c0_i32, %c0_i32_0 : i32, i32
  }
  func.func @transform_2(%arg0: i32) -> (i32, i32) {
    %c0_i32 = arith.constant 0 : i32
    %c0_i32_0 = arith.constant 0 : i32
    %c0_i32_1 = arith.constant 0 : i32
    return %c0_i32, %c0_i32_0 : i32, i32
  }
  func.func @transform_3(%arg0: i32) -> (i32, i32) {
    %c0_i32 = arith.constant 0 : i32
    %c0_i32_0 = arith.constant 0 : i32
    return %arg0, %c0_i32 : i32, i32
  }
}

module attributes {stable_mosaic.version = 11 : i64} {
  func.func @_scale_shift_kernel(%arg0: i32, %arg1: memref<16x640xbf16, #tpu.memory_space<vmem>>, %arg2: memref<1x640xf32, #tpu.memory_space<vmem>>, %arg3: memref<1x640xf32, #tpu.memory_space<vmem>>, %arg4: memref<16x640xbf16, #tpu.memory_space<vmem>>) attributes {dimension_semantics = [#tpu.dimension_semantics<parallel>], iteration_bounds = array<i64: 1>, scalar_prefetch = 0 : i64, scratch_operands = 0 : i64, tpu.core_type = #tpu.core_type<tc>, window_params = [{transform_indices = @transform_0, window_bounds = array<i64: 16, 640>}, {pipeline_mode = #tpu.pipeline_mode<synchronous>, transform_indices = @transform_1, window_bounds = array<i64: 1, 640>}, {pipeline_mode = #tpu.pipeline_mode<synchronous>, transform_indices = @transform_2, window_bounds = array<i64: 1, 640>}, {transform_indices = @transform_3, window_bounds = array<i64: 16, 640>}]} {
    %c0 = arith.constant 0 : index
    %c0_0 = arith.constant 0 : index
    %0 = vector.load %arg1[%c0, %c0_0] : memref<16x640xbf16, #tpu.memory_space<vmem>>, vector<16x640xbf16>
    %1 = arith.extf %0 : vector<16x640xbf16> to vector<16x640xf32>
    %c0_1 = arith.constant 0 : index
    %c0_2 = arith.constant 0 : index
    %2 = vector.load %arg2[%c0_1, %c0_2] : memref<1x640xf32, #tpu.memory_space<vmem>>, vector<1x640xf32>
    %3 = vector.broadcast %2 : vector<1x640xf32> to vector<16x640xf32>
    %4 = arith.mulf %1, %3 : vector<16x640xf32>
    %c0_3 = arith.constant 0 : index
    %c0_4 = arith.constant 0 : index
    %5 = vector.load %arg3[%c0_3, %c0_4] : memref<1x640xf32, #tpu.memory_space<vmem>>, vector<1x640xf32>
    %6 = vector.broadcast %5 : vector<1x640xf32> to vector<16x640xf32>
    %7 = arith.addf %4, %6 : vector<16x640xf32>
    %cst = arith.constant 0.000000e+00 : f32
    %8 = vector.broadcast %cst : f32 to vector<16x640xf32>
    %9 = arith.maximumf %7, %8 : vector<16x640xf32>
    %10 = arith.truncf %9 : vector<16x640xf32> to vector<16x640xbf16>
    %c0_5 = arith.constant 0 : index
    %c0_6 = arith.constant 0 : index
    %11 = vector.load %arg4[%c0_5, %c0_6] : memref<16x640xbf16, #tpu.memory_space<vmem>>, vector<16x640xbf16>
    tpu.vector_store %arg4[%c0_5, %c0_6], %10 {strides = array<i32>} : memref<16x640xbf16, #tpu.memory_space<vmem>>, vector<16x640xbf16>,
    return
  }
  func.func @transform_0(%arg0: i32) -> (i32, i32) {
    %c0_i32 = arith.constant 0 : i32
    %c0_i32_0 = arith.constant 0 : i32
    return %arg0, %c0_i32 : i32, i32
  }
  func.func @transform_1(%arg0: i32) -> (i32, i32) {
    %c0_i32 = arith.constant 0 : i32
    %c0_i32_0 = arith.constant 0 : i32
    %c0_i32_1 = arith.constant 0 : i32
    return %c0_i32, %c0_i32_0 : i32, i32
  }
  func.func @transform_2(%arg0: i32) -> (i32, i32) {
    %c0_i32 = arith.constant 0 : i32
    %c0_i32_0 = arith.constant 0 : i32
    %c0_i32_1 = arith.constant 0 : i32
    return %c0_i32, %c0_i32_0 : i32, i32
  }
  func.func @transform_3(%arg0: i32) -> (i32, i32) {
    %c0_i32 = arith.constant 0 : i32
    %c0_i32_0 = arith.constant 0 : i32
    return %arg0, %c0_i32 : i32, i32
  }
}

module attributes {stable_mosaic.version = 11 : i64} {
  func.func @_mm_stats_kernel(%arg0: i32, %arg1: i32, %arg2: i32, %arg3: memref<16x384xbf16, #tpu.memory_space<vmem>>, %arg4: memref<384x128xbf16, #tpu.memory_space<vmem>>, %arg5: memref<16x128xbf16, #tpu.memory_space<vmem>>, %arg6: memref<1x1x128xf32, #tpu.memory_space<vmem>>, %arg7: memref<1x1x128xf32, #tpu.memory_space<vmem>>, %arg8: memref<16x128xf32, #tpu.memory_space<vmem>>) attributes {dimension_semantics = [#tpu.dimension_semantics<parallel>, #tpu.dimension_semantics<parallel>, #tpu.dimension_semantics<arbitrary>], iteration_bounds = array<i64: 1, 5, 15>, scalar_prefetch = 0 : i64, scratch_operands = 1 : i64, tpu.core_type = #tpu.core_type<tc>, window_params = [{transform_indices = @transform_0, window_bounds = array<i64: 16, 384>}, {transform_indices = @transform_1, window_bounds = array<i64: 384, 128>}, {transform_indices = @transform_2, window_bounds = array<i64: 16, 128>}, {transform_indices = @transform_3, window_bounds = array<i64: 1, 1, 128>}, {transform_indices = @transform_4, window_bounds = array<i64: 1, 1, 128>}]} {
    %c0_i32 = arith.constant 0 : i32
    %0 = arith.cmpi eq, %arg2, %c0_i32 : i32
    %1 = arith.extui %0 : i1 to i32
    %c0_i32_0 = arith.constant 0 : i32
    %2 = arith.cmpi ne, %1, %c0_i32_0 : i32
    scf.if %2 {
      %cst_9 = arith.constant 0.000000e+00 : f32
      %12 = vector.broadcast %cst_9 : f32 to vector<16x128xf32>
      %c0_10 = arith.constant 0 : index
      %c0_11 = arith.constant 0 : index
      %13 = vector.load %arg8[%c0_10, %c0_11] : memref<16x128xf32, #tpu.memory_space<vmem>>, vector<16x128xf32>
      tpu.vector_store %arg8[%c0_10, %c0_11], %12 {strides = array<i32>} : memref<16x128xf32, #tpu.memory_space<vmem>>, vector<16x128xf32>,
    } else {
    }
    %c0 = arith.constant 0 : index
    %c0_1 = arith.constant 0 : index
    %3 = vector.load %arg8[%c0, %c0_1] : memref<16x128xf32, #tpu.memory_space<vmem>>, vector<16x128xf32>
    %c0_2 = arith.constant 0 : index
    %c0_3 = arith.constant 0 : index
    %4 = vector.load %arg3[%c0_2, %c0_3] : memref<16x384xbf16, #tpu.memory_space<vmem>>, vector<16x384xbf16>
    %c0_4 = arith.constant 0 : index
    %c0_5 = arith.constant 0 : index
    %5 = vector.load %arg4[%c0_4, %c0_5] : memref<384x128xbf16, #tpu.memory_space<vmem>>, vector<384x128xbf16>
    %cst = arith.constant dense<0.000000e+00> : vector<16x128xf32>
    %6 = tpu.matmul %4, %5, %cst {dimension_numbers = #tpu.dot_dimension_numbers<[1], [0], [0], [1], [0, 0, 1, 1], [], []>} : vector<16x384xbf16>, vector<384x128xbf16>, vector<16x128xf32> -> vector<16x128xf32>
    %7 = arith.addf %3, %6 : vector<16x128xf32>
    %c0_6 = arith.constant 0 : index
    %c0_7 = arith.constant 0 : index
    %8 = vector.load %arg8[%c0_6, %c0_7] : memref<16x128xf32, #tpu.memory_space<vmem>>, vector<16x128xf32>
    tpu.vector_store %arg8[%c0_6, %c0_7], %7 {strides = array<i32>} : memref<16x128xf32, #tpu.memory_space<vmem>>, vector<16x128xf32>,
    %c14_i32 = arith.constant 14 : i32
    %9 = arith.cmpi eq, %arg2, %c14_i32 : i32
    %10 = arith.extui %9 : i1 to i32
    %c0_i32_8 = arith.constant 0 : i32
    %11 = arith.cmpi ne, %10, %c0_i32_8 : i32
    scf.if %11 {
      %c0_9 = arith.constant 0 : index
      %c0_10 = arith.constant 0 : index
      %12 = vector.load %arg8[%c0_9, %c0_10] : memref<16x128xf32, #tpu.memory_space<vmem>>, vector<16x128xf32>
      %13 = arith.truncf %12 : vector<16x128xf32> to vector<16x128xbf16>
      %c0_11 = arith.constant 0 : index
      %c0_12 = arith.constant 0 : index
      %14 = vector.load %arg5[%c0_11, %c0_12] : memref<16x128xbf16, #tpu.memory_space<vmem>>, vector<16x128xbf16>
      tpu.vector_store %arg5[%c0_11, %c0_12], %13 {strides = array<i32>} : memref<16x128xbf16, #tpu.memory_space<vmem>>, vector<16x128xbf16>,
      %cst_13 = arith.constant dense<0.000000e+00> : vector<128xf32>
      %15 = vector.multi_reduction <add>, %12, %cst_13 [0] : vector<16x128xf32> to vector<128xf32>
      %16 = vector.shape_cast %15 : vector<128xf32> to vector<1x1x128xf32>
      %c0_14 = arith.constant 0 : index
      %c0_15 = arith.constant 0 : index
      %c0_16 = arith.constant 0 : index
      %17 = vector.load %arg6[%c0_14, %c0_15, %c0_16] : memref<1x1x128xf32, #tpu.memory_space<vmem>>, vector<1x1x128xf32>
      tpu.vector_store %arg6[%c0_14, %c0_15, %c0_16], %16 {strides = array<i32>} : memref<1x1x128xf32, #tpu.memory_space<vmem>>, vector<1x1x128xf32>,
      %18 = arith.mulf %12, %12 : vector<16x128xf32>
      %cst_17 = arith.constant dense<0.000000e+00> : vector<128xf32>
      %19 = vector.multi_reduction <add>, %18, %cst_17 [0] : vector<16x128xf32> to vector<128xf32>
      %20 = vector.shape_cast %19 : vector<128xf32> to vector<1x1x128xf32>
      %c0_18 = arith.constant 0 : index
      %c0_19 = arith.constant 0 : index
      %c0_20 = arith.constant 0 : index
      %21 = vector.load %arg7[%c0_18, %c0_19, %c0_20] : memref<1x1x128xf32, #tpu.memory_space<vmem>>, vector<1x1x128xf32>
      tpu.vector_store %arg7[%c0_18, %c0_19, %c0_20], %20 {strides = array<i32>} : memref<1x1x128xf32, #tpu.memory_space<vmem>>, vector<1x1x128xf32>,
    } else {
    }
    return
  }
  func.func @transform_0(%arg0: i32, %arg1: i32, %arg2: i32) -> (i32, i32) {
    %c0_i32 = arith.constant 0 : i32
    return %arg0, %arg2 : i32, i32
  }
  func.func @transform_1(%arg0: i32, %arg1: i32, %arg2: i32) -> (i32, i32) {
    %c0_i32 = arith.constant 0 : i32
    return %arg2, %arg1 : i32, i32
  }
  func.func @transform_2(%arg0: i32, %arg1: i32, %arg2: i32) -> (i32, i32) {
    %c0_i32 = arith.constant 0 : i32
    return %arg0, %arg1 : i32, i32
  }
  func.func @transform_3(%arg0: i32, %arg1: i32, %arg2: i32) -> (i32, i32, i32) {
    %c0_i32 = arith.constant 0 : i32
    %c0_i32_0 = arith.constant 0 : i32
    return %arg0, %c0_i32, %arg1 : i32, i32, i32
  }
  func.func @transform_4(%arg0: i32, %arg1: i32, %arg2: i32) -> (i32, i32, i32) {
    %c0_i32 = arith.constant 0 : i32
    %c0_i32_0 = arith.constant 0 : i32
    return %arg0, %c0_i32, %arg1 : i32, i32, i32
  }
}

module attributes {stable_mosaic.version = 11 : i64} {
  func.func @_mm_stats_kernel(%arg0: i32, %arg1: i32, %arg2: i32, %arg3: memref<16x128xbf16, #tpu.memory_space<vmem>>, %arg4: memref<128x128xbf16, #tpu.memory_space<vmem>>, %arg5: memref<16x128xbf16, #tpu.memory_space<vmem>>, %arg6: memref<1x1x128xf32, #tpu.memory_space<vmem>>, %arg7: memref<1x1x128xf32, #tpu.memory_space<vmem>>, %arg8: memref<16x128xf32, #tpu.memory_space<vmem>>) attributes {dimension_semantics = [#tpu.dimension_semantics<parallel>, #tpu.dimension_semantics<parallel>, #tpu.dimension_semantics<arbitrary>], iteration_bounds = array<i64: 1, 5, 5>, scalar_prefetch = 0 : i64, scratch_operands = 1 : i64, tpu.core_type = #tpu.core_type<tc>, window_params = [{transform_indices = @transform_0, window_bounds = array<i64: 16, 128>}, {transform_indices = @transform_1, window_bounds = array<i64: 128, 128>}, {transform_indices = @transform_2, window_bounds = array<i64: 16, 128>}, {transform_indices = @transform_3, window_bounds = array<i64: 1, 1, 128>}, {transform_indices = @transform_4, window_bounds = array<i64: 1, 1, 128>}]} {
    %c0_i32 = arith.constant 0 : i32
    %0 = arith.cmpi eq, %arg2, %c0_i32 : i32
    %1 = arith.extui %0 : i1 to i32
    %c0_i32_0 = arith.constant 0 : i32
    %2 = arith.cmpi ne, %1, %c0_i32_0 : i32
    scf.if %2 {
      %cst_9 = arith.constant 0.000000e+00 : f32
      %12 = vector.broadcast %cst_9 : f32 to vector<16x128xf32>
      %c0_10 = arith.constant 0 : index
      %c0_11 = arith.constant 0 : index
      %13 = vector.load %arg8[%c0_10, %c0_11] : memref<16x128xf32, #tpu.memory_space<vmem>>, vector<16x128xf32>
      tpu.vector_store %arg8[%c0_10, %c0_11], %12 {strides = array<i32>} : memref<16x128xf32, #tpu.memory_space<vmem>>, vector<16x128xf32>,
    } else {
    }
    %c0 = arith.constant 0 : index
    %c0_1 = arith.constant 0 : index
    %3 = vector.load %arg8[%c0, %c0_1] : memref<16x128xf32, #tpu.memory_space<vmem>>, vector<16x128xf32>
    %c0_2 = arith.constant 0 : index
    %c0_3 = arith.constant 0 : index
    %4 = vector.load %arg3[%c0_2, %c0_3] : memref<16x128xbf16, #tpu.memory_space<vmem>>, vector<16x128xbf16>
    %c0_4 = arith.constant 0 : index
    %c0_5 = arith.constant 0 : index
    %5 = vector.load %arg4[%c0_4, %c0_5] : memref<128x128xbf16, #tpu.memory_space<vmem>>, vector<128x128xbf16>
    %cst = arith.constant dense<0.000000e+00> : vector<16x128xf32>
    %6 = tpu.matmul %4, %5, %cst {dimension_numbers = #tpu.dot_dimension_numbers<[1], [0], [0], [1], [0, 0, 1, 1], [], []>} : vector<16x128xbf16>, vector<128x128xbf16>, vector<16x128xf32> -> vector<16x128xf32>
    %7 = arith.addf %3, %6 : vector<16x128xf32>
    %c0_6 = arith.constant 0 : index
    %c0_7 = arith.constant 0 : index
    %8 = vector.load %arg8[%c0_6, %c0_7] : memref<16x128xf32, #tpu.memory_space<vmem>>, vector<16x128xf32>
    tpu.vector_store %arg8[%c0_6, %c0_7], %7 {strides = array<i32>} : memref<16x128xf32, #tpu.memory_space<vmem>>, vector<16x128xf32>,
    %c4_i32 = arith.constant 4 : i32
    %9 = arith.cmpi eq, %arg2, %c4_i32 : i32
    %10 = arith.extui %9 : i1 to i32
    %c0_i32_8 = arith.constant 0 : i32
    %11 = arith.cmpi ne, %10, %c0_i32_8 : i32
    scf.if %11 {
      %c0_9 = arith.constant 0 : index
      %c0_10 = arith.constant 0 : index
      %12 = vector.load %arg8[%c0_9, %c0_10] : memref<16x128xf32, #tpu.memory_space<vmem>>, vector<16x128xf32>
      %13 = arith.truncf %12 : vector<16x128xf32> to vector<16x128xbf16>
      %c0_11 = arith.constant 0 : index
      %c0_12 = arith.constant 0 : index
      %14 = vector.load %arg5[%c0_11, %c0_12] : memref<16x128xbf16, #tpu.memory_space<vmem>>, vector<16x128xbf16>
      tpu.vector_store %arg5[%c0_11, %c0_12], %13 {strides = array<i32>} : memref<16x128xbf16, #tpu.memory_space<vmem>>, vector<16x128xbf16>,
      %cst_13 = arith.constant dense<0.000000e+00> : vector<128xf32>
      %15 = vector.multi_reduction <add>, %12, %cst_13 [0] : vector<16x128xf32> to vector<128xf32>
      %16 = vector.shape_cast %15 : vector<128xf32> to vector<1x1x128xf32>
      %c0_14 = arith.constant 0 : index
      %c0_15 = arith.constant 0 : index
      %c0_16 = arith.constant 0 : index
      %17 = vector.load %arg6[%c0_14, %c0_15, %c0_16] : memref<1x1x128xf32, #tpu.memory_space<vmem>>, vector<1x1x128xf32>
      tpu.vector_store %arg6[%c0_14, %c0_15, %c0_16], %16 {strides = array<i32>} : memref<1x1x128xf32, #tpu.memory_space<vmem>>, vector<1x1x128xf32>,
      %18 = arith.mulf %12, %12 : vector<16x128xf32>
      %cst_17 = arith.constant dense<0.000000e+00> : vector<128xf32>
      %19 = vector.multi_reduction <add>, %18, %cst_17 [0] : vector<16x128xf32> to vector<128xf32>
      %20 = vector.shape_cast %19 : vector<128xf32> to vector<1x1x128xf32>
      %c0_18 = arith.constant 0 : index
      %c0_19 = arith.constant 0 : index
      %c0_20 = arith.constant 0 : index
      %21 = vector.load %arg7[%c0_18, %c0_19, %c0_20] : memref<1x1x128xf32, #tpu.memory_space<vmem>>, vector<1x1x128xf32>
      tpu.vector_store %arg7[%c0_18, %c0_19, %c0_20], %20 {strides = array<i32>} : memref<1x1x128xf32, #tpu.memory_space<vmem>>, vector<1x1x128xf32>,
    } else {
    }
    return
  }
  func.func @transform_0(%arg0: i32, %arg1: i32, %arg2: i32) -> (i32, i32) {
    %c0_i32 = arith.constant 0 : i32
    return %arg0, %arg2 : i32, i32
  }
  func.func @transform_1(%arg0: i32, %arg1: i32, %arg2: i32) -> (i32, i32) {
    %c0_i32 = arith.constant 0 : i32
    return %arg2, %arg1 : i32, i32
  }
  func.func @transform_2(%arg0: i32, %arg1: i32, %arg2: i32) -> (i32, i32) {
    %c0_i32 = arith.constant 0 : i32
    return %arg0, %arg1 : i32, i32
  }
  func.func @transform_3(%arg0: i32, %arg1: i32, %arg2: i32) -> (i32, i32, i32) {
    %c0_i32 = arith.constant 0 : i32
    %c0_i32_0 = arith.constant 0 : i32
    return %arg0, %c0_i32, %arg1 : i32, i32, i32
  }
  func.func @transform_4(%arg0: i32, %arg1: i32, %arg2: i32) -> (i32, i32, i32) {
    %c0_i32 = arith.constant 0 : i32
    %c0_i32_0 = arith.constant 0 : i32
    return %arg0, %c0_i32, %arg1 : i32, i32, i32
  }
}

module attributes {stable_mosaic.version = 11 : i64} {
  func.func @_scale_shift_kernel(%arg0: i32, %arg1: memref<16x640xbf16, #tpu.memory_space<vmem>>, %arg2: memref<1x640xf32, #tpu.memory_space<vmem>>, %arg3: memref<1x640xf32, #tpu.memory_space<vmem>>, %arg4: memref<16x640xbf16, #tpu.memory_space<vmem>>) attributes {dimension_semantics = [#tpu.dimension_semantics<parallel>], iteration_bounds = array<i64: 1>, scalar_prefetch = 0 : i64, scratch_operands = 0 : i64, tpu.core_type = #tpu.core_type<tc>, window_params = [{transform_indices = @transform_0, window_bounds = array<i64: 16, 640>}, {pipeline_mode = #tpu.pipeline_mode<synchronous>, transform_indices = @transform_1, window_bounds = array<i64: 1, 640>}, {pipeline_mode = #tpu.pipeline_mode<synchronous>, transform_indices = @transform_2, window_bounds = array<i64: 1, 640>}, {transform_indices = @transform_3, window_bounds = array<i64: 16, 640>}]} {
    %c0 = arith.constant 0 : index
    %c0_0 = arith.constant 0 : index
    %0 = vector.load %arg1[%c0, %c0_0] : memref<16x640xbf16, #tpu.memory_space<vmem>>, vector<16x640xbf16>
    %1 = arith.extf %0 : vector<16x640xbf16> to vector<16x640xf32>
    %c0_1 = arith.constant 0 : index
    %c0_2 = arith.constant 0 : index
    %2 = vector.load %arg2[%c0_1, %c0_2] : memref<1x640xf32, #tpu.memory_space<vmem>>, vector<1x640xf32>
    %3 = vector.broadcast %2 : vector<1x640xf32> to vector<16x640xf32>
    %4 = arith.mulf %1, %3 : vector<16x640xf32>
    %c0_3 = arith.constant 0 : index
    %c0_4 = arith.constant 0 : index
    %5 = vector.load %arg3[%c0_3, %c0_4] : memref<1x640xf32, #tpu.memory_space<vmem>>, vector<1x640xf32>
    %6 = vector.broadcast %5 : vector<1x640xf32> to vector<16x640xf32>
    %7 = arith.addf %4, %6 : vector<16x640xf32>
    %cst = arith.constant 0.000000e+00 : f32
    %8 = vector.broadcast %cst : f32 to vector<16x640xf32>
    %9 = arith.maximumf %7, %8 : vector<16x640xf32>
    %cst_5 = arith.constant 2.000000e+00 : f32
    %10 = vector.broadcast %cst_5 : f32 to vector<16x640xf32>
    %11 = arith.mulf %9, %10 : vector<16x640xf32>
    %12 = arith.truncf %11 : vector<16x640xf32> to vector<16x640xbf16>
    %c0_6 = arith.constant 0 : index
    %c0_7 = arith.constant 0 : index
    %13 = vector.load %arg4[%c0_6, %c0_7] : memref<16x640xbf16, #tpu.memory_space<vmem>>, vector<16x640xbf16>
    tpu.vector_store %arg4[%c0_6, %c0_7], %12 {strides = array<i32>} : memref<16x640xbf16, #tpu.memory_space<vmem>>, vector<16x640xbf16>,
    return
  }
  func.func @transform_0(%arg0: i32) -> (i32, i32) {
    %c0_i32 = arith.constant 0 : i32
    %c0_i32_0 = arith.constant 0 : i32
    return %arg0, %c0_i32 : i32, i32
  }
  func.func @transform_1(%arg0: i32) -> (i32, i32) {
    %c0_i32 = arith.constant 0 : i32
    %c0_i32_0 = arith.constant 0 : i32
    %c0_i32_1 = arith.constant 0 : i32
    return %c0_i32, %c0_i32_0 : i32, i32
  }
  func.func @transform_2(%arg0: i32) -> (i32, i32) {
    %c0_i32 = arith.constant 0 : i32
    %c0_i32_0 = arith.constant 0 : i32
    %c0_i32_1 = arith.constant 0 : i32
    return %c0_i32, %c0_i32_0 : i32, i32
  }
  func.func @transform_3(%arg0: i32) -> (i32, i32) {
    %c0_i32 = arith.constant 0 : i32
    %c0_i32_0 = arith.constant 0 : i32
    return %arg0, %c0_i32 : i32, i32
  }
}

module attributes {stable_mosaic.version = 11 : i64} {
  func.func @_gap_kernel(%arg0: i32, %arg1: memref<1x4x640xbf16, #tpu.memory_space<vmem>>, %arg2: memref<1x1x640xbf16, #tpu.memory_space<vmem>>) attributes {dimension_semantics = [#tpu.dimension_semantics<parallel>], iteration_bounds = array<i64: 2>, scalar_prefetch = 0 : i64, scratch_operands = 0 : i64, tpu.core_type = #tpu.core_type<tc>, window_params = [{transform_indices = @transform_0, window_bounds = array<i64: 1, 4, 640>}, {transform_indices = @transform_1, window_bounds = array<i64: 1, 1, 640>}]} {
    %c0 = arith.constant 0 : index
    %c0_0 = arith.constant 0 : index
    %c0_1 = arith.constant 0 : index
    %0 = vector.load %arg1[%c0, %c0_0, %c0_1] : memref<1x4x640xbf16, #tpu.memory_space<vmem>>, vector<1x4x640xbf16>
    %1 = arith.extf %0 : vector<1x4x640xbf16> to vector<1x4x640xf32>
    %cst = arith.constant dense<0.000000e+00> : vector<1x640xf32>
    %2 = vector.multi_reduction <add>, %1, %cst [1] : vector<1x4x640xf32> to vector<1x640xf32>
    %3 = vector.shape_cast %2 : vector<1x640xf32> to vector<1x1x640xf32>
    %cst_2 = arith.constant 2.500000e-01 : f32
    %4 = vector.broadcast %cst_2 : f32 to vector<1x1x640xf32>
    %5 = arith.mulf %3, %4 : vector<1x1x640xf32>
    %6 = arith.truncf %5 : vector<1x1x640xf32> to vector<1x1x640xbf16>
    %c0_3 = arith.constant 0 : index
    %c0_4 = arith.constant 0 : index
    %c0_5 = arith.constant 0 : index
    %7 = vector.load %arg2[%c0_3, %c0_4, %c0_5] : memref<1x1x640xbf16, #tpu.memory_space<vmem>>, vector<1x1x640xbf16>
    tpu.vector_store %arg2[%c0_3, %c0_4, %c0_5], %6 {strides = array<i32>} : memref<1x1x640xbf16, #tpu.memory_space<vmem>>, vector<1x1x640xbf16>,
    return
  }
  func.func @transform_0(%arg0: i32) -> (i32, i32, i32) {
    %c0_i32 = arith.constant 0 : i32
    %c0_i32_0 = arith.constant 0 : i32
    %c0_i32_1 = arith.constant 0 : i32
    return %arg0, %c0_i32, %c0_i32_0 : i32, i32, i32
  }
  func.func @transform_1(%arg0: i32) -> (i32, i32, i32) {
    %c0_i32 = arith.constant 0 : i32
    %c0_i32_0 = arith.constant 0 : i32
    %c0_i32_1 = arith.constant 0 : i32
    return %arg0, %c0_i32, %c0_i32_0 : i32, i32, i32
  }
}

module attributes {stable_mosaic.version = 11 : i64} {
  func.func @_mm_bias_kernel(%arg0: i32, %arg1: i32, %arg2: i32, %arg3: memref<16x128xbf16, #tpu.memory_space<vmem>>, %arg4: memref<128x256xbf16, #tpu.memory_space<vmem>>, %arg5: memref<1x256xf32, #tpu.memory_space<vmem>>, %arg6: memref<16x256xf32, #tpu.memory_space<vmem>>, %arg7: memref<16x256xf32, #tpu.memory_space<vmem>>) attributes {dimension_semantics = [#tpu.dimension_semantics<parallel>, #tpu.dimension_semantics<parallel>, #tpu.dimension_semantics<arbitrary>], iteration_bounds = array<i64: 1, 4, 5>, scalar_prefetch = 0 : i64, scratch_operands = 1 : i64, tpu.core_type = #tpu.core_type<tc>, window_params = [{transform_indices = @transform_0, window_bounds = array<i64: 16, 128>}, {transform_indices = @transform_1, window_bounds = array<i64: 128, 256>}, {transform_indices = @transform_2, window_bounds = array<i64: 1, 256>}, {transform_indices = @transform_3, window_bounds = array<i64: 16, 256>}]} {
    %c0_i32 = arith.constant 0 : i32
    %0 = arith.cmpi eq, %arg2, %c0_i32 : i32
    %1 = arith.extui %0 : i1 to i32
    %c0_i32_0 = arith.constant 0 : i32
    %2 = arith.cmpi ne, %1, %c0_i32_0 : i32
    scf.if %2 {
      %cst_9 = arith.constant 0.000000e+00 : f32
      %12 = vector.broadcast %cst_9 : f32 to vector<16x256xf32>
      %c0_10 = arith.constant 0 : index
      %c0_11 = arith.constant 0 : index
      %13 = vector.load %arg7[%c0_10, %c0_11] : memref<16x256xf32, #tpu.memory_space<vmem>>, vector<16x256xf32>
      tpu.vector_store %arg7[%c0_10, %c0_11], %12 {strides = array<i32>} : memref<16x256xf32, #tpu.memory_space<vmem>>, vector<16x256xf32>,
    } else {
    }
    %c0 = arith.constant 0 : index
    %c0_1 = arith.constant 0 : index
    %3 = vector.load %arg7[%c0, %c0_1] : memref<16x256xf32, #tpu.memory_space<vmem>>, vector<16x256xf32>
    %c0_2 = arith.constant 0 : index
    %c0_3 = arith.constant 0 : index
    %4 = vector.load %arg3[%c0_2, %c0_3] : memref<16x128xbf16, #tpu.memory_space<vmem>>, vector<16x128xbf16>
    %c0_4 = arith.constant 0 : index
    %c0_5 = arith.constant 0 : index
    %5 = vector.load %arg4[%c0_4, %c0_5] : memref<128x256xbf16, #tpu.memory_space<vmem>>, vector<128x256xbf16>
    %cst = arith.constant dense<0.000000e+00> : vector<16x256xf32>
    %6 = tpu.matmul %4, %5, %cst {dimension_numbers = #tpu.dot_dimension_numbers<[1], [0], [0], [1], [0, 0, 1, 1], [], []>} : vector<16x128xbf16>, vector<128x256xbf16>, vector<16x256xf32> -> vector<16x256xf32>
    %7 = arith.addf %3, %6 : vector<16x256xf32>
    %c0_6 = arith.constant 0 : index
    %c0_7 = arith.constant 0 : index
    %8 = vector.load %arg7[%c0_6, %c0_7] : memref<16x256xf32, #tpu.memory_space<vmem>>, vector<16x256xf32>
    tpu.vector_store %arg7[%c0_6, %c0_7], %7 {strides = array<i32>} : memref<16x256xf32, #tpu.memory_space<vmem>>, vector<16x256xf32>,
    %c4_i32 = arith.constant 4 : i32
    %9 = arith.cmpi eq, %arg2, %c4_i32 : i32
    %10 = arith.extui %9 : i1 to i32
    %c0_i32_8 = arith.constant 0 : i32
    %11 = arith.cmpi ne, %10, %c0_i32_8 : i32
    scf.if %11 {
      %c0_9 = arith.constant 0 : index
      %c0_10 = arith.constant 0 : index
      %12 = vector.load %arg7[%c0_9, %c0_10] : memref<16x256xf32, #tpu.memory_space<vmem>>, vector<16x256xf32>
      %c0_11 = arith.constant 0 : index
      %c0_12 = arith.constant 0 : index
      %13 = vector.load %arg5[%c0_11, %c0_12] : memref<1x256xf32, #tpu.memory_space<vmem>>, vector<1x256xf32>
      %14 = vector.broadcast %13 : vector<1x256xf32> to vector<16x256xf32>
      %15 = arith.addf %12, %14 : vector<16x256xf32>
      %c0_13 = arith.constant 0 : index
      %c0_14 = arith.constant 0 : index
      %16 = vector.load %arg6[%c0_13, %c0_14] : memref<16x256xf32, #tpu.memory_space<vmem>>, vector<16x256xf32>
      tpu.vector_store %arg6[%c0_13, %c0_14], %15 {strides = array<i32>} : memref<16x256xf32, #tpu.memory_space<vmem>>, vector<16x256xf32>,
    } else {
    }
    return
  }
  func.func @transform_0(%arg0: i32, %arg1: i32, %arg2: i32) -> (i32, i32) {
    %c0_i32 = arith.constant 0 : i32
    return %arg0, %arg2 : i32, i32
  }
  func.func @transform_1(%arg0: i32, %arg1: i32, %arg2: i32) -> (i32, i32) {
    %c0_i32 = arith.constant 0 : i32
    return %arg2, %arg1 : i32, i32
  }
  func.func @transform_2(%arg0: i32, %arg1: i32, %arg2: i32) -> (i32, i32) {
    %c0_i32 = arith.constant 0 : i32
    %c0_i32_0 = arith.constant 0 : i32
    return %c0_i32, %arg1 : i32, i32
  }
  func.func @transform_3(%arg0: i32, %arg1: i32, %arg2: i32) -> (i32, i32) {
    %c0_i32 = arith.constant 0 : i32
    return %arg0, %arg1 : i32, i32
  }
}

</mosaic_0001>

<bundles_post_ra>
// kernel: _lambda_.28
= control target key start
LH: loop header
LB: loop body
LE: loop exit
PB: predicated region body
PF: predicated region fallthrough
CT: control target
= control target key end

     0   :  { %s1888_s15 = smov 0   ;;  %s1890_s16 = smov 0   ;;  %s2132_s0 = inlined_call_operand.vmem [shape: bf16[1024,256], index: 0, kind: input, shape index: {}]   ;;  %s2133_s1 = inlined_call_operand.vmem [shape: bf16[256,128], index: 1, kind: input, shape index: {}]   ;;  %s2134_s2 = inlined_call_operand.vmem [shape: bf16[1024,128], index: 2, kind: output, shape index: {0}]   ;;  %s2135_s3 = inlined_call_operand.vmem [shape: f32[4,1,128], index: 3, kind: output, shape index: {1}]   ;;  %s2136_s4 = inlined_call_operand.vmem [shape: f32[4,1,128], index: 4, kind: output, shape index: {2}]  }
   0x1   :  { %s1892_s17 = smov 0  }
   0x2 LB: > { %s34_s18 = sadd.s32 1, %s1857_s16  ;;  %p1407_p0 = scmp.ge.s32.totalorder %s1861_s17, 1  ;;  %s1861_s17 = sphi %s1892_s17, %s15_s17   ;;  %s1857_s16 = sphi %s1890_s16, %s2138_s16   ;;  %s1853_s15 = sphi %s1888_s15, %s2137_s15  }
   0x3   : > { %p36_p1 = scmp.ge.s32.totalorder %s34_s18, 4  ;;  %p217_p2 = scmp.lt.s32.totalorder %s1861_s17, 5 }
   0x5   : > { %s2140_s18 = smov (%p36_p1, %s34_s18), 0  ;;  %p218_p3 = pnand %p1407_p0, %p217_p2 }
   0x6   : > { %s1408_s21 = sshll.u32 (!%p218_p3), %s1853_s15, 5  ;;  %p301_p5 = scmp.lt.s32.totalorder (!%p218_p3), %s1853_s15, 3 }
   0x7   : > { %221 = sbr.rel (%p218_p3) target bundleno = 351 (0x15f), region = 28  ;;  %p273_p4 = scmp.lt.s32.totalorder (!%p218_p3), %s1408_s21, 127 }
   0xc   : > { %v1775_v0 = vld [vmem:[%s2133_s1 + $0x78] sm:$0xff]   ;;  %v1777_v2 = vld [vmem:[%s2133_s1 + $0x70] sm:$0xff]   ;;  %v1779_v4 = vld [vmem:[%s2133_s1 + $0x68] sm:$0xff]   ;;  %s2142_s21 = smov (!%p273_p4, %s1408_s21), 127  ;;  %s2144_s15 = smov (!%p301_p5, %s1853_s15), 3 }
   0xd   : > { %v1776_v1 = vld [vmem:[%s2133_s1 + $0x38] sm:$0xff]   ;;  %1623 = vmatprep.subr.bf16.mxu0 %v1775_v0  ;;  %1735 = vmatprep.subr.bf16.mxu1 %v1775_v0  ;;  %v1778_v3 = vld [vmem:[%s2133_s1 + $0x30] sm:$0xff]   ;;  %v1780_v5 = vld [vmem:[%s2133_s1 + $0x28] sm:$0xff]   ;;  %s1495_s10 = sshll.u32 %s2142_s21, 3  ;;  %s1412_s9 = sshll.u32 %s2142_s21, 2 }
   0xe   : > { %1624 = vmatpush3.bf16.msra.mxu0 %v1776_v1  ;;  %1743 = vmatpush3.bf16.msra.mxu1 %v1776_v1  ;;  %v1781_v6 = vld [vmem:[%s2133_s1 + $0x60] sm:$0xff]   ;;  %v1783_v8 = vld [vmem:[%s2133_s1 + $0x58] sm:$0xff]   ;;  %s1942_s19 = scalar_lea.vmem %s2132_s0, %s1495_s10  ;;  %v1785_v10 = vld [vmem:[%s2133_s1 + $0x50] sm:$0xff]   ;;  %s2007_s12 = scalar_lea.vmem %s2134_s2, %s1412_s9 }
   0xf   : > { %1625 = vmatprep.subr.bf16.mxu0 %v1777_v2  ;;  %1736 = vmatprep.subr.bf16.mxu1 %v1777_v2  ;;  %v1782_v7 = vld [vmem:[%s2133_s1 + $0x20] sm:$0xff]   ;;  %v1784_v9 = vld [vmem:[%s2133_s1 + $0x18] sm:$0xff]   ;;  %v1786_v12 = vld [vmem:[%s2133_s1 + $0x10] sm:$0xff]   ;;  %s306_s14 = scalar_lea.vmem %s2135_s3, %s2144_s15  ;;  %s312_s22 = scalar_lea.vmem %s2136_s4, %s2144_s15 }
  0x10   : > { %v1793_v11 = vld [vmem:[%s1942_s19 + $0x4] ss:$8 sps:$4 sm:$0xff]   ;;  %v1791_v18 = vld [vmem:[%s1942_s19] ss:$8 sps:$4 sm:$0xff]   ;;  %v1794_v19 = vld [vmem:[%s1942_s19 + $0x14] ss:$8 sps:$4 sm:$0xff]  }
  0x11   : > { %734 = vmatprep.mubr.bf16.mxu0 %v1793_v11  ;;  %v1787_v13 = vld [vmem:[%s2133_s1 + $0x48] sm:$0xff]   ;;  %v1789_v16 = vld [vmem:[%s2133_s1 + $0x40] sm:$0xff]   ;;  %v1809_v21 = vld [vmem:[%s1942_s19 + $0x94] ss:$8 sps:$4 sm:$0xff]  }
  0x12   : > { %1626 = vmatpush3.bf16.msra.mxu0 %v1778_v3  ;;  %1744 = vmatpush3.bf16.msra.mxu1 %v1778_v3  ;;  %v1805_v14 = vld [vmem:[%s1942_s19 + $0x84] ss:$8 sps:$4 sm:$0xff]   ;;  %v1803_v20 = vld [vmem:[%s1942_s19 + $0x80] ss:$8 sps:$4 sm:$0xff]   ;;  %v1796_v22 = vld [vmem:[%s1942_s19 + $0x10] ss:$8 sps:$4 sm:$0xff]  }
  0x13   : > { %1627 = vmatprep.subr.bf16.mxu0 %v1779_v4  ;;  %1737 = vmatprep.subr.bf16.mxu1 %v1779_v4  ;;  %v1788_v15 = vld [vmem:[%s2133_s1 + $0x8] sm:$0xff]   ;;  %v1790_v17 = vld [vmem:[%s2133_s1] sm:$0xff]   ;;  %v1811_v24 = vld [vmem:[%s1942_s19 + $0x90] ss:$8 sps:$4 sm:$0xff]  }
  0x14   : > { %798 = vmatprep.mubr.bf16.mxu1 %v1805_v14  ;;  %v1797_v23 = vld [vmem:[%s1942_s19 + $0x24] ss:$8 sps:$4 sm:$0xff]   ;;  %v1799_v26 = vld [vmem:[%s1942_s19 + $0x20] ss:$8 sps:$4 sm:$0xff]   ;;  %v1800_v27 = vld [vmem:[%s1942_s19 + $0x34] ss:$8 sps:$4 sm:$0xff]  }
  0x15   : > { %v1815_v25 = vld [vmem:[%s1942_s19 + $0xa4] ss:$8 sps:$4 sm:$0xff]   ;;  %v1817_v28 = vld [vmem:[%s1942_s19 + $0xa0] ss:$8 sps:$4 sm:$0xff]   ;;  %v1821_v29 = vld [vmem:[%s1942_s19 + $0xb4] ss:$8 sps:$4 sm:$0xff]  }
  0x16   : > { %1628 = vmatpush3.bf16.msra.mxu0 %v1780_v5  ;;  %1745 = vmatpush3.bf16.msra.mxu1 %v1780_v5  ;;  %v1802_v30 = vld [vmem:[%s1942_s19 + $0x30] ss:$8 sps:$4 sm:$0xff]   ;;  %v1806_v31 = vld [vmem:[%s1942_s19 + $0x44] ss:$8 sps:$4 sm:$0xff]   ;;  %v1808_v34 = vld [vmem:[%s1942_s19 + $0x40] ss:$8 sps:$4 sm:$0xff]  }
  0x17   : > { %1629 = vmatprep.subr.bf16.mxu0 %v1781_v6  ;;  %1738 = vmatprep.subr.bf16.mxu1 %v1781_v6  ;;  %v1823_v32 = vld [vmem:[%s1942_s19 + $0xb0] ss:$8 sps:$4 sm:$0xff]   ;;  %v1827_v33 = vld [vmem:[%s1942_s19 + $0xc4] ss:$8 sps:$4 sm:$0xff]   ;;  %v1812_v35 = vld [vmem:[%s1942_s19 + $0x54] ss:$8 sps:$4 sm:$0xff]  }
  0x18   : > { %v1829_v36 = vld [vmem:[%s1942_s19 + $0xc0] ss:$8 sps:$4 sm:$0xff]   ;;  %v1830_v37 = vld [vmem:[%s1942_s19 + $0xd4] ss:$8 sps:$4 sm:$0xff]   ;;  %v1814_v38 = vld [vmem:[%s1942_s19 + $0x50] ss:$8 sps:$4 sm:$0xff]  }
  0x19   : > { %v1818_v39 = vld [vmem:[%s1942_s19 + $0x64] ss:$8 sps:$4 sm:$0xff]   ;;  %v1832_v40 = vld [vmem:[%s1942_s19 + $0xd0] ss:$8 sps:$4 sm:$0xff]   ;;  %v1820_v42 = vld [vmem:[%s1942_s19 + $0x60] ss:$8 sps:$4 sm:$0xff]  }
  0x1a   : > { %1630 = vmatpush3.bf16.msra.mxu0 %v1782_v7  ;;  %1746 = vmatpush3.bf16.msra.mxu1 %v1782_v7  ;;  %v1833_v41 = vld [vmem:[%s1942_s19 + $0xe4] ss:$8 sps:$4 sm:$0xff]   ;;  %v1824_v43 = vld [vmem:[%s1942_s19 + $0x74] ss:$8 sps:$4 sm:$0xff]   ;;  %v1835_v44 = vld [vmem:[%s1942_s19 + $0xe0] ss:$8 sps:$4 sm:$0xff]  }
  0x1b   : > { %1631 = vmatprep.subr.bf16.mxu0 %v1783_v8  ;;  %1739 = vmatprep.subr.bf16.mxu1 %v1783_v8  ;;  %v1836_v45 = vld [vmem:[%s1942_s19 + $0xf4] ss:$8 sps:$4 sm:$0xff]   ;;  %v1826_v46 = vld [vmem:[%s1942_s19 + $0x70] ss:$8 sps:$4 sm:$0xff]  }
  0x1c   : > { %v1838_v47 = vld [vmem:[%s1942_s19 + $0xf0] ss:$8 sps:$4 sm:$0xff]  }
  0x1e   : > { %1632 = vmatpush3.bf16.msra.mxu0 %v1784_v9  ;;  %1747 = vmatpush3.bf16.msra.mxu1 %v1784_v9 }
  0x1f   : > { %1633 = vmatprep.subr.bf16.mxu0 %v1785_v10  ;;  %1740 = vmatprep.subr.bf16.mxu1 %v1785_v10 }
  0x22   : > { %1634 = vmatpush3.bf16.msra.mxu0 %v1786_v12  ;;  %1748 = vmatpush3.bf16.msra.mxu1 %v1786_v12 }
  0x23   : > { %1635 = vmatprep.subr.bf16.mxu0 %v1787_v13  ;;  %1741 = vmatprep.subr.bf16.mxu1 %v1787_v13 }
  0x26   : > { %1636 = vmatpush3.bf16.msra.mxu0 %v1788_v15  ;;  %1749 = vmatpush3.bf16.msra.mxu1 %v1788_v15 }
  0x27   : > { %1637 = vmatprep.subr.bf16.mxu0 %v1789_v16  ;;  %1742 = vmatprep.subr.bf16.mxu1 %v1789_v16 }
  0x2a   : > { %1638 = vmatpush3.bf16.msra.mxu0 %v1790_v17  ;;  %1750 = vmatpush3.bf16.msra.mxu1 %v1790_v17 }
  0x2d   : > { %735 = vmatmul.mubr.bf16.vlgmr.msra.gmra.mxu0 %v1791_v18  ;;  %799 = vmatmul.mubr.bf16.vlgmr.msra.gmra.mxu1 %v1803_v20 }
  0x2e   : > { %742 = vmatprep.mubr.bf16.mxu0 %v1794_v19  ;;  %806 = vmatprep.mubr.bf16.mxu1 %v1809_v21 }
  0x35   : > { %743 = vmatmul.mubr.bf16.gmra.mxu0 %v1796_v22  ;;  %807 = vmatmul.mubr.bf16.gmra.mxu1 %v1811_v24 }
  0x36   : > { %750 = vmatprep.mubr.bf16.mxu0 %v1797_v23  ;;  %814 = vmatprep.mubr.bf16.mxu1 %v1815_v25 }
  0x3d   : > { %751 = vmatmul.mubr.bf16.gmra.mxu0 %v1799_v26  ;;  %815 = vmatmul.mubr.bf16.gmra.mxu1 %v1817_v28 }
  0x3e   : > { %758 = vmatprep.mubr.bf16.mxu0 %v1800_v27  ;;  %822 = vmatprep.mubr.bf16.mxu1 %v1821_v29 }
  0x45   : > { %759 = vmatmul.mubr.bf16.gmra.mxu0 %v1802_v30  ;;  %823 = vmatmul.mubr.bf16.gmra.mxu1 %v1823_v32 }
  0x46   : > { %766 = vmatprep.mubr.bf16.mxu0 %v1806_v31  ;;  %830 = vmatprep.mubr.bf16.mxu1 %v1827_v33 }
  0x4d   : > { %767 = vmatmul.mubr.bf16.gmra.mxu0 %v1808_v34  ;;  %831 = vmatmul.mubr.bf16.gmra.mxu1 %v1829_v36 }
  0x4e   : > { %774 = vmatprep.mubr.bf16.mxu0 %v1812_v35  ;;  %838 = vmatprep.mubr.bf16.mxu1 %v1830_v37 }
  0x55   : > { %775 = vmatmul.mubr.bf16.gmra.mxu0 %v1814_v38  ;;  %839 = vmatmul.mubr.bf16.gmra.mxu1 %v1832_v40 }
  0x56   : > { %782 = vmatprep.mubr.bf16.mxu0 %v1818_v39  ;;  %846 = vmatprep.mubr.bf16.mxu1 %v1833_v41 }
  0x5d   : > { %783 = vmatmul.mubr.bf16.gmra.mxu0 %v1820_v42  ;;  %847 = vmatmul.mubr.bf16.gmra.mxu1 %v1835_v44 }
  0x5e   : > { %790 = vmatprep.mubr.bf16.mxu0 %v1824_v43  ;;  %854 = vmatprep.mubr.bf16.mxu1 %v1836_v45 }
  0x65   : > { %791 = vmatmul.mubr.bf16.gmra.mxu0 %v1826_v46  ;;  %855 = vmatmul.mubr.bf16.gmra.mxu1 %v1838_v47 }
  0xed   : > { %v1639_v48 = vpop.f32.mrf.mxu0  ;;  %v1687_v49 = vpop.f32.mrf.mxu1 }
  0xef   : > { %v1640_v50 = vpop.f32.mrf.mxu0  ;;  %v1688_v51 = vpop.f32.mrf.mxu1 }
  0xf0   : > { %v1998_v55 = vadd.f32 %v1688_v51, %v1687_v49  ;;  %v2000_v56 = vadd.f32 %v1640_v50, %v1639_v48 }
  0xf1   : > { %v1642_v52 = vpop.f32.mrf.mxu0  ;;  %v1690_v53 = vpop.f32.mrf.mxu1 }
  0xf2   : > { %v1160_v45 = vmul.f32 %v2000_v56, %v2000_v56 }
  0xf3   : > { %v1643_v54 = vpop.f32.mrf.mxu0  ;;  %v1691_v58 = vpop.f32.mrf.mxu1 }
  0xf4   : > { %v2002_v57 = vadd.f32 %v1643_v54, %v1642_v52  ;;  %v2009_v60 = vadd.f32 %v1691_v58, %v1690_v53 }
  0xf5   : > { %v1645_v59 = vpop.f32.mrf.mxu0  ;;  %v1693_v62 = vpop.f32.mrf.mxu1 }
  0xf6   : > { %v1531_v61 = vpack.c.bf16 %v2002_v57, %v2000_v56  ;;  %v1571_v0 = vpack.c.bf16 %v2009_v60, %v1998_v55  ;;  %v1161_v41 = vmul.f32 %v2002_v57, %v2002_v57  ;;  %v1122_v48 = vadd.f32 %v2002_v57, %v2000_v56 }
  0xf7   : > { %v1646_v63 = vpop.f32.mrf.mxu0  ;;  %v1694_v1 = vpop.f32.mrf.mxu1 }
  0xf8   : > { %1532 = vst [vmem:[%s2007_s12] sm:$0xff] %v1531_v61   ;;  %1615 = vst [vmem:[%s2007_s12 + $0x40] sm:$0xff] %v1571_v0   ;;  %v2017_v5 = vadd.f32 %v1694_v1, %v1693_v62  ;;  %v1647_v6 = vadd.f32 %v1646_v63, %v1645_v59  ;;  %v1192_v50 = vadd.f32 %v1161_v41, %v1160_v45 }
  0xf9   : > { %v1648_v2 = vpop.f32.mrf.mxu0  ;;  %v1696_v3 = vpop.f32.mrf.mxu1 }
  0xfa   : > { %v1162_v46 = vmul.f32 %v1647_v6, %v1647_v6  ;;  %v1123_v54 = vadd.f32 %v1647_v6, %v1122_v48 }
  0xfb   : > { %v1649_v4 = vpop.f32.mrf.mxu0  ;;  %v1697_v8 = vpop.f32.mrf.mxu1 }
  0xfc   : > { %v1650_v7 = vadd.f32 %v1649_v4, %v1648_v2  ;;  %v2019_v10 = vadd.f32 %v1697_v8, %v1696_v3  ;;  %v1193_v62 = vadd.f32 %v1192_v50, %v1162_v46 }
  0xfd   : > { %v1651_v9 = vpop.f32.mrf.mxu0  ;;  %v1699_v12 = vpop.f32.mrf.mxu1 }
  0xfe   : > { %v1536_v11 = vpack.c.bf16 %v1650_v7, %v1647_v6  ;;  %v1576_v14 = vpack.c.bf16 %v2019_v10, %v2017_v5  ;;  %v1163_v51 = vmul.f32 %v1650_v7, %v1650_v7  ;;  %v1124_v2 = vadd.f32 %v1650_v7, %v1123_v54 }
  0xff   : > { %v1652_v13 = vpop.f32.mrf.mxu0  ;;  %v1700_v15 = vpop.f32.mrf.mxu1 }
 0x100   : > { %1608 = vst [vmem:[%s2007_s12 + $0x8] sm:$0xff] %v1536_v11   ;;  %1616 = vst [vmem:[%s2007_s12 + $0x48] sm:$0xff] %v1576_v14   ;;  %v2025_v19 = vadd.f32 %v1700_v15, %v1699_v12  ;;  %v1653_v20 = vadd.f32 %v1652_v13, %v1651_v9  ;;  %v1194_v57 = vadd.f32 %v1193_v62, %v1163_v51 }
 0x101   : > { %v1654_v16 = vpop.f32.mrf.mxu0  ;;  %v1702_v17 = vpop.f32.mrf.mxu1 }
 0x102   : > { %v1164_v63 = vmul.f32 %v1653_v20, %v1653_v20  ;;  %v1125_v6 = vadd.f32 %v1653_v20, %v1124_v2 }
 0x103   : > { %v1655_v18 = vpop.f32.mrf.mxu0  ;;  %v1703_v22 = vpop.f32.mrf.mxu1 }
 0x104   : > { %v1656_v21 = vadd.f32 %v1655_v18, %v1654_v16  ;;  %v2027_v24 = vadd.f32 %v1703_v22, %v1702_v17  ;;  %v1195_v12 = vadd.f32 %v1194_v57, %v1164_v63 }
 0x105   : > { %v1657_v23 = vpop.f32.mrf.mxu0  ;;  %v1705_v26 = vpop.f32.mrf.mxu1 }
 0x106   : > { %v1541_v25 = vpack.c.bf16 %v1656_v21, %v1653_v20  ;;  %v1581_v28 = vpack.c.bf16 %v2027_v24, %v2025_v19  ;;  %v1165_v4 = vmul.f32 %v1656_v21, %v1656_v21  ;;  %v1126_v14 = vadd.f32 %v1656_v21, %v1125_v6 }
 0x107   : > { %v1658_v27 = vpop.f32.mrf.mxu0  ;;  %v1706_v29 = vpop.f32.mrf.mxu1 }
 0x108   : > { %1609 = vst [vmem:[%s2007_s12 + $0x10] sm:$0xff] %v1541_v25   ;;  %1617 = vst [vmem:[%s2007_s12 + $0x50] sm:$0xff] %v1581_v28   ;;  %v2033_v33 = vadd.f32 %v1706_v29, %v1705_v26  ;;  %v1659_v34 = vadd.f32 %v1658_v27, %v1657_v23  ;;  %v1196_v17 = vadd.f32 %v1195_v12, %v1165_v4 }
 0x109   : > { %v1660_v30 = vpop.f32.mrf.mxu0  ;;  %v1708_v31 = vpop.f32.mrf.mxu1 }
 0x10a   : > { %v1166_v15 = vmul.f32 %v1659_v34, %v1659_v34  ;;  %v1127_v22 = vadd.f32 %v1659_v34, %v1126_v14 }
 0x10b   : > { %v1661_v32 = vpop.f32.mrf.mxu0  ;;  %v1709_v36 = vpop.f32.mrf.mxu1 }
 0x10c   : > { %v1662_v35 = vadd.f32 %v1661_v32, %v1660_v30  ;;  %v2035_v38 = vadd.f32 %v1709_v36, %v1708_v31  ;;  %v1197_v29 = vadd.f32 %v1196_v17, %v1166_v15 }
 0x10d   : > { %v1663_v37 = vpop.f32.mrf.mxu0  ;;  %v1711_v40 = vpop.f32.mrf.mxu1 }
 0x10e   : > { %v1546_v39 = vpack.c.bf16 %v1662_v35, %v1659_v34  ;;  %v1586_v43 = vpack.c.bf16 %v2035_v38, %v2033_v33  ;;  %v1167_v23 = vmul.f32 %v1662_v35, %v1662_v35  ;;  %v1128_v30 = vadd.f32 %v1662_v35, %v1127_v22 }
 0x10f   : > { %v1664_v42 = vpop.f32.mrf.mxu0  ;;  %v1712_v44 = vpop.f32.mrf.mxu1 }
 0x110   : > { %1610 = vst [vmem:[%s2007_s12 + $0x18] sm:$0xff] %v1546_v39   ;;  %1618 = vst [vmem:[%s2007_s12 + $0x58] sm:$0xff] %v1586_v43   ;;  %v2047_v53 = vadd.f32 %v1712_v44, %v1711_v40  ;;  %v1665_v58 = vadd.f32 %v1664_v42, %v1663_v37  ;;  %v1198_v39 = vadd.f32 %v1197_v29, %v1167_v23 }
 0x111   : > { %v1666_v47 = vpop.f32.mrf.mxu0  ;;  %v1714_v49 = vpop.f32.mrf.mxu1 }
 0x112   : > { %v1168_v31 = vmul.f32 %v1665_v58, %v1665_v58  ;;  %v1129_v34 = vadd.f32 %v1665_v58, %v1128_v30 }
 0x113   : > { %v1667_v52 = vpop.f32.mrf.mxu0  ;;  %v1715_v61 = vpop.f32.mrf.mxu1 }
 0x114   : > { %v1668_v59 = vadd.f32 %v1667_v52, %v1666_v47  ;;  %v2049_v1 = vadd.f32 %v1715_v61, %v1714_v49  ;;  %v1199_v43 = vadd.f32 %v1198_v39, %v1168_v31 }
 0x115   : > { %v1669_v0 = vpop.f32.mrf.mxu0  ;;  %v1717_v56 = vpop.f32.mrf.mxu1 }
 0x116   : > { %v1551_v3 = vpack.c.bf16 %v1668_v59, %v1665_v58  ;;  %v1591_v9 = vpack.c.bf16 %v2049_v1, %v2047_v53  ;;  %v1169_v40 = vmul.f32 %v1668_v59, %v1668_v59  ;;  %v1130_v44 = vadd.f32 %v1668_v59, %v1129_v34 }
 0x117   : > { %v1670_v8 = vpop.f32.mrf.mxu0  ;;  %v1718_v11 = vpop.f32.mrf.mxu1 }
 0x118   : > { %1611 = vst [vmem:[%s2007_s12 + $0x20] sm:$0xff] %v1551_v3   ;;  %1619 = vst [vmem:[%s2007_s12 + $0x60] sm:$0xff] %v1591_v9   ;;  %v2055_v7 = vadd.f32 %v1718_v11, %v1717_v56  ;;  %v1671_v25 = vadd.f32 %v1670_v8, %v1669_v0  ;;  %v1200_v49 = vadd.f32 %v1199_v43, %v1169_v40 }
 0x119   : > { %v1672_v13 = vpop.f32.mrf.mxu0  ;;  %v1720_v16 = vpop.f32.mrf.mxu1  ;;  %v1178_v40 = vmul.f32 %v2017_v5, %v2017_v5  ;;  %v1179_v43 = vmul.f32 %v2019_v10, %v2019_v10 }
 0x11a   : > { %v1170_v45 = vmul.f32 %v1671_v25, %v1671_v25  ;;  %v1131_v50 = vadd.f32 %v1671_v25, %v1130_v44 }
 0x11b   : > { %v1673_v18 = vpop.f32.mrf.mxu0  ;;  %v1721_v27 = vpop.f32.mrf.mxu1 }
 0x11c   : > { %v1674_v26 = vadd.f32 %v1673_v18, %v1672_v13  ;;  %v2057_v28 = vadd.f32 %v1721_v27, %v1720_v16  ;;  %v1201_v62 = vadd.f32 %v1200_v49, %v1170_v45  ;;  %v1180_v45 = vmul.f32 %v2025_v19, %v2025_v19 }
 0x11d   : > { %v1675_v20 = vpop.f32.mrf.mxu0  ;;  %v1723_v32 = vpop.f32.mrf.mxu1 }
 0x11e   : > { %v1556_v21 = vpack.c.bf16 %v1674_v26, %v1671_v25  ;;  %v1596_v37 = vpack.c.bf16 %v2057_v28, %v2055_v7  ;;  %v1171_v51 = vmul.f32 %v1674_v26, %v1674_v26  ;;  %v1132_v63 = vadd.f32 %v1674_v26, %v1131_v50 }
 0x11f   : > { %v1676_v36 = vpop.f32.mrf.mxu0  ;;  %v1724_v41 = vpop.f32.mrf.mxu1 }
 0x120   : > { %1612 = vst [vmem:[%s2007_s12 + $0x28] sm:$0xff] %v1556_v21   ;;  %1620 = vst [vmem:[%s2007_s12 + $0x68] sm:$0xff] %v1596_v37   ;;  %v1677_v46 = vadd.f32 %v1676_v36, %v1675_v20  ;;  %v2063_v48 = vadd.f32 %v1724_v41, %v1723_v32  ;;  %v1202_v57 = vadd.f32 %v1201_v62, %v1171_v51 }
 0x121   : > { %v1678_v42 = vpop.f32.mrf.mxu0  ;;  %v1726_v47 = vpop.f32.mrf.mxu1  ;;  %v1176_v21 = vmul.f32 %v1998_v55, %v1998_v55  ;;  %v1177_v37 = vmul.f32 %v2009_v60, %v2009_v60 }
 0x122   : > { %v1172_v0 = vmul.f32 %v1677_v46, %v1677_v46  ;;  %v1133_v4 = vadd.f32 %v1677_v46, %v1132_v63  ;;  %v1185_v63 = vmul.f32 %v2049_v1, %v2049_v1 }
 0x123   : > { %v1679_v35 = vpop.f32.mrf.mxu0  ;;  %v1727_v54 = vpop.f32.mrf.mxu1 }
 0x124   : > { %v1680_v52 = vadd.f32 %v1679_v35, %v1678_v42  ;;  %v2065_v61 = vadd.f32 %v1727_v54, %v1726_v47  ;;  %v1203_v12 = vadd.f32 %v1202_v57, %v1172_v0 }
 0x125   : > { %v1681_v58 = vpop.f32.mrf.mxu0  ;;  %v1729_v2 = vpop.f32.mrf.mxu1 }
 0x126   : > { %v1561_v59 = vpack.c.bf16 %v1680_v52, %v1677_v46  ;;  %v1601_v56 = vpack.c.bf16 %v2065_v61, %v2063_v48  ;;  %v1173_v8 = vmul.f32 %v1680_v52, %v1680_v52  ;;  %v1134_v13 = vadd.f32 %v1680_v52, %v1133_v4 }
 0x127   : > { %v1682_v3 = vpop.f32.mrf.mxu0  ;;  %v1730_v6 = vpop.f32.mrf.mxu1 }
 0x128   : > { %1613 = vst [vmem:[%s2007_s12 + $0x30] sm:$0xff] %v1561_v59   ;;  %v1683_v9 = vadd.f32 %v1682_v3, %v1681_v58  ;;  %1621 = vst [vmem:[%s2007_s12 + $0x70] sm:$0xff] %v1601_v56   ;;  %v1731_v17 = vadd.f32 %v1730_v6, %v1729_v2  ;;  %v1204_v18 = vadd.f32 %v1203_v12, %v1173_v8 }
 0x129   : > { %v1684_v11 = vpop.f32.mrf.mxu0  ;;  %v1732_v15 = vpop.f32.mrf.mxu1  ;;  %v1186_v2 = vmul.f32 %v2055_v7, %v2055_v7 }
 0x12a   : > { %v1174_v14 = vmul.f32 %v1683_v9, %v1683_v9  ;;  %v1135_v22 = vadd.f32 %v1683_v9, %v1134_v13 }
 0x12b   : > { %v1685_v16 = vpop.f32.mrf.mxu0  ;;  %v1733_v25 = vpop.f32.mrf.mxu1 }
 0x12c   : > { %v1686_v23 = vadd.f32 %v1685_v16, %v1684_v11  ;;  %v1734_v26 = vadd.f32 %v1733_v25, %v1732_v15  ;;  %v1205_v27 = vadd.f32 %v1204_v18, %v1174_v14  ;;  %v1190_v11 = vmul.f32 %v1731_v17, %v1731_v17 }
 0x12e   : > { %v1566_v20 = vpack.c.bf16 %v1686_v23, %v1683_v9  ;;  %v1136_v29 = vadd.f32 %v1686_v23, %v1135_v22  ;;  %v1175_v30 = vmul.f32 %v1686_v23, %v1686_v23  ;;  %v1606_v31 = vpack.c.bf16 %v1734_v26, %v1731_v17 }
 0x12f   : > { %v1191_v14 = vmul.f32 %v1734_v26, %v1734_v26 }
 0x130   : > { %1614 = vst [vmem:[%s2007_s12 + $0x38] sm:$0xff] %v1566_v20   ;;  %v1137_v32 = vadd.f32 %v1998_v55, %v1136_v29  ;;  %v1206_v36 = vadd.f32 %v1205_v27, %v1175_v30  ;;  %1622 = vst [vmem:[%s2007_s12 + $0x78] sm:$0xff] %v1606_v31  }
 0x132   : > { %v1138_v39 = vadd.f32 %v2009_v60, %v1137_v32  ;;  %v1207_v34 = vadd.f32 %v1206_v36, %v1176_v21  ;;  %v1181_v60 = vmul.f32 %v2027_v24, %v2027_v24 }
 0x134   : > { %v1139_v41 = vadd.f32 %v2017_v5, %v1138_v39  ;;  %v1208_v42 = vadd.f32 %v1207_v34, %v1177_v37  ;;  %v1182_v5 = vmul.f32 %v2033_v33, %v2033_v33 }
 0x136   : > { %v1140_v44 = vadd.f32 %v2019_v10, %v1139_v41  ;;  %v1209_v55 = vadd.f32 %v1208_v42, %v1178_v40  ;;  %v1183_v10 = vmul.f32 %v2035_v38, %v2035_v38 }
 0x138   : > { %v1210_v46 = vadd.f32 %v1209_v55, %v1179_v43  ;;  %v1141_v47 = vadd.f32 %v2025_v19, %v1140_v44  ;;  %v1184_v19 = vmul.f32 %v2047_v53, %v2047_v53 }
 0x13a   : > { %v1142_v35 = vadd.f32 %v2027_v24, %v1141_v47  ;;  %v1211_v49 = vadd.f32 %v1210_v46, %v1180_v45 }
 0x13c   : > { %v1143_v50 = vadd.f32 %v2033_v33, %v1142_v35  ;;  %v1212_v51 = vadd.f32 %v1211_v49, %v1181_v60 }
 0x13e   : > { %v1144_v52 = vadd.f32 %v2035_v38, %v1143_v50  ;;  %v1213_v54 = vadd.f32 %v1212_v51, %v1182_v5 }
 0x140   : > { %v1145_v58 = vadd.f32 %v2047_v53, %v1144_v52  ;;  %v1214_v62 = vadd.f32 %v1213_v54, %v1183_v10  ;;  %v1187_v53 = vmul.f32 %v2057_v28, %v2057_v28 }
 0x142   : > { %v1146_v24 = vadd.f32 %v2049_v1, %v1145_v58  ;;  %v1215_v0 = vadd.f32 %v1214_v62, %v1184_v19  ;;  %v1188_v1 = vmul.f32 %v2063_v48, %v2063_v48 }
 0x144   : > { %v1216_v33 = vadd.f32 %v1215_v0, %v1185_v63  ;;  %v1147_v59 = vadd.f32 %v2055_v7, %v1146_v24  ;;  %v1189_v7 = vmul.f32 %v2065_v61, %v2065_v61 }
 0x146   : > { %v1217_v38 = vadd.f32 %v1216_v33, %v1186_v2  ;;  %v1148_v3 = vadd.f32 %v2057_v28, %v1147_v59 }
 0x148   : > { %v1218_v56 = vadd.f32 %v1217_v38, %v1187_v53  ;;  %v1149_v57 = vadd.f32 %v2063_v48, %v1148_v3 }
 0x14a   : > { %v1219_v4 = vadd.f32 %v1218_v56, %v1188_v1  ;;  %v1150_v8 = vadd.f32 %v2065_v61, %v1149_v57 }
 0x14c   : > { %v1220_v9 = vadd.f32 %v1219_v4, %v1189_v7  ;;  %v1151_v6 = vadd.f32 %v1731_v17, %v1150_v8 }
 0x14e   : > { %v1221_v12 = vadd.f32 %v1220_v9, %v1190_v11  ;;  %v1152_v13 = vadd.f32 %v1734_v26, %v1151_v6 }
 0x150   : > { %v1153_v28 = vrot.slane %v1152_v13, 4  ;;  %v1222_v15 = vadd.f32 %v1221_v12, %v1191_v14 }
 0x152   : > { %v1154_v16 = vadd.f32 %v1153_v28, %v1152_v13  ;;  %v1223_v18 = vrot.slane %v1222_v15, 4 }
 0x154   : > { %v1155_v22 = vrot.slane %v1154_v16, 2  ;;  %v1224_v48 = vadd.f32 %v1223_v18, %v1222_v15 }
 0x156   : > { %v1156_v23 = vadd.f32 %v1155_v22, %v1154_v16  ;;  %v1225_v25 = vrot.slane %v1224_v48, 2 }
 0x158   : > { %v1157_v27 = vrot.slane %v1156_v23, 1  ;;  %v1226_v20 = vadd.f32 %v1225_v25, %v1224_v48 }
 0x15a   : > { %v1158_v61 = vadd.f32 %v1157_v27, %v1156_v23  ;;  %v1227_v17 = vrot.slane %v1226_v20, 1 }
 0x15c   : > { %1159 = vst [vmem:[%s306_s14] sm:$0x1] %v1158_v61  ;;  %v1228_v26 = vadd.f32 %v1227_v17, %v1226_v20 }
 0x15e   : > { %1229 = vst [vmem:[%s312_s22] sm:$0x1] %v1228_v26 }
 0x15f PF: > { %s15_s17 = sadd.s32 1, %s1861_s17   ;;  %s2137_s15 = smov %s1857_s16 }
 0x160   : > { %p12_p6 = scmp.ge.s32.totalorder %s15_s17, 6   ;;  %s2138_s16 = smov %s2140_s18 }
 0x162   :  { %14 = sbr.rel (!%p12_p6) target bundleno = 2 (0x2), region = 93 }

// kernel: _lambda_.29
= control target key start
LH: loop header
LB: loop body
LE: loop exit
PB: predicated region body
PF: predicated region fallthrough
CT: control target
= control target key end

     0   :  { %s1411_s12 = smov 0   ;;  %s1741_s0 = inlined_call_operand.vmem [shape: bf16[1024,128], index: 0, kind: input, shape index: {}, may-alias: {0,3}]   ;;  %s1742_s1 = inlined_call_operand.vmem [shape: f32[1,128], index: 1, kind: input, shape index: {}]   ;;  %s1743_s2 = inlined_call_operand.vmem [shape: f32[1,128], index: 2, kind: input, shape index: {}]   ;;  %s1744_s3 = inlined_call_operand.vmem [shape: bf16[1024,128], index: 3, kind: output, shape index: {}, may-alias: {0,3}]  }
   0x1 LB: > { %s884_s13 = sadd.s32 4294967295, %s1389_s12   ;;  %p888_p0 = scmp.ge.s32.totalorder %s1389_s12, 1  ;;  %s1389_s12 = sphi %s1411_s12, %s13_s12  }
   0x2   : > { %p138_p1 = scmp.lt.s32.totalorder %s1389_s12, 3 }
   0x4   : > { %p139_p2 = pnand %p888_p0, %p138_p1 }
   0x5   : > { %s889_s14 = sshll.u32 (!%p139_p2), %s884_s13, 6 }
   0x6   : > { %142 = sbr.rel (%p139_p2) target bundleno = 93 (0x5d), region = 32  ;;  %p163_p3 = scmp.lt.s32.totalorder (!%p139_p2), %s889_s14, 127 }
   0xb   : > { %s1746_s14 = smov (!%p163_p3, %s889_s14), 127  ;;  %v1432_v0 = vld [vmem:[%s1742_s1] ss:$0 sm:$0xff] }
   0xc   : > { %s890_s15 = sshll.u32 %s1746_s14, 2  ;;  %v1441_v9 = vld [vmem:[%s1743_s2] ss:$0 sm:$0xff] }
   0xd   : > { %s1427_s18 = scalar_lea.vmem %s1741_s0, %s890_s15  ;;  %s1470_s25 = scalar_lea.vmem %s1744_s3, %s890_s15 }
   0xe   : > { %v1026_v1 = vld [vmem:[%s1427_s18] sm:$0xff]   ;;  %v1313_v2 = vld [vmem:[%s1427_s18 + $0x8] sm:$0xff]   ;;  %v1314_v3 = vld [vmem:[%s1427_s18 + $0x10] sm:$0xff]  }
   0xf   : > { %v1027_v4 = vunpack.c.l.bf16 %v1026_v1  ;;  %v1028_v5 = vunpack.c.h.bf16 %v1026_v1  ;;  %v1315_v6 = vld [vmem:[%s1427_s18 + $0x18] sm:$0xff]   ;;  %v1031_v7 = vunpack.c.l.bf16 %v1313_v2  ;;  %v1032_v8 = vunpack.c.h.bf16 %v1313_v2  ;;  %v1316_v18 = vld [vmem:[%s1427_s18 + $0x20] sm:$0xff]   ;;  %v1317_v31 = vld [vmem:[%s1427_s18 + $0x28] sm:$0xff]  }
  0x10   : > { %v1035_v10 = vunpack.c.l.bf16 %v1314_v3  ;;  %v1036_v11 = vunpack.c.h.bf16 %v1314_v3  ;;  %v1039_v12 = vunpack.c.l.bf16 %v1315_v6  ;;  %v1040_v13 = vunpack.c.h.bf16 %v1315_v6  ;;  %v1318_v32 = vld [vmem:[%s1427_s18 + $0x30] sm:$0xff]   ;;  %v1463_v33 = vld [vmem:[%s1427_s18 + $0x38] sm:$0xff]   ;;  %v1473_v38 = vld [vmem:[%s1427_s18 + $0x40] sm:$0xff]  }
  0x11   : > { %v309_v14 = vmul.f32 %v1027_v4, %v1432_v0  ;;  %v310_v15 = vmul.f32 %v1028_v5, %v1432_v0  ;;  %v311_v16 = vmul.f32 %v1031_v7, %v1432_v0  ;;  %v312_v17 = vmul.f32 %v1032_v8, %v1432_v0  ;;  %v1476_v39 = vld [vmem:[%s1427_s18 + $0x48] sm:$0xff]   ;;  %v1479_v40 = vld [vmem:[%s1427_s18 + $0x50] sm:$0xff]   ;;  %v1482_v41 = vld [vmem:[%s1427_s18 + $0x58] sm:$0xff]  }
  0x12   : > { %v313_v19 = vmul.f32 %v1035_v10, %v1432_v0  ;;  %v314_v20 = vmul.f32 %v1036_v11, %v1432_v0  ;;  %v315_v21 = vmul.f32 %v1039_v12, %v1432_v0  ;;  %v316_v22 = vmul.f32 %v1040_v13, %v1432_v0  ;;  %v1485_v42 = vld [vmem:[%s1427_s18 + $0x60] sm:$0xff]   ;;  %v1488_v43 = vld [vmem:[%s1427_s18 + $0x68] sm:$0xff]   ;;  %v1491_v44 = vld [vmem:[%s1427_s18 + $0x70] sm:$0xff]  }
  0x13   : > { %v380_v23 = vadd.f32 %v1441_v9, %v309_v14  ;;  %v381_v24 = vadd.f32 %v1441_v9, %v310_v15  ;;  %v382_v25 = vadd.f32 %v1441_v9, %v311_v16  ;;  %v383_v26 = vadd.f32 %v1441_v9, %v312_v17  ;;  %v1494_v45 = vld [vmem:[%s1427_s18 + $0x78] sm:$0xff]   ;;  %v1497_v46 = vld [vmem:[%s1427_s18 + $0x80] sm:$0xff]   ;;  %v1500_v47 = vld [vmem:[%s1427_s18 + $0x88] sm:$0xff]  }
  0x14   : > { %v384_v27 = vadd.f32 %v1441_v9, %v313_v19  ;;  %v385_v28 = vadd.f32 %v1441_v9, %v314_v20  ;;  %v386_v29 = vadd.f32 %v1441_v9, %v315_v21  ;;  %v387_v30 = vadd.f32 %v1441_v9, %v316_v22  ;;  %v1503_v48 = vld [vmem:[%s1427_s18 + $0x90] sm:$0xff]   ;;  %v1506_v49 = vld [vmem:[%s1427_s18 + $0x98] sm:$0xff]   ;;  %v1509_v50 = vld [vmem:[%s1427_s18 + $0xa0] sm:$0xff]  }
  0x15   : > { %v444_v34 = vmax.f32 %v380_v23, 0.0  ;;  %v445_v35 = vmax.f32 %v381_v24, 0.0  ;;  %v446_v36 = vmax.f32 %v382_v25, 0.0  ;;  %v1043_v37 = vunpack.c.l.bf16 %v1316_v18  ;;  %v1512_v51 = vld [vmem:[%s1427_s18 + $0xa8] sm:$0xff]   ;;  %v1515_v52 = vld [vmem:[%s1427_s18 + $0xb0] sm:$0xff]   ;;  %v1518_v53 = vld [vmem:[%s1427_s18 + $0xb8] sm:$0xff]  }
  0x16   : > { %v1521_v54 = vld [vmem:[%s1427_s18 + $0xc0] sm:$0xff]   ;;  %v1524_v55 = vld [vmem:[%s1427_s18 + $0xc8] sm:$0xff]   ;;  %v447_v56 = vmax.f32 %v383_v26, 0.0  ;;  %v448_v57 = vmax.f32 %v384_v27, 0.0  ;;  %v449_v58 = vmax.f32 %v385_v28, 0.0  ;;  %v1044_v59 = vunpack.c.h.bf16 %v1316_v18  ;;  %v1527_v60 = vld [vmem:[%s1427_s18 + $0xd0] sm:$0xff]  }
  0x17   : > { %v1530_v61 = vld [vmem:[%s1427_s18 + $0xd8] sm:$0xff]   ;;  %v1533_v62 = vld [vmem:[%s1427_s18 + $0xe0] sm:$0xff]   ;;  %v1156_v63 = vpack.c.bf16 %v445_v35, %v444_v34  ;;  %v450_v1 = vmax.f32 %v386_v29, 0.0  ;;  %v451_v2 = vmax.f32 %v387_v30, 0.0  ;;  %v317_v3 = vmul.f32 %v1043_v37, %v1432_v0  ;;  %v1537_v4 = vld [vmem:[%s1427_s18 + $0xe8] sm:$0xff]  }
  0x18   : > { %v1540_v5 = vld [vmem:[%s1427_s18 + $0xf0] sm:$0xff]   ;;  %v1543_v6 = vld [vmem:[%s1427_s18 + $0xf8] sm:$0xff]   ;;  %v1161_v7 = vpack.c.bf16 %v447_v56, %v446_v36  ;;  %v1166_v8 = vpack.c.bf16 %v449_v58, %v448_v57  ;;  %v318_v10 = vmul.f32 %v1044_v59, %v1432_v0  ;;  %v1047_v11 = vunpack.c.l.bf16 %v1317_v31 }
  0x19   : > { %1157 = vst [vmem:[%s1470_s25] sm:$0xff] %v1156_v63   ;;  %v1171_v12 = vpack.c.bf16 %v451_v2, %v450_v1  ;;  %v388_v13 = vadd.f32 %v1441_v9, %v317_v3  ;;  %v1048_v14 = vunpack.c.h.bf16 %v1317_v31  ;;  %v1051_v15 = vunpack.c.l.bf16 %v1318_v32 }
  0x1a   : > { %1344 = vst [vmem:[%s1470_s25 + $0x8] sm:$0xff] %v1161_v7   ;;  %1345 = vst [vmem:[%s1470_s25 + $0x10] sm:$0xff] %v1166_v8   ;;  %v389_v16 = vadd.f32 %v1441_v9, %v318_v10  ;;  %v319_v17 = vmul.f32 %v1047_v11, %v1432_v0  ;;  %v1052_v18 = vunpack.c.h.bf16 %v1318_v32  ;;  %v1055_v19 = vunpack.c.l.bf16 %v1463_v33 }
  0x1b   : > { %1346 = vst [vmem:[%s1470_s25 + $0x18] sm:$0xff] %v1171_v12   ;;  %v452_v20 = vmax.f32 %v388_v13, 0.0  ;;  %v320_v21 = vmul.f32 %v1048_v14, %v1432_v0  ;;  %v321_v22 = vmul.f32 %v1051_v15, %v1432_v0  ;;  %v1056_v23 = vunpack.c.h.bf16 %v1463_v33 }
  0x1c   : > { %v453_v24 = vmax.f32 %v389_v16, 0.0  ;;  %v390_v25 = vadd.f32 %v1441_v9, %v319_v17  ;;  %v322_v26 = vmul.f32 %v1052_v18, %v1432_v0  ;;  %v323_v27 = vmul.f32 %v1055_v19, %v1432_v0 }
  0x1d   : > { %v391_v28 = vadd.f32 %v1441_v9, %v320_v21  ;;  %v392_v29 = vadd.f32 %v1441_v9, %v321_v22  ;;  %v324_v30 = vmul.f32 %v1056_v23, %v1432_v0  ;;  %v1059_v31 = vunpack.c.l.bf16 %v1473_v38 }
  0x1e   : > { %v1176_v32 = vpack.c.bf16 %v453_v24, %v452_v20  ;;  %v454_v34 = vmax.f32 %v390_v25, 0.0  ;;  %v393_v33 = vadd.f32 %v1441_v9, %v322_v26  ;;  %v394_v35 = vadd.f32 %v1441_v9, %v323_v27 }
  0x1f   : > { %v455_v36 = vmax.f32 %v391_v28, 0.0  ;;  %v456_v37 = vmax.f32 %v392_v29, 0.0  ;;  %v395_v56 = vadd.f32 %v1441_v9, %v324_v30  ;;  %v1060_v57 = vunpack.c.h.bf16 %v1473_v38 }
  0x20   : > { %1347 = vst [vmem:[%s1470_s25 + $0x20] sm:$0xff] %v1176_v32   ;;  %v457_v58 = vmax.f32 %v393_v33, 0.0  ;;  %v458_v59 = vmax.f32 %v394_v35, 0.0  ;;  %v325_v63 = vmul.f32 %v1059_v31, %v1432_v0  ;;  %v1063_v1 = vunpack.c.l.bf16 %v1476_v39 }
  0x21   : > { %v1181_v2 = vpack.c.bf16 %v455_v36, %v454_v34  ;;  %v459_v3 = vmax.f32 %v395_v56, 0.0  ;;  %v326_v7 = vmul.f32 %v1060_v57, %v1432_v0  ;;  %v1064_v8 = vunpack.c.h.bf16 %v1476_v39 }
  0x22   : > { %v1186_v10 = vpack.c.bf16 %v457_v58, %v456_v37  ;;  %v396_v11 = vadd.f32 %v1441_v9, %v325_v63  ;;  %v327_v38 = vmul.f32 %v1063_v1, %v1432_v0  ;;  %v1067_v12 = vunpack.c.l.bf16 %v1479_v40 }
  0x23   : > { %1348 = vst [vmem:[%s1470_s25 + $0x28] sm:$0xff] %v1181_v2   ;;  %v1191_v13 = vpack.c.bf16 %v459_v3, %v458_v59  ;;  %v397_v14 = vadd.f32 %v1441_v9, %v326_v7  ;;  %v328_v15 = vmul.f32 %v1064_v8, %v1432_v0  ;;  %v1068_v16 = vunpack.c.h.bf16 %v1479_v40 }
  0x24   : > { %1349 = vst [vmem:[%s1470_s25 + $0x30] sm:$0xff] %v1186_v10   ;;  %v460_v17 = vmax.f32 %v396_v11, 0.0  ;;  %v398_v18 = vadd.f32 %v1441_v9, %v327_v38  ;;  %v329_v39 = vmul.f32 %v1067_v12, %v1432_v0  ;;  %v1071_v19 = vunpack.c.l.bf16 %v1482_v41 }
  0x25   : > { %1350 = vst [vmem:[%s1470_s25 + $0x38] sm:$0xff] %v1191_v13   ;;  %v461_v20 = vmax.f32 %v397_v14, 0.0  ;;  %v399_v21 = vadd.f32 %v1441_v9, %v328_v15  ;;  %v330_v22 = vmul.f32 %v1068_v16, %v1432_v0  ;;  %v1072_v23 = vunpack.c.h.bf16 %v1482_v41 }
  0x26   : > { %v462_v24 = vmax.f32 %v398_v18, 0.0  ;;  %v400_v40 = vadd.f32 %v1441_v9, %v329_v39  ;;  %v331_v25 = vmul.f32 %v1071_v19, %v1432_v0  ;;  %v1075_v26 = vunpack.c.l.bf16 %v1485_v42 }
  0x27   : > { %v1196_v27 = vpack.c.bf16 %v461_v20, %v460_v17  ;;  %v463_v28 = vmax.f32 %v399_v21, 0.0  ;;  %v401_v29 = vadd.f32 %v1441_v9, %v330_v22  ;;  %v332_v30 = vmul.f32 %v1072_v23, %v1432_v0 }
  0x28   : > { %v464_v31 = vmax.f32 %v400_v40, 0.0  ;;  %v402_v32 = vadd.f32 %v1441_v9, %v331_v25  ;;  %v1076_v34 = vunpack.c.h.bf16 %v1485_v42  ;;  %v333_v41 = vmul.f32 %v1075_v26, %v1432_v0 }
  0x29   : > { %1351 = vst [vmem:[%s1470_s25 + $0x40] sm:$0xff] %v1196_v27   ;;  %v1201_v33 = vpack.c.bf16 %v463_v28, %v462_v24  ;;  %v465_v35 = vmax.f32 %v401_v29, 0.0  ;;  %v403_v36 = vadd.f32 %v1441_v9, %v332_v30  ;;  %v1079_v37 = vunpack.c.l.bf16 %v1488_v43 }
  0x2a   : > { %v466_v56 = vmax.f32 %v402_v32, 0.0  ;;  %v334_v57 = vmul.f32 %v1076_v34, %v1432_v0  ;;  %v404_v58 = vadd.f32 %v1441_v9, %v333_v41  ;;  %v1080_v59 = vunpack.c.h.bf16 %v1488_v43 }
  0x2b   : > { %1352 = vst [vmem:[%s1470_s25 + $0x48] sm:$0xff] %v1201_v33   ;;  %v1206_v63 = vpack.c.bf16 %v465_v35, %v464_v31  ;;  %v467_v42 = vmax.f32 %v403_v36, 0.0  ;;  %v335_v1 = vmul.f32 %v1079_v37, %v1432_v0  ;;  %v1083_v2 = vunpack.c.l.bf16 %v1491_v44 }
  0x2c   : > { %v405_v3 = vadd.f32 %v1441_v9, %v334_v57  ;;  %v468_v7 = vmax.f32 %v404_v58, 0.0  ;;  %v336_v8 = vmul.f32 %v1080_v59, %v1432_v0  ;;  %v1084_v10 = vunpack.c.h.bf16 %v1491_v44 }
  0x2d   : > { %1353 = vst [vmem:[%s1470_s25 + $0x50] sm:$0xff] %v1206_v63   ;;  %v1211_v11 = vpack.c.bf16 %v467_v42, %v466_v56  ;;  %v406_v38 = vadd.f32 %v1441_v9, %v335_v1  ;;  %v337_v43 = vmul.f32 %v1083_v2, %v1432_v0  ;;  %v1087_v12 = vunpack.c.l.bf16 %v1494_v45 }
  0x2e   : > { %v469_v13 = vmax.f32 %v405_v3, 0.0  ;;  %v407_v14 = vadd.f32 %v1441_v9, %v336_v8  ;;  %v338_v15 = vmul.f32 %v1084_v10, %v1432_v0  ;;  %v1088_v16 = vunpack.c.h.bf16 %v1494_v45 }
  0x2f   : > { %1354 = vst [vmem:[%s1470_s25 + $0x58] sm:$0xff] %v1211_v11   ;;  %v470_v17 = vmax.f32 %v406_v38, 0.0  ;;  %v408_v44 = vadd.f32 %v1441_v9, %v337_v43  ;;  %v339_v18 = vmul.f32 %v1087_v12, %v1432_v0  ;;  %v1091_v39 = vunpack.c.l.bf16 %v1497_v46 }
  0x30   : > { %v1216_v19 = vpack.c.bf16 %v469_v13, %v468_v7  ;;  %v471_v20 = vmax.f32 %v407_v14, 0.0  ;;  %v409_v21 = vadd.f32 %v1441_v9, %v338_v15  ;;  %v340_v22 = vmul.f32 %v1088_v16, %v1432_v0 }
  0x31   : > { %v472_v23 = vmax.f32 %v408_v44, 0.0  ;;  %v410_v24 = vadd.f32 %v1441_v9, %v339_v18  ;;  %v1092_v45 = vunpack.c.h.bf16 %v1497_v46  ;;  %v341_v40 = vmul.f32 %v1091_v39, %v1432_v0 }
  0x32   : > { %1355 = vst [vmem:[%s1470_s25 + $0x60] sm:$0xff] %v1216_v19   ;;  %v1221_v25 = vpack.c.bf16 %v471_v20, %v470_v17  ;;  %v473_v26 = vmax.f32 %v409_v21, 0.0  ;;  %v411_v27 = vadd.f32 %v1441_v9, %v340_v22  ;;  %v1095_v28 = vunpack.c.l.bf16 %v1500_v47 }
  0x33   : > { %v474_v29 = vmax.f32 %v410_v24, 0.0  ;;  %v342_v30 = vmul.f32 %v1092_v45, %v1432_v0  ;;  %v412_v31 = vadd.f32 %v1441_v9, %v341_v40  ;;  %v1096_v32 = vunpack.c.h.bf16 %v1500_v47 }
  0x34   : > { %1356 = vst [vmem:[%s1470_s25 + $0x68] sm:$0xff] %v1221_v25   ;;  %v1226_v34 = vpack.c.bf16 %v473_v26, %v472_v23  ;;  %v475_v46 = vmax.f32 %v411_v27, 0.0  ;;  %v343_v41 = vmul.f32 %v1095_v28, %v1432_v0  ;;  %v1099_v33 = vunpack.c.l.bf16 %v1503_v48 }
  0x35   : > { %v413_v35 = vadd.f32 %v1441_v9, %v342_v30  ;;  %v476_v36 = vmax.f32 %v412_v31, 0.0  ;;  %v344_v37 = vmul.f32 %v1096_v32, %v1432_v0  ;;  %v1100_v56 = vunpack.c.h.bf16 %v1503_v48 }
  0x36   : > { %1357 = vst [vmem:[%s1470_s25 + $0x70] sm:$0xff] %v1226_v34   ;;  %v1231_v57 = vpack.c.bf16 %v475_v46, %v474_v29  ;;  %v414_v58 = vadd.f32 %v1441_v9, %v343_v41  ;;  %v345_v47 = vmul.f32 %v1099_v33, %v1432_v0  ;;  %v1103_v59 = vunpack.c.l.bf16 %v1506_v49 }
  0x37   : > { %v477_v63 = vmax.f32 %v413_v35, 0.0  ;;  %v415_v42 = vadd.f32 %v1441_v9, %v344_v37  ;;  %v346_v1 = vmul.f32 %v1100_v56, %v1432_v0  ;;  %v1104_v2 = vunpack.c.h.bf16 %v1506_v49 }
  0x38   : > { %1358 = vst [vmem:[%s1470_s25 + $0x78] sm:$0xff] %v1231_v57   ;;  %v478_v3 = vmax.f32 %v414_v58, 0.0  ;;  %v416_v48 = vadd.f32 %v1441_v9, %v345_v47  ;;  %v347_v7 = vmul.f32 %v1103_v59, %v1432_v0  ;;  %v1107_v8 = vunpack.c.l.bf16 %v1509_v50 }
  0x39   : > { %v1236_v10 = vpack.c.bf16 %v477_v63, %v476_v36  ;;  %v479_v11 = vmax.f32 %v415_v42, 0.0  ;;  %v417_v38 = vadd.f32 %v1441_v9, %v346_v1  ;;  %v348_v43 = vmul.f32 %v1104_v2, %v1432_v0 }
  0x3a   : > { %v480_v12 = vmax.f32 %v416_v48, 0.0  ;;  %v418_v13 = vadd.f32 %v1441_v9, %v347_v7  ;;  %v1108_v49 = vunpack.c.h.bf16 %v1509_v50  ;;  %v349_v14 = vmul.f32 %v1107_v8, %v1432_v0 }
  0x3b   : > { %1359 = vst [vmem:[%s1470_s25 + $0x80] sm:$0xff] %v1236_v10   ;;  %v1241_v15 = vpack.c.bf16 %v479_v11, %v478_v3  ;;  %v481_v16 = vmax.f32 %v417_v38, 0.0  ;;  %v419_v17 = vadd.f32 %v1441_v9, %v348_v43  ;;  %v1111_v44 = vunpack.c.l.bf16 %v1512_v51 }
  0x3c   : > { %v482_v18 = vmax.f32 %v418_v13, 0.0  ;;  %v350_v39 = vmul.f32 %v1108_v49, %v1432_v0  ;;  %v420_v19 = vadd.f32 %v1441_v9, %v349_v14  ;;  %v1112_v20 = vunpack.c.h.bf16 %v1512_v51 }
  0x3d   : > { %1360 = vst [vmem:[%s1470_s25 + $0x88] sm:$0xff] %v1241_v15   ;;  %v1246_v21 = vpack.c.bf16 %v481_v16, %v480_v12  ;;  %v483_v50 = vmax.f32 %v419_v17, 0.0  ;;  %v351_v22 = vmul.f32 %v1111_v44, %v1432_v0  ;;  %v1115_v23 = vunpack.c.l.bf16 %v1515_v52 }
  0x3e   : > { %v421_v24 = vadd.f32 %v1441_v9, %v350_v39  ;;  %v484_v45 = vmax.f32 %v420_v19, 0.0  ;;  %v352_v40 = vmul.f32 %v1112_v20, %v1432_v0  ;;  %v1116_v25 = vunpack.c.h.bf16 %v1515_v52 }
  0x3f   : > { %1361 = vst [vmem:[%s1470_s25 + $0x90] sm:$0xff] %v1246_v21   ;;  %v1251_v26 = vpack.c.bf16 %v483_v50, %v482_v18  ;;  %v422_v27 = vadd.f32 %v1441_v9, %v351_v22  ;;  %v353_v51 = vmul.f32 %v1115_v23, %v1432_v0  ;;  %v1119_v28 = vunpack.c.l.bf16 %v1518_v53 }
  0x40   : > { %v485_v29 = vmax.f32 %v421_v24, 0.0  ;;  %v423_v30 = vadd.f32 %v1441_v9, %v352_v40  ;;  %v354_v31 = vmul.f32 %v1116_v25, %v1432_v0  ;;  %v1120_v32 = vunpack.c.h.bf16 %v1518_v53 }
  0x41   : > { %1362 = vst [vmem:[%s1470_s25 + $0x98] sm:$0xff] %v1251_v26   ;;  %v486_v34 = vmax.f32 %v422_v27, 0.0  ;;  %v424_v52 = vadd.f32 %v1441_v9, %v353_v51  ;;  %v355_v46 = vmul.f32 %v1119_v28, %v1432_v0  ;;  %v1123_v41 = vunpack.c.l.bf16 %v1521_v54 }
  0x42   : > { %v1256_v33 = vpack.c.bf16 %v485_v29, %v484_v45  ;;  %v487_v35 = vmax.f32 %v423_v30, 0.0  ;;  %v425_v36 = vadd.f32 %v1441_v9, %v354_v31  ;;  %v356_v37 = vmul.f32 %v1120_v32, %v1432_v0 }
  0x43   : > { %v488_v56 = vmax.f32 %v424_v52, 0.0  ;;  %v426_v57 = vadd.f32 %v1441_v9, %v355_v46  ;;  %v1124_v53 = vunpack.c.h.bf16 %v1521_v54  ;;  %v357_v58 = vmul.f32 %v1123_v41, %v1432_v0 }
  0x44   : > { %1363 = vst [vmem:[%s1470_s25 + $0xa0] sm:$0xff] %v1256_v33   ;;  %v1261_v47 = vpack.c.bf16 %v487_v35, %v486_v34  ;;  %v489_v59 = vmax.f32 %v425_v36, 0.0  ;;  %v427_v63 = vadd.f32 %v1441_v9, %v356_v37  ;;  %v1127_v42 = vunpack.c.l.bf16 %v1524_v55 }
  0x45   : > { %v490_v1 = vmax.f32 %v426_v57, 0.0  ;;  %v358_v2 = vmul.f32 %v1124_v53, %v1432_v0  ;;  %v428_v3 = vadd.f32 %v1441_v9, %v357_v58  ;;  %v1128_v48 = vunpack.c.h.bf16 %v1524_v55 }
  0x46   : > { %1364 = vst [vmem:[%s1470_s25 + $0xa8] sm:$0xff] %v1261_v47   ;;  %v1266_v7 = vpack.c.bf16 %v489_v59, %v488_v56  ;;  %v491_v54 = vmax.f32 %v427_v63, 0.0  ;;  %v359_v8 = vmul.f32 %v1127_v42, %v1432_v0  ;;  %v1131_v10 = vunpack.c.l.bf16 %v1527_v60 }
  0x47   : > { %v429_v11 = vadd.f32 %v1441_v9, %v358_v2  ;;  %v492_v38 = vmax.f32 %v428_v3, 0.0  ;;  %v360_v43 = vmul.f32 %v1128_v48, %v1432_v0  ;;  %v1132_v12 = vunpack.c.h.bf16 %v1527_v60 }
  0x48   : > { %1365 = vst [vmem:[%s1470_s25 + $0xb0] sm:$0xff] %v1266_v7   ;;  %v1271_v13 = vpack.c.bf16 %v491_v54, %v490_v1  ;;  %v430_v49 = vadd.f32 %v1441_v9, %v359_v8  ;;  %v361_v55 = vmul.f32 %v1131_v10, %v1432_v0  ;;  %v1135_v14 = vunpack.c.l.bf16 %v1530_v61 }
  0x49   : > { %v493_v15 = vmax.f32 %v429_v11, 0.0  ;;  %v431_v16 = vadd.f32 %v1441_v9, %v360_v43  ;;  %v362_v17 = vmul.f32 %v1132_v12, %v1432_v0  ;;  %v1136_v44 = vunpack.c.h.bf16 %v1530_v61 }
  0x4a   : > { %1366 = vst [vmem:[%s1470_s25 + $0xb8] sm:$0xff] %v1271_v13   ;;  %v494_v18 = vmax.f32 %v430_v49, 0.0  ;;  %v432_v60 = vadd.f32 %v1441_v9, %v361_v55  ;;  %v363_v39 = vmul.f32 %v1135_v14, %v1432_v0  ;;  %v1139_v19 = vunpack.c.l.bf16 %v1533_v62 }
  0x4b   : > { %v1276_v20 = vpack.c.bf16 %v493_v15, %v492_v38  ;;  %v495_v21 = vmax.f32 %v431_v16, 0.0  ;;  %v433_v50 = vadd.f32 %v1441_v9, %v362_v17  ;;  %v364_v22 = vmul.f32 %v1136_v44, %v1432_v0 }
  0x4c   : > { %v496_v23 = vmax.f32 %v432_v60, 0.0  ;;  %v434_v24 = vadd.f32 %v1441_v9, %v363_v39  ;;  %v1140_v61 = vunpack.c.h.bf16 %v1533_v62  ;;  %v365_v45 = vmul.f32 %v1139_v19, %v1432_v0 }
  0x4d   : > { %1367 = vst [vmem:[%s1470_s25 + $0xc0] sm:$0xff] %v1276_v20   ;;  %v1281_v40 = vpack.c.bf16 %v495_v21, %v494_v18  ;;  %v497_v25 = vmax.f32 %v433_v50, 0.0  ;;  %v435_v26 = vadd.f32 %v1441_v9, %v364_v22  ;;  %v1143_v27 = vunpack.c.l.bf16 %v1537_v4 }
  0x4e   : > { %v498_v51 = vmax.f32 %v434_v24, 0.0  ;;  %v366_v28 = vmul.f32 %v1140_v61, %v1432_v0  ;;  %v436_v29 = vadd.f32 %v1441_v9, %v365_v45  ;;  %v1144_v30 = vunpack.c.h.bf16 %v1537_v4 }
  0x4f   : > { %1368 = vst [vmem:[%s1470_s25 + $0xc8] sm:$0xff] %v1281_v40   ;;  %v1286_v31 = vpack.c.bf16 %v497_v25, %v496_v23  ;;  %v499_v62 = vmax.f32 %v435_v26, 0.0  ;;  %v367_v32 = vmul.f32 %v1143_v27, %v1432_v0  ;;  %v1147_v34 = vunpack.c.l.bf16 %v1540_v5 }
  0x50   : > { %v437_v52 = vadd.f32 %v1441_v9, %v366_v28  ;;  %v500_v46 = vmax.f32 %v436_v29, 0.0  ;;  %v368_v41 = vmul.f32 %v1144_v30, %v1432_v0  ;;  %v1148_v33 = vunpack.c.h.bf16 %v1540_v5 }
  0x51   : > { %1369 = vst [vmem:[%s1470_s25 + $0xd0] sm:$0xff] %v1286_v31   ;;  %v1291_v35 = vpack.c.bf16 %v499_v62, %v498_v51  ;;  %v438_v36 = vadd.f32 %v1441_v9, %v367_v32  ;;  %v369_v4 = vmul.f32 %v1147_v34, %v1432_v0  ;;  %v1151_v37 = vunpack.c.l.bf16 %v1543_v6 }
  0x52   : > { %v501_v56 = vmax.f32 %v437_v52, 0.0  ;;  %v439_v57 = vadd.f32 %v1441_v9, %v368_v41  ;;  %v370_v53 = vmul.f32 %v1148_v33, %v1432_v0  ;;  %v1152_v58 = vunpack.c.h.bf16 %v1543_v6 }
  0x53   : > { %1370 = vst [vmem:[%s1470_s25 + $0xd8] sm:$0xff] %v1291_v35   ;;  %v502_v47 = vmax.f32 %v438_v36, 0.0  ;;  %v440_v5 = vadd.f32 %v1441_v9, %v369_v4  ;;  %v371_v59 = vmul.f32 %v1151_v37, %v1432_v0 }
  0x54   : > { %v1296_v63 = vpack.c.bf16 %v501_v56, %v500_v46  ;;  %v503_v42 = vmax.f32 %v439_v57, 0.0  ;;  %v441_v1 = vadd.f32 %v1441_v9, %v370_v53  ;;  %v372_v2 = vmul.f32 %v1152_v58, %v1432_v0 }
  0x55   : > { %v504_v3 = vmax.f32 %v440_v5, 0.0  ;;  %v442_v48 = vadd.f32 %v1441_v9, %v371_v59 }
  0x56   : > { %1371 = vst [vmem:[%s1470_s25 + $0xe0] sm:$0xff] %v1296_v63   ;;  %v1301_v6 = vpack.c.bf16 %v503_v42, %v502_v47  ;;  %v505_v7 = vmax.f32 %v441_v1, 0.0  ;;  %v443_v54 = vadd.f32 %v1441_v9, %v372_v2 }
  0x57   : > { %v506_v8 = vmax.f32 %v442_v48, 0.0 }
  0x58   : > { %1372 = vst [vmem:[%s1470_s25 + $0xe8] sm:$0xff] %v1301_v6   ;;  %v1306_v10 = vpack.c.bf16 %v505_v7, %v504_v3  ;;  %v507_v11 = vmax.f32 %v443_v54, 0.0 }
  0x5a   : > { %1373 = vst [vmem:[%s1470_s25 + $0xf0] sm:$0xff] %v1306_v10   ;;  %v1311_v38 = vpack.c.bf16 %v507_v11, %v506_v8 }
  0x5c   : > { %1374 = vst [vmem:[%s1470_s25 + $0xf8] sm:$0xff] %v1311_v38  }
  0x5d PF: > { %s13_s12 = sadd.s32 1, %s1389_s12  }
  0x5e   : > { %p10_p4 = scmp.ge.s32.totalorder %s13_s12, 4  }
  0x60   :  { %12 = sbr.rel (!%p10_p4) target bundleno = 1 (0x1), region = 62 }

// kernel: _lambda_.30
= control target key start
LH: loop header
LB: loop body
LE: loop exit
PB: predicated region body
PF: predicated region fallthrough
CT: control target
= control target key end

     0   :  { %v967_v0 = vmov 0.0   ;;  %vm968_vm0 = vmmov 0   ;;  %s1210_s1 = inlined_call_operand.vmem [shape: bf16[128,128], index: 1, kind: input, shape index: {}]   ;;  %s1211_s0 = inlined_call_operand.vmem [shape: bf16[208,128], index: 0, kind: input, shape index: {}]   ;;  %s1212_s2 = inlined_call_operand.vmem [shape: bf16[208,128], index: 2, kind: output, shape index: {0}]   ;;  %s1213_s3 = inlined_call_operand.vmem [shape: f32[1,1,128], index: 3, kind: output, shape index: {1}]   ;;  %s1214_s4 = inlined_call_operand.vmem [shape: f32[1,1,128], index: 4, kind: output, shape index: {2}]  }
   0x1   :  { %860 = vmatprep.subr.bf16.mxu0 %v967_v0  ;;  %v946_v1 = vld [vmem:[%s1210_s1 + $0x38] sm:$0xff]   ;;  %928 = vmatprep.subr.bf16.mxu1 %v967_v0  ;;  %v947_v2 = vld [vmem:[%s1210_s1 + $0x30] sm:$0xff]   ;;  %v948_v3 = vld [vmem:[%s1210_s1 + $0x28] sm:$0xff]  }
   0x2   :  { %876 = vmatprep.mubr.msk.bf16.mxu0 %vm968_vm0, %v967_v0  ;;  %904 = vmatprep.mubr.msk.bf16.mxu1 %vm968_vm0, %v967_v0  ;;  %v949_v4 = vld [vmem:[%s1210_s1 + $0x20] sm:$0xff]   ;;  %v950_v5 = vld [vmem:[%s1210_s1 + $0x18] sm:$0xff]   ;;  %v951_v6 = vld [vmem:[%s1210_s1 + $0x10] sm:$0xff]  }
   0x3   :  { %861 = vmatpush3.bf16.msra.mxu0 %v946_v1  ;;  %936 = vmatpush3.bf16.msra.mxu1 %v946_v1  ;;  %v952_v7 = vld [vmem:[%s1210_s1 + $0x8] sm:$0xff]   ;;  %v953_v8 = vld [vmem:[%s1210_s1] sm:$0xff]   ;;  %v958_v10 = vld [vmem:[%s1211_s0 + $0x38] sm:$0xff]  }
   0x4   :  { %862 = vmatprep.subr.bf16.mxu0 %v967_v0  ;;  %929 = vmatprep.subr.bf16.mxu1 %v967_v0  ;;  %v954_v9 = vld [vmem:[%s1211_s0] sm:$0xff]   ;;  %v955_v11 = vld [vmem:[%s1211_s0 + $0x8] sm:$0xff]   ;;  %v956_v13 = vld [vmem:[%s1211_s0 + $0x10] sm:$0xff]  }
   0x5   :  { %v960_v12 = vld [vmem:[%s1211_s0 + $0x40] sm:$0xff]   ;;  %v962_v14 = vld [vmem:[%s1211_s0 + $0x48] sm:$0xff]   ;;  %v957_v15 = vld [vmem:[%s1211_s0 + $0x18] sm:$0xff]  }
   0x6   :  { %v964_v16 = vld [vmem:[%s1211_s0 + $0x50] sm:$0xff]   ;;  %v959_v17 = vld [vmem:[%s1211_s0 + $0x20] sm:$0xff]   ;;  %v965_v18 = vld [vmem:[%s1211_s0 + $0x58] sm:$0xff]  }
   0x7   :  { %863 = vmatpush3.bf16.msra.mxu0 %v947_v2  ;;  %937 = vmatpush3.bf16.msra.mxu1 %v947_v2  ;;  %v961_v19 = vld [vmem:[%s1211_s0 + $0x28] sm:$0xff]   ;;  %v966_v20 = vld [vmem:[%s1211_s0 + $0x60] sm:$0xff]   ;;  %v963_v21 = vld [vmem:[%s1211_s0 + $0x30] sm:$0xff]  }
   0x8   :  { %864 = vmatprep.subr.bf16.mxu0 %v967_v0  ;;  %930 = vmatprep.subr.bf16.mxu1 %v967_v0 }
   0xb   :  { %865 = vmatpush3.bf16.msra.mxu0 %v948_v3  ;;  %938 = vmatpush3.bf16.msra.mxu1 %v948_v3 }
   0xc   :  { %866 = vmatprep.subr.bf16.mxu0 %v967_v0  ;;  %931 = vmatprep.subr.bf16.mxu1 %v967_v0 }
   0xf   :  { %867 = vmatpush3.bf16.msra.mxu0 %v949_v4  ;;  %939 = vmatpush3.bf16.msra.mxu1 %v949_v4 }
  0x10   :  { %868 = vmatprep.subr.bf16.mxu0 %v967_v0  ;;  %932 = vmatprep.subr.bf16.mxu1 %v967_v0 }
  0x13   :  { %869 = vmatpush3.bf16.msra.mxu0 %v950_v5  ;;  %940 = vmatpush3.bf16.msra.mxu1 %v950_v5 }
  0x14   :  { %870 = vmatprep.subr.bf16.mxu0 %v967_v0  ;;  %933 = vmatprep.subr.bf16.mxu1 %v967_v0 }
  0x17   :  { %871 = vmatpush3.bf16.msra.mxu0 %v951_v6  ;;  %941 = vmatpush3.bf16.msra.mxu1 %v951_v6 }
  0x18   :  { %872 = vmatprep.subr.bf16.mxu0 %v967_v0  ;;  %934 = vmatprep.subr.bf16.mxu1 %v967_v0 }
  0x1b   :  { %873 = vmatpush3.bf16.msra.mxu0 %v952_v7  ;;  %942 = vmatpush3.bf16.msra.mxu1 %v952_v7 }
  0x1c   :  { %874 = vmatprep.subr.bf16.mxu0 %v967_v0  ;;  %935 = vmatprep.subr.bf16.mxu1 %v967_v0 }
  0x1f   :  { %875 = vmatpush3.bf16.msra.mxu0 %v953_v8  ;;  %943 = vmatpush3.bf16.msra.mxu1 %v953_v8 }
  0x22   :  { %877 = vmatmul.mubr.bf16.vlgmr.msra.gmra.mxu0 %v954_v9  ;;  %905 = vmatmul.mubr.bf16.vlgmr.msra.gmra.mxu1 %v958_v10 }
  0x23   :  { %880 = vmatprep.mubr.msk.bf16.mxu0 %vm968_vm0, %v967_v0  ;;  %908 = vmatprep.mubr.msk.bf16.mxu1 %vm968_vm0, %v967_v0 }
  0x2a   :  { %881 = vmatmul.mubr.bf16.gmra.mxu0 %v955_v11  ;;  %909 = vmatmul.mubr.bf16.gmra.mxu1 %v960_v12 }
  0x2b   :  { %884 = vmatprep.mubr.msk.bf16.mxu0 %vm968_vm0, %v967_v0  ;;  %912 = vmatprep.mubr.msk.bf16.mxu1 %vm968_vm0, %v967_v0 }
  0x32   :  { %885 = vmatmul.mubr.bf16.gmra.mxu0 %v956_v13  ;;  %913 = vmatmul.mubr.bf16.gmra.mxu1 %v962_v14 }
  0x33   :  { %888 = vmatprep.mubr.msk.bf16.mxu0 %vm968_vm0, %v967_v0  ;;  %916 = vmatprep.mubr.msk.bf16.mxu1 %vm968_vm0, %v967_v0 }
  0x3a   :  { %889 = vmatmul.mubr.bf16.gmra.mxu0 %v957_v15  ;;  %917 = vmatmul.mubr.bf16.gmra.mxu1 %v964_v16 }
  0x3b   :  { %892 = vmatprep.mubr.msk.bf16.mxu0 %vm968_vm0, %v967_v0  ;;  %920 = vmatprep.mubr.msk.bf16.mxu1 %vm968_vm0, %v967_v0 }
  0x42   :  { %893 = vmatmul.mubr.bf16.gmra.mxu0 %v959_v17  ;;  %921 = vmatmul.mubr.bf16.gmra.mxu1 %v965_v18 }
  0x43   :  { %896 = vmatprep.mubr.msk.bf16.mxu0 %vm968_vm0, %v967_v0  ;;  %924 = vmatprep.mubr.msk.bf16.mxu1 %vm968_vm0, %v967_v0 }
  0x4a   :  { %897 = vmatmul.mubr.bf16.gmra.mxu0 %v961_v19  ;;  %925 = vmatmul.mubr.bf16.gmra.mxu1 %v966_v20 }
  0x4b   :  { %900 = vmatprep.mubr.msk.bf16.mxu0 %vm968_vm0, %v967_v0 }
  0x52   :  { %901 = vmatmul.mubr.bf16.gmra.mxu0 %v963_v21 }
  0xe2   :  { %v273_v22 = vpop.f32.mrf.mxu0  ;;  %v1099_v23 = vpop.f32.mrf.mxu1 }
  0xe3   :  { %v619_v57 = vmul.f32 %v273_v22, %v273_v22 }
  0xe4   :  { %v878_v24 = vpop.f32.mrf.mxu0  ;;  %v906_v25 = vpop.f32.mrf.mxu1 }
  0xe6   :  { %v276_v26 = vpop.f32.mrf.mxu0  ;;  %v1101_v27 = vpop.f32.mrf.mxu1 }
  0xe7   :  { %v765_v28 = vpack.c.bf16 %v276_v26, %v273_v22  ;;  %v800_v29 = vpack.c.bf16 %v1101_v27, %v1099_v23  ;;  %v620_v54 = vmul.f32 %v276_v26, %v276_v26  ;;  %v587_v61 = vadd.f32 %v276_v26, %v273_v22 }
  0xe8   :  { %v879_v30 = vpop.f32.mrf.mxu0  ;;  %v907_v31 = vpop.f32.mrf.mxu1 }
  0xe9   :  { %766 = vst [vmem:[%s1212_s2] sm:$0xff] %v765_v28   ;;  %833 = vst [vmem:[%s1212_s2 + $0x38] sm:$0xff] %v800_v29   ;;  %v645_v0 = vadd.f32 %v620_v54, %v619_v57 }
  0xea   :  { %v281_v32 = vpop.f32.mrf.mxu0  ;;  %v1111_v33 = vpop.f32.mrf.mxu1 }
  0xeb   :  { %v621_v58 = vmul.f32 %v281_v32, %v281_v32  ;;  %v588_v4 = vadd.f32 %v587_v61, %v281_v32 }
  0xec   :  { %v882_v34 = vpop.f32.mrf.mxu0  ;;  %v910_v35 = vpop.f32.mrf.mxu1 }
  0xed   :  { %v646_v5 = vadd.f32 %v645_v0, %v621_v58 }
  0xee   :  { %v284_v36 = vpop.f32.mrf.mxu0  ;;  %v1113_v37 = vpop.f32.mrf.mxu1 }
  0xef   :  { %v770_v38 = vpack.c.bf16 %v284_v36, %v281_v32  ;;  %v805_v39 = vpack.c.bf16 %v1113_v37, %v1111_v33  ;;  %v622_v1 = vmul.f32 %v284_v36, %v284_v36  ;;  %v589_v9 = vadd.f32 %v588_v4, %v284_v36 }
  0xf0   :  { %v883_v40 = vpop.f32.mrf.mxu0  ;;  %v911_v41 = vpop.f32.mrf.mxu1 }
  0xf1   :  { %827 = vst [vmem:[%s1212_s2 + $0x8] sm:$0xff] %v770_v38   ;;  %834 = vst [vmem:[%s1212_s2 + $0x40] sm:$0xff] %v805_v39   ;;  %v647_v10 = vadd.f32 %v646_v5, %v622_v1 }
  0xf2   :  { %v289_v42 = vpop.f32.mrf.mxu0  ;;  %v1123_v43 = vpop.f32.mrf.mxu1 }
  0xf3   :  { %v623_v6 = vmul.f32 %v289_v42, %v289_v42  ;;  %v590_v14 = vadd.f32 %v589_v9, %v289_v42 }
  0xf4   :  { %v886_v44 = vpop.f32.mrf.mxu0  ;;  %v914_v45 = vpop.f32.mrf.mxu1 }
  0xf5   :  { %v648_v15 = vadd.f32 %v647_v10, %v623_v6  ;;  %v633_v6 = vmul.f32 %v1099_v23, %v1099_v23  ;;  %v634_v10 = vmul.f32 %v1101_v27, %v1101_v27 }
  0xf6   :  { %v292_v46 = vpop.f32.mrf.mxu0  ;;  %v1125_v47 = vpop.f32.mrf.mxu1 }
  0xf7   :  { %v775_v48 = vpack.c.bf16 %v292_v46, %v289_v42  ;;  %v810_v49 = vpack.c.bf16 %v1125_v47, %v1123_v43  ;;  %v624_v11 = vmul.f32 %v292_v46, %v292_v46  ;;  %v591_v19 = vadd.f32 %v590_v14, %v292_v46 }
  0xf8   :  { %v887_v50 = vpop.f32.mrf.mxu0  ;;  %v915_v51 = vpop.f32.mrf.mxu1 }
  0xf9   :  { %828 = vst [vmem:[%s1212_s2 + $0x10] sm:$0xff] %v775_v48   ;;  %835 = vst [vmem:[%s1212_s2 + $0x48] sm:$0xff] %v810_v49   ;;  %v649_v22 = vadd.f32 %v648_v15, %v624_v11 }
  0xfa   :  { %v297_v52 = vpop.f32.mrf.mxu0  ;;  %v1135_v53 = vpop.f32.mrf.mxu1 }
  0xfb   :  { %v625_v16 = vmul.f32 %v297_v52, %v297_v52  ;;  %v592_v28 = vadd.f32 %v591_v19, %v297_v52 }
  0xfc   :  { %v890_v55 = vpop.f32.mrf.mxu0  ;;  %v918_v56 = vpop.f32.mrf.mxu1 }
  0xfd   :  { %v650_v29 = vadd.f32 %v649_v22, %v625_v16  ;;  %v636_v16 = vmul.f32 %v1113_v37, %v1113_v37 }
  0xfe   :  { %v300_v59 = vpop.f32.mrf.mxu0  ;;  %v1137_v60 = vpop.f32.mrf.mxu1 }
  0xff   :  { %v780_v62 = vpack.c.bf16 %v300_v59, %v297_v52  ;;  %v815_v63 = vpack.c.bf16 %v1137_v60, %v1135_v53  ;;  %v626_v24 = vmul.f32 %v300_v59, %v300_v59  ;;  %v593_v34 = vadd.f32 %v592_v28, %v300_v59 }
 0x100   :  { %v891_v2 = vpop.f32.mrf.mxu0  ;;  %v919_v3 = vpop.f32.mrf.mxu1  ;;  %v640_v28 = vmul.f32 %v1137_v60, %v1137_v60 }
 0x101   :  { %829 = vst [vmem:[%s1212_s2 + $0x18] sm:$0xff] %v780_v62   ;;  %836 = vst [vmem:[%s1212_s2 + $0x50] sm:$0xff] %v815_v63   ;;  %v651_v35 = vadd.f32 %v650_v29, %v626_v24 }
 0x102   :  { %v305_v7 = vpop.f32.mrf.mxu0  ;;  %v1147_v8 = vpop.f32.mrf.mxu1 }
 0x103   :  { %v627_v30 = vmul.f32 %v305_v7, %v305_v7  ;;  %v594_v39 = vadd.f32 %v593_v34, %v305_v7 }
 0x104   :  { %v894_v12 = vpop.f32.mrf.mxu0  ;;  %v922_v13 = vpop.f32.mrf.mxu1 }
 0x105   :  { %v652_v41 = vadd.f32 %v651_v35, %v627_v30  ;;  %v635_v13 = vmul.f32 %v1111_v33, %v1111_v33 }
 0x106   :  { %v308_v17 = vpop.f32.mrf.mxu0  ;;  %v1149_v18 = vpop.f32.mrf.mxu1 }
 0x107   :  { %v785_v20 = vpack.c.bf16 %v308_v17, %v305_v7  ;;  %v820_v21 = vpack.c.bf16 %v1149_v18, %v1147_v8  ;;  %v628_v40 = vmul.f32 %v308_v17, %v308_v17  ;;  %v595_v45 = vadd.f32 %v594_v39, %v308_v17 }
 0x108   :  { %v895_v25 = vpop.f32.mrf.mxu0  ;;  %v923_v26 = vpop.f32.mrf.mxu1  ;;  %v642_v35 = vmul.f32 %v1149_v18, %v1149_v18 }
 0x109   :  { %830 = vst [vmem:[%s1212_s2 + $0x20] sm:$0xff] %v785_v20   ;;  %837 = vst [vmem:[%s1212_s2 + $0x58] sm:$0xff] %v820_v21   ;;  %v653_v52 = vadd.f32 %v652_v41, %v628_v40 }
 0x10a   :  { %v313_v31 = vpop.f32.mrf.mxu0  ;;  %v1159_v32 = vpop.f32.mrf.mxu1 }
 0x10b   :  { %v629_v46 = vmul.f32 %v313_v31, %v313_v31  ;;  %v596_v54 = vadd.f32 %v595_v45, %v313_v31 }
 0x10c   :  { %v898_v36 = vpop.f32.mrf.mxu0  ;;  %v926_v38 = vpop.f32.mrf.mxu1 }
 0x10d   :  { %v654_v57 = vadd.f32 %v653_v52, %v629_v46  ;;  %v643_v38 = vmul.f32 %v1159_v32, %v1159_v32 }
 0x10e   :  { %v316_v42 = vpop.f32.mrf.mxu0  ;;  %v372_v44 = vpop.f32.mrf.mxu1 }
 0x10f   :  { %v790_v48 = vpack.c.bf16 %v316_v42, %v313_v31  ;;  %v825_v49 = vpack.c.bf16 %v372_v44, %v1159_v32  ;;  %v630_v55 = vmul.f32 %v316_v42, %v316_v42  ;;  %v597_v58 = vadd.f32 %v596_v54, %v316_v42 }
 0x110   :  { %v899_v50 = vpop.f32.mrf.mxu0  ;;  %v927_v51 = vpop.f32.mrf.mxu1  ;;  %v641_v31 = vmul.f32 %v1147_v8, %v1147_v8  ;;  %v644_v40 = vmul.f32 %v372_v44, %v372_v44 }
 0x111   :  { %831 = vst [vmem:[%s1212_s2 + $0x28] sm:$0xff] %v790_v48   ;;  %838 = vst [vmem:[%s1212_s2 + $0x60] sm:$0xff] %v825_v49   ;;  %v655_v62 = vadd.f32 %v654_v57, %v630_v55 }
 0x112   :  { %v321_v56 = vpop.f32.mrf.mxu0 }
 0x113   :  { %v631_v59 = vmul.f32 %v321_v56, %v321_v56  ;;  %v598_v63 = vadd.f32 %v597_v58, %v321_v56 }
 0x114   :  { %v902_v61 = vpop.f32.mrf.mxu0 }
 0x115   :  { %v656_v1 = vadd.f32 %v655_v62, %v631_v59 }
 0x116   :  { %v324_v0 = vpop.f32.mrf.mxu0 }
 0x117   :  { %v795_v2 = vpack.c.bf16 %v324_v0, %v321_v56  ;;  %v599_v3 = vadd.f32 %v598_v63, %v324_v0  ;;  %v632_v4 = vmul.f32 %v324_v0, %v324_v0 }
 0x118   :  { %v903_v5 = vpop.f32.mrf.mxu0 }
 0x119   :  { %832 = vst [vmem:[%s1212_s2 + $0x30] sm:$0xff] %v795_v2   ;;  %v600_v7 = vadd.f32 %v599_v3, %v1099_v23  ;;  %v657_v9 = vadd.f32 %v656_v1, %v632_v4  ;;  %v637_v23 = vmul.f32 %v1123_v43, %v1123_v43 }
 0x11b   :  { %v601_v11 = vadd.f32 %v600_v7, %v1101_v27  ;;  %v658_v12 = vadd.f32 %v657_v9, %v633_v6  ;;  %v638_v27 = vmul.f32 %v1125_v47, %v1125_v47 }
 0x11d   :  { %v602_v14 = vadd.f32 %v601_v11, %v1111_v33  ;;  %v659_v15 = vadd.f32 %v658_v12, %v634_v10  ;;  %v639_v33 = vmul.f32 %v1135_v53, %v1135_v53 }
 0x11f   :  { %v660_v17 = vadd.f32 %v659_v15, %v635_v13  ;;  %v603_v19 = vadd.f32 %v602_v14, %v1113_v37 }
 0x121   :  { %v604_v20 = vadd.f32 %v603_v19, %v1123_v43  ;;  %v661_v21 = vadd.f32 %v660_v17, %v636_v16 }
 0x123   :  { %v605_v22 = vadd.f32 %v604_v20, %v1125_v47  ;;  %v662_v24 = vadd.f32 %v661_v21, %v637_v23 }
 0x125   :  { %v606_v25 = vadd.f32 %v605_v22, %v1135_v53  ;;  %v663_v26 = vadd.f32 %v662_v24, %v638_v27 }
 0x127   :  { %v607_v37 = vadd.f32 %v606_v25, %v1137_v60  ;;  %v664_v29 = vadd.f32 %v663_v26, %v639_v33 }
 0x129   :  { %v665_v43 = vadd.f32 %v664_v29, %v640_v28  ;;  %v608_v30 = vadd.f32 %v607_v37, %v1147_v8 }
 0x12b   :  { %v666_v47 = vadd.f32 %v665_v43, %v641_v31  ;;  %v609_v34 = vadd.f32 %v608_v30, %v1149_v18 }
 0x12d   :  { %v667_v53 = vadd.f32 %v666_v47, %v642_v35  ;;  %v610_v36 = vadd.f32 %v609_v34, %v1159_v32 }
 0x12f   :  { %v668_v60 = vadd.f32 %v667_v53, %v643_v38  ;;  %v611_v39 = vadd.f32 %v610_v36, %v372_v44 }
 0x131   :  { %v612_v41 = vrot.slane %v611_v39, 4  ;;  %v669_v42 = vadd.f32 %v668_v60, %v644_v40 }
 0x133   :  { %v613_v45 = vadd.f32 %v612_v41, %v611_v39  ;;  %v670_v46 = vrot.slane %v669_v42, 4 }
 0x135   :  { %v614_v8 = vrot.slane %v613_v45, 2  ;;  %v671_v48 = vadd.f32 %v670_v46, %v669_v42 }
 0x137   :  { %v615_v49 = vadd.f32 %v614_v8, %v613_v45  ;;  %v672_v50 = vrot.slane %v671_v48, 2 }
 0x139   :  { %v616_v51 = vrot.slane %v615_v49, 1  ;;  %v673_v52 = vadd.f32 %v672_v50, %v671_v48 }
 0x13b   :  { %v617_v18 = vadd.f32 %v616_v51, %v615_v49  ;;  %v674_v54 = vrot.slane %v673_v52, 1 }
 0x13d   :  { %618 = vst [vmem:[%s1213_s3] sm:$0x1] %v617_v18  ;;  %v675_v32 = vadd.f32 %v674_v54, %v673_v52 }
 0x13f   :  { %676 = vst [vmem:[%s1214_s4] sm:$0x1] %v675_v32 }

// kernel: _lambda_.31
= control target key start
LH: loop header
LB: loop body
LE: loop exit
PB: predicated region body
PF: predicated region fallthrough
CT: control target
= control target key end

     0   :  { %s647_s0 = inlined_call_operand.vmem [shape: bf16[208,128], index: 0, kind: input, shape index: {}, may-alias: {0,3}]   ;;  %s648_s1 = inlined_call_operand.vmem [shape: f32[1,128], index: 1, kind: input, shape index: {}]   ;;  %s649_s2 = inlined_call_operand.vmem [shape: f32[1,128], index: 2, kind: input, shape index: {}]   ;;  %s650_s3 = inlined_call_operand.vmem [shape: bf16[208,128], index: 3, kind: output, shape index: {}, may-alias: {0,3}]  }
   0x1   :  { %v347_v0 = vld [vmem:[%s647_s0] sm:$0xff]   ;;  %v463_v4 = vld [vmem:[%s647_s0 + $0x8] sm:$0xff]   ;;  %v464_v5 = vld [vmem:[%s647_s0 + $0x10] sm:$0xff]  }
   0x2   :  { %v513_v1 = vld [vmem:[%s648_s1] ss:$0 sm:$0xff]  ;;  %v348_v2 = vunpack.c.l.bf16 %v347_v0  ;;  %v349_v3 = vunpack.c.h.bf16 %v347_v0  ;;  %v465_v6 = vld [vmem:[%s647_s0 + $0x18] sm:$0xff]   ;;  %v352_v8 = vunpack.c.l.bf16 %v463_v4  ;;  %v353_v9 = vunpack.c.h.bf16 %v463_v4  ;;  %v467_v33 = vld [vmem:[%s647_s0 + $0x28] sm:$0xff]  }
   0x3   :  { %v527_v7 = vld [vmem:[%s649_s2] ss:$0 sm:$0xff]  ;;  %v356_v10 = vunpack.c.l.bf16 %v464_v5  ;;  %v357_v11 = vunpack.c.h.bf16 %v464_v5  ;;  %v360_v14 = vunpack.c.l.bf16 %v465_v6  ;;  %v361_v15 = vunpack.c.h.bf16 %v465_v6  ;;  %v468_v38 = vld [vmem:[%s647_s0 + $0x30] sm:$0xff]   ;;  %v469_v43 = vld [vmem:[%s647_s0 + $0x38] sm:$0xff]  }
   0x4   :  { %v73_v12 = vmul.f32 %v348_v2, %v513_v1  ;;  %v74_v13 = vmul.f32 %v349_v3, %v513_v1  ;;  %v75_v16 = vmul.f32 %v352_v8, %v513_v1  ;;  %v76_v17 = vmul.f32 %v353_v9, %v513_v1  ;;  %v466_v28 = vld [vmem:[%s647_s0 + $0x20] sm:$0xff]  }
   0x5   :  { %v77_v18 = vmul.f32 %v356_v10, %v513_v1  ;;  %v78_v19 = vmul.f32 %v357_v11, %v513_v1  ;;  %v79_v22 = vmul.f32 %v360_v14, %v513_v1  ;;  %v80_v23 = vmul.f32 %v361_v15, %v513_v1 }
   0x6   :  { %v106_v20 = vadd.f32 %v527_v7, %v73_v12  ;;  %v107_v21 = vadd.f32 %v527_v7, %v74_v13  ;;  %v108_v24 = vadd.f32 %v527_v7, %v75_v16  ;;  %v109_v25 = vadd.f32 %v527_v7, %v76_v17 }
   0x7   :  { %v110_v26 = vadd.f32 %v527_v7, %v77_v18  ;;  %v111_v27 = vadd.f32 %v527_v7, %v78_v19  ;;  %v112_v31 = vadd.f32 %v527_v7, %v79_v22  ;;  %v113_v32 = vadd.f32 %v527_v7, %v80_v23 }
   0x8   :  { %v132_v29 = vmax.f32 %v106_v20, 0.0  ;;  %v133_v30 = vmax.f32 %v107_v21, 0.0  ;;  %v134_v34 = vmax.f32 %v108_v24, 0.0  ;;  %v135_v35 = vmax.f32 %v109_v25, 0.0 }
   0x9   :  { %v136_v36 = vmax.f32 %v110_v26, 0.0  ;;  %v137_v37 = vmax.f32 %v111_v27, 0.0  ;;  %v138_v40 = vmax.f32 %v112_v31, 0.0  ;;  %v139_v41 = vmax.f32 %v113_v32, 0.0 }
   0xa   :  { %v401_v39 = vpack.c.bf16 %v133_v30, %v132_v29  ;;  %v364_v42 = vunpack.c.l.bf16 %v466_v28  ;;  %v406_v44 = vpack.c.bf16 %v135_v35, %v134_v34  ;;  %v365_v46 = vunpack.c.h.bf16 %v466_v28 }
   0xb   :  { %v411_v45 = vpack.c.bf16 %v137_v37, %v136_v36  ;;  %v368_v47 = vunpack.c.l.bf16 %v467_v33  ;;  %v416_v48 = vpack.c.bf16 %v139_v41, %v138_v40  ;;  %v369_v50 = vunpack.c.h.bf16 %v467_v33 }
   0xc   :  { %402 = vst [vmem:[%s650_s3] sm:$0xff] %v401_v39   ;;  %v81_v49 = vmul.f32 %v364_v42, %v513_v1  ;;  %v372_v51 = vunpack.c.l.bf16 %v468_v38  ;;  %475 = vst [vmem:[%s650_s3 + $0x8] sm:$0xff] %v406_v44   ;;  %v82_v52 = vmul.f32 %v365_v46, %v513_v1  ;;  %v373_v54 = vunpack.c.h.bf16 %v468_v38 }
   0xd   :  { %476 = vst [vmem:[%s650_s3 + $0x10] sm:$0xff] %v411_v45   ;;  %v83_v53 = vmul.f32 %v368_v47, %v513_v1  ;;  %v376_v55 = vunpack.c.l.bf16 %v469_v43  ;;  %477 = vst [vmem:[%s650_s3 + $0x18] sm:$0xff] %v416_v48   ;;  %v84_v57 = vmul.f32 %v369_v50, %v513_v1  ;;  %v377_v59 = vunpack.c.h.bf16 %v469_v43 }
   0xe   :  { %v114_v56 = vadd.f32 %v527_v7, %v81_v49  ;;  %v85_v58 = vmul.f32 %v372_v51, %v513_v1  ;;  %v115_v60 = vadd.f32 %v527_v7, %v82_v52  ;;  %v86_v62 = vmul.f32 %v373_v54, %v513_v1 }
   0xf   :  { %v116_v61 = vadd.f32 %v527_v7, %v83_v53  ;;  %v87_v63 = vmul.f32 %v376_v55, %v513_v1  ;;  %v117_v3 = vadd.f32 %v527_v7, %v84_v57  ;;  %v88_v5 = vmul.f32 %v377_v59, %v513_v1 }
  0x10   :  { %v140_v2 = vmax.f32 %v114_v56, 0.0  ;;  %v118_v4 = vadd.f32 %v527_v7, %v85_v58  ;;  %v141_v6 = vmax.f32 %v115_v60, 0.0  ;;  %v119_v9 = vadd.f32 %v527_v7, %v86_v62 }
  0x11   :  { %v142_v8 = vmax.f32 %v116_v61, 0.0  ;;  %v120_v10 = vadd.f32 %v527_v7, %v87_v63  ;;  %v143_v12 = vmax.f32 %v117_v3, 0.0  ;;  %v121_v14 = vadd.f32 %v527_v7, %v88_v5 }
  0x12   :  { %v144_v13 = vmax.f32 %v118_v4, 0.0  ;;  %v421_v17 = vpack.c.bf16 %v141_v6, %v140_v2  ;;  %v145_v18 = vmax.f32 %v119_v9, 0.0 }
  0x13   :  { %v146_v19 = vmax.f32 %v120_v10, 0.0  ;;  %v426_v21 = vpack.c.bf16 %v143_v12, %v142_v8  ;;  %v147_v22 = vmax.f32 %v121_v14, 0.0 }
  0x14   :  { %v470_v0 = vld [vmem:[%s647_s0 + $0x40] sm:$0xff]   ;;  %v471_v11 = vld [vmem:[%s647_s0 + $0x48] sm:$0xff]   ;;  %v472_v16 = vld [vmem:[%s647_s0 + $0x50] sm:$0xff]   ;;  %v431_v26 = vpack.c.bf16 %v145_v18, %v144_v13 }
  0x15   :  { %v380_v15 = vunpack.c.l.bf16 %v470_v0  ;;  %v381_v20 = vunpack.c.h.bf16 %v470_v0  ;;  %v384_v24 = vunpack.c.l.bf16 %v471_v11  ;;  %v473_v25 = vld [vmem:[%s647_s0 + $0x58] sm:$0xff]   ;;  %v385_v28 = vunpack.c.h.bf16 %v471_v11 }
  0x16   :  { %478 = vst [vmem:[%s650_s3 + $0x20] sm:$0xff] %v421_v17   ;;  %v388_v29 = vunpack.c.l.bf16 %v472_v16  ;;  %479 = vst [vmem:[%s650_s3 + $0x28] sm:$0xff] %v426_v21   ;;  %v436_v30 = vpack.c.bf16 %v147_v22, %v146_v19  ;;  %v389_v33 = vunpack.c.h.bf16 %v472_v16  ;;  %v392_v37 = vunpack.c.l.bf16 %v473_v25 }
  0x17   :  { %v89_v23 = vmul.f32 %v380_v15, %v513_v1  ;;  %v90_v27 = vmul.f32 %v381_v20, %v513_v1  ;;  %v91_v32 = vmul.f32 %v384_v24, %v513_v1  ;;  %480 = vst [vmem:[%s650_s3 + $0x30] sm:$0xff] %v431_v26   ;;  %v92_v35 = vmul.f32 %v385_v28, %v513_v1 }
  0x18   :  { %v93_v36 = vmul.f32 %v388_v29, %v513_v1  ;;  %v94_v41 = vmul.f32 %v389_v33, %v513_v1  ;;  %v393_v42 = vunpack.c.h.bf16 %v473_v25  ;;  %v95_v46 = vmul.f32 %v392_v37, %v513_v1 }
  0x19   :  { %v122_v31 = vadd.f32 %v527_v7, %v89_v23  ;;  %v123_v34 = vadd.f32 %v527_v7, %v90_v27  ;;  %v124_v40 = vadd.f32 %v527_v7, %v91_v32  ;;  %v125_v44 = vadd.f32 %v527_v7, %v92_v35 }
  0x1a   :  { %v126_v45 = vadd.f32 %v527_v7, %v93_v36  ;;  %v127_v48 = vadd.f32 %v527_v7, %v94_v41  ;;  %v96_v49 = vmul.f32 %v393_v42, %v513_v1  ;;  %v128_v54 = vadd.f32 %v527_v7, %v95_v46 }
  0x1b   :  { %v148_v39 = vmax.f32 %v122_v31, 0.0  ;;  %v149_v43 = vmax.f32 %v123_v34, 0.0  ;;  %v150_v47 = vmax.f32 %v124_v40, 0.0  ;;  %v151_v52 = vmax.f32 %v125_v44, 0.0 }
  0x1c   :  { %v152_v53 = vmax.f32 %v126_v45, 0.0  ;;  %v153_v55 = vmax.f32 %v127_v48, 0.0  ;;  %v129_v56 = vadd.f32 %v527_v7, %v96_v49  ;;  %v154_v60 = vmax.f32 %v128_v54, 0.0 }
  0x1d   :  { %v441_v51 = vpack.c.bf16 %v149_v43, %v148_v39  ;;  %v446_v59 = vpack.c.bf16 %v151_v52, %v150_v47 }
  0x1e   :  { %v474_v38 = vld [vmem:[%s647_s0 + $0x60] sm:$0xff]   ;;  %v451_v61 = vpack.c.bf16 %v153_v55, %v152_v53  ;;  %v155_v62 = vmax.f32 %v129_v56, 0.0 }
  0x1f   :  { %481 = vst [vmem:[%s650_s3 + $0x38] sm:$0xff] %v436_v30   ;;  %v396_v50 = vunpack.c.l.bf16 %v474_v38  ;;  %v397_v57 = vunpack.c.h.bf16 %v474_v38  ;;  %482 = vst [vmem:[%s650_s3 + $0x40] sm:$0xff] %v441_v51  }
  0x20   :  { %483 = vst [vmem:[%s650_s3 + $0x48] sm:$0xff] %v446_v59   ;;  %484 = vst [vmem:[%s650_s3 + $0x50] sm:$0xff] %v451_v61   ;;  %v456_v2 = vpack.c.bf16 %v155_v62, %v154_v60 }
  0x21   :  { %v97_v58 = vmul.f32 %v396_v50, %v513_v1  ;;  %v98_v63 = vmul.f32 %v397_v57, %v513_v1 }
  0x22   :  { %485 = vst [vmem:[%s650_s3 + $0x58] sm:$0xff] %v456_v2  }
  0x23   :  { %v130_v0 = vadd.f32 %v527_v7, %v97_v58  ;;  %v131_v3 = vadd.f32 %v527_v7, %v98_v63 }
  0x25   :  { %v156_v4 = vmax.f32 %v130_v0, 0.0  ;;  %v157_v5 = vmax.f32 %v131_v3, 0.0 }
  0x27   :  { %v461_v1 = vpack.c.bf16 %v157_v5, %v156_v4 }
  0x29   :  { %486 = vst [vmem:[%s650_s3 + $0x60] sm:$0xff] %v461_v1  }

// kernel: _lambda_.32
= control target key start
LH: loop header
LB: loop body
LE: loop exit
PB: predicated region body
PF: predicated region fallthrough
CT: control target
= control target key end

     0   :  { %s2314_s15 = smov 0   ;;  %s2316_s16 = smov 0   ;;  %s2635_s0 = inlined_call_operand.vmem [shape: bf16[208,1152], index: 0, kind: input, shape index: {}]   ;;  %s2636_s1 = inlined_call_operand.vmem [shape: bf16[1152,128], index: 1, kind: input, shape index: {}]   ;;  %s2637_s2 = inlined_call_operand.vmem [shape: bf16[208,128], index: 2, kind: output, shape index: {0}]   ;;  %s2638_s3 = inlined_call_operand.vmem [shape: f32[1,1,128], index: 3, kind: output, shape index: {1}]   ;;  %s2639_s4 = inlined_call_operand.vmem [shape: f32[1,1,128], index: 4, kind: output, shape index: {2}]  }
   0x1   :  { %s2318_s17 = smov 0   ;;  %s2320_s18 = smov 0  }
   0x2   :  { %s2322_s19 = smov 0  }
   0x3 LB: > { %s27_s20 = sadd.s32 1, %s2280_s18  ;;  %p50_p1 = scmp.ne.s32.totalorder %s2272_s16, %s2268_s15  ;;  %s2284_s19 = sphi %s2322_s19, %s15_s19   ;;  %s2280_s18 = sphi %s2320_s18, %s2643_s18   ;;  %s2276_s17 = sphi %s2318_s17, %s2642_s17   ;;  %s2272_s16 = sphi %s2316_s16, %s2641_s16   ;;  %s2268_s15 = sphi %s2314_s15, %s2640_s15  }
   0x4   : > { %p28_p0 = scmp.ge.s32.totalorder %s27_s20, 3  ;;  %p51_p2 = scmp.eq.s32.totalorder %s2284_s19, 0 }
   0x5   : > { %s43_s22 = sadd.s32 1, %s2272_s16  ;;  %p1685_p5 = scmp.ge.s32.totalorder %s2284_s19, 3 }
   0x6   : > { %s2645_s20 = smov (%p28_p0, %s27_s20), 0  ;;  %p52_p3 = por %p51_p2, %p50_p1 }
   0x7   : > { %s39_s21 = ssub.s32 %s2280_s18, %s2645_s20  ;;  %188 = sbr.rel (%p1685_p5) target bundleno = 47 (0x2f), region = 16 }
   0x8   : > { %p41_p4 = scmp.eq.s32.totalorder %s39_s21, 0 }
   0xa   : > { %s2349_s23 = scalar_select %p41_p4, %s2272_s16, %s43_s22  }
   0xc   : > { %191 = sbr.rel (!%p52_p3) target bundleno = 47 (0x2f), region = 20  ;;  %s193_s24 = sand.u32 (%p52_p3), 1, %s2272_s16  }
   0xd   : > { %s1838_s25 = smul.u32 (%p52_p3), 12, %s2280_s18 }
   0xe   : > { %s2125_s26 = smul.u32 (%p52_p3), 312, %s193_s24 }
   0xf   : > { %s2357_s29 = scalar_lea.vmem (%p52_p3), %s2635_s0, %s1838_s25 }
  0x10   : > { %v216_v0 = vld [vmem:[%s2357_s29] sm:$0xff] (%p52_p3)  ;;  %v220_v2 = vld [vmem:[%s2357_s29 + $0x48] sm:$0xff] (%p52_p3)  ;;  %s2362_s30 = scalar_lea.vmem (%p52_p3), [#allocation3], %s2125_s26  ;;  %v224_v4 = vld [vmem:[%s2357_s29 + $0x90] sm:$0xff] (%p52_p3) }
  0x11   : > { %v218_v1 = vld [vmem:[%s2357_s29 + $0x24] sm:$0xff]  ;;  %217 = vst [vmem:[%s2362_s30] sm:$0xff] %v216_v0  ;;  %221 = vst [vmem:[%s2362_s30 + $0x18] sm:$0xff] %v220_v2  ;;  %v222_v3 = vld [vmem:[%s2357_s29 + $0x6c] sm:$0xff] }
  0x12   : > { %219 = vst [vmem:[%s2362_s30 + $0xc] sm:$0xff] %v218_v1  ;;  %v226_v5 = vld [vmem:[%s2357_s29 + $0xb4] sm:$0xff]  ;;  %223 = vst [vmem:[%s2362_s30 + $0x24] sm:$0xff] %v222_v3  ;;  %v230_v7 = vld [vmem:[%s2357_s29 + $0xfc] sm:$0xff] }
  0x13   : > { %225 = vst [vmem:[%s2362_s30 + $0x30] sm:$0xff] %v224_v4  ;;  %227 = vst [vmem:[%s2362_s30 + $0x3c] sm:$0xff] %v226_v5  ;;  %v228_v6 = vld [vmem:[%s2357_s29 + $0xd8] sm:$0xff]  ;;  %v232_v8 = vld [vmem:[%s2357_s29 + $0x120] sm:$0xff] }
  0x14   : > { %229 = vst [vmem:[%s2362_s30 + $0x48] sm:$0xff] %v228_v6  ;;  %231 = vst [vmem:[%s2362_s30 + $0x54] sm:$0xff] %v230_v7  ;;  %v234_v9 = vld [vmem:[%s2357_s29 + $0x144] sm:$0xff]  ;;  %v238_v11 = vld [vmem:[%s2357_s29 + $0x18c] sm:$0xff] }
  0x15   : > { %233 = vst [vmem:[%s2362_s30 + $0x60] sm:$0xff] %v232_v8  ;;  %v236_v10 = vld [vmem:[%s2357_s29 + $0x168] sm:$0xff]  ;;  %235 = vst [vmem:[%s2362_s30 + $0x6c] sm:$0xff] %v234_v9  ;;  %v240_v12 = vld [vmem:[%s2357_s29 + $0x1b0] sm:$0xff] }
  0x16   : > { %237 = vst [vmem:[%s2362_s30 + $0x78] sm:$0xff] %v236_v10  ;;  %239 = vst [vmem:[%s2362_s30 + $0x84] sm:$0xff] %v238_v11  ;;  %v242_v13 = vld [vmem:[%s2357_s29 + $0x1d4] sm:$0xff]  ;;  %v246_v15 = vld [vmem:[%s2357_s29 + $0x21c] sm:$0xff] }
  0x17   : > { %v244_v14 = vld [vmem:[%s2357_s29 + $0x1f8] sm:$0xff]  ;;  %241 = vst [vmem:[%s2362_s30 + $0x90] sm:$0xff] %v240_v12  ;;  %243 = vst [vmem:[%s2362_s30 + $0x9c] sm:$0xff] %v242_v13  ;;  %v248_v16 = vld [vmem:[%s2357_s29 + $0x240] sm:$0xff] }
  0x18   : > { %245 = vst [vmem:[%s2362_s30 + $0xa8] sm:$0xff] %v244_v14  ;;  %v250_v17 = vld [vmem:[%s2357_s29 + $0x264] sm:$0xff]  ;;  %247 = vst [vmem:[%s2362_s30 + $0xb4] sm:$0xff] %v246_v15  ;;  %v254_v19 = vld [vmem:[%s2357_s29 + $0x2ac] sm:$0xff] }
  0x19   : > { %249 = vst [vmem:[%s2362_s30 + $0xc0] sm:$0xff] %v248_v16  ;;  %251 = vst [vmem:[%s2362_s30 + $0xcc] sm:$0xff] %v250_v17  ;;  %v252_v18 = vld [vmem:[%s2357_s29 + $0x288] sm:$0xff]  ;;  %v256_v20 = vld [vmem:[%s2357_s29 + $0x2d0] sm:$0xff] }
  0x1a   : > { %253 = vst [vmem:[%s2362_s30 + $0xd8] sm:$0xff] %v252_v18  ;;  %255 = vst [vmem:[%s2362_s30 + $0xe4] sm:$0xff] %v254_v19  ;;  %v258_v21 = vld [vmem:[%s2357_s29 + $0x2f4] sm:$0xff]  ;;  %v262_v23 = vld [vmem:[%s2357_s29 + $0x33c] sm:$0xff] }
  0x1b   : > { %257 = vst [vmem:[%s2362_s30 + $0xf0] sm:$0xff] %v256_v20  ;;  %v260_v22 = vld [vmem:[%s2357_s29 + $0x318] sm:$0xff]  ;;  %259 = vst [vmem:[%s2362_s30 + $0xfc] sm:$0xff] %v258_v21  ;;  %v264_v24 = vld [vmem:[%s2357_s29 + $0x360] sm:$0xff] }
  0x1c   : > { %261 = vst [vmem:[%s2362_s30 + $0x108] sm:$0xff] %v260_v22  ;;  %263 = vst [vmem:[%s2362_s30 + $0x114] sm:$0xff] %v262_v23  ;;  %v266_v25 = vld [vmem:[%s2357_s29 + $0x384] sm:$0xff]  ;;  %v1689_v27 = vld [vmem:[%s2357_s29 + $0x2c] sm:$0xf] }
  0x1d   : > { %v1687_v26 = vld [vmem:[%s2357_s29 + $0x8] sm:$0xf]  ;;  %265 = vst [vmem:[%s2362_s30 + $0x120] sm:$0xff] %v264_v24  ;;  %267 = vst [vmem:[%s2362_s30 + $0x12c] sm:$0xff] %v266_v25  ;;  %v1691_v28 = vld [vmem:[%s2357_s29 + $0x50] sm:$0xf] }
  0x1e   : > { %1688 = vst [vmem:[%s2362_s30 + $0x8] sm:$0xf] %v1687_v26  ;;  %v1693_v29 = vld [vmem:[%s2357_s29 + $0x74] sm:$0xf]  ;;  %1690 = vst [vmem:[%s2362_s30 + $0x14] sm:$0xf] %v1689_v27 }
  0x1f   : > { %1692 = vst [vmem:[%s2362_s30 + $0x20] sm:$0xf] %v1691_v28  ;;  %1694 = vst [vmem:[%s2362_s30 + $0x2c] sm:$0xf] %v1693_v29  ;;  %v1695_v30 = vld [vmem:[%s2357_s29 + $0x98] sm:$0xf] }
  0x20   : > { %v1697_v31 = vld [vmem:[%s2357_s29 + $0xbc] sm:$0xf]  ;;  %v1699_v32 = vld [vmem:[%s2357_s29 + $0xe0] sm:$0xf]  ;;  %1696 = vst [vmem:[%s2362_s30 + $0x38] sm:$0xf] %v1695_v30 }
  0x21   : > { %1698 = vst [vmem:[%s2362_s30 + $0x44] sm:$0xf] %v1697_v31  ;;  %1700 = vst [vmem:[%s2362_s30 + $0x50] sm:$0xf] %v1699_v32  ;;  %v1701_v33 = vld [vmem:[%s2357_s29 + $0x104] sm:$0xf] }
  0x22   : > { %v1703_v34 = vld [vmem:[%s2357_s29 + $0x128] sm:$0xf]  ;;  %v1705_v35 = vld [vmem:[%s2357_s29 + $0x14c] sm:$0xf]  ;;  %1702 = vst [vmem:[%s2362_s30 + $0x5c] sm:$0xf] %v1701_v33 }
  0x23   : > { %1704 = vst [vmem:[%s2362_s30 + $0x68] sm:$0xf] %v1703_v34  ;;  %1706 = vst [vmem:[%s2362_s30 + $0x74] sm:$0xf] %v1705_v35  ;;  %v1707_v36 = vld [vmem:[%s2357_s29 + $0x170] sm:$0xf] }
  0x24   : > { %v1709_v37 = vld [vmem:[%s2357_s29 + $0x194] sm:$0xf]  ;;  %v1711_v38 = vld [vmem:[%s2357_s29 + $0x1b8] sm:$0xf]  ;;  %1708 = vst [vmem:[%s2362_s30 + $0x80] sm:$0xf] %v1707_v36 }
  0x25   : > { %1710 = vst [vmem:[%s2362_s30 + $0x8c] sm:$0xf] %v1709_v37  ;;  %1712 = vst [vmem:[%s2362_s30 + $0x98] sm:$0xf] %v1711_v38  ;;  %v1713_v39 = vld [vmem:[%s2357_s29 + $0x1dc] sm:$0xf] }
  0x26   : > { %v1715_v40 = vld [vmem:[%s2357_s29 + $0x200] sm:$0xf]  ;;  %v1717_v41 = vld [vmem:[%s2357_s29 + $0x224] sm:$0xf]  ;;  %1714 = vst [vmem:[%s2362_s30 + $0xa4] sm:$0xf] %v1713_v39 }
  0x27   : > { %1716 = vst [vmem:[%s2362_s30 + $0xb0] sm:$0xf] %v1715_v40  ;;  %1718 = vst [vmem:[%s2362_s30 + $0xbc] sm:$0xf] %v1717_v41  ;;  %v1719_v42 = vld [vmem:[%s2357_s29 + $0x248] sm:$0xf] }
  0x28   : > { %v1721_v43 = vld [vmem:[%s2357_s29 + $0x26c] sm:$0xf]  ;;  %v1723_v44 = vld [vmem:[%s2357_s29 + $0x290] sm:$0xf]  ;;  %1720 = vst [vmem:[%s2362_s30 + $0xc8] sm:$0xf] %v1719_v42 }
  0x29   : > { %1722 = vst [vmem:[%s2362_s30 + $0xd4] sm:$0xf] %v1721_v43  ;;  %1724 = vst [vmem:[%s2362_s30 + $0xe0] sm:$0xf] %v1723_v44  ;;  %v1725_v45 = vld [vmem:[%s2357_s29 + $0x2b4] sm:$0xf] }
  0x2a   : > { %v1727_v46 = vld [vmem:[%s2357_s29 + $0x2d8] sm:$0xf]  ;;  %v1729_v47 = vld [vmem:[%s2357_s29 + $0x2fc] sm:$0xf]  ;;  %1726 = vst [vmem:[%s2362_s30 + $0xec] sm:$0xf] %v1725_v45 }
  0x2b   : > { %1728 = vst [vmem:[%s2362_s30 + $0xf8] sm:$0xf] %v1727_v46  ;;  %1730 = vst [vmem:[%s2362_s30 + $0x104] sm:$0xf] %v1729_v47  ;;  %v1731_v48 = vld [vmem:[%s2357_s29 + $0x320] sm:$0xf] }
  0x2c   : > { %v1733_v49 = vld [vmem:[%s2357_s29 + $0x344] sm:$0xf]  ;;  %v1735_v50 = vld [vmem:[%s2357_s29 + $0x368] sm:$0xf]  ;;  %1732 = vst [vmem:[%s2362_s30 + $0x110] sm:$0xf] %v1731_v48 }
  0x2d   : > { %1734 = vst [vmem:[%s2362_s30 + $0x11c] sm:$0xf] %v1733_v49  ;;  %1736 = vst [vmem:[%s2362_s30 + $0x128] sm:$0xf] %v1735_v50  ;;  %v1737_v51 = vld [vmem:[%s2357_s29 + $0x38c] sm:$0xf] }
  0x2e   : > { %1738 = vst [vmem:[%s2362_s30 + $0x134] sm:$0xf] %v1737_v51 }
  0x2f PF: > { %p1739_p6 = scmp.ge.s32.totalorder %s2284_s19, 1  ;;  %p344_p7 = scmp.lt.s32.totalorder %s2284_s19, 4 }
  0x31   : > { %p345_p8 = pnand %p1739_p6, %p344_p7 }
  0x32   : > { %s351_s5 = sand.u32 (!%p345_p8), 1, %s2268_s15   ;;  %s401_s6 = smul.u32 (!%p345_p8), 48, %s2276_s17 }
  0x33   : > { %348 = sbr.rel (%p345_p8) target bundleno = 477 (0x1dd), region = 50  ;;  %p1741_p10 = scmp.ne.s32.totalorder (!%p345_p8), %s2276_s17, 0 }
  0x34   : > { %s2126_s7 = smul.u32 (!%p345_p8), 312, %s351_s5  ;;  %p402_p9 = scmp.lt.s32.totalorder (!%p345_p8), %s401_s6, 143 }
  0x36   : > { %s2474_s12 = scalar_lea.vmem (!%p345_p8), [#allocation3], %s2126_s7 }
  0x38   : > { %s2647_s6 = smov (!%p402_p9, %s401_s6), 143  ;;  %435 = sbr.rel (%p1741_p10) target bundleno = 75 (0x4b), region = 58 }
  0x39   : > { %s1740_s8 = sshll.u32 %s2647_s6, 2 }
  0x3a   : > { %s2472_s11 = scalar_lea.vmem %s2636_s1, %s1740_s8 }
  0x3d   : > { %v2286_v52 = vmov 0.0  }
  0x3e   : > { %436 = vst [vmem:[#allocation2 + $0xb0] sm:$0xff] %v2286_v52  ;;  %437 = vst [vmem:[#allocation2] sm:$0xff] %v2286_v52 }
  0x3f   : > { %438 = vst [vmem:[#allocation2 + $0x10] sm:$0xff] %v2286_v52  ;;  %439 = vst [vmem:[#allocation2 + $0x48] sm:$0xff] %v2286_v52 }
  0x40   : > { %440 = vst [vmem:[#allocation2 + $0x60] sm:$0xff] %v2286_v52  ;;  %441 = vst [vmem:[#allocation2 + $0x28] sm:$0xff] %v2286_v52 }
  0x41   : > { %442 = vst [vmem:[#allocation2 + $0x40] sm:$0xff] %v2286_v52  ;;  %443 = vst [vmem:[#allocation2 + $0x78] sm:$0xff] %v2286_v52 }
  0x42   : > { %444 = vst [vmem:[#allocation2 + $0x80] sm:$0xff] %v2286_v52  ;;  %445 = vst [vmem:[#allocation2 + $0xa8] sm:$0xff] %v2286_v52 }
  0x43   : > { %446 = vst [vmem:[#allocation2 + $0x50] sm:$0xff] %v2286_v52  ;;  %447 = vst [vmem:[#allocation2 + $0x30] sm:$0xff] %v2286_v52 }
  0x44   : > { %448 = vst [vmem:[#allocation2 + $0x88] sm:$0xff] %v2286_v52  ;;  %449 = vst [vmem:[#allocation2 + $0x70] sm:$0xff] %v2286_v52 }
  0x45   : > { %450 = vst [vmem:[#allocation2 + $0x8] sm:$0xff] %v2286_v52  ;;  %451 = vst [vmem:[#allocation2 + $0x38] sm:$0xff] %v2286_v52 }
  0x46   : > { %452 = vst [vmem:[#allocation2 + $0x20] sm:$0xff] %v2286_v52  ;;  %453 = vst [vmem:[#allocation2 + $0xb8] sm:$0xff] %v2286_v52 }
  0x47   : > { %454 = vst [vmem:[#allocation2 + $0x58] sm:$0xff] %v2286_v52  ;;  %455 = vst [vmem:[#allocation2 + $0xc8] sm:$0xff] %v2286_v52 }
  0x48   : > { %456 = vst [vmem:[#allocation2 + $0xa0] sm:$0xff] %v2286_v52  ;;  %457 = vst [vmem:[#allocation2 + $0x90] sm:$0xff] %v2286_v52 }
  0x49   : > { %458 = vst [vmem:[#allocation2 + $0x98] sm:$0xff] %v2286_v52  ;;  %459 = vst [vmem:[#allocation2 + $0x18] sm:$0xff] %v2286_v52 }
  0x4a   : > { %460 = vst [vmem:[#allocation2 + $0xc0] sm:$0xff] %v2286_v52  ;;  %461 = vst [vmem:[#allocation2 + $0x68] sm:$0xff] %v2286_v52 }
  0x4b PF: > { %v2170_v53 = vld [vmem:[%s2472_s11 + $0x78] sm:$0xff]   ;;  %v2287_v54 = vmov 0.0   ;;  %vm2288_vm0 = vmmov 0   ;;  %v2173_v57 = vld [vmem:[%s2472_s11 + $0x70] sm:$0xff]   ;;  %v2176_v60 = vld [vmem:[%s2472_s11 + $0x68] sm:$0xff]   ;;  %p1805_p11 = scmp.ne.s32.totalorder %s2276_s17, 2 }
  0x4c   : > { %2057 = vmatprep.subr.bf16.mxu1 %v2287_v54  ;;  %v2171_v55 = vld [vmem:[%s2472_s11 + $0xb8] sm:$0xff]   ;;  %1942 = vmatprep.subr.bf16.mxu0 %v2170_v53  ;;  %v2174_v58 = vld [vmem:[%s2472_s11 + $0xb0] sm:$0xff]   ;;  %v2177_v61 = vld [vmem:[%s2472_s11 + $0xa8] sm:$0xff]  }
  0x4d   : > { %v2172_v56 = vld [vmem:[%s2472_s11 + $0x38] sm:$0xff]   ;;  %2073 = vmatprep.mubr.msk.bf16.mxu1 %vm2288_vm0, %v2287_v54  ;;  %2058 = vmatpush3.bf16.msra.mxu1 %v2171_v55  ;;  %v2175_v59 = vld [vmem:[%s2472_s11 + $0x30] sm:$0xff]   ;;  %v2178_v62 = vld [vmem:[%s2472_s11 + $0x28] sm:$0xff]  }
  0x4e   : > { %1943 = vmatpush3.bf16.msra.mxu0 %v2172_v56  ;;  %2059 = vmatprep.subr.bf16.mxu1 %v2287_v54  ;;  %v2179_v63 = vld [vmem:[%s2472_s11 + $0x60] sm:$0xff]   ;;  %v2182_v2 = vld [vmem:[%s2472_s11 + $0x58] sm:$0xff]   ;;  %v2185_v5 = vld [vmem:[%s2472_s11 + $0x50] sm:$0xff]  }
  0x4f   : > { %1944 = vmatprep.subr.bf16.mxu0 %v2173_v57  ;;  %v2180_v0 = vld [vmem:[%s2472_s11 + $0xa0] sm:$0xff]   ;;  %v2183_v3 = vld [vmem:[%s2472_s11 + $0x98] sm:$0xff]   ;;  %v2186_v6 = vld [vmem:[%s2472_s11 + $0x90] sm:$0xff]  }
  0x50   : > { %v2181_v1 = vld [vmem:[%s2472_s11 + $0x20] sm:$0xff]   ;;  %v2184_v4 = vld [vmem:[%s2472_s11 + $0x18] sm:$0xff]   ;;  %v2187_v7 = vld [vmem:[%s2472_s11 + $0x10] sm:$0xff]  }
  0x51   : > { %2060 = vmatpush3.bf16.msra.mxu1 %v2174_v58  ;;  %v2188_v8 = vld [vmem:[%s2472_s11 + $0x48] sm:$0xff]   ;;  %v2191_v11 = vld [vmem:[%s2472_s11 + $0x40] sm:$0xff]  }
  0x52   : > { %1945 = vmatpush3.bf16.msra.mxu0 %v2175_v59  ;;  %2061 = vmatprep.subr.bf16.mxu1 %v2287_v54  ;;  %v2189_v9 = vld [vmem:[%s2472_s11 + $0x88] sm:$0xff]   ;;  %v2192_v13 = vld [vmem:[%s2472_s11 + $0x80] sm:$0xff]  }
  0x53   : > { %1946 = vmatprep.subr.bf16.mxu0 %v2176_v60  ;;  %v2190_v10 = vld [vmem:[%s2472_s11 + $0x8] sm:$0xff]   ;;  %v2193_v14 = vld [vmem:[%s2472_s11] sm:$0xff]   ;;  %v462_v60 = vld [vmem:[#allocation2 + $0xb0] sm:$0xff] }
  0x54   : > { %v2196_v12 = vld [vmem:[%s2474_s12 + $0x4] ss:$12 sps:$4 sm:$0xff]   ;;  %v2197_v15 = vld [vmem:[%s2474_s12 + $0x8] ss:$12 sps:$4 sm:$0xff]   ;;  %v2194_v16 = vld [vmem:[%s2474_s12] ss:$12 sps:$4 sm:$0xff]  }
  0x55   : > { %2062 = vmatpush3.bf16.msra.mxu1 %v2177_v61  ;;  %972 = vmatprep.mubr.bf16.mxu0 %v2196_v12  ;;  %v2198_v17 = vld [vmem:[%s2474_s12 + $0x1c] ss:$12 sps:$4 sm:$0xff]   ;;  %v2200_v18 = vld [vmem:[%s2474_s12 + $0x20] ss:$12 sps:$4 sm:$0xff]   ;;  %v2201_v19 = vld [vmem:[%s2474_s12 + $0x18] ss:$12 sps:$4 sm:$0xff]  }
  0x56   : > { %1947 = vmatpush3.bf16.msra.mxu0 %v2178_v62  ;;  %2063 = vmatprep.subr.bf16.mxu1 %v2287_v54  ;;  %v2202_v20 = vld [vmem:[%s2474_s12 + $0x34] ss:$12 sps:$4 sm:$0xff]   ;;  %v2204_v21 = vld [vmem:[%s2474_s12 + $0x38] ss:$12 sps:$4 sm:$0xff]   ;;  %v2205_v22 = vld [vmem:[%s2474_s12 + $0x30] ss:$12 sps:$4 sm:$0xff]  }
  0x57   : > { %1948 = vmatprep.subr.bf16.mxu0 %v2179_v63  ;;  %v2206_v23 = vld [vmem:[%s2474_s12 + $0x4c] ss:$12 sps:$4 sm:$0xff]   ;;  %v2208_v24 = vld [vmem:[%s2474_s12 + $0x50] ss:$12 sps:$4 sm:$0xff]   ;;  %v2209_v25 = vld [vmem:[%s2474_s12 + $0x48] ss:$12 sps:$4 sm:$0xff]  }
  0x58   : > { %v2210_v26 = vld [vmem:[%s2474_s12 + $0x64] ss:$12 sps:$4 sm:$0xff]   ;;  %v2212_v27 = vld [vmem:[%s2474_s12 + $0x68] ss:$12 sps:$4 sm:$0xff]   ;;  %v2213_v28 = vld [vmem:[%s2474_s12 + $0x60] ss:$12 sps:$4 sm:$0xff]  }
  0x59   : > { %2064 = vmatpush3.bf16.msra.mxu1 %v2180_v0  ;;  %v2214_v29 = vld [vmem:[%s2474_s12 + $0x7c] ss:$12 sps:$4 sm:$0xff]   ;;  %v2216_v30 = vld [vmem:[%s2474_s12 + $0x80] ss:$12 sps:$4 sm:$0xff]   ;;  %v2217_v31 = vld [vmem:[%s2474_s12 + $0x78] ss:$12 sps:$4 sm:$0xff]  }
  0x5a   : > { %1949 = vmatpush3.bf16.msra.mxu0 %v2181_v1  ;;  %2065 = vmatprep.subr.bf16.mxu1 %v2287_v54  ;;  %v2218_v32 = vld [vmem:[%s2474_s12 + $0x94] ss:$12 sps:$4 sm:$0xff]   ;;  %v2220_v33 = vld [vmem:[%s2474_s12 + $0x98] ss:$12 sps:$4 sm:$0xff]   ;;  %v2221_v34 = vld [vmem:[%s2474_s12 + $0x90] ss:$12 sps:$4 sm:$0xff]  }
  0x5b   : > { %1950 = vmatprep.subr.bf16.mxu0 %v2182_v2  ;;  %v2222_v35 = vld [vmem:[%s2474_s12 + $0xac] ss:$12 sps:$4 sm:$0xff]   ;;  %v2224_v36 = vld [vmem:[%s2474_s12 + $0xb0] ss:$12 sps:$4 sm:$0xff]   ;;  %v2225_v37 = vld [vmem:[%s2474_s12 + $0xa8] ss:$12 sps:$4 sm:$0xff]  }
  0x5c   : > { %v2226_v38 = vld [vmem:[%s2474_s12 + $0xc4] ss:$12 sps:$4 sm:$0xff]   ;;  %v2228_v39 = vld [vmem:[%s2474_s12 + $0xc8] ss:$12 sps:$4 sm:$0xff]   ;;  %v2229_v40 = vld [vmem:[%s2474_s12 + $0xc0] ss:$12 sps:$4 sm:$0xff]  }
  0x5d   : > { %2066 = vmatpush3.bf16.msra.mxu1 %v2183_v3  ;;  %v2230_v41 = vld [vmem:[%s2474_s12 + $0xdc] ss:$12 sps:$4 sm:$0xff]   ;;  %v2232_v42 = vld [vmem:[%s2474_s12 + $0xe0] ss:$12 sps:$4 sm:$0xff]   ;;  %v2233_v43 = vld [vmem:[%s2474_s12 + $0xd8] ss:$12 sps:$4 sm:$0xff]  }
  0x5e   : > { %1951 = vmatpush3.bf16.msra.mxu0 %v2184_v4  ;;  %2067 = vmatprep.subr.bf16.mxu1 %v2287_v54  ;;  %v2234_v44 = vld [vmem:[%s2474_s12 + $0xf4] ss:$12 sps:$4 sm:$0xff]   ;;  %v2236_v45 = vld [vmem:[%s2474_s12 + $0xf8] ss:$12 sps:$4 sm:$0xff]   ;;  %v2237_v46 = vld [vmem:[%s2474_s12 + $0xf0] ss:$12 sps:$4 sm:$0xff]  }
  0x5f   : > { %1952 = vmatprep.subr.bf16.mxu0 %v2185_v5  ;;  %v2238_v47 = vld [vmem:[%s2474_s12 + $0x10c] ss:$12 sps:$4 sm:$0xff]   ;;  %v2240_v48 = vld [vmem:[%s2474_s12 + $0x110] ss:$12 sps:$4 sm:$0xff]   ;;  %v2241_v49 = vld [vmem:[%s2474_s12 + $0x108] ss:$12 sps:$4 sm:$0xff]  }
  0x60   : > { %v2242_v50 = vld [vmem:[%s2474_s12 + $0x124] ss:$12 sps:$4 sm:$0xff]   ;;  %v2244_v51 = vld [vmem:[%s2474_s12 + $0x128] ss:$12 sps:$4 sm:$0xff]   ;;  %v2245_v52 = vld [vmem:[%s2474_s12 + $0x120] ss:$12 sps:$4 sm:$0xff]  }
  0x61   : > { %2068 = vmatpush3.bf16.msra.mxu1 %v2186_v6 }
  0x62   : > { %1953 = vmatpush3.bf16.msra.mxu0 %v2187_v7  ;;  %2069 = vmatprep.subr.bf16.mxu1 %v2287_v54 }
  0x63   : > { %1954 = vmatprep.subr.bf16.mxu0 %v2188_v8 }
  0x65   : > { %2070 = vmatpush3.bf16.msra.mxu1 %v2189_v9 }
  0x66   : > { %1955 = vmatpush3.bf16.msra.mxu0 %v2190_v10  ;;  %2071 = vmatprep.subr.bf16.mxu1 %v2287_v54 }
  0x67   : > { %1956 = vmatprep.subr.bf16.mxu0 %v2191_v11  ;;  %v464_v11 = vld [vmem:[#allocation2 + $0x10] sm:$0xff] }
  0x69   : > { %2072 = vmatpush3.bf16.msra.mxu1 %v2192_v13 }
  0x6a   : > { %1957 = vmatpush3.bf16.msra.mxu0 %v2193_v14 }
  0x6c   : > { %2074 = vmatmul.mubr.bf16.vlgmr.msra.gmra.mxu1 %v2197_v15 }
  0x6d   : > { %973 = vmatmul.mubr.bf16.vlgmr.msra.gmra.mxu0 %v2194_v16  ;;  %2077 = vmatprep.mubr.msk.bf16.mxu1 %vm2288_vm0, %v2287_v54 }
  0x6e   : > { %980 = vmatprep.mubr.bf16.mxu0 %v2198_v17 }
  0x74   : > { %2078 = vmatmul.mubr.bf16.gmra.mxu1 %v2200_v18 }
  0x75   : > { %981 = vmatmul.mubr.bf16.gmra.mxu0 %v2201_v19  ;;  %2081 = vmatprep.mubr.msk.bf16.mxu1 %vm2288_vm0, %v2287_v54  ;;  %v465_v19 = vld [vmem:[#allocation2 + $0x48] sm:$0xff] }
  0x76   : > { %988 = vmatprep.mubr.bf16.mxu0 %v2202_v20 }
  0x7c   : > { %2082 = vmatmul.mubr.bf16.gmra.mxu1 %v2204_v21 }
  0x7d   : > { %989 = vmatmul.mubr.bf16.gmra.mxu0 %v2205_v22  ;;  %2085 = vmatprep.mubr.msk.bf16.mxu1 %vm2288_vm0, %v2287_v54 }
  0x7e   : > { %996 = vmatprep.mubr.bf16.mxu0 %v2206_v23 }
  0x84   : > { %2086 = vmatmul.mubr.bf16.gmra.mxu1 %v2208_v24 }
  0x85   : > { %997 = vmatmul.mubr.bf16.gmra.mxu0 %v2209_v25  ;;  %2089 = vmatprep.mubr.msk.bf16.mxu1 %vm2288_vm0, %v2287_v54 }
  0x86   : > { %1004 = vmatprep.mubr.bf16.mxu0 %v2210_v26 }
  0x8c   : > { %2090 = vmatmul.mubr.bf16.gmra.mxu1 %v2212_v27  ;;  %v466_v27 = vld [vmem:[#allocation2 + $0x60] sm:$0xff] }
  0x8d   : > { %1005 = vmatmul.mubr.bf16.gmra.mxu0 %v2213_v28  ;;  %2093 = vmatprep.mubr.msk.bf16.mxu1 %vm2288_vm0, %v2287_v54 }
  0x8e   : > { %1012 = vmatprep.mubr.bf16.mxu0 %v2214_v29 }
  0x94   : > { %2094 = vmatmul.mubr.bf16.gmra.mxu1 %v2216_v30 }
  0x95   : > { %1013 = vmatmul.mubr.bf16.gmra.mxu0 %v2217_v31  ;;  %2097 = vmatprep.mubr.msk.bf16.mxu1 %vm2288_vm0, %v2287_v54 }
  0x96   : > { %1020 = vmatprep.mubr.bf16.mxu0 %v2218_v32 }
  0x9c   : > { %2098 = vmatmul.mubr.bf16.gmra.mxu1 %v2220_v33 }
  0x9d   : > { %1021 = vmatmul.mubr.bf16.gmra.mxu0 %v2221_v34  ;;  %2101 = vmatprep.mubr.msk.bf16.mxu1 %vm2288_vm0, %v2287_v54 }
  0x9e   : > { %1028 = vmatprep.mubr.bf16.mxu0 %v2222_v35  ;;  %v467_v35 = vld [vmem:[#allocation2 + $0x28] sm:$0xff] }
  0xa4   : > { %2102 = vmatmul.mubr.bf16.gmra.mxu1 %v2224_v36 }
  0xa5   : > { %1029 = vmatmul.mubr.bf16.gmra.mxu0 %v2225_v37  ;;  %2105 = vmatprep.mubr.msk.bf16.mxu1 %vm2288_vm0, %v2287_v54 }
  0xa6   : > { %1036 = vmatprep.mubr.bf16.mxu0 %v2226_v38 }
  0xac   : > { %2106 = vmatmul.mubr.bf16.gmra.mxu1 %v2228_v39 }
  0xad   : > { %1037 = vmatmul.mubr.bf16.gmra.mxu0 %v2229_v40  ;;  %2109 = vmatprep.mubr.msk.bf16.mxu1 %vm2288_vm0, %v2287_v54 }
  0xae   : > { %1044 = vmatprep.mubr.bf16.mxu0 %v2230_v41 }
  0xb4   : > { %2110 = vmatmul.mubr.bf16.gmra.mxu1 %v2232_v42 }
  0xb5   : > { %1045 = vmatmul.mubr.bf16.gmra.mxu0 %v2233_v43  ;;  %2113 = vmatprep.mubr.msk.bf16.mxu1 %vm2288_vm0, %v2287_v54  ;;  %v468_v43 = vld [vmem:[#allocation2 + $0x40] sm:$0xff] }
  0xb6   : > { %1052 = vmatprep.mubr.bf16.mxu0 %v2234_v44 }
  0xbc   : > { %2114 = vmatmul.mubr.bf16.gmra.mxu1 %v2236_v45 }
  0xbd   : > { %1053 = vmatmul.mubr.bf16.gmra.mxu0 %v2237_v46  ;;  %2117 = vmatprep.mubr.msk.bf16.mxu1 %vm2288_vm0, %v2287_v54 }
  0xbe   : > { %1060 = vmatprep.mubr.bf16.mxu0 %v2238_v47 }
  0xc4   : > { %2118 = vmatmul.mubr.bf16.gmra.mxu1 %v2240_v48 }
  0xc5   : > { %1061 = vmatmul.mubr.bf16.gmra.mxu0 %v2241_v49  ;;  %2121 = vmatprep.mubr.msk.bf16.mxu1 %vm2288_vm0, %v2287_v54  ;;  %v463_v54 = vld [vmem:[#allocation2] sm:$0xff] }
  0xc6   : > { %1068 = vmatprep.mubr.bf16.mxu0 %v2242_v50 }
  0xcc   : > { %2122 = vmatmul.mubr.bf16.gmra.mxu1 %v2244_v51  ;;  %v469_v51 = vld [vmem:[#allocation2 + $0x78] sm:$0xff] }
  0xcd   : > { %1069 = vmatmul.mubr.bf16.gmra.mxu0 %v2245_v52 }
 0x12c   : > { %v1111_v53 = vpop.f32.mrf.mxu1 }
 0x12d   : > { %v1958_v55 = vpop.f32.mrf.mxu0 }
 0x12e   : > { %v2075_v56 = vpop.f32.mrf.mxu1 }
 0x12f   : > { %v1959_v57 = vpop.f32.mrf.mxu0 }
 0x130   : > { %v1960_v58 = vadd.f32 %v1959_v57, %v1958_v55  ;;  %v1114_v59 = vpop.f32.mrf.mxu1 }
 0x131   : > { %v1961_v61 = vpop.f32.mrf.mxu0 }
 0x132   : > { %v1112_v62 = vadd.f32 %v1960_v58, %v1111_v53  ;;  %v2076_v63 = vpop.f32.mrf.mxu1 }
 0x133   : > { %v1962_v0 = vpop.f32.mrf.mxu0 }
 0x134   : > { %v1214_v1 = vadd.f32 %v1112_v62, %v462_v60  ;;  %v1963_v2 = vadd.f32 %v1962_v0, %v1961_v61  ;;  %v1119_v3 = vpop.f32.mrf.mxu1  ;;  %v470_v60 = vld [vmem:[#allocation2 + $0x80] sm:$0xff] }
 0x135   : > { %v1964_v4 = vpop.f32.mrf.mxu0 }
 0x136   : > { %1240 = vst [vmem:[#allocation2 + $0xb0] sm:$0xff] %v1214_v1  ;;  %v1115_v5 = vadd.f32 %v1963_v2, %v1114_v59  ;;  %v2079_v6 = vpop.f32.mrf.mxu1 }
 0x137   : > { %v1965_v7 = vpop.f32.mrf.mxu0 }
 0x138   : > { %v1215_v8 = vadd.f32 %v1115_v5, %v463_v54  ;;  %v1966_v9 = vadd.f32 %v1965_v7, %v1964_v4  ;;  %v1122_v10 = vpop.f32.mrf.mxu1  ;;  %v471_v54 = vld [vmem:[#allocation2 + $0xa8] sm:$0xff] }
 0x139   : > { %v1967_v12 = vpop.f32.mrf.mxu0 }
 0x13a   : > { %1241 = vst [vmem:[#allocation2] sm:$0xff] %v1215_v8  ;;  %v1120_v13 = vadd.f32 %v1966_v9, %v1119_v3  ;;  %v2080_v14 = vpop.f32.mrf.mxu1 }
 0x13b   : > { %v1968_v15 = vpop.f32.mrf.mxu0 }
 0x13c   : > { %v1216_v16 = vadd.f32 %v1120_v13, %v464_v11  ;;  %v1969_v17 = vadd.f32 %v1968_v15, %v1967_v12  ;;  %v1127_v18 = vpop.f32.mrf.mxu1  ;;  %v472_v11 = vld [vmem:[#allocation2 + $0x50] sm:$0xff] }
 0x13d   : > { %v1970_v20 = vpop.f32.mrf.mxu0 }
 0x13e   : > { %1242 = vst [vmem:[#allocation2 + $0x10] sm:$0xff] %v1216_v16  ;;  %v1123_v21 = vadd.f32 %v1969_v17, %v1122_v10  ;;  %v2083_v22 = vpop.f32.mrf.mxu1 }
 0x13f   : > { %v1971_v23 = vpop.f32.mrf.mxu0 }
 0x140   : > { %v1217_v24 = vadd.f32 %v1123_v21, %v465_v19  ;;  %v1972_v25 = vadd.f32 %v1971_v23, %v1970_v20  ;;  %v1130_v26 = vpop.f32.mrf.mxu1  ;;  %v473_v19 = vld [vmem:[#allocation2 + $0x30] sm:$0xff] }
 0x141   : > { %v1973_v28 = vpop.f32.mrf.mxu0 }
 0x142   : > { %1243 = vst [vmem:[#allocation2 + $0x48] sm:$0xff] %v1217_v24  ;;  %v1128_v29 = vadd.f32 %v1972_v25, %v1127_v18  ;;  %v2084_v30 = vpop.f32.mrf.mxu1 }
 0x143   : > { %v1974_v31 = vpop.f32.mrf.mxu0 }
 0x144   : > { %v1218_v32 = vadd.f32 %v1128_v29, %v466_v27  ;;  %v1975_v33 = vadd.f32 %v1974_v31, %v1973_v28  ;;  %v1135_v34 = vpop.f32.mrf.mxu1  ;;  %v474_v27 = vld [vmem:[#allocation2 + $0x88] sm:$0xff] }
 0x145   : > { %v1976_v36 = vpop.f32.mrf.mxu0 }
 0x146   : > { %1244 = vst [vmem:[#allocation2 + $0x60] sm:$0xff] %v1218_v32  ;;  %v1131_v37 = vadd.f32 %v1975_v33, %v1130_v26  ;;  %v2087_v38 = vpop.f32.mrf.mxu1 }
 0x147   : > { %v1977_v39 = vpop.f32.mrf.mxu0 }
 0x148   : > { %v1219_v40 = vadd.f32 %v1131_v37, %v467_v35  ;;  %v1978_v41 = vadd.f32 %v1977_v39, %v1976_v36  ;;  %v1138_v42 = vpop.f32.mrf.mxu1  ;;  %v475_v35 = vld [vmem:[#allocation2 + $0x70] sm:$0xff] }
 0x149   : > { %v1979_v44 = vpop.f32.mrf.mxu0 }
 0x14a   : > { %1245 = vst [vmem:[#allocation2 + $0x28] sm:$0xff] %v1219_v40  ;;  %v1136_v45 = vadd.f32 %v1978_v41, %v1135_v34  ;;  %v2088_v46 = vpop.f32.mrf.mxu1 }
 0x14b   : > { %v1980_v47 = vpop.f32.mrf.mxu0 }
 0x14c   : > { %v1220_v48 = vadd.f32 %v1136_v45, %v468_v43  ;;  %v1981_v49 = vadd.f32 %v1980_v47, %v1979_v44  ;;  %v1143_v50 = vpop.f32.mrf.mxu1  ;;  %v476_v43 = vld [vmem:[#allocation2 + $0x8] sm:$0xff] }
 0x14d   : > { %v1982_v52 = vpop.f32.mrf.mxu0 }
 0x14e   : > { %1246 = vst [vmem:[#allocation2 + $0x40] sm:$0xff] %v1220_v48  ;;  %v1139_v53 = vadd.f32 %v1981_v49, %v1138_v42  ;;  %v2091_v55 = vpop.f32.mrf.mxu1 }
 0x14f   : > { %v1983_v56 = vpop.f32.mrf.mxu0 }
 0x150   : > { %v1221_v57 = vadd.f32 %v1139_v53, %v469_v51  ;;  %v1984_v58 = vadd.f32 %v1983_v56, %v1982_v52  ;;  %v1146_v59 = vpop.f32.mrf.mxu1  ;;  %v477_v51 = vld [vmem:[#allocation2 + $0x38] sm:$0xff] }
 0x151   : > { %v1985_v61 = vpop.f32.mrf.mxu0 }
 0x152   : > { %1247 = vst [vmem:[#allocation2 + $0x78] sm:$0xff] %v1221_v57  ;;  %v1144_v62 = vadd.f32 %v1984_v58, %v1143_v50  ;;  %v2092_v63 = vpop.f32.mrf.mxu1 }
 0x153   : > { %v1986_v0 = vpop.f32.mrf.mxu0 }
 0x154   : > { %v1222_v1 = vadd.f32 %v1144_v62, %v470_v60  ;;  %v1987_v2 = vadd.f32 %v1986_v0, %v1985_v61  ;;  %v1151_v3 = vpop.f32.mrf.mxu1  ;;  %v478_v60 = vld [vmem:[#allocation2 + $0x20] sm:$0xff] }
 0x155   : > { %v1988_v4 = vpop.f32.mrf.mxu0 }
 0x156   : > { %1248 = vst [vmem:[#allocation2 + $0x80] sm:$0xff] %v1222_v1  ;;  %v1147_v5 = vadd.f32 %v1987_v2, %v1146_v59  ;;  %v2095_v6 = vpop.f32.mrf.mxu1 }
 0x157   : > { %v1989_v7 = vpop.f32.mrf.mxu0 }
 0x158   : > { %v1223_v8 = vadd.f32 %v1147_v5, %v471_v54  ;;  %v1990_v9 = vadd.f32 %v1989_v7, %v1988_v4  ;;  %v1154_v10 = vpop.f32.mrf.mxu1  ;;  %v479_v54 = vld [vmem:[#allocation2 + $0xb8] sm:$0xff] }
 0x159   : > { %v1991_v12 = vpop.f32.mrf.mxu0 }
 0x15a   : > { %1249 = vst [vmem:[#allocation2 + $0xa8] sm:$0xff] %v1223_v8  ;;  %v1152_v13 = vadd.f32 %v1990_v9, %v1151_v3  ;;  %v2096_v14 = vpop.f32.mrf.mxu1 }
 0x15b   : > { %v1992_v15 = vpop.f32.mrf.mxu0 }
 0x15c   : > { %v1224_v16 = vadd.f32 %v1152_v13, %v472_v11  ;;  %v1993_v17 = vadd.f32 %v1992_v15, %v1991_v12  ;;  %v1159_v18 = vpop.f32.mrf.mxu1  ;;  %v480_v11 = vld [vmem:[#allocation2 + $0x58] sm:$0xff] }
 0x15d   : > { %v1994_v20 = vpop.f32.mrf.mxu0 }
 0x15e   : > { %1250 = vst [vmem:[#allocation2 + $0x50] sm:$0xff] %v1224_v16  ;;  %v1155_v21 = vadd.f32 %v1993_v17, %v1154_v10  ;;  %v2099_v22 = vpop.f32.mrf.mxu1 }
 0x15f   : > { %v1995_v23 = vpop.f32.mrf.mxu0 }
 0x160   : > { %v1225_v24 = vadd.f32 %v1155_v21, %v473_v19  ;;  %v1996_v25 = vadd.f32 %v1995_v23, %v1994_v20  ;;  %v1162_v26 = vpop.f32.mrf.mxu1  ;;  %v481_v19 = vld [vmem:[#allocation2 + $0xc8] sm:$0xff] }
 0x161   : > { %v1997_v28 = vpop.f32.mrf.mxu0 }
 0x162   : > { %1251 = vst [vmem:[#allocation2 + $0x30] sm:$0xff] %v1225_v24  ;;  %v1160_v29 = vadd.f32 %v1996_v25, %v1159_v18  ;;  %v2100_v30 = vpop.f32.mrf.mxu1 }
 0x163   : > { %v1998_v31 = vpop.f32.mrf.mxu0 }
 0x164   : > { %v1226_v32 = vadd.f32 %v1160_v29, %v474_v27  ;;  %v1999_v33 = vadd.f32 %v1998_v31, %v1997_v28  ;;  %v1167_v34 = vpop.f32.mrf.mxu1  ;;  %v482_v27 = vld [vmem:[#allocation2 + $0xa0] sm:$0xff] }
 0x165   : > { %v2000_v36 = vpop.f32.mrf.mxu0 }
 0x166   : > { %1252 = vst [vmem:[#allocation2 + $0x88] sm:$0xff] %v1226_v32  ;;  %v1163_v37 = vadd.f32 %v1999_v33, %v1162_v26  ;;  %v2103_v38 = vpop.f32.mrf.mxu1 }
 0x167   : > { %v2001_v39 = vpop.f32.mrf.mxu0 }
 0x168   : > { %v1227_v40 = vadd.f32 %v1163_v37, %v475_v35  ;;  %v2002_v41 = vadd.f32 %v2001_v39, %v2000_v36  ;;  %v1170_v42 = vpop.f32.mrf.mxu1  ;;  %v483_v35 = vld [vmem:[#allocation2 + $0x90] sm:$0xff] }
 0x169   : > { %v2003_v44 = vpop.f32.mrf.mxu0 }
 0x16a   : > { %1253 = vst [vmem:[#allocation2 + $0x70] sm:$0xff] %v1227_v40  ;;  %v1168_v45 = vadd.f32 %v2002_v41, %v1167_v34  ;;  %v2104_v46 = vpop.f32.mrf.mxu1 }
 0x16b   : > { %v2004_v47 = vpop.f32.mrf.mxu0 }
 0x16c   : > { %v1228_v48 = vadd.f32 %v1168_v45, %v476_v43  ;;  %v2005_v49 = vadd.f32 %v2004_v47, %v2003_v44  ;;  %v1175_v50 = vpop.f32.mrf.mxu1  ;;  %v484_v43 = vld [vmem:[#allocation2 + $0x98] sm:$0xff] }
 0x16d   : > { %v2006_v52 = vpop.f32.mrf.mxu0 }
 0x16e   : > { %1254 = vst [vmem:[#allocation2 + $0x8] sm:$0xff] %v1228_v48  ;;  %v1171_v53 = vadd.f32 %v2005_v49, %v1170_v42  ;;  %v2107_v55 = vpop.f32.mrf.mxu1 }
 0x16f   : > { %v2007_v56 = vpop.f32.mrf.mxu0 }
 0x170   : > { %v1229_v57 = vadd.f32 %v1171_v53, %v477_v51  ;;  %v2008_v58 = vadd.f32 %v2007_v56, %v2006_v52  ;;  %v1178_v59 = vpop.f32.mrf.mxu1  ;;  %v485_v51 = vld [vmem:[#allocation2 + $0x18] sm:$0xff] }
 0x171   : > { %v2009_v61 = vpop.f32.mrf.mxu0 }
 0x172   : > { %1255 = vst [vmem:[#allocation2 + $0x38] sm:$0xff] %v1229_v57  ;;  %v1176_v62 = vadd.f32 %v2008_v58, %v1175_v50  ;;  %v2108_v63 = vpop.f32.mrf.mxu1 }
 0x173   : > { %v2010_v0 = vpop.f32.mrf.mxu0 }
 0x174   : > { %v1230_v1 = vadd.f32 %v1176_v62, %v478_v60  ;;  %v2011_v2 = vadd.f32 %v2010_v0, %v2009_v61  ;;  %v1183_v3 = vpop.f32.mrf.mxu1  ;;  %v486_v60 = vld [vmem:[#allocation2 + $0xc0] sm:$0xff] }
 0x175   : > { %v2012_v4 = vpop.f32.mrf.mxu0 }
 0x176   : > { %1256 = vst [vmem:[#allocation2 + $0x20] sm:$0xff] %v1230_v1  ;;  %v1179_v5 = vadd.f32 %v2011_v2, %v1178_v59  ;;  %v2111_v6 = vpop.f32.mrf.mxu1 }
 0x177   : > { %v2013_v7 = vpop.f32.mrf.mxu0 }
 0x178   : > { %v1231_v8 = vadd.f32 %v1179_v5, %v479_v54  ;;  %v2014_v9 = vadd.f32 %v2013_v7, %v2012_v4  ;;  %v1186_v10 = vpop.f32.mrf.mxu1 }
 0x179   : > { %v2015_v12 = vpop.f32.mrf.mxu0 }
 0x17a   : > { %1257 = vst [vmem:[#allocation2 + $0xb8] sm:$0xff] %v1231_v8  ;;  %v1184_v13 = vadd.f32 %v2014_v9, %v1183_v3  ;;  %v2112_v14 = vpop.f32.mrf.mxu1  ;;  %v487_v3 = vld [vmem:[#allocation2 + $0x68] sm:$0xff] }
 0x17b   : > { %v2016_v15 = vpop.f32.mrf.mxu0 }
 0x17c   : > { %v1232_v16 = vadd.f32 %v1184_v13, %v480_v11  ;;  %v2017_v17 = vadd.f32 %v2016_v15, %v2015_v12  ;;  %v1191_v18 = vpop.f32.mrf.mxu1 }
 0x17d   : > { %v2018_v20 = vpop.f32.mrf.mxu0 }
 0x17e   : > { %1258 = vst [vmem:[#allocation2 + $0x58] sm:$0xff] %v1232_v16  ;;  %v1187_v21 = vadd.f32 %v2017_v17, %v1186_v10  ;;  %v2115_v22 = vpop.f32.mrf.mxu1 }
 0x17f   : > { %v2019_v23 = vpop.f32.mrf.mxu0 }
 0x180   : > { %v1233_v24 = vadd.f32 %v1187_v21, %v481_v19  ;;  %v2020_v25 = vadd.f32 %v2019_v23, %v2018_v20  ;;  %v1194_v26 = vpop.f32.mrf.mxu1 }
 0x181   : > { %v2021_v28 = vpop.f32.mrf.mxu0 }
 0x182   : > { %1259 = vst [vmem:[#allocation2 + $0xc8] sm:$0xff] %v1233_v24  ;;  %v1192_v29 = vadd.f32 %v2020_v25, %v1191_v18  ;;  %v2116_v30 = vpop.f32.mrf.mxu1 }
 0x183   : > { %v2022_v31 = vpop.f32.mrf.mxu0 }
 0x184   : > { %v1234_v32 = vadd.f32 %v1192_v29, %v482_v27  ;;  %v2023_v33 = vadd.f32 %v2022_v31, %v2021_v28  ;;  %v1199_v34 = vpop.f32.mrf.mxu1 }
 0x185   : > { %v2024_v36 = vpop.f32.mrf.mxu0 }
 0x186   : > { %1260 = vst [vmem:[#allocation2 + $0xa0] sm:$0xff] %v1234_v32  ;;  %v1195_v37 = vadd.f32 %v2023_v33, %v1194_v26  ;;  %v2119_v38 = vpop.f32.mrf.mxu1 }
 0x187   : > { %v2025_v39 = vpop.f32.mrf.mxu0 }
 0x188   : > { %v1235_v40 = vadd.f32 %v1195_v37, %v483_v35  ;;  %v2026_v41 = vadd.f32 %v2025_v39, %v2024_v36  ;;  %v1202_v42 = vpop.f32.mrf.mxu1 }
 0x189   : > { %v2027_v44 = vpop.f32.mrf.mxu0 }
 0x18a   : > { %1261 = vst [vmem:[#allocation2 + $0x90] sm:$0xff] %v1235_v40  ;;  %v1200_v45 = vadd.f32 %v2026_v41, %v1199_v34  ;;  %v2120_v46 = vpop.f32.mrf.mxu1 }
 0x18b   : > { %v2028_v47 = vpop.f32.mrf.mxu0 }
 0x18c   : > { %v1236_v48 = vadd.f32 %v1200_v45, %v484_v43  ;;  %v2029_v49 = vadd.f32 %v2028_v47, %v2027_v44  ;;  %v1207_v50 = vpop.f32.mrf.mxu1 }
 0x18d   : > { %v2030_v52 = vpop.f32.mrf.mxu0 }
 0x18e   : > { %1262 = vst [vmem:[#allocation2 + $0x98] sm:$0xff] %v1236_v48  ;;  %v1203_v53 = vadd.f32 %v2029_v49, %v1202_v42  ;;  %v2123_v55 = vpop.f32.mrf.mxu1 }
 0x18f   : > { %v2031_v56 = vpop.f32.mrf.mxu0 }
 0x190   : > { %v1237_v57 = vadd.f32 %v1203_v53, %v485_v51  ;;  %v2032_v58 = vadd.f32 %v2031_v56, %v2030_v52  ;;  %v1210_v59 = vpop.f32.mrf.mxu1 }
 0x191   : > { %v2033_v61 = vpop.f32.mrf.mxu0 }
 0x192   : > { %1263 = vst [vmem:[#allocation2 + $0x18] sm:$0xff] %v1237_v57  ;;  %v1208_v62 = vadd.f32 %v2032_v58, %v1207_v50  ;;  %v2124_v63 = vpop.f32.mrf.mxu1 }
 0x193   : > { %v2034_v0 = vpop.f32.mrf.mxu0 }
 0x194   : > { %v1238_v1 = vadd.f32 %v1208_v62, %v486_v60  ;;  %v2035_v2 = vadd.f32 %v2034_v0, %v2033_v61 }
 0x196   : > { %1264 = vst [vmem:[#allocation2 + $0xc0] sm:$0xff] %v1238_v1  ;;  %v1211_v54 = vadd.f32 %v2035_v2, %v1210_v59  ;;  %1269 = sbr.rel (%p1805_p11) target bundleno = 477 (0x1dd), region = 62 }
 0x198   : > { %v1239_v4 = vadd.f32 %v1211_v54, %v487_v3 }
 0x19a   : > { %1265 = vst [vmem:[#allocation2 + $0x68] sm:$0xff] %v1239_v4 }
 0x19b   : > { %v1270_v5 = vld [vmem:[#allocation2 + $0xb0] sm:$0xff]  ;;  %v1271_v6 = vld [vmem:[#allocation2] sm:$0xff]  ;;  %v1273_v12 = vld [vmem:[#allocation2 + $0x48] sm:$0xff] }
 0x19c   : > { %v1272_v7 = vld [vmem:[#allocation2 + $0x10] sm:$0xff]  ;;  %v1868_v8 = vpack.c.bf16 %v1271_v6, %v1270_v5  ;;  %v1426_v9 = vadd.f32 %v1271_v6, %v1270_v5  ;;  %v1458_v10 = vmul.f32 %v1270_v5, %v1270_v5  ;;  %v1459_v11 = vmul.f32 %v1271_v6, %v1271_v6  ;;  %v1274_v13 = vld [vmem:[#allocation2 + $0x60] sm:$0xff]  ;;  %v1275_v14 = vld [vmem:[#allocation2 + $0x28] sm:$0xff] }
 0x19d   : > { %v1873_v15 = vpack.c.bf16 %v1273_v12, %v1272_v7  ;;  %v1460_v16 = vmul.f32 %v1272_v7, %v1272_v7  ;;  %v1878_v17 = vpack.c.bf16 %v1275_v14, %v1274_v13  ;;  %v1276_v18 = vld [vmem:[#allocation2 + $0x40] sm:$0xff]  ;;  %v1461_v21 = vmul.f32 %v1273_v12, %v1273_v12  ;;  %v1277_v22 = vld [vmem:[#allocation2 + $0x78] sm:$0xff]  ;;  %v1279_v24 = vld [vmem:[#allocation2 + $0xa8] sm:$0xff] }
 0x19e   : > { %1869 = vst [vmem:[%s2637_s2] sm:$0xff] %v1868_v8   ;;  %v1484_v19 = vadd.f32 %v1459_v11, %v1458_v10  ;;  %v1427_v20 = vadd.f32 %v1426_v9, %v1272_v7  ;;  %v1278_v23 = vld [vmem:[#allocation2 + $0x80] sm:$0xff]  ;;  %v1883_v25 = vpack.c.bf16 %v1277_v22, %v1276_v18  ;;  %v1280_v27 = vld [vmem:[#allocation2 + $0x50] sm:$0xff]  ;;  %v1462_v30 = vmul.f32 %v1274_v13, %v1274_v13  ;;  %v1282_v32 = vld [vmem:[#allocation2 + $0x88] sm:$0xff] }
 0x19f   : > { %1930 = vst [vmem:[%s2637_s2 + $0x8] sm:$0xff] %v1873_v15   ;;  %1931 = vst [vmem:[%s2637_s2 + $0x10] sm:$0xff] %v1878_v17   ;;  %v1888_v26 = vpack.c.bf16 %v1279_v24, %v1278_v23  ;;  %v1281_v31 = vld [vmem:[#allocation2 + $0x30] sm:$0xff]  ;;  %v1284_v36 = vld [vmem:[#allocation2 + $0x8] sm:$0xff]  ;;  %v1463_v39 = vmul.f32 %v1275_v14, %v1275_v14  ;;  %v1464_v48 = vmul.f32 %v1276_v18, %v1276_v18 }
 0x1a0   : > { %v1428_v28 = vadd.f32 %v1427_v20, %v1273_v12  ;;  %v1485_v29 = vadd.f32 %v1484_v19, %v1460_v16  ;;  %v1283_v33 = vld [vmem:[#allocation2 + $0x70] sm:$0xff]  ;;  %1932 = vst [vmem:[%s2637_s2 + $0x18] sm:$0xff] %v1883_v25   ;;  %v1893_v34 = vpack.c.bf16 %v1281_v31, %v1280_v27  ;;  %v1285_v40 = vld [vmem:[#allocation2 + $0x38] sm:$0xff]  ;;  %v1286_v41 = vld [vmem:[#allocation2 + $0x20] sm:$0xff]  ;;  %v1465_v58 = vmul.f32 %v1277_v22, %v1277_v22 }
 0x1a1   : > { %1933 = vst [vmem:[%s2637_s2 + $0x20] sm:$0xff] %v1888_v26   ;;  %v1898_v35 = vpack.c.bf16 %v1283_v33, %v1282_v32  ;;  %v1287_v42 = vld [vmem:[#allocation2 + $0xb8] sm:$0xff]  ;;  %v1903_v43 = vpack.c.bf16 %v1285_v40, %v1284_v36  ;;  %v1289_v49 = vld [vmem:[#allocation2 + $0xc8] sm:$0xff]  ;;  %v1290_v50 = vld [vmem:[#allocation2 + $0xa0] sm:$0xff]  ;;  %v1466_v2 = vmul.f32 %v1278_v23, %v1278_v23  ;;  %v1467_v4 = vmul.f32 %v1279_v24, %v1279_v24 }
 0x1a2   : > { %v1486_v37 = vadd.f32 %v1485_v29, %v1461_v21  ;;  %v1429_v38 = vadd.f32 %v1428_v28, %v1274_v13  ;;  %1934 = vst [vmem:[%s2637_s2 + $0x28] sm:$0xff] %v1893_v34   ;;  %v1908_v44 = vpack.c.bf16 %v1287_v42, %v1286_v41  ;;  %v1288_v45 = vld [vmem:[#allocation2 + $0x58] sm:$0xff]  ;;  %v1291_v51 = vld [vmem:[#allocation2 + $0x90] sm:$0xff]  ;;  %v1294_v60 = vld [vmem:[#allocation2 + $0xc0] sm:$0xff]  ;;  %v1468_v7 = vmul.f32 %v1280_v27, %v1280_v27 }
 0x1a3   : > { %1935 = vst [vmem:[%s2637_s2 + $0x30] sm:$0xff] %v1898_v35   ;;  %1936 = vst [vmem:[%s2637_s2 + $0x38] sm:$0xff] %v1903_v43   ;;  %v1913_v52 = vpack.c.bf16 %v1289_v49, %v1288_v45  ;;  %v1918_v53 = vpack.c.bf16 %v1291_v51, %v1290_v50  ;;  %v1292_v55 = vld [vmem:[#allocation2 + $0x98] sm:$0xff]  ;;  %v1295_v61 = vld [vmem:[#allocation2 + $0x68] sm:$0xff]  ;;  %v1469_v10 = vmul.f32 %v1281_v31, %v1281_v31 }
 0x1a4   : > { %v1430_v46 = vadd.f32 %v1429_v38, %v1275_v14  ;;  %v1487_v47 = vadd.f32 %v1486_v37, %v1462_v30  ;;  %1937 = vst [vmem:[%s2637_s2 + $0x40] sm:$0xff] %v1908_v44   ;;  %v1293_v59 = vld [vmem:[#allocation2 + $0x18] sm:$0xff]  ;;  %v1928_v63 = vpack.c.bf16 %v1295_v61, %v1294_v60  ;;  %v1470_v13 = vmul.f32 %v1282_v32, %v1282_v32 }
 0x1a5   : > { %1938 = vst [vmem:[%s2637_s2 + $0x48] sm:$0xff] %v1913_v52   ;;  %1939 = vst [vmem:[%s2637_s2 + $0x50] sm:$0xff] %v1918_v53   ;;  %v1923_v62 = vpack.c.bf16 %v1293_v59, %v1292_v55  ;;  %v1471_v16 = vmul.f32 %v1283_v33, %v1283_v33  ;;  %v1472_v19 = vmul.f32 %v1284_v36, %v1284_v36 }
 0x1a6   : > { %v1488_v56 = vadd.f32 %v1487_v47, %v1463_v39  ;;  %v1431_v57 = vadd.f32 %v1430_v46, %v1276_v18  ;;  %1941 = vst [vmem:[%s2637_s2 + $0x60] sm:$0xff] %v1928_v63   ;;  %v1475_v29 = vmul.f32 %v1287_v42, %v1287_v42  ;;  %v1477_v37 = vmul.f32 %v1289_v49, %v1289_v49 }
 0x1a7   : > { %1940 = vst [vmem:[%s2637_s2 + $0x58] sm:$0xff] %v1923_v62   ;;  %v1479_v44 = vmul.f32 %v1291_v51, %v1291_v51  ;;  %v1481_v52 = vmul.f32 %v1293_v59, %v1293_v59 }
 0x1a8   : > { %v1432_v0 = vadd.f32 %v1431_v57, %v1277_v22  ;;  %v1489_v1 = vadd.f32 %v1488_v56, %v1464_v48  ;;  %v1473_v22 = vmul.f32 %v1285_v40, %v1285_v40 }
 0x1aa   : > { %v1490_v3 = vadd.f32 %v1489_v1, %v1465_v58  ;;  %v1433_v54 = vadd.f32 %v1432_v0, %v1278_v23  ;;  %v1483_v58 = vmul.f32 %v1295_v61, %v1295_v61 }
 0x1ac   : > { %v1434_v5 = vadd.f32 %v1433_v54, %v1279_v24  ;;  %v1491_v6 = vadd.f32 %v1490_v3, %v1466_v2  ;;  %v1474_v24 = vmul.f32 %v1286_v41, %v1286_v41 }
 0x1ae   : > { %v1492_v8 = vadd.f32 %v1491_v6, %v1467_v4  ;;  %v1435_v9 = vadd.f32 %v1434_v5, %v1280_v27 }
 0x1b0   : > { %v1436_v11 = vadd.f32 %v1435_v9, %v1281_v31  ;;  %v1493_v12 = vadd.f32 %v1492_v8, %v1468_v7  ;;  %v1476_v31 = vmul.f32 %v1288_v45, %v1288_v45 }
 0x1b2   : > { %v1494_v14 = vadd.f32 %v1493_v12, %v1469_v10  ;;  %v1437_v15 = vadd.f32 %v1436_v11, %v1282_v32 }
 0x1b4   : > { %v1438_v17 = vadd.f32 %v1437_v15, %v1283_v33  ;;  %v1495_v18 = vadd.f32 %v1494_v14, %v1470_v13  ;;  %v1478_v33 = vmul.f32 %v1290_v50, %v1290_v50 }
 0x1b6   : > { %v1496_v20 = vadd.f32 %v1495_v18, %v1471_v16  ;;  %v1439_v21 = vadd.f32 %v1438_v17, %v1284_v36 }
 0x1b8   : > { %v1440_v23 = vadd.f32 %v1439_v21, %v1285_v40  ;;  %v1497_v25 = vadd.f32 %v1496_v20, %v1472_v19  ;;  %v1480_v40 = vmul.f32 %v1292_v55, %v1292_v55 }
 0x1ba   : > { %v1498_v26 = vadd.f32 %v1497_v25, %v1473_v22  ;;  %v1441_v28 = vadd.f32 %v1440_v23, %v1286_v41 }
 0x1bc   : > { %v1442_v27 = vadd.f32 %v1441_v28, %v1287_v42  ;;  %v1499_v30 = vadd.f32 %v1498_v26, %v1474_v24  ;;  %v1482_v42 = vmul.f32 %v1294_v60, %v1294_v60 }
 0x1be   : > { %v1500_v34 = vadd.f32 %v1499_v30, %v1475_v29  ;;  %v1443_v35 = vadd.f32 %v1442_v27, %v1288_v45 }
 0x1c0   : > { %v1444_v32 = vadd.f32 %v1443_v35, %v1289_v49  ;;  %v1501_v38 = vadd.f32 %v1500_v34, %v1476_v31 }
 0x1c2   : > { %v1502_v39 = vadd.f32 %v1501_v38, %v1477_v37  ;;  %v1445_v43 = vadd.f32 %v1444_v32, %v1290_v50 }
 0x1c4   : > { %v1446_v36 = vadd.f32 %v1445_v43, %v1291_v51  ;;  %v1503_v46 = vadd.f32 %v1502_v39, %v1478_v33 }
 0x1c6   : > { %v1504_v47 = vadd.f32 %v1503_v46, %v1479_v44  ;;  %v1447_v48 = vadd.f32 %v1446_v36, %v1292_v55 }
 0x1c8   : > { %v1448_v41 = vadd.f32 %v1447_v48, %v1293_v59  ;;  %v1505_v53 = vadd.f32 %v1504_v47, %v1480_v40 }
 0x1ca   : > { %v1506_v56 = vadd.f32 %v1505_v53, %v1481_v52  ;;  %v1449_v57 = vadd.f32 %v1448_v41, %v1294_v60 }
 0x1cc   : > { %v1450_v45 = vadd.f32 %v1449_v57, %v1295_v61  ;;  %v1507_v62 = vadd.f32 %v1506_v56, %v1482_v42 }
 0x1ce   : > { %v1451_v49 = vrot.slane %v1450_v45, 4  ;;  %v1508_v63 = vadd.f32 %v1507_v62, %v1483_v58 }
 0x1d0   : > { %v1452_v0 = vadd.f32 %v1451_v49, %v1450_v45  ;;  %v1509_v1 = vrot.slane %v1508_v63, 4 }
 0x1d2   : > { %v1453_v50 = vrot.slane %v1452_v0, 2  ;;  %v1510_v2 = vadd.f32 %v1509_v1, %v1508_v63 }
 0x1d4   : > { %v1454_v51 = vadd.f32 %v1453_v50, %v1452_v0  ;;  %v1511_v3 = vrot.slane %v1510_v2, 2 }
 0x1d6   : > { %v1455_v54 = vrot.slane %v1454_v51, 1  ;;  %v1512_v4 = vadd.f32 %v1511_v3, %v1510_v2 }
 0x1d8   : > { %v1456_v55 = vadd.f32 %v1455_v54, %v1454_v51  ;;  %v1513_v5 = vrot.slane %v1512_v4, 1 }
 0x1da   : > { %1457 = vst [vmem:[%s2638_s3] sm:$0x1] %v1456_v55  ;;  %v1514_v59 = vadd.f32 %v1513_v5, %v1512_v4 }
 0x1dc   : > { %1515 = vst [vmem:[%s2639_s4] sm:$0x1] %v1514_v59 }
 0x1dd PF: > { %s15_s19 = sadd.s32 1, %s2284_s19   ;;  %s2640_s15 = smov %s2272_s16 }
 0x1de   : > { %p12_p12 = scmp.ge.s32.totalorder %s15_s19, 5   ;;  %s2641_s16 = smov %s2349_s23 }
 0x1df   : > { %s2642_s17 = smov %s2280_s18  ;;  %s2643_s18 = smov %s2645_s20 }
 0x1e0   :  { %14 = sbr.rel (!%p12_p12) target bundleno = 3 (0x3), region = 130 }

// kernel: _lambda_.35
= control target key start
LH: loop header
LB: loop body
LE: loop exit
PB: predicated region body
PF: predicated region fallthrough
CT: control target
= control target key end

     0   :  { %s673_s0 = inlined_call_operand.vmem [shape: bf16[208,128], index: 0, kind: input, shape index: {}, may-alias: {0,3}]   ;;  %s674_s1 = inlined_call_operand.vmem [shape: f32[1,128], index: 1, kind: input, shape index: {}]   ;;  %s675_s2 = inlined_call_operand.vmem [shape: f32[1,128], index: 2, kind: input, shape index: {}]   ;;  %s676_s3 = inlined_call_operand.vmem [shape: bf16[208,128], index: 3, kind: output, shape index: {}, may-alias: {0,3}]  }
   0x1   :  { %v373_v0 = vld [vmem:[%s673_s0] sm:$0xff]   ;;  %v489_v4 = vld [vmem:[%s673_s0 + $0x8] sm:$0xff]   ;;  %v490_v5 = vld [vmem:[%s673_s0 + $0x10] sm:$0xff]  }
   0x2   :  { %v539_v1 = vld [vmem:[%s674_s1] ss:$0 sm:$0xff]  ;;  %v374_v2 = vunpack.c.l.bf16 %v373_v0  ;;  %v375_v3 = vunpack.c.h.bf16 %v373_v0  ;;  %v491_v6 = vld [vmem:[%s673_s0 + $0x18] sm:$0xff]   ;;  %v378_v8 = vunpack.c.l.bf16 %v489_v4  ;;  %v379_v9 = vunpack.c.h.bf16 %v489_v4  ;;  %v493_v41 = vld [vmem:[%s673_s0 + $0x28] sm:$0xff]  }
   0x3   :  { %v553_v7 = vld [vmem:[%s675_s2] ss:$0 sm:$0xff]  ;;  %v382_v10 = vunpack.c.l.bf16 %v490_v5  ;;  %v383_v11 = vunpack.c.h.bf16 %v490_v5  ;;  %v386_v14 = vunpack.c.l.bf16 %v491_v6  ;;  %v387_v15 = vunpack.c.h.bf16 %v491_v6  ;;  %v494_v46 = vld [vmem:[%s673_s0 + $0x30] sm:$0xff]   ;;  %v495_v51 = vld [vmem:[%s673_s0 + $0x38] sm:$0xff]  }
   0x4   :  { %v73_v12 = vmul.f32 %v374_v2, %v539_v1  ;;  %v74_v13 = vmul.f32 %v375_v3, %v539_v1  ;;  %v75_v16 = vmul.f32 %v378_v8, %v539_v1  ;;  %v76_v17 = vmul.f32 %v379_v9, %v539_v1  ;;  %v492_v36 = vld [vmem:[%s673_s0 + $0x20] sm:$0xff]  }
   0x5   :  { %v77_v18 = vmul.f32 %v382_v10, %v539_v1  ;;  %v78_v19 = vmul.f32 %v383_v11, %v539_v1  ;;  %v79_v22 = vmul.f32 %v386_v14, %v539_v1  ;;  %v80_v23 = vmul.f32 %v387_v15, %v539_v1 }
   0x6   :  { %v106_v20 = vadd.f32 %v553_v7, %v73_v12  ;;  %v107_v21 = vadd.f32 %v553_v7, %v74_v13  ;;  %v108_v24 = vadd.f32 %v553_v7, %v75_v16  ;;  %v109_v25 = vadd.f32 %v553_v7, %v76_v17 }
   0x7   :  { %v110_v26 = vadd.f32 %v553_v7, %v77_v18  ;;  %v111_v27 = vadd.f32 %v553_v7, %v78_v19  ;;  %v112_v30 = vadd.f32 %v553_v7, %v79_v22  ;;  %v113_v31 = vadd.f32 %v553_v7, %v80_v23 }
   0x8   :  { %v132_v28 = vmax.f32 %v106_v20, 0.0  ;;  %v133_v29 = vmax.f32 %v107_v21, 0.0  ;;  %v134_v32 = vmax.f32 %v108_v24, 0.0  ;;  %v135_v33 = vmax.f32 %v109_v25, 0.0 }
   0x9   :  { %v136_v34 = vmax.f32 %v110_v26, 0.0  ;;  %v137_v35 = vmax.f32 %v111_v27, 0.0  ;;  %v138_v39 = vmax.f32 %v112_v30, 0.0  ;;  %v139_v40 = vmax.f32 %v113_v31, 0.0 }
   0xa   :  { %v158_v37 = vmul.f32 2.0, %v132_v28  ;;  %v159_v38 = vmul.f32 2.0, %v133_v29  ;;  %v160_v42 = vmul.f32 2.0, %v134_v32  ;;  %v161_v43 = vmul.f32 2.0, %v135_v33 }
   0xb   :  { %v162_v44 = vmul.f32 2.0, %v136_v34  ;;  %v163_v45 = vmul.f32 2.0, %v137_v35  ;;  %v164_v48 = vmul.f32 2.0, %v138_v39  ;;  %v165_v49 = vmul.f32 2.0, %v139_v40 }
   0xc   :  { %v427_v47 = vpack.c.bf16 %v159_v38, %v158_v37  ;;  %v390_v50 = vunpack.c.l.bf16 %v492_v36  ;;  %v432_v52 = vpack.c.bf16 %v161_v43, %v160_v42  ;;  %v391_v54 = vunpack.c.h.bf16 %v492_v36 }
   0xd   :  { %v437_v53 = vpack.c.bf16 %v163_v45, %v162_v44  ;;  %v394_v55 = vunpack.c.l.bf16 %v493_v41  ;;  %v442_v56 = vpack.c.bf16 %v165_v49, %v164_v48  ;;  %v395_v58 = vunpack.c.h.bf16 %v493_v41 }
   0xe   :  { %428 = vst [vmem:[%s676_s3] sm:$0xff] %v427_v47   ;;  %v81_v57 = vmul.f32 %v390_v50, %v539_v1  ;;  %v398_v59 = vunpack.c.l.bf16 %v494_v46  ;;  %501 = vst [vmem:[%s676_s3 + $0x8] sm:$0xff] %v432_v52   ;;  %v82_v60 = vmul.f32 %v391_v54, %v539_v1  ;;  %v399_v62 = vunpack.c.h.bf16 %v494_v46 }
   0xf   :  { %502 = vst [vmem:[%s676_s3 + $0x10] sm:$0xff] %v437_v53   ;;  %v83_v61 = vmul.f32 %v394_v55, %v539_v1  ;;  %v402_v63 = vunpack.c.l.bf16 %v495_v51  ;;  %503 = vst [vmem:[%s676_s3 + $0x18] sm:$0xff] %v442_v56   ;;  %v84_v2 = vmul.f32 %v395_v58, %v539_v1  ;;  %v403_v4 = vunpack.c.h.bf16 %v495_v51 }
  0x10   :  { %v114_v0 = vadd.f32 %v553_v7, %v81_v57  ;;  %v85_v3 = vmul.f32 %v398_v59, %v539_v1  ;;  %v115_v5 = vadd.f32 %v553_v7, %v82_v60  ;;  %v86_v8 = vmul.f32 %v399_v62, %v539_v1 }
  0x11   :  { %v116_v6 = vadd.f32 %v553_v7, %v83_v61  ;;  %v87_v9 = vmul.f32 %v402_v63, %v539_v1  ;;  %v117_v11 = vadd.f32 %v553_v7, %v84_v2  ;;  %v88_v13 = vmul.f32 %v403_v4, %v539_v1 }
  0x12   :  { %v140_v10 = vmax.f32 %v114_v0, 0.0  ;;  %v118_v12 = vadd.f32 %v553_v7, %v85_v3  ;;  %v141_v14 = vmax.f32 %v115_v5, 0.0  ;;  %v119_v16 = vadd.f32 %v553_v7, %v86_v8 }
  0x13   :  { %v142_v15 = vmax.f32 %v116_v6, 0.0  ;;  %v120_v17 = vadd.f32 %v553_v7, %v87_v9  ;;  %v143_v20 = vmax.f32 %v117_v11, 0.0  ;;  %v121_v22 = vadd.f32 %v553_v7, %v88_v13 }
  0x14   :  { %v166_v19 = vmul.f32 2.0, %v140_v10  ;;  %v144_v21 = vmax.f32 %v118_v12, 0.0  ;;  %v167_v23 = vmul.f32 2.0, %v141_v14  ;;  %v145_v25 = vmax.f32 %v119_v16, 0.0 }
  0x15   :  { %v168_v24 = vmul.f32 2.0, %v142_v15  ;;  %v146_v26 = vmax.f32 %v120_v17, 0.0  ;;  %v169_v28 = vmul.f32 2.0, %v143_v20  ;;  %v147_v30 = vmax.f32 %v121_v22, 0.0 }
  0x16   :  { %v496_v18 = vld [vmem:[%s673_s0 + $0x40] sm:$0xff]   ;;  %v497_v27 = vld [vmem:[%s673_s0 + $0x48] sm:$0xff]   ;;  %v170_v29 = vmul.f32 2.0, %v144_v21  ;;  %v498_v32 = vld [vmem:[%s673_s0 + $0x50] sm:$0xff]   ;;  %v447_v33 = vpack.c.bf16 %v167_v23, %v166_v19  ;;  %v171_v34 = vmul.f32 2.0, %v145_v25 }
  0x17   :  { %v406_v31 = vunpack.c.l.bf16 %v496_v18  ;;  %v172_v35 = vmul.f32 2.0, %v146_v26  ;;  %v407_v36 = vunpack.c.h.bf16 %v496_v18  ;;  %v452_v37 = vpack.c.bf16 %v169_v28, %v168_v24  ;;  %v499_v41 = vld [vmem:[%s673_s0 + $0x58] sm:$0xff]  }
  0x18   :  { %v173_v38 = vmul.f32 2.0, %v147_v30  ;;  %v410_v40 = vunpack.c.l.bf16 %v497_v27  ;;  %504 = vst [vmem:[%s676_s3 + $0x20] sm:$0xff] %v447_v33   ;;  %v457_v42 = vpack.c.bf16 %v171_v34, %v170_v29  ;;  %v411_v44 = vunpack.c.h.bf16 %v497_v27 }
  0x19   :  { %v89_v39 = vmul.f32 %v406_v31, %v539_v1  ;;  %v90_v43 = vmul.f32 %v407_v36, %v539_v1  ;;  %v414_v45 = vunpack.c.l.bf16 %v498_v32  ;;  %505 = vst [vmem:[%s676_s3 + $0x28] sm:$0xff] %v452_v37   ;;  %v415_v49 = vunpack.c.h.bf16 %v498_v32 }
  0x1a   :  { %v462_v46 = vpack.c.bf16 %v173_v38, %v172_v35  ;;  %v91_v48 = vmul.f32 %v410_v40, %v539_v1  ;;  %506 = vst [vmem:[%s676_s3 + $0x30] sm:$0xff] %v457_v42   ;;  %v92_v51 = vmul.f32 %v411_v44, %v539_v1  ;;  %v418_v53 = vunpack.c.l.bf16 %v499_v41 }
  0x1b   :  { %v122_v47 = vadd.f32 %v553_v7, %v89_v39  ;;  %v123_v50 = vadd.f32 %v553_v7, %v90_v43  ;;  %v93_v52 = vmul.f32 %v414_v45, %v539_v1  ;;  %v94_v56 = vmul.f32 %v415_v49, %v539_v1 }
  0x1c   :  { %507 = vst [vmem:[%s676_s3 + $0x38] sm:$0xff] %v462_v46   ;;  %v124_v55 = vadd.f32 %v553_v7, %v91_v48  ;;  %v419_v57 = vunpack.c.h.bf16 %v499_v41  ;;  %v125_v59 = vadd.f32 %v553_v7, %v92_v51  ;;  %v95_v61 = vmul.f32 %v418_v53, %v539_v1 }
  0x1d   :  { %v148_v54 = vmax.f32 %v122_v47, 0.0  ;;  %v149_v58 = vmax.f32 %v123_v50, 0.0  ;;  %v126_v60 = vadd.f32 %v553_v7, %v93_v52  ;;  %v127_v2 = vadd.f32 %v553_v7, %v94_v56 }
  0x1e   :  { %v150_v0 = vmax.f32 %v124_v55, 0.0  ;;  %v96_v3 = vmul.f32 %v419_v57, %v539_v1  ;;  %v151_v5 = vmax.f32 %v125_v59, 0.0  ;;  %v128_v8 = vadd.f32 %v553_v7, %v95_v61 }
  0x1f   :  { %v174_v63 = vmul.f32 2.0, %v148_v54  ;;  %v175_v4 = vmul.f32 2.0, %v149_v58  ;;  %v152_v6 = vmax.f32 %v126_v60, 0.0  ;;  %v153_v10 = vmax.f32 %v127_v2, 0.0 }
  0x20   :  { %v176_v9 = vmul.f32 2.0, %v150_v0  ;;  %v129_v11 = vadd.f32 %v553_v7, %v96_v3  ;;  %v177_v14 = vmul.f32 2.0, %v151_v5  ;;  %v154_v16 = vmax.f32 %v128_v8, 0.0 }
  0x21   :  { %v467_v13 = vpack.c.bf16 %v175_v4, %v174_v63  ;;  %v178_v15 = vmul.f32 2.0, %v152_v6  ;;  %v179_v17 = vmul.f32 2.0, %v153_v10 }
  0x22   :  { %v155_v18 = vmax.f32 %v129_v11, 0.0  ;;  %v472_v21 = vpack.c.bf16 %v177_v14, %v176_v9  ;;  %v180_v22 = vmul.f32 2.0, %v154_v16 }
  0x23   :  { %v500_v62 = vld [vmem:[%s673_s0 + $0x60] sm:$0xff]   ;;  %v477_v23 = vpack.c.bf16 %v179_v17, %v178_v15 }
  0x24   :  { %v422_v12 = vunpack.c.l.bf16 %v500_v62  ;;  %v423_v19 = vunpack.c.h.bf16 %v500_v62  ;;  %508 = vst [vmem:[%s676_s3 + $0x40] sm:$0xff] %v467_v13   ;;  %v181_v24 = vmul.f32 2.0, %v155_v18  ;;  %509 = vst [vmem:[%s676_s3 + $0x48] sm:$0xff] %v472_v21  }
  0x25   :  { %510 = vst [vmem:[%s676_s3 + $0x50] sm:$0xff] %v477_v23  }
  0x26   :  { %v97_v20 = vmul.f32 %v422_v12, %v539_v1  ;;  %v98_v25 = vmul.f32 %v423_v19, %v539_v1  ;;  %v482_v27 = vpack.c.bf16 %v181_v24, %v180_v22 }
  0x28   :  { %v130_v26 = vadd.f32 %v553_v7, %v97_v20  ;;  %v131_v28 = vadd.f32 %v553_v7, %v98_v25  ;;  %511 = vst [vmem:[%s676_s3 + $0x58] sm:$0xff] %v482_v27  }
  0x2a   :  { %v156_v29 = vmax.f32 %v130_v26, 0.0  ;;  %v157_v30 = vmax.f32 %v131_v28, 0.0 }
  0x2c   :  { %v182_v1 = vmul.f32 2.0, %v156_v29  ;;  %v183_v31 = vmul.f32 2.0, %v157_v30 }
  0x2e   :  { %v487_v32 = vpack.c.bf16 %v183_v31, %v182_v1 }
  0x30   :  { %512 = vst [vmem:[%s676_s3 + $0x60] sm:$0xff] %v487_v32  }

// kernel: _lambda_.39
= control target key start
LH: loop header
LB: loop body
LE: loop exit
PB: predicated region body
PF: predicated region fallthrough
CT: control target
= control target key end

     0   :  { %s222_s0 = inlined_call_operand.vmem [shape: bf16[64,128], index: 0, kind: input, shape index: {}, may-alias: {0,3}]   ;;  %s223_s1 = inlined_call_operand.vmem [shape: f32[1,128], index: 1, kind: input, shape index: {}]   ;;  %s224_s2 = inlined_call_operand.vmem [shape: f32[1,128], index: 2, kind: input, shape index: {}]   ;;  %s225_s3 = inlined_call_operand.vmem [shape: bf16[64,128], index: 3, kind: output, shape index: {}, may-alias: {0,3}]  }
   0x1   :  { %v131_v0 = vld [vmem:[%s222_s0] sm:$0xff]   ;;  %v166_v4 = vld [vmem:[%s222_s0 + $0x8] sm:$0xff]   ;;  %v167_v5 = vld [vmem:[%s222_s0 + $0x10] sm:$0xff]  }
   0x2   :  { %v112_v1 = vld [vmem:[%s223_s1] ss:$0 sm:$0xff]  ;;  %v132_v2 = vunpack.c.l.bf16 %v131_v0  ;;  %v133_v3 = vunpack.c.h.bf16 %v131_v0  ;;  %v168_v6 = vld [vmem:[%s222_s0 + $0x18] sm:$0xff]   ;;  %v136_v8 = vunpack.c.l.bf16 %v166_v4  ;;  %v137_v9 = vunpack.c.h.bf16 %v166_v4 }
   0x3   :  { %v113_v7 = vld [vmem:[%s224_s2] ss:$0 sm:$0xff]  ;;  %v140_v10 = vunpack.c.l.bf16 %v167_v5  ;;  %v141_v11 = vunpack.c.h.bf16 %v167_v5  ;;  %v144_v14 = vunpack.c.l.bf16 %v168_v6  ;;  %v145_v15 = vunpack.c.h.bf16 %v168_v6 }
   0x4   :  { %v37_v12 = vmul.f32 %v132_v2, %v112_v1  ;;  %v38_v13 = vmul.f32 %v133_v3, %v112_v1  ;;  %v39_v16 = vmul.f32 %v136_v8, %v112_v1  ;;  %v40_v17 = vmul.f32 %v137_v9, %v112_v1 }
   0x5   :  { %v41_v18 = vmul.f32 %v140_v10, %v112_v1  ;;  %v42_v19 = vmul.f32 %v141_v11, %v112_v1  ;;  %v43_v22 = vmul.f32 %v144_v14, %v112_v1  ;;  %v44_v23 = vmul.f32 %v145_v15, %v112_v1 }
   0x6   :  { %v52_v20 = vadd.f32 %v113_v7, %v37_v12  ;;  %v53_v21 = vadd.f32 %v113_v7, %v38_v13  ;;  %v54_v24 = vadd.f32 %v113_v7, %v39_v16  ;;  %v55_v25 = vadd.f32 %v113_v7, %v40_v17 }
   0x7   :  { %v56_v26 = vadd.f32 %v113_v7, %v41_v18  ;;  %v57_v27 = vadd.f32 %v113_v7, %v42_v19  ;;  %v58_v30 = vadd.f32 %v113_v7, %v43_v22  ;;  %v59_v31 = vadd.f32 %v113_v7, %v44_v23 }
   0x8   :  { %v60_v28 = vmax.f32 %v52_v20, 0.0  ;;  %v61_v29 = vmax.f32 %v53_v21, 0.0  ;;  %v62_v32 = vmax.f32 %v54_v24, 0.0  ;;  %v63_v33 = vmax.f32 %v55_v25, 0.0 }
   0x9   :  { %v64_v34 = vmax.f32 %v56_v26, 0.0  ;;  %v65_v35 = vmax.f32 %v57_v27, 0.0  ;;  %v66_v37 = vmax.f32 %v58_v30, 0.0  ;;  %v67_v38 = vmax.f32 %v59_v31, 0.0 }
   0xa   :  { %v149_v36 = vpack.c.bf16 %v61_v29, %v60_v28  ;;  %v154_v39 = vpack.c.bf16 %v63_v33, %v62_v32 }
   0xb   :  { %v159_v40 = vpack.c.bf16 %v65_v35, %v64_v34  ;;  %v164_v41 = vpack.c.bf16 %v67_v38, %v66_v37 }
   0xc   :  { %150 = vst [vmem:[%s225_s3] sm:$0xff] %v149_v36   ;;  %169 = vst [vmem:[%s225_s3 + $0x8] sm:$0xff] %v154_v39  }
   0xd   :  { %170 = vst [vmem:[%s225_s3 + $0x10] sm:$0xff] %v159_v40   ;;  %171 = vst [vmem:[%s225_s3 + $0x18] sm:$0xff] %v164_v41  }

// kernel: _lambda_.38
= control target key start
LH: loop header
LB: loop body
LE: loop exit
PB: predicated region body
PF: predicated region fallthrough
CT: control target
= control target key end

     0   :  { %s1384_s15 = smov 0   ;;  %s1386_s16 = smov 0   ;;  %s1527_s0 = inlined_call_operand.vmem [shape: bf16[64,1152], index: 0, kind: input, shape index: {}]   ;;  %s1528_s1 = inlined_call_operand.vmem [shape: bf16[1152,128], index: 1, kind: input, shape index: {}]   ;;  %s1529_s2 = inlined_call_operand.vmem [shape: bf16[64,128], index: 2, kind: output, shape index: {0}]   ;;  %s1530_s3 = inlined_call_operand.vmem [shape: f32[1,1,128], index: 3, kind: output, shape index: {1}]   ;;  %s1531_s4 = inlined_call_operand.vmem [shape: f32[1,1,128], index: 4, kind: output, shape index: {2}]  }
   0x1   :  { %s1388_s17 = smov 0   ;;  %s1390_s18 = smov 0  }
   0x2   :  { %s1392_s19 = smov 0  }
   0x3 LB: > { %s27_s20 = sadd.s32 1, %s1352_s18  ;;  %p50_p1 = scmp.ne.s32.totalorder %s1344_s16, %s1340_s15  ;;  %s1356_s19 = sphi %s1392_s19, %s15_s19   ;;  %s1352_s18 = sphi %s1390_s18, %s1535_s18   ;;  %s1348_s17 = sphi %s1388_s17, %s1534_s17   ;;  %s1344_s16 = sphi %s1386_s16, %s1533_s16   ;;  %s1340_s15 = sphi %s1384_s15, %s1532_s15  }
   0x4   : > { %p28_p0 = scmp.ge.s32.totalorder %s27_s20, 3  ;;  %p51_p2 = scmp.eq.s32.totalorder %s1356_s19, 0 }
   0x5   : > { %s43_s22 = sadd.s32 1, %s1344_s16  ;;  %p1055_p5 = scmp.ge.s32.totalorder %s1356_s19, 3 }
   0x6   : > { %s1537_s20 = smov (%p28_p0, %s27_s20), 0  ;;  %p52_p3 = por %p51_p2, %p50_p1 }
   0x7   : > { %s39_s21 = ssub.s32 %s1352_s18, %s1537_s20  ;;  %188 = sbr.rel (%p1055_p5) target bundleno = 26 (0x1a), region = 16 }
   0x8   : > { %p41_p4 = scmp.eq.s32.totalorder %s39_s21, 0 }
   0xa   : > { %s1419_s23 = scalar_select %p41_p4, %s1344_s16, %s43_s22  }
   0xc   : > { %191 = sbr.rel (!%p52_p3) target bundleno = 26 (0x1a), region = 20  ;;  %s193_s24 = sand.u32 (%p52_p3), 1, %s1344_s16  }
   0xd   : > { %s1127_s25 = smul.u32 (%p52_p3), 12, %s1352_s18 }
   0xe   : > { %s1235_s26 = smul.u32 (%p52_p3), 96, %s193_s24 }
   0xf   : > { %s1427_s29 = scalar_lea.vmem (%p52_p3), %s1527_s0, %s1127_s25 }
  0x10   : > { %v216_v0 = vld [vmem:[%s1427_s29] sm:$0xff] (%p52_p3)  ;;  %v220_v2 = vld [vmem:[%s1427_s29 + $0x48] sm:$0xff] (%p52_p3)  ;;  %s195_s30 = scalar_lea.vmem (%p52_p3), [#allocation3], %s1235_s26  ;;  %v224_v4 = vld [vmem:[%s1427_s29 + $0x90] sm:$0xff] (%p52_p3) }
  0x11   : > { %v218_v1 = vld [vmem:[%s1427_s29 + $0x24] sm:$0xff]  ;;  %217 = vst [vmem:[%s195_s30] sm:$0xff] %v216_v0  ;;  %221 = vst [vmem:[%s195_s30 + $0x18] sm:$0xff] %v220_v2  ;;  %v222_v3 = vld [vmem:[%s1427_s29 + $0x6c] sm:$0xff] }
  0x12   : > { %219 = vst [vmem:[%s195_s30 + $0xc] sm:$0xff] %v218_v1  ;;  %v226_v5 = vld [vmem:[%s1427_s29 + $0xb4] sm:$0xff]  ;;  %223 = vst [vmem:[%s195_s30 + $0x24] sm:$0xff] %v222_v3  ;;  %v230_v7 = vld [vmem:[%s1427_s29 + $0xfc] sm:$0xff] }
  0x13   : > { %225 = vst [vmem:[%s195_s30 + $0x30] sm:$0xff] %v224_v4  ;;  %227 = vst [vmem:[%s195_s30 + $0x3c] sm:$0xff] %v226_v5  ;;  %v228_v6 = vld [vmem:[%s1427_s29 + $0xd8] sm:$0xff]  ;;  %v1057_v8 = vld [vmem:[%s1427_s29 + $0x8] sm:$0xf] }
  0x14   : > { %229 = vst [vmem:[%s195_s30 + $0x48] sm:$0xff] %v228_v6  ;;  %231 = vst [vmem:[%s195_s30 + $0x54] sm:$0xff] %v230_v7  ;;  %v1059_v9 = vld [vmem:[%s1427_s29 + $0x2c] sm:$0xf]  ;;  %v1061_v10 = vld [vmem:[%s1427_s29 + $0x50] sm:$0xf] }
  0x15   : > { %1058 = vst [vmem:[%s195_s30 + $0x8] sm:$0xf] %v1057_v8  ;;  %v1063_v11 = vld [vmem:[%s1427_s29 + $0x74] sm:$0xf]  ;;  %1060 = vst [vmem:[%s195_s30 + $0x14] sm:$0xf] %v1059_v9 }
  0x16   : > { %1062 = vst [vmem:[%s195_s30 + $0x20] sm:$0xf] %v1061_v10  ;;  %1064 = vst [vmem:[%s195_s30 + $0x2c] sm:$0xf] %v1063_v11  ;;  %v1065_v12 = vld [vmem:[%s1427_s29 + $0x98] sm:$0xf] }
  0x17   : > { %v1067_v13 = vld [vmem:[%s1427_s29 + $0xbc] sm:$0xf]  ;;  %v1069_v14 = vld [vmem:[%s1427_s29 + $0xe0] sm:$0xf]  ;;  %1066 = vst [vmem:[%s195_s30 + $0x38] sm:$0xf] %v1065_v12 }
  0x18   : > { %1068 = vst [vmem:[%s195_s30 + $0x44] sm:$0xf] %v1067_v13  ;;  %1070 = vst [vmem:[%s195_s30 + $0x50] sm:$0xf] %v1069_v14  ;;  %v1071_v15 = vld [vmem:[%s1427_s29 + $0x104] sm:$0xf] }
  0x19   : > { %1072 = vst [vmem:[%s195_s30 + $0x5c] sm:$0xf] %v1071_v15 }
  0x1a PF: > { %p1073_p6 = scmp.ge.s32.totalorder %s1356_s19, 1  ;;  %p272_p7 = scmp.lt.s32.totalorder %s1356_s19, 4 }
  0x1c   : > { %p273_p8 = pnand %p1073_p6, %p272_p7 }
  0x1d   : > { %s279_s5 = sand.u32 (!%p273_p8), 1, %s1340_s15   ;;  %s329_s6 = smul.u32 (!%p273_p8), 48, %s1348_s17 }
  0x1e   : > { %276 = sbr.rel (%p273_p8) target bundleno = 338 (0x152), region = 50  ;;  %p1075_p10 = scmp.ne.s32.totalorder (!%p273_p8), %s1348_s17, 0 }
  0x1f   : > { %s1236_s7 = smul.u32 (!%p273_p8), 96, %s279_s5  ;;  %p330_p9 = scmp.lt.s32.totalorder (!%p273_p8), %s329_s6, 143 }
  0x21   : > { %s1454_s12 = scalar_lea.vmem (!%p273_p8), [#allocation3], %s1236_s7 }
  0x23   : > { %s1539_s6 = smov (!%p330_p9, %s329_s6), 143  ;;  %363 = sbr.rel (%p1075_p10) target bundleno = 45 (0x2d), region = 58 }
  0x24   : > { %s1074_s8 = sshll.u32 %s1539_s6, 2 }
  0x25   : > { %s1452_s11 = scalar_lea.vmem %s1528_s1, %s1074_s8 }
  0x28   : > { %v1358_v16 = vmov 0.0  }
  0x29   : > { %364 = vst [vmem:[#allocation2 + $0x30] sm:$0xff] %v1358_v16  ;;  %365 = vst [vmem:[#allocation2] sm:$0xff] %v1358_v16 }
  0x2a   : > { %366 = vst [vmem:[#allocation2 + $0x18] sm:$0xff] %v1358_v16  ;;  %367 = vst [vmem:[#allocation2 + $0x10] sm:$0xff] %v1358_v16 }
  0x2b   : > { %368 = vst [vmem:[#allocation2 + $0x8] sm:$0xff] %v1358_v16  ;;  %369 = vst [vmem:[#allocation2 + $0x20] sm:$0xff] %v1358_v16 }
  0x2c   : > { %370 = vst [vmem:[#allocation2 + $0x28] sm:$0xff] %v1358_v16  ;;  %371 = vst [vmem:[#allocation2 + $0x38] sm:$0xff] %v1358_v16 }
  0x2d PF: > { %v1278_v17 = vld [vmem:[%s1452_s11 + $0x78] sm:$0xff]   ;;  %v1281_v20 = vld [vmem:[%s1452_s11 + $0x70] sm:$0xff]   ;;  %v1284_v23 = vld [vmem:[%s1452_s11 + $0x68] sm:$0xff]   ;;  %p1112_p11 = scmp.ne.s32.totalorder %s1348_s17, 2 }
  0x2e   : > { %v1279_v18 = vld [vmem:[%s1452_s11 + $0x38] sm:$0xff]   ;;  %1159 = vmatprep.subr.bf16.mxu0 %v1278_v17  ;;  %v1282_v21 = vld [vmem:[%s1452_s11 + $0x30] sm:$0xff]   ;;  %v1285_v24 = vld [vmem:[%s1452_s11 + $0x28] sm:$0xff]  }
  0x2f   : > { %v1280_v19 = vld [vmem:[%s1452_s11 + $0xb8] sm:$0xff]   ;;  %1160 = vmatpush3.bf16.msra.mxu0 %v1279_v18  ;;  %v1283_v22 = vld [vmem:[%s1452_s11 + $0xb0] sm:$0xff]   ;;  %v1286_v25 = vld [vmem:[%s1452_s11 + $0xa8] sm:$0xff]  }
  0x30   : > { %1211 = vmatprep.subr.bf16.mxu1 %v1280_v19  ;;  %1161 = vmatprep.subr.bf16.mxu0 %v1281_v20  ;;  %v1287_v26 = vld [vmem:[%s1452_s11 + $0x60] sm:$0xff]   ;;  %v1290_v29 = vld [vmem:[%s1452_s11 + $0x58] sm:$0xff]   ;;  %v1293_v32 = vld [vmem:[%s1452_s11 + $0x50] sm:$0xff]  }
  0x31   : > { %1212 = vmatpush3.bf16.msra.mxu1 %v1280_v19  ;;  %v1288_v27 = vld [vmem:[%s1452_s11 + $0x20] sm:$0xff]   ;;  %v1292_v30 = vld [vmem:[%s1452_s11 + $0x98] sm:$0xff]   ;;  %v1295_v33 = vld [vmem:[%s1452_s11 + $0x90] sm:$0xff]  }
  0x32   : > { %1213 = vmatprep.subr.bf16.mxu1 %v1283_v22  ;;  %v1289_v28 = vld [vmem:[%s1452_s11 + $0xa0] sm:$0xff]   ;;  %v1291_v31 = vld [vmem:[%s1452_s11 + $0x18] sm:$0xff]   ;;  %v1294_v34 = vld [vmem:[%s1452_s11 + $0x10] sm:$0xff]  }
  0x33   : > { %1162 = vmatpush3.bf16.msra.mxu0 %v1282_v21  ;;  %v1296_v35 = vld [vmem:[%s1452_s11 + $0x48] sm:$0xff]   ;;  %v1299_v38 = vld [vmem:[%s1452_s11 + $0x40] sm:$0xff]   ;;  %v1314_v49 = vld [vmem:[%s1454_s12 + $0x50] ss:$12 sps:$4 sm:$0xff]  }
  0x34   : > { %1163 = vmatprep.subr.bf16.mxu0 %v1284_v23  ;;  %v1297_v36 = vld [vmem:[%s1452_s11 + $0x8] sm:$0xff]   ;;  %v1301_v39 = vld [vmem:[%s1452_s11 + $0x80] sm:$0xff]   ;;  %v1312_v50 = vld [vmem:[%s1454_s12 + $0x30] ss:$12 sps:$4 sm:$0xff]  }
  0x35   : > { %1214 = vmatpush3.bf16.msra.mxu1 %v1283_v22  ;;  %v1298_v37 = vld [vmem:[%s1452_s11 + $0x88] sm:$0xff]   ;;  %v1304_v40 = vld [vmem:[%s1454_s12 + $0x4] ss:$12 sps:$4 sm:$0xff]   ;;  %v1310_v48 = vld [vmem:[%s1454_s12 + $0x34] ss:$12 sps:$4 sm:$0xff]  }
  0x36   : > { %1215 = vmatprep.subr.bf16.mxu1 %v1286_v25  ;;  %v1305_v41 = vld [vmem:[%s1454_s12 + $0x8] ss:$12 sps:$4 sm:$0xff]   ;;  %v1300_v42 = vld [vmem:[%s1452_s11] sm:$0xff]   ;;  %684 = vmatprep.mubr.bf16.mxu0 %v1304_v40  ;;  %v1315_v51 = vld [vmem:[%s1454_s12 + $0x4c] ss:$12 sps:$4 sm:$0xff]  }
  0x37   : > { %1164 = vmatpush3.bf16.msra.mxu0 %v1285_v24  ;;  %1227 = vmatprep.mubr.bf16.mxu1 %v1305_v41  ;;  %v1302_v43 = vld [vmem:[%s1454_s12] ss:$12 sps:$4 sm:$0xff]   ;;  %v1307_v44 = vld [vmem:[%s1454_s12 + $0x1c] ss:$12 sps:$4 sm:$0xff]   ;;  %v1313_v46 = vld [vmem:[%s1454_s12 + $0x38] ss:$12 sps:$4 sm:$0xff]  }
  0x38   : > { %1165 = vmatprep.subr.bf16.mxu0 %v1287_v26  ;;  %v1306_v45 = vld [vmem:[%s1454_s12 + $0x20] ss:$12 sps:$4 sm:$0xff]   ;;  %v1309_v47 = vld [vmem:[%s1454_s12 + $0x18] ss:$12 sps:$4 sm:$0xff]   ;;  %v1317_v52 = vld [vmem:[%s1454_s12 + $0x48] ss:$12 sps:$4 sm:$0xff]  }
  0x39   : > { %1216 = vmatpush3.bf16.msra.mxu1 %v1286_v25  ;;  %v372_v58 = vld [vmem:[#allocation2 + $0x30] sm:$0xff]  ;;  %v373_v2 = vld [vmem:[#allocation2] sm:$0xff]  ;;  %v374_v9 = vld [vmem:[#allocation2 + $0x18] sm:$0xff] }
  0x3a   : > { %1217 = vmatprep.subr.bf16.mxu1 %v1289_v28  ;;  %v375_v16 = vld [vmem:[#allocation2 + $0x10] sm:$0xff]  ;;  %v376_v24 = vld [vmem:[#allocation2 + $0x8] sm:$0xff] }
  0x3b   : > { %1166 = vmatpush3.bf16.msra.mxu0 %v1288_v27 }
  0x3c   : > { %1167 = vmatprep.subr.bf16.mxu0 %v1290_v29 }
  0x3d   : > { %1218 = vmatpush3.bf16.msra.mxu1 %v1289_v28 }
  0x3e   : > { %1219 = vmatprep.subr.bf16.mxu1 %v1292_v30 }
  0x3f   : > { %1168 = vmatpush3.bf16.msra.mxu0 %v1291_v31  ;;  %v377_v31 = vld [vmem:[#allocation2 + $0x20] sm:$0xff] }
  0x40   : > { %1169 = vmatprep.subr.bf16.mxu0 %v1293_v32 }
  0x41   : > { %1220 = vmatpush3.bf16.msra.mxu1 %v1292_v30 }
  0x42   : > { %1221 = vmatprep.subr.bf16.mxu1 %v1295_v33 }
  0x43   : > { %1170 = vmatpush3.bf16.msra.mxu0 %v1294_v34 }
  0x44   : > { %1171 = vmatprep.subr.bf16.mxu0 %v1296_v35 }
  0x45   : > { %1222 = vmatpush3.bf16.msra.mxu1 %v1295_v33 }
  0x46   : > { %1223 = vmatprep.subr.bf16.mxu1 %v1298_v37 }
  0x47   : > { %1172 = vmatpush3.bf16.msra.mxu0 %v1297_v36  ;;  %v378_v36 = vld [vmem:[#allocation2 + $0x28] sm:$0xff] }
  0x48   : > { %1173 = vmatprep.subr.bf16.mxu0 %v1299_v38 }
  0x49   : > { %1224 = vmatpush3.bf16.msra.mxu1 %v1298_v37 }
  0x4a   : > { %1225 = vmatprep.subr.bf16.mxu1 %v1301_v39 }
  0x4b   : > { %1174 = vmatpush3.bf16.msra.mxu0 %v1300_v42  ;;  %v379_v42 = vld [vmem:[#allocation2 + $0x38] sm:$0xff] }
  0x4d   : > { %1226 = vmatpush3.bf16.msra.mxu1 %v1301_v39 }
  0x4e   : > { %685 = vmatmul.mubr.bf16.vlgmr.msra.gmra.mxu0 %v1302_v43 }
  0x4f   : > { %692 = vmatprep.mubr.bf16.mxu0 %v1307_v44 }
  0x50   : > { %1228 = vmatmul.mubr.bf16.vlgmr.msra.gmra.mxu1 %v1306_v45 }
  0x51   : > { %1231 = vmatprep.mubr.bf16.mxu1 %v1313_v46 }
  0x56   : > { %693 = vmatmul.mubr.bf16.gmra.mxu0 %v1309_v47 }
  0x57   : > { %700 = vmatprep.mubr.bf16.mxu0 %v1310_v48 }
  0x58   : > { %1232 = vmatmul.mubr.bf16.gmra.mxu1 %v1314_v49 }
  0x5e   : > { %701 = vmatmul.mubr.bf16.gmra.mxu0 %v1312_v50 }
  0x5f   : > { %708 = vmatprep.mubr.bf16.mxu0 %v1315_v51 }
  0x66   : > { %709 = vmatmul.mubr.bf16.gmra.mxu0 %v1317_v52 }
 0x10e   : > { %v1175_v53 = vpop.f32.mrf.mxu0 }
 0x110   : > { %v1176_v54 = vpop.f32.mrf.mxu0  ;;  %v1229_v55 = vpop.f32.mrf.mxu1 }
 0x111   : > { %v1177_v56 = vadd.f32 %v1176_v54, %v1175_v53 }
 0x112   : > { %v1178_v57 = vpop.f32.mrf.mxu0  ;;  %v751_v59 = vpop.f32.mrf.mxu1 }
 0x113   : > { %v752_v60 = vadd.f32 %v1177_v56, %v751_v59 }
 0x114   : > { %v1179_v61 = vpop.f32.mrf.mxu0  ;;  %v1230_v62 = vpop.f32.mrf.mxu1 }
 0x115   : > { %v782_v63 = vadd.f32 %v752_v60, %v372_v58  ;;  %v1180_v0 = vadd.f32 %v1179_v61, %v1178_v57 }
 0x116   : > { %v1181_v1 = vpop.f32.mrf.mxu0  ;;  %v754_v3 = vpop.f32.mrf.mxu1 }
 0x117   : > { %790 = vst [vmem:[#allocation2 + $0x30] sm:$0xff] %v782_v63  ;;  %v755_v4 = vadd.f32 %v1180_v0, %v754_v3 }
 0x118   : > { %v1182_v5 = vpop.f32.mrf.mxu0  ;;  %v1233_v6 = vpop.f32.mrf.mxu1 }
 0x119   : > { %v783_v7 = vadd.f32 %v755_v4, %v373_v2  ;;  %v1183_v8 = vadd.f32 %v1182_v5, %v1181_v1 }
 0x11a   : > { %v1184_v10 = vpop.f32.mrf.mxu0  ;;  %v767_v13 = vpop.f32.mrf.mxu1 }
 0x11b   : > { %791 = vst [vmem:[#allocation2] sm:$0xff] %v783_v7  ;;  %v760_v11 = vadd.f32 %v1229_v55, %v1183_v8 }
 0x11c   : > { %v1185_v12 = vpop.f32.mrf.mxu0  ;;  %v1234_v20 = vpop.f32.mrf.mxu1 }
 0x11d   : > { %v784_v14 = vadd.f32 %v760_v11, %v374_v9  ;;  %v1186_v15 = vadd.f32 %v1185_v12, %v1184_v10 }
 0x11e   : > { %v1187_v17 = vpop.f32.mrf.mxu0  ;;  %v770_v27 = vpop.f32.mrf.mxu1 }
 0x11f   : > { %792 = vst [vmem:[#allocation2 + $0x18] sm:$0xff] %v784_v14  ;;  %v763_v18 = vadd.f32 %v1230_v62, %v1186_v15 }
 0x120   : > { %v1188_v19 = vpop.f32.mrf.mxu0 }
 0x121   : > { %v785_v21 = vadd.f32 %v763_v18, %v375_v16  ;;  %v1189_v22 = vadd.f32 %v1188_v19, %v1187_v17 }
 0x122   : > { %v1190_v23 = vpop.f32.mrf.mxu0 }
 0x123   : > { %793 = vst [vmem:[#allocation2 + $0x10] sm:$0xff] %v785_v21  ;;  %v768_v25 = vadd.f32 %v1189_v22, %v767_v13 }
 0x124   : > { %v1191_v26 = vpop.f32.mrf.mxu0 }
 0x125   : > { %v786_v28 = vadd.f32 %v768_v25, %v376_v24  ;;  %v1192_v29 = vadd.f32 %v1191_v26, %v1190_v23 }
 0x126   : > { %v1193_v30 = vpop.f32.mrf.mxu0 }
 0x127   : > { %794 = vst [vmem:[#allocation2 + $0x8] sm:$0xff] %v786_v28  ;;  %v771_v32 = vadd.f32 %v1192_v29, %v770_v27 }
 0x128   : > { %v1194_v33 = vpop.f32.mrf.mxu0 }
 0x129   : > { %v787_v34 = vadd.f32 %v771_v32, %v377_v31  ;;  %v1195_v35 = vadd.f32 %v1194_v33, %v1193_v30 }
 0x12a   : > { %v1196_v37 = vpop.f32.mrf.mxu0 }
 0x12b   : > { %795 = vst [vmem:[#allocation2 + $0x20] sm:$0xff] %v787_v34  ;;  %v776_v38 = vadd.f32 %v1233_v6, %v1195_v35 }
 0x12c   : > { %v1197_v39 = vpop.f32.mrf.mxu0 }
 0x12d   : > { %v788_v40 = vadd.f32 %v776_v38, %v378_v36  ;;  %v1198_v41 = vadd.f32 %v1197_v39, %v1196_v37 }
 0x12f   : > { %796 = vst [vmem:[#allocation2 + $0x28] sm:$0xff] %v788_v40  ;;  %v779_v43 = vadd.f32 %v1234_v20, %v1198_v41  ;;  %801 = sbr.rel (%p1112_p11) target bundleno = 338 (0x152), region = 62 }
 0x131   : > { %v789_v44 = vadd.f32 %v779_v43, %v379_v42 }
 0x133   : > { %797 = vst [vmem:[#allocation2 + $0x38] sm:$0xff] %v789_v44 }
 0x134   : > { %v802_v45 = vld [vmem:[#allocation2 + $0x30] sm:$0xff]  ;;  %v803_v46 = vld [vmem:[#allocation2] sm:$0xff]  ;;  %v804_v47 = vld [vmem:[#allocation2 + $0x18] sm:$0xff] }
 0x135   : > { %v1139_v48 = vpack.c.bf16 %v803_v46, %v802_v45  ;;  %v850_v49 = vadd.f32 %v803_v46, %v802_v45  ;;  %v864_v50 = vmul.f32 %v802_v45, %v802_v45  ;;  %v865_v51 = vmul.f32 %v803_v46, %v803_v46  ;;  %v805_v52 = vld [vmem:[#allocation2 + $0x10] sm:$0xff]  ;;  %v806_v53 = vld [vmem:[#allocation2 + $0x8] sm:$0xff]  ;;  %v807_v54 = vld [vmem:[#allocation2 + $0x20] sm:$0xff] }
 0x136   : > { %v1144_v55 = vpack.c.bf16 %v805_v52, %v804_v47  ;;  %v866_v56 = vmul.f32 %v804_v47, %v804_v47  ;;  %v1149_v57 = vpack.c.bf16 %v807_v54, %v806_v53  ;;  %v867_v60 = vmul.f32 %v805_v52, %v805_v52  ;;  %v808_v61 = vld [vmem:[#allocation2 + $0x28] sm:$0xff] }
 0x137   : > { %1140 = vst [vmem:[%s1529_s2] sm:$0xff] %v1139_v48   ;;  %v872_v58 = vadd.f32 %v865_v51, %v864_v50  ;;  %v851_v59 = vadd.f32 %v850_v49, %v804_v47  ;;  %v868_v2 = vmul.f32 %v806_v53, %v806_v53  ;;  %v869_v5 = vmul.f32 %v807_v54, %v807_v54 }
 0x138   : > { %1156 = vst [vmem:[%s1529_s2 + $0x8] sm:$0xff] %v1144_v55   ;;  %1157 = vst [vmem:[%s1529_s2 + $0x10] sm:$0xff] %v1149_v57   ;;  %v870_v8 = vmul.f32 %v808_v61, %v808_v61 }
 0x139   : > { %v852_v0 = vadd.f32 %v851_v59, %v805_v52  ;;  %v873_v1 = vadd.f32 %v872_v58, %v866_v56 }
 0x13a   : > { %v809_v62 = vld [vmem:[#allocation2 + $0x38] sm:$0xff] }
 0x13b   : > { %v1154_v63 = vpack.c.bf16 %v809_v62, %v808_v61  ;;  %v874_v3 = vadd.f32 %v873_v1, %v867_v60  ;;  %v853_v4 = vadd.f32 %v852_v0, %v806_v53  ;;  %v871_v11 = vmul.f32 %v809_v62, %v809_v62 }
 0x13d   : > { %1158 = vst [vmem:[%s1529_s2 + $0x18] sm:$0xff] %v1154_v63   ;;  %v854_v6 = vadd.f32 %v853_v4, %v807_v54  ;;  %v875_v7 = vadd.f32 %v874_v3, %v868_v2 }
 0x13f   : > { %v876_v9 = vadd.f32 %v875_v7, %v869_v5  ;;  %v855_v10 = vadd.f32 %v854_v6, %v808_v61 }
 0x141   : > { %v856_v12 = vadd.f32 %v855_v10, %v809_v62  ;;  %v877_v13 = vadd.f32 %v876_v9, %v870_v8 }
 0x143   : > { %v857_v14 = vrot.slane %v856_v12, 4  ;;  %v878_v15 = vadd.f32 %v877_v13, %v871_v11 }
 0x145   : > { %v858_v16 = vadd.f32 %v857_v14, %v856_v12  ;;  %v879_v17 = vrot.slane %v878_v15, 4 }
 0x147   : > { %v859_v18 = vrot.slane %v858_v16, 2  ;;  %v880_v19 = vadd.f32 %v879_v17, %v878_v15 }
 0x149   : > { %v860_v20 = vadd.f32 %v859_v18, %v858_v16  ;;  %v881_v21 = vrot.slane %v880_v19, 2 }
 0x14b   : > { %v861_v22 = vrot.slane %v860_v20, 1  ;;  %v882_v23 = vadd.f32 %v881_v21, %v880_v19 }
 0x14d   : > { %v862_v24 = vadd.f32 %v861_v22, %v860_v20  ;;  %v883_v25 = vrot.slane %v882_v23, 1 }
 0x14f   : > { %863 = vst [vmem:[%s1530_s3] sm:$0x1] %v862_v24  ;;  %v884_v26 = vadd.f32 %v883_v25, %v882_v23 }
 0x151   : > { %885 = vst [vmem:[%s1531_s4] sm:$0x1] %v884_v26 }
 0x152 PF: > { %s15_s19 = sadd.s32 1, %s1356_s19   ;;  %s1532_s15 = smov %s1344_s16 }
 0x153   : > { %p12_p12 = scmp.ge.s32.totalorder %s15_s19, 5   ;;  %s1533_s16 = smov %s1419_s23 }
 0x154   : > { %s1534_s17 = smov %s1352_s18  ;;  %s1535_s18 = smov %s1537_s20 }
 0x155   :  { %14 = sbr.rel (!%p12_p12) target bundleno = 3 (0x3), region = 130 }

// kernel: _lambda_.41
= control target key start
LH: loop header
LB: loop body
LE: loop exit
PB: predicated region body
PF: predicated region fallthrough
CT: control target
= control target key end

     0   :  { %s230_s0 = inlined_call_operand.vmem [shape: bf16[64,128], index: 0, kind: input, shape index: {}, may-alias: {0,3}]   ;;  %s231_s1 = inlined_call_operand.vmem [shape: f32[1,128], index: 1, kind: input, shape index: {}]   ;;  %s232_s2 = inlined_call_operand.vmem [shape: f32[1,128], index: 2, kind: input, shape index: {}]   ;;  %s233_s3 = inlined_call_operand.vmem [shape: bf16[64,128], index: 3, kind: output, shape index: {}, may-alias: {0,3}]  }
   0x1   :  { %v139_v0 = vld [vmem:[%s230_s0] sm:$0xff]   ;;  %v174_v4 = vld [vmem:[%s230_s0 + $0x8] sm:$0xff]   ;;  %v175_v5 = vld [vmem:[%s230_s0 + $0x10] sm:$0xff]  }
   0x2   :  { %v120_v1 = vld [vmem:[%s231_s1] ss:$0 sm:$0xff]  ;;  %v140_v2 = vunpack.c.l.bf16 %v139_v0  ;;  %v141_v3 = vunpack.c.h.bf16 %v139_v0  ;;  %v176_v6 = vld [vmem:[%s230_s0 + $0x18] sm:$0xff]   ;;  %v144_v8 = vunpack.c.l.bf16 %v174_v4  ;;  %v145_v9 = vunpack.c.h.bf16 %v174_v4 }
   0x3   :  { %v121_v7 = vld [vmem:[%s232_s2] ss:$0 sm:$0xff]  ;;  %v148_v10 = vunpack.c.l.bf16 %v175_v5  ;;  %v149_v11 = vunpack.c.h.bf16 %v175_v5  ;;  %v152_v14 = vunpack.c.l.bf16 %v176_v6  ;;  %v153_v15 = vunpack.c.h.bf16 %v176_v6 }
   0x4   :  { %v37_v12 = vmul.f32 %v140_v2, %v120_v1  ;;  %v38_v13 = vmul.f32 %v141_v3, %v120_v1  ;;  %v39_v16 = vmul.f32 %v144_v8, %v120_v1  ;;  %v40_v17 = vmul.f32 %v145_v9, %v120_v1 }
   0x5   :  { %v41_v18 = vmul.f32 %v148_v10, %v120_v1  ;;  %v42_v19 = vmul.f32 %v149_v11, %v120_v1  ;;  %v43_v22 = vmul.f32 %v152_v14, %v120_v1  ;;  %v44_v23 = vmul.f32 %v153_v15, %v120_v1 }
   0x6   :  { %v52_v20 = vadd.f32 %v121_v7, %v37_v12  ;;  %v53_v21 = vadd.f32 %v121_v7, %v38_v13  ;;  %v54_v24 = vadd.f32 %v121_v7, %v39_v16  ;;  %v55_v25 = vadd.f32 %v121_v7, %v40_v17 }
   0x7   :  { %v56_v26 = vadd.f32 %v121_v7, %v41_v18  ;;  %v57_v27 = vadd.f32 %v121_v7, %v42_v19  ;;  %v58_v30 = vadd.f32 %v121_v7, %v43_v22  ;;  %v59_v31 = vadd.f32 %v121_v7, %v44_v23 }
   0x8   :  { %v60_v28 = vmax.f32 %v52_v20, 0.0  ;;  %v61_v29 = vmax.f32 %v53_v21, 0.0  ;;  %v62_v32 = vmax.f32 %v54_v24, 0.0  ;;  %v63_v33 = vmax.f32 %v55_v25, 0.0 }
   0x9   :  { %v64_v34 = vmax.f32 %v56_v26, 0.0  ;;  %v65_v35 = vmax.f32 %v57_v27, 0.0  ;;  %v66_v38 = vmax.f32 %v58_v30, 0.0  ;;  %v67_v39 = vmax.f32 %v59_v31, 0.0 }
   0xa   :  { %v68_v36 = vmul.f32 2.0, %v60_v28  ;;  %v69_v37 = vmul.f32 2.0, %v61_v29  ;;  %v70_v40 = vmul.f32 2.0, %v62_v32  ;;  %v71_v41 = vmul.f32 2.0, %v63_v33 }
   0xb   :  { %v72_v42 = vmul.f32 2.0, %v64_v34  ;;  %v73_v43 = vmul.f32 2.0, %v65_v35  ;;  %v74_v45 = vmul.f32 2.0, %v66_v38  ;;  %v75_v46 = vmul.f32 2.0, %v67_v39 }
   0xc   :  { %v157_v44 = vpack.c.bf16 %v69_v37, %v68_v36  ;;  %v162_v47 = vpack.c.bf16 %v71_v41, %v70_v40 }
   0xd   :  { %v167_v48 = vpack.c.bf16 %v73_v43, %v72_v42  ;;  %v172_v49 = vpack.c.bf16 %v75_v46, %v74_v45 }
   0xe   :  { %158 = vst [vmem:[%s233_s3] sm:$0xff] %v157_v44   ;;  %177 = vst [vmem:[%s233_s3 + $0x8] sm:$0xff] %v162_v47  }
   0xf   :  { %178 = vst [vmem:[%s233_s3 + $0x10] sm:$0xff] %v167_v48   ;;  %179 = vst [vmem:[%s233_s3 + $0x18] sm:$0xff] %v172_v49  }

// kernel: _lambda_.40
= control target key start
LH: loop header
LB: loop body
LE: loop exit
PB: predicated region body
PF: predicated region fallthrough
CT: control target
= control target key end

     0   :  { %s505_s1 = inlined_call_operand.vmem [shape: bf16[128,128], index: 1, kind: input, shape index: {}]   ;;  %s506_s0 = inlined_call_operand.vmem [shape: bf16[64,128], index: 0, kind: input, shape index: {}]   ;;  %s507_s2 = inlined_call_operand.vmem [shape: bf16[64,128], index: 2, kind: output, shape index: {0}]   ;;  %s508_s3 = inlined_call_operand.vmem [shape: f32[1,1,128], index: 3, kind: output, shape index: {1}]   ;;  %s509_s4 = inlined_call_operand.vmem [shape: f32[1,1,128], index: 4, kind: output, shape index: {2}]  }
   0x1   :  { %v414_v0 = vld [vmem:[%s505_s1 + $0x38] sm:$0xff]   ;;  %v415_v1 = vld [vmem:[%s505_s1 + $0x30] sm:$0xff]   ;;  %v416_v2 = vld [vmem:[%s505_s1 + $0x28] sm:$0xff]  }
   0x2   :  { %374 = vmatprep.subr.bf16.mxu0 %v414_v0  ;;  %398 = vmatprep.subr.bf16.mxu1 %v414_v0  ;;  %v417_v3 = vld [vmem:[%s505_s1 + $0x20] sm:$0xff]   ;;  %v424_v5 = vld [vmem:[%s506_s0 + $0x10] sm:$0xff]   ;;  %v418_v6 = vld [vmem:[%s505_s1 + $0x18] sm:$0xff]  }
   0x3   :  { %375 = vmatpush3.bf16.msra.mxu0 %v414_v0  ;;  %406 = vmatpush3.bf16.msra.mxu1 %v414_v0  ;;  %v422_v4 = vld [vmem:[%s506_s0] sm:$0xff]   ;;  %v419_v7 = vld [vmem:[%s505_s1 + $0x10] sm:$0xff]   ;;  %v420_v8 = vld [vmem:[%s505_s1 + $0x8] sm:$0xff]  }
   0x4   :  { %376 = vmatprep.subr.bf16.mxu0 %v415_v1  ;;  %399 = vmatprep.subr.bf16.mxu1 %v415_v1  ;;  %v421_v9 = vld [vmem:[%s505_s1] sm:$0xff]   ;;  %v423_v10 = vld [vmem:[%s506_s0 + $0x8] sm:$0xff]   ;;  %v425_v11 = vld [vmem:[%s506_s0 + $0x18] sm:$0xff]  }
   0x5   :  { %390 = vmatprep.mubr.bf16.mxu0 %v422_v4  ;;  %394 = vmatprep.mubr.bf16.mxu1 %v424_v5 }
   0x7   :  { %377 = vmatpush3.bf16.msra.mxu0 %v415_v1  ;;  %407 = vmatpush3.bf16.msra.mxu1 %v415_v1 }
   0x8   :  { %378 = vmatprep.subr.bf16.mxu0 %v416_v2  ;;  %400 = vmatprep.subr.bf16.mxu1 %v416_v2 }
   0xb   :  { %379 = vmatpush3.bf16.msra.mxu0 %v416_v2  ;;  %408 = vmatpush3.bf16.msra.mxu1 %v416_v2 }
   0xc   :  { %380 = vmatprep.subr.bf16.mxu0 %v417_v3  ;;  %401 = vmatprep.subr.bf16.mxu1 %v417_v3 }
   0xf   :  { %381 = vmatpush3.bf16.msra.mxu0 %v417_v3  ;;  %409 = vmatpush3.bf16.msra.mxu1 %v417_v3 }
  0x10   :  { %382 = vmatprep.subr.bf16.mxu0 %v418_v6  ;;  %402 = vmatprep.subr.bf16.mxu1 %v418_v6 }
  0x13   :  { %383 = vmatpush3.bf16.msra.mxu0 %v418_v6  ;;  %410 = vmatpush3.bf16.msra.mxu1 %v418_v6 }
  0x14   :  { %384 = vmatprep.subr.bf16.mxu0 %v419_v7  ;;  %403 = vmatprep.subr.bf16.mxu1 %v419_v7 }
  0x17   :  { %385 = vmatpush3.bf16.msra.mxu0 %v419_v7  ;;  %411 = vmatpush3.bf16.msra.mxu1 %v419_v7 }
  0x18   :  { %386 = vmatprep.subr.bf16.mxu0 %v420_v8  ;;  %404 = vmatprep.subr.bf16.mxu1 %v420_v8 }
  0x1b   :  { %387 = vmatpush3.bf16.msra.mxu0 %v420_v8  ;;  %412 = vmatpush3.bf16.msra.mxu1 %v420_v8 }
  0x1c   :  { %388 = vmatprep.subr.bf16.mxu0 %v421_v9  ;;  %405 = vmatprep.subr.bf16.mxu1 %v421_v9 }
  0x1f   :  { %389 = vmatpush3.bf16.msra.mxu0 %v421_v9  ;;  %413 = vmatpush3.bf16.msra.mxu1 %v421_v9 }
  0x22   :  { %391 = vmatmul.mubr.bf16.vlgmr.msra.gmra.mxu0 %v423_v10  ;;  %395 = vmatmul.mubr.bf16.vlgmr.msra.gmra.mxu1 %v425_v11 }
  0xe2   :  { %v392_v12 = vpop.f32.mrf.mxu0  ;;  %v396_v13 = vpop.f32.mrf.mxu1 }
  0xe3   :  { %v279_v27 = vmul.f32 %v392_v12, %v392_v12  ;;  %v283_v39 = vmul.f32 %v396_v13, %v396_v13 }
  0xe4   :  { %v165_v14 = vpop.f32.mrf.mxu0  ;;  %v181_v15 = vpop.f32.mrf.mxu1 }
  0xe5   :  { %v277_v20 = vmul.f32 %v165_v14, %v165_v14  ;;  %v281_v33 = vmul.f32 %v181_v15, %v181_v15 }
  0xe6   :  { %v393_v16 = vpop.f32.mrf.mxu0  ;;  %v397_v17 = vpop.f32.mrf.mxu1 }
  0xe7   :  { %v347_v18 = vpack.c.bf16 %v393_v16, %v392_v12  ;;  %v357_v19 = vpack.c.bf16 %v397_v17, %v396_v13  ;;  %v280_v30 = vmul.f32 %v393_v16, %v393_v16  ;;  %v284_v42 = vmul.f32 %v397_v17, %v397_v17 }
  0xe8   :  { %v168_v21 = vpop.f32.mrf.mxu0  ;;  %v184_v22 = vpop.f32.mrf.mxu1 }
  0xe9   :  { %359 = vst [vmem:[%s507_s2 + $0x8] sm:$0xff] %v347_v18   ;;  %v342_v23 = vpack.c.bf16 %v168_v21, %v165_v14  ;;  %v263_v24 = vadd.f32 %v168_v21, %v165_v14  ;;  %v278_v25 = vmul.f32 %v168_v21, %v168_v21  ;;  %361 = vst [vmem:[%s507_s2 + $0x18] sm:$0xff] %v357_v19  }
  0xea   :  { %v352_v26 = vpack.c.bf16 %v184_v22, %v181_v15  ;;  %v282_v37 = vmul.f32 %v184_v22, %v184_v22 }
  0xeb   :  { %343 = vst [vmem:[%s507_s2] sm:$0xff] %v342_v23   ;;  %v264_v28 = vadd.f32 %v392_v12, %v263_v24  ;;  %v285_v29 = vadd.f32 %v278_v25, %v277_v20 }
  0xec   :  { %360 = vst [vmem:[%s507_s2 + $0x10] sm:$0xff] %v352_v26  }
  0xed   :  { %v286_v31 = vadd.f32 %v285_v29, %v279_v27  ;;  %v265_v32 = vadd.f32 %v393_v16, %v264_v28 }
  0xef   :  { %v266_v34 = vadd.f32 %v265_v32, %v181_v15  ;;  %v287_v35 = vadd.f32 %v286_v31, %v280_v30 }
  0xf1   :  { %v267_v36 = vadd.f32 %v266_v34, %v184_v22  ;;  %v288_v38 = vadd.f32 %v287_v35, %v281_v33 }
  0xf3   :  { %v268_v40 = vadd.f32 %v396_v13, %v267_v36  ;;  %v289_v41 = vadd.f32 %v288_v38, %v282_v37 }
  0xf5   :  { %v269_v43 = vadd.f32 %v397_v17, %v268_v40  ;;  %v290_v44 = vadd.f32 %v289_v41, %v283_v39 }
  0xf7   :  { %v270_v45 = vrot.slane %v269_v43, 4  ;;  %v291_v46 = vadd.f32 %v290_v44, %v284_v42 }
  0xf9   :  { %v271_v47 = vadd.f32 %v270_v45, %v269_v43  ;;  %v292_v48 = vrot.slane %v291_v46, 4 }
  0xfb   :  { %v272_v49 = vrot.slane %v271_v47, 2  ;;  %v293_v50 = vadd.f32 %v292_v48, %v291_v46 }
  0xfd   :  { %v273_v51 = vadd.f32 %v272_v49, %v271_v47  ;;  %v294_v52 = vrot.slane %v293_v50, 2 }
  0xff   :  { %v274_v53 = vrot.slane %v273_v51, 1  ;;  %v295_v54 = vadd.f32 %v294_v52, %v293_v50 }
 0x101   :  { %v275_v55 = vadd.f32 %v274_v53, %v273_v51  ;;  %v296_v56 = vrot.slane %v295_v54, 1 }
 0x103   :  { %276 = vst [vmem:[%s508_s3] sm:$0x1] %v275_v55  ;;  %v297_v57 = vadd.f32 %v296_v56, %v295_v54 }
 0x105   :  { %298 = vst [vmem:[%s509_s4] sm:$0x1] %v297_v57 }

// kernel: _lambda_.42
= control target key start
LH: loop header
LB: loop body
LE: loop exit
PB: predicated region body
PF: predicated region fallthrough
CT: control target
= control target key end

     0   :  { %v563_v1 = vmov 0   ;;  %s680_s1 = inlined_call_operand.vmem [shape: bf16[128,256], index: 1, kind: input, shape index: {}]   ;;  %s681_s0 = inlined_call_operand.vmem [shape: bf16[64,128], index: 0, kind: input, shape index: {}]   ;;  %s682_s2 = inlined_call_operand.vmem [shape: bf16[64,256], index: 2, kind: output, shape index: {0}]   ;;  %s683_s3 = inlined_call_operand.vmem [shape: f32[1,1,256], index: 3, kind: output, shape index: {1}]   ;;  %s684_s4 = inlined_call_operand.vmem [shape: f32[1,1,256], index: 4, kind: output, shape index: {2}]  }
   0x1   :  { %v535_v0 = vld [vmem:[%s680_s1 + $0x74] ss:$8 sps:$4 sm:$0xff]   ;;  %211 = vmatprep.mubr.bf16.mxu0 %v563_v1  ;;  %231 = vmatprep.mubr.bf16.mxu1 %v563_v1  ;;  %v537_v2 = vld [vmem:[%s680_s1 + $0x70] ss:$8 sps:$4 sm:$0xff]   ;;  %v538_v3 = vld [vmem:[%s680_s1 + $0x64] ss:$8 sps:$4 sm:$0xff]  }
   0x2   :  { %179 = vmatprep.subr.bf16.mxu0 %v535_v0  ;;  %517 = vmatprep.subr.bf16.mxu1 %v535_v0  ;;  %v540_v4 = vld [vmem:[%s680_s1 + $0x60] ss:$8 sps:$4 sm:$0xff]   ;;  %v541_v5 = vld [vmem:[%s680_s1 + $0x54] ss:$8 sps:$4 sm:$0xff]   ;;  %v543_v6 = vld [vmem:[%s680_s1 + $0x50] ss:$8 sps:$4 sm:$0xff]  }
   0x3   :  { %180 = vmatpush1.bf16.msra.mxu0 %v537_v2  ;;  %525 = vmatpush1.bf16.msra.mxu1 %v537_v2  ;;  %v544_v7 = vld [vmem:[%s680_s1 + $0x44] ss:$8 sps:$4 sm:$0xff]   ;;  %v546_v8 = vld [vmem:[%s680_s1 + $0x40] ss:$8 sps:$4 sm:$0xff]   ;;  %v547_v9 = vld [vmem:[%s680_s1 + $0x34] ss:$8 sps:$4 sm:$0xff]  }
   0x4   :  { %181 = vmatprep.subr.bf16.mxu0 %v538_v3  ;;  %518 = vmatprep.subr.bf16.mxu1 %v538_v3  ;;  %v549_v10 = vld [vmem:[%s680_s1 + $0x30] ss:$8 sps:$4 sm:$0xff]   ;;  %v550_v11 = vld [vmem:[%s680_s1 + $0x24] ss:$8 sps:$4 sm:$0xff]   ;;  %v552_v12 = vld [vmem:[%s680_s1 + $0x20] ss:$8 sps:$4 sm:$0xff]  }
   0x5   :  { %v553_v13 = vld [vmem:[%s680_s1 + $0x14] ss:$8 sps:$4 sm:$0xff]   ;;  %v555_v14 = vld [vmem:[%s680_s1 + $0x10] ss:$8 sps:$4 sm:$0xff]   ;;  %v556_v15 = vld [vmem:[%s680_s1 + $0x4] ss:$8 sps:$4 sm:$0xff]  }
   0x6   :  { %v558_v16 = vld [vmem:[%s680_s1] ss:$8 sps:$4 sm:$0xff]   ;;  %v560_v18 = vld [vmem:[%s681_s0 + $0x10] sm:$0xff]   ;;  %v562_v20 = vld [vmem:[%s681_s0 + $0x18] sm:$0xff]  }
   0x7   :  { %182 = vmatpush1.bf16.msra.mxu0 %v540_v4  ;;  %526 = vmatpush1.bf16.msra.mxu1 %v540_v4  ;;  %v559_v17 = vld [vmem:[%s681_s0] sm:$0xff]   ;;  %v561_v19 = vld [vmem:[%s681_s0 + $0x8] sm:$0xff]  }
   0x8   :  { %183 = vmatprep.subr.bf16.mxu0 %v541_v5  ;;  %519 = vmatprep.subr.bf16.mxu1 %v541_v5 }
   0xb   :  { %184 = vmatpush1.bf16.msra.mxu0 %v543_v6  ;;  %527 = vmatpush1.bf16.msra.mxu1 %v543_v6 }
   0xc   :  { %185 = vmatprep.subr.bf16.mxu0 %v544_v7  ;;  %520 = vmatprep.subr.bf16.mxu1 %v544_v7 }
   0xf   :  { %186 = vmatpush1.bf16.msra.mxu0 %v546_v8  ;;  %528 = vmatpush1.bf16.msra.mxu1 %v546_v8 }
  0x10   :  { %187 = vmatprep.subr.bf16.mxu0 %v547_v9  ;;  %521 = vmatprep.subr.bf16.mxu1 %v547_v9 }
  0x13   :  { %188 = vmatpush1.bf16.msra.mxu0 %v549_v10  ;;  %529 = vmatpush1.bf16.msra.mxu1 %v549_v10 }
  0x14   :  { %189 = vmatprep.subr.bf16.mxu0 %v550_v11  ;;  %522 = vmatprep.subr.bf16.mxu1 %v550_v11 }
  0x17   :  { %190 = vmatpush1.bf16.msra.mxu0 %v552_v12  ;;  %530 = vmatpush1.bf16.msra.mxu1 %v552_v12 }
  0x18   :  { %191 = vmatprep.subr.bf16.mxu0 %v553_v13  ;;  %523 = vmatprep.subr.bf16.mxu1 %v553_v13 }
  0x1b   :  { %192 = vmatpush1.bf16.msra.mxu0 %v555_v14  ;;  %531 = vmatpush1.bf16.msra.mxu1 %v555_v14 }
  0x1c   :  { %193 = vmatprep.subr.bf16.mxu0 %v556_v15  ;;  %524 = vmatprep.subr.bf16.mxu1 %v556_v15 }
  0x1f   :  { %194 = vmatpush1.bf16.msra.mxu0 %v558_v16  ;;  %532 = vmatpush1.bf16.msra.mxu1 %v558_v16 }
  0x22   :  { %212 = vmatmul.mubr.bf16.vlgmr.msra.gmra.mxu0 %v559_v17  ;;  %232 = vmatmul.mubr.bf16.vlgmr.msra.gmra.mxu1 %v560_v18 }
  0x23   :  { %221 = vmatprep.mubr.bf16.mxu0 %v563_v1  ;;  %241 = vmatprep.mubr.bf16.mxu1 %v563_v1 }
  0x2a   :  { %222 = vmatmul.mubr.bf16.gmra.mxu0 %v561_v19  ;;  %242 = vmatmul.mubr.bf16.gmra.mxu1 %v562_v20 }
  0xe2   :  { %v213_v21 = vpop.f32.mrf.mxu0  ;;  %v233_v22 = vpop.f32.mrf.mxu1 }
  0xe3   :  { %v408_v36 = vmul.f32 %v213_v21, %v213_v21  ;;  %v416_v55 = vmul.f32 %v233_v22, %v233_v22 }
  0xe4   :  { %v215_v23 = vpop.f32.mrf.mxu0  ;;  %v235_v24 = vpop.f32.mrf.mxu1 }
  0xe5   :  { %v509_v25 = vpack.c.bf16 %v215_v23, %v213_v21  ;;  %v513_v26 = vpack.c.bf16 %v235_v24, %v233_v22  ;;  %v409_v46 = vmul.f32 %v215_v23, %v215_v23  ;;  %v417_v6 = vmul.f32 %v235_v24, %v235_v24 }
  0xe6   :  { %v217_v27 = vpop.f32.mrf.mxu0  ;;  %v237_v28 = vpop.f32.mrf.mxu1 }
  0xe7   :  { %351 = vst [vmem:[%s682_s2] sm:$0xff] %v509_v25  ;;  %355 = vst [vmem:[%s682_s2 + $0x20] sm:$0xff] %v513_v26  ;;  %v410_v31 = vmul.f32 %v217_v27, %v217_v27  ;;  %v359_v37 = vadd.f32 %v217_v27, %v213_v21  ;;  %v418_v2 = vmul.f32 %v237_v28, %v237_v28 }
  0xe8   :  { %v219_v29 = vpop.f32.mrf.mxu0  ;;  %v239_v30 = vpop.f32.mrf.mxu1 }
  0xe9   :  { %v510_v32 = vpack.c.bf16 %v219_v29, %v217_v27  ;;  %v514_v34 = vpack.c.bf16 %v239_v30, %v237_v28  ;;  %v411_v39 = vmul.f32 %v219_v29, %v219_v29  ;;  %v424_v42 = vadd.f32 %v410_v31, %v408_v36 }
  0xea   :  { %v223_v33 = vpop.f32.mrf.mxu0  ;;  %v243_v35 = vpop.f32.mrf.mxu1  ;;  %v372_v43 = vadd.f32 %v219_v29, %v215_v23  ;;  %v419_v12 = vmul.f32 %v239_v30, %v239_v30 }
  0xeb   :  { %352 = vst [vmem:[%s682_s2 + $0x8] sm:$0xff] %v510_v32  ;;  %v412_v38 = vmul.f32 %v223_v33, %v223_v33  ;;  %356 = vst [vmem:[%s682_s2 + $0x28] sm:$0xff] %v514_v34  ;;  %v360_v44 = vadd.f32 %v359_v37, %v223_v33  ;;  %v437_v56 = vadd.f32 %v411_v39, %v409_v46  ;;  %v391_v34 = vlaneseq }
  0xec   :  { %v225_v40 = vpop.f32.mrf.mxu0  ;;  %v245_v41 = vpop.f32.mrf.mxu1  ;;  %v420_v8 = vmul.f32 %v243_v35, %v243_v35 }
  0xed   :  { %v511_v45 = vpack.c.bf16 %v225_v40, %v223_v33  ;;  %v413_v47 = vmul.f32 %v225_v40, %v225_v40  ;;  %v515_v49 = vpack.c.bf16 %v245_v41, %v243_v35  ;;  %v425_v51 = vadd.f32 %v424_v42, %v412_v38 }
  0xee   :  { %v227_v48 = vpop.f32.mrf.mxu0  ;;  %v247_v50 = vpop.f32.mrf.mxu1  ;;  %v373_v52 = vadd.f32 %v372_v43, %v225_v40  ;;  %v421_v18 = vmul.f32 %v245_v41, %v245_v41  ;;  %vm405_vm0 = vcmp.lt.s32.totalorder %v391_v34, 256 }
  0xef   :  { %353 = vst [vmem:[%s682_s2 + $0x10] sm:$0xff] %v511_v45  ;;  %v361_v53 = vadd.f32 %v360_v44, %v227_v48  ;;  %v414_v54 = vmul.f32 %v227_v48, %v227_v48  ;;  %357 = vst [vmem:[%s682_s2 + $0x30] sm:$0xff] %v515_v49  ;;  %v438_v63 = vadd.f32 %v437_v56, %v413_v47  ;;  %v392_v44 = vshrl.u32 %v391_v34, 7 }
  0xf0   :  { %v229_v57 = vpop.f32.mrf.mxu0  ;;  %v249_v58 = vpop.f32.mrf.mxu1  ;;  %v422_v15 = vmul.f32 %v247_v50, %v247_v50 }
  0xf1   :  { %v362_v59 = vadd.f32 %v361_v53, %v233_v22  ;;  %v426_v60 = vadd.f32 %v425_v51, %v414_v54  ;;  %v512_v61 = vpack.c.bf16 %v229_v57, %v227_v48  ;;  %v374_v62 = vadd.f32 %v373_v52, %v229_v57 }
  0xf2   :  { %v415_v0 = vmul.f32 %v229_v57, %v229_v57  ;;  %v516_v1 = vpack.c.bf16 %v249_v58, %v247_v50  ;;  %v423_v23 = vmul.f32 %v249_v58, %v249_v58 }
  0xf3   :  { %v427_v3 = vadd.f32 %v426_v60, %v416_v55  ;;  %354 = vst [vmem:[%s682_s2 + $0x18] sm:$0xff] %v512_v61  ;;  %v375_v4 = vadd.f32 %v374_v62, %v235_v24  ;;  %v363_v5 = vadd.f32 %v362_v59, %v237_v28  ;;  %v564_v28 = vmov 1966171168  }
  0xf4   :  { %v439_v7 = vadd.f32 %v438_v63, %v415_v0  ;;  %358 = vst [vmem:[%s682_s2 + $0x38] sm:$0xff] %v516_v1  ;;  %v389_v29 = vunpack.c.l.s4 %v564_v28 }
  0xf5   :  { %v364_v9 = vadd.f32 %v363_v5, %v243_v35  ;;  %v428_v10 = vadd.f32 %v427_v3, %v418_v2  ;;  %v376_v11 = vadd.f32 %v375_v4, %v239_v30 }
  0xf6   :  { %v440_v13 = vadd.f32 %v439_v7, %v417_v6  ;;  %v390_v39 = vunpack.c.0.s8 %v389_v29 }
  0xf7   :  { %v365_v14 = vadd.f32 %v364_v9, %v247_v50  ;;  %v429_v16 = vadd.f32 %v428_v10, %v420_v8  ;;  %v377_v17 = vadd.f32 %v376_v11, %v245_v41 }
  0xf8   :  { %v441_v19 = vadd.f32 %v440_v13, %v419_v12  ;;  %v393_v51 = vsub.s32 %v390_v39, %v392_v44 }
  0xf9   :  { %v366_v20 = vrot.slane %v365_v14, 4  ;;  %v430_v21 = vadd.f32 %v429_v16, %v422_v15  ;;  %v378_v22 = vadd.f32 %v377_v17, %v249_v58 }
  0xfa   :  { %v442_v24 = vadd.f32 %v441_v19, %v421_v18 }
  0xfb   :  { %v367_v25 = vadd.f32 %v366_v20, %v365_v14  ;;  %v431_v26 = vrot.slane %v430_v21, 4  ;;  %v379_v27 = vrot.slane %v378_v22, 4 }
  0xfc   :  { %v443_v31 = vadd.f32 %v442_v24, %v423_v23 }
  0xfd   :  { %v368_v32 = vrot.slane %v367_v25, 2  ;;  %v432_v30 = vadd.f32 %v431_v26, %v430_v21  ;;  %v380_v33 = vadd.f32 %v379_v27, %v378_v22 }
  0xfe   :  { %v444_v35 = vrot.slane %v443_v31, 4 }
  0xff   :  { %v369_v36 = vadd.f32 %v368_v32, %v367_v25  ;;  %v433_v37 = vrot.slane %v432_v30, 2  ;;  %v381_v38 = vrot.slane %v380_v33, 2 }
 0x100   :  { %v445_v40 = vadd.f32 %v444_v35, %v443_v31 }
 0x101   :  { %v370_v41 = vrot.slane %v369_v36, 1  ;;  %v434_v42 = vadd.f32 %v433_v37, %v432_v30  ;;  %v382_v43 = vadd.f32 %v381_v38, %v380_v33 }
 0x102   :  { %v446_v45 = vrot.slane %v445_v40, 2 }
 0x103   :  { %v383_v46 = vrot.slane %v382_v43, 1  ;;  %v435_v47 = vrot.slane %v434_v42, 1  ;;  %v371_v49 = vadd.f32 %v370_v41, %v369_v36 }
 0x104   :  { %v447_v48 = vadd.f32 %v446_v45, %v445_v40 }
 0x105   :  { %v384_v50 = vadd.f32 %v383_v46, %v382_v43  ;;  %v436_v54 = vadd.f32 %v435_v47, %v434_v42 }
 0x106   :  { %v448_v52 = vrot.slane %v447_v48, 1 }
 0x107   :  { %v387_v53 = vcombine.low %v371_v49, %v384_v50 }
 0x108   :  { %v449_v55 = vadd.f32 %v448_v52, %v447_v48 }
 0x109   :  { %v394_v56 = vrot.slane %v387_v53, %v393_v51 }
 0x10a   :  { %v452_v57 = vcombine.low %v436_v54, %v449_v55 }
 0x10b   :  { %v401_v58 = vrot.slane %v394_v56, %v393_v51 }
 0x10c   :  { %v459_v59 = vrot.slane %v452_v57, %v393_v51 }
 0x10d   :  { %407 = vst.msk [vmem:[%s683_s3] sm:$0x3] %vm405_vm0, %v401_v58 }
 0x10e   :  { %v466_v60 = vrot.slane %v459_v59, %v393_v51 }
 0x110   :  { %468 = vst.msk [vmem:[%s684_s4] sm:$0x3] %vm405_vm0, %v466_v60 }

// kernel: _lambda_.43
= control target key start
LH: loop header
LB: loop body
LE: loop exit
PB: predicated region body
PF: predicated region fallthrough
CT: control target
= control target key end

     0   :  { %v40_v0 = vlaneseq  ;;  %s260_s0 = inlined_call_operand.vmem [shape: bf16[64,256], index: 0, kind: input, shape index: {}, may-alias: {0,3}]   ;;  %s261_s1 = inlined_call_operand.vmem [shape: f32[1,256], index: 1, kind: input, shape index: {}]   ;;  %s262_s2 = inlined_call_operand.vmem [shape: f32[1,256], index: 2, kind: input, shape index: {}]   ;;  %s263_s3 = inlined_call_operand.vmem [shape: bf16[64,256], index: 3, kind: output, shape index: {}, may-alias: {0,3}]  }
   0x1   :  { %v14_v1 = vld [vmem:[%s260_s0] sm:$0xff]  ;;  %v15_v6 = vld [vmem:[%s260_s0 + $0x8] sm:$0xff]  ;;  %v16_v7 = vld [vmem:[%s260_s0 + $0x10] sm:$0xff] }
   0x2   :  { %v38_v2 = vld [vmem:[%s261_s1] sm:$0x3]  ;;  %v22_v3 = vunpack.c.l.bf16 %v14_v1  ;;  %v23_v4 = vunpack.c.h.bf16 %v14_v1  ;;  %v41_v5 = vshrl.u32 %v40_v0, 7  ;;  %v17_v8 = vld [vmem:[%s260_s0 + $0x18] sm:$0xff]  ;;  %v24_v10 = vunpack.c.l.bf16 %v15_v6  ;;  %v19_v15 = vld [vmem:[%s260_s0 + $0x28] sm:$0xff] }
   0x3   :  { %v66_v9 = vld [vmem:[%s262_s2] sm:$0x3]  ;;  %v25_v11 = vunpack.c.h.bf16 %v15_v6  ;;  %v26_v12 = vunpack.c.l.bf16 %v16_v7  ;;  %v27_v13 = vunpack.c.h.bf16 %v16_v7  ;;  %v28_v18 = vunpack.c.l.bf16 %v17_v8  ;;  %v20_v20 = vld [vmem:[%s260_s0 + $0x30] sm:$0xff]  ;;  %v21_v21 = vld [vmem:[%s260_s0 + $0x38] sm:$0xff] }
   0x4   :  { %v18_v14 = vld [vmem:[%s260_s0 + $0x20] sm:$0xff]  ;;  %v42_v16 = vsub.s32 0, %v41_v5  ;;  %v46_v17 = vsub.s32 1, %v41_v5  ;;  %v29_v19 = vunpack.c.h.bf16 %v17_v8  ;;  %v32_v24 = vunpack.c.l.bf16 %v19_v15 }
   0x5   :  { %v30_v22 = vunpack.c.l.bf16 %v18_v14  ;;  %v31_v23 = vunpack.c.h.bf16 %v18_v14  ;;  %v33_v25 = vunpack.c.h.bf16 %v19_v15  ;;  %v34_v30 = vunpack.c.l.bf16 %v20_v20 }
   0x6   :  { %v43_v26 = vrot.slane %v38_v2, %v42_v16  ;;  %v47_v27 = vrot.slane %v38_v2, %v46_v17  ;;  %v71_v28 = vrot.slane %v66_v9, %v42_v16  ;;  %v75_v29 = vrot.slane %v66_v9, %v46_v17 }
   0x7   :  { %v35_v31 = vunpack.c.h.bf16 %v20_v20  ;;  %v36_v32 = vunpack.c.l.bf16 %v21_v21  ;;  %v37_v33 = vunpack.c.h.bf16 %v21_v21 }
   0x8   :  { %v50_v34 = vmul.f32 %v43_v26, %v22_v3  ;;  %v51_v35 = vmul.f32 %v47_v27, %v23_v4  ;;  %v52_v36 = vmul.f32 %v43_v26, %v24_v10  ;;  %v53_v37 = vmul.f32 %v47_v27, %v25_v11 }
   0x9   :  { %v54_v38 = vmul.f32 %v43_v26, %v26_v12  ;;  %v55_v39 = vmul.f32 %v47_v27, %v27_v13  ;;  %v56_v40 = vmul.f32 %v43_v26, %v28_v18  ;;  %v57_v41 = vmul.f32 %v47_v27, %v29_v19 }
   0xa   :  { %v78_v42 = vadd.f32 %v71_v28, %v50_v34  ;;  %v79_v43 = vadd.f32 %v75_v29, %v51_v35  ;;  %v80_v44 = vadd.f32 %v71_v28, %v52_v36  ;;  %v81_v45 = vadd.f32 %v75_v29, %v53_v37 }
   0xb   :  { %v82_v46 = vadd.f32 %v71_v28, %v54_v38  ;;  %v83_v47 = vadd.f32 %v75_v29, %v55_v39  ;;  %v84_v48 = vadd.f32 %v71_v28, %v56_v40  ;;  %v85_v49 = vadd.f32 %v75_v29, %v57_v41 }
   0xc   :  { %v94_v50 = vmax.f32 %v78_v42, 0.0  ;;  %v95_v51 = vmax.f32 %v79_v43, 0.0  ;;  %v96_v52 = vmax.f32 %v80_v44, 0.0  ;;  %v97_v53 = vmax.f32 %v81_v45, 0.0 }
   0xd   :  { %v98_v54 = vmax.f32 %v82_v46, 0.0  ;;  %v99_v55 = vmax.f32 %v83_v47, 0.0  ;;  %v100_v56 = vmax.f32 %v84_v48, 0.0  ;;  %v101_v57 = vmax.f32 %v85_v49, 0.0 }
   0xe   :  { %v178_v58 = vpack.c.bf16 %v95_v51, %v94_v50  ;;  %v179_v59 = vpack.c.bf16 %v97_v53, %v96_v52  ;;  %v58_v60 = vmul.f32 %v43_v26, %v30_v22  ;;  %v59_v61 = vmul.f32 %v47_v27, %v31_v23 }
   0xf   :  { %v180_v62 = vpack.c.bf16 %v99_v55, %v98_v54  ;;  %v181_v63 = vpack.c.bf16 %v101_v57, %v100_v56  ;;  %v60_v0 = vmul.f32 %v43_v26, %v32_v24  ;;  %v61_v1 = vmul.f32 %v47_v27, %v33_v25 }
  0x10   :  { %158 = vst [vmem:[%s263_s3] sm:$0xff] %v178_v58  ;;  %159 = vst [vmem:[%s263_s3 + $0x8] sm:$0xff] %v179_v59  ;;  %v86_v2 = vadd.f32 %v71_v28, %v58_v60  ;;  %v87_v3 = vadd.f32 %v75_v29, %v59_v61  ;;  %v62_v4 = vmul.f32 %v43_v26, %v34_v30 }
  0x11   :  { %v63_v5 = vmul.f32 %v47_v27, %v35_v31  ;;  %160 = vst [vmem:[%s263_s3 + $0x10] sm:$0xff] %v180_v62  ;;  %161 = vst [vmem:[%s263_s3 + $0x18] sm:$0xff] %v181_v63  ;;  %v88_v6 = vadd.f32 %v71_v28, %v60_v0  ;;  %v89_v7 = vadd.f32 %v75_v29, %v61_v1 }
  0x12   :  { %v64_v8 = vmul.f32 %v43_v26, %v36_v32  ;;  %v65_v9 = vmul.f32 %v47_v27, %v37_v33  ;;  %v102_v10 = vmax.f32 %v86_v2, 0.0  ;;  %v103_v11 = vmax.f32 %v87_v3, 0.0 }
  0x13   :  { %v90_v12 = vadd.f32 %v71_v28, %v62_v4  ;;  %v91_v13 = vadd.f32 %v75_v29, %v63_v5  ;;  %v104_v14 = vmax.f32 %v88_v6, 0.0  ;;  %v105_v15 = vmax.f32 %v89_v7, 0.0 }
  0x14   :  { %v92_v16 = vadd.f32 %v71_v28, %v64_v8  ;;  %v93_v17 = vadd.f32 %v75_v29, %v65_v9  ;;  %v182_v18 = vpack.c.bf16 %v103_v11, %v102_v10 }
  0x15   :  { %v106_v19 = vmax.f32 %v90_v12, 0.0  ;;  %v107_v20 = vmax.f32 %v91_v13, 0.0  ;;  %v183_v21 = vpack.c.bf16 %v105_v15, %v104_v14 }
  0x16   :  { %v108_v22 = vmax.f32 %v92_v16, 0.0  ;;  %v109_v23 = vmax.f32 %v93_v17, 0.0  ;;  %162 = vst [vmem:[%s263_s3 + $0x20] sm:$0xff] %v182_v18 }
  0x17   :  { %v184_v24 = vpack.c.bf16 %v107_v20, %v106_v19  ;;  %163 = vst [vmem:[%s263_s3 + $0x28] sm:$0xff] %v183_v21 }
  0x18   :  { %v185_v25 = vpack.c.bf16 %v109_v23, %v108_v22 }
  0x19   :  { %164 = vst [vmem:[%s263_s3 + $0x30] sm:$0xff] %v184_v24 }
  0x1a   :  { %165 = vst [vmem:[%s263_s3 + $0x38] sm:$0xff] %v185_v25 }

// kernel: _lambda_.44
= control target key start
LH: loop header
LB: loop body
LE: loop exit
PB: predicated region body
PF: predicated region fallthrough
CT: control target
= control target key end

     0   :  { %s1442_s15 = smov 0   ;;  %s1444_s16 = smov 0   ;;  %s1587_s0 = inlined_call_operand.vmem [shape: bf16[32,2304], index: 0, kind: input, shape index: {}]   ;;  %s1588_s1 = inlined_call_operand.vmem [shape: bf16[2304,256], index: 1, kind: input, shape index: {}]   ;;  %s1589_s2 = inlined_call_operand.vmem [shape: bf16[32,256], index: 2, kind: output, shape index: {0}]   ;;  %s1590_s3 = inlined_call_operand.vmem [shape: f32[1,1,256], index: 3, kind: output, shape index: {1}]   ;;  %s1591_s4 = inlined_call_operand.vmem [shape: f32[1,1,256], index: 4, kind: output, shape index: {2}]  }
   0x1   :  { %s1446_s17 = smov 0   ;;  %s1448_s18 = smov 0  }
   0x2   :  { %s1450_s19 = smov 0  }
   0x3 LB: > { %s27_s20 = sadd.s32 1, %s1408_s18  ;;  %p50_p1 = scmp.ne.s32.totalorder %s1400_s16, %s1396_s15  ;;  %s1412_s19 = sphi %s1450_s19, %s15_s19   ;;  %s1408_s18 = sphi %s1448_s18, %s1595_s18   ;;  %s1404_s17 = sphi %s1446_s17, %s1594_s17   ;;  %s1400_s16 = sphi %s1444_s16, %s1593_s16   ;;  %s1396_s15 = sphi %s1442_s15, %s1592_s15  }
   0x4   : > { %p28_p0 = scmp.ge.s32.totalorder %s27_s20, 6  ;;  %p51_p2 = scmp.eq.s32.totalorder %s1412_s19, 0 }
   0x5   : > { %s43_s22 = sadd.s32 1, %s1400_s16  ;;  %p1162_p5 = scmp.ge.s32.totalorder %s1412_s19, 6 }
   0x6   : > { %s1597_s20 = smov (%p28_p0, %s27_s20), 0  ;;  %p52_p3 = por %p51_p2, %p50_p1 }
   0x7   : > { %s39_s21 = ssub.s32 %s1408_s18, %s1597_s20  ;;  %188 = sbr.rel (%p1162_p5) target bundleno = 21 (0x15), region = 16 }
   0x8   : > { %p41_p4 = scmp.eq.s32.totalorder %s39_s21, 0 }
   0xa   : > { %s1477_s23 = scalar_select %p41_p4, %s1400_s16, %s43_s22  }
   0xc   : > { %191 = sbr.rel (!%p52_p3) target bundleno = 21 (0x15), region = 20  ;;  %s193_s24 = sand.u32 (%p52_p3), 1, %s1400_s16  }
   0xd   : > { %s1243_s25 = smul.u32 (%p52_p3), 12, %s1408_s18 }
   0xe   : > { %s1249_s26 = smul.u32 (%p52_p3), 48, %s193_s24 }
   0xf   : > { %s201_s29 = scalar_lea.vmem (%p52_p3), %s1587_s0, %s1243_s25 }
  0x10   : > { %v216_v0 = vld [vmem:[%s201_s29] sm:$0xff] (%p52_p3)  ;;  %v218_v1 = vld [vmem:[%s201_s29 + $0x48] sm:$0xff] (%p52_p3)  ;;  %v220_v2 = vld [vmem:[%s201_s29 + $0x90] sm:$0xff] (%p52_p3)  ;;  %s195_s30 = scalar_lea.vmem (%p52_p3), [#allocation3], %s1249_s26 }
  0x11   : > { %217 = vst [vmem:[%s195_s30] sm:$0xff] %v216_v0  ;;  %219 = vst [vmem:[%s195_s30 + $0xc] sm:$0xff] %v218_v1  ;;  %v222_v3 = vld [vmem:[%s201_s29 + $0xd8] sm:$0xff]  ;;  %v1164_v4 = vld [vmem:[%s201_s29 + $0x8] sm:$0xf] }
  0x12   : > { %221 = vst [vmem:[%s195_s30 + $0x18] sm:$0xff] %v220_v2  ;;  %v1166_v5 = vld [vmem:[%s201_s29 + $0x50] sm:$0xf]  ;;  %223 = vst [vmem:[%s195_s30 + $0x24] sm:$0xff] %v222_v3  ;;  %v1168_v6 = vld [vmem:[%s201_s29 + $0x98] sm:$0xf] }
  0x13   : > { %1165 = vst [vmem:[%s195_s30 + $0x8] sm:$0xf] %v1164_v4  ;;  %1167 = vst [vmem:[%s195_s30 + $0x14] sm:$0xf] %v1166_v5  ;;  %v1170_v7 = vld [vmem:[%s201_s29 + $0xe0] sm:$0xf] }
  0x14   : > { %1169 = vst [vmem:[%s195_s30 + $0x20] sm:$0xf] %v1168_v6  ;;  %1171 = vst [vmem:[%s195_s30 + $0x2c] sm:$0xf] %v1170_v7 }
  0x15 PF: > { %p1172_p6 = scmp.ge.s32.totalorder %s1412_s19, 1  ;;  %p259_p7 = scmp.lt.s32.totalorder %s1412_s19, 7 }
  0x17   : > { %p260_p8 = pnand %p1172_p6, %p259_p7 }
  0x18   : > { %s266_s5 = sand.u32 (!%p260_p8), 1, %s1396_s15   ;;  %s324_s6 = smul.u32 (!%p260_p8), 48, %s1404_s17 }
  0x19   : > { %263 = sbr.rel (%p260_p8) target bundleno = 347 (0x15b), region = 50  ;;  %p1175_p10 = scmp.ne.s32.totalorder (!%p260_p8), %s1404_s17, 0 }
  0x1a   : > { %s1250_s7 = smul.u32 (!%p260_p8), 48, %s266_s5  ;;  %p326_p9 = scmp.lt.s32.totalorder (!%p260_p8), %s324_s6, 287 }
  0x1c   : > { %s1494_s12 = scalar_lea.vmem (!%p260_p8), [#allocation3], %s1250_s7 }
  0x1e   : > { %s1599_s6 = smov (!%p326_p9, %s324_s6), 287  ;;  %370 = sbr.rel (%p1175_p10) target bundleno = 40 (0x28), region = 58 }
  0x1f   : > { %s1244_s8 = sshll.u32 %s1599_s6, 3 }
  0x20   : > { %s1492_s11 = scalar_lea.vmem %s1588_s1, %s1244_s8 }
  0x23   : > { %v1414_v8 = vmov 0.0  }
  0x24   : > { %371 = vst [vmem:[#allocation2 + $0x30] sm:$0xff] %v1414_v8  ;;  %372 = vst [vmem:[#allocation2] sm:$0xff] %v1414_v8 }
  0x25   : > { %373 = vst [vmem:[#allocation2 + $0x18] sm:$0xff] %v1414_v8  ;;  %374 = vst [vmem:[#allocation2 + $0x10] sm:$0xff] %v1414_v8 }
  0x26   : > { %375 = vst [vmem:[#allocation2 + $0x8] sm:$0xff] %v1414_v8  ;;  %376 = vst [vmem:[#allocation2 + $0x20] sm:$0xff] %v1414_v8 }
  0x27   : > { %377 = vst [vmem:[#allocation2 + $0x28] sm:$0xff] %v1414_v8  ;;  %378 = vst [vmem:[#allocation2 + $0x38] sm:$0xff] %v1414_v8 }
  0x28 PF: > { %v1294_v9 = vld [vmem:[%s1492_s11 + $0x74] ss:$8 sps:$4 sm:$0xff]   ;;  %v1296_v10 = vld [vmem:[%s1492_s11 + $0x70] ss:$8 sps:$4 sm:$0xff]   ;;  %v1415_v11 = vmov 0   ;;  %p1230_p11 = scmp.ne.s32.totalorder %s1404_s17, 5 }
  0x29   : > { %800 = vmatprep.mubr.bf16.mxu1 %v1415_v11  ;;  %715 = vmatprep.subr.bf16.mxu0 %v1294_v9  ;;  %v1297_v12 = vld [vmem:[%s1492_s11 + $0x64] ss:$8 sps:$4 sm:$0xff]   ;;  %v1299_v13 = vld [vmem:[%s1492_s11 + $0x60] ss:$8 sps:$4 sm:$0xff]   ;;  %v1300_v14 = vld [vmem:[%s1492_s11 + $0x54] ss:$8 sps:$4 sm:$0xff]  }
  0x2a   : > { %716 = vmatpush1.bf16.msra.mxu0 %v1296_v10  ;;  %v1302_v15 = vld [vmem:[%s1492_s11 + $0x50] ss:$8 sps:$4 sm:$0xff]   ;;  %v1303_v16 = vld [vmem:[%s1492_s11 + $0x44] ss:$8 sps:$4 sm:$0xff]   ;;  %v1315_v17 = vld [vmem:[%s1492_s11 + $0x174] ss:$8 sps:$4 sm:$0xff]  }
  0x2b   : > { %717 = vmatprep.subr.bf16.mxu0 %v1297_v12  ;;  %v1317_v18 = vld [vmem:[%s1492_s11 + $0x170] ss:$8 sps:$4 sm:$0xff]   ;;  %v1305_v19 = vld [vmem:[%s1492_s11 + $0x40] ss:$8 sps:$4 sm:$0xff]   ;;  %v1306_v20 = vld [vmem:[%s1492_s11 + $0x34] ss:$8 sps:$4 sm:$0xff]   ;;  %768 = vmatprep.subr.bf16.mxu1 %v1315_v17 }
  0x2c   : > { %v1321_v21 = vld [vmem:[%s1492_s11 + $0x164] ss:$8 sps:$4 sm:$0xff]   ;;  %769 = vmatpush1.bf16.msra.mxu1 %v1317_v18  ;;  %v1323_v22 = vld [vmem:[%s1492_s11 + $0x160] ss:$8 sps:$4 sm:$0xff]   ;;  %v1308_v23 = vld [vmem:[%s1492_s11 + $0x30] ss:$8 sps:$4 sm:$0xff]  }
  0x2d   : > { %770 = vmatprep.subr.bf16.mxu1 %v1321_v21  ;;  %v1327_v24 = vld [vmem:[%s1492_s11 + $0x154] ss:$8 sps:$4 sm:$0xff]   ;;  %v1309_v25 = vld [vmem:[%s1492_s11 + $0x24] ss:$8 sps:$4 sm:$0xff]   ;;  %v1329_v26 = vld [vmem:[%s1492_s11 + $0x150] ss:$8 sps:$4 sm:$0xff]  }
  0x2e   : > { %718 = vmatpush1.bf16.msra.mxu0 %v1299_v13  ;;  %v1333_v27 = vld [vmem:[%s1492_s11 + $0x144] ss:$8 sps:$4 sm:$0xff]   ;;  %v1311_v28 = vld [vmem:[%s1492_s11 + $0x20] ss:$8 sps:$4 sm:$0xff]   ;;  %v1312_v29 = vld [vmem:[%s1492_s11 + $0x14] ss:$8 sps:$4 sm:$0xff]  }
  0x2f   : > { %719 = vmatprep.subr.bf16.mxu0 %v1300_v14  ;;  %v1335_v30 = vld [vmem:[%s1492_s11 + $0x140] ss:$8 sps:$4 sm:$0xff]   ;;  %v1339_v31 = vld [vmem:[%s1492_s11 + $0x134] ss:$8 sps:$4 sm:$0xff]   ;;  %v1314_v32 = vld [vmem:[%s1492_s11 + $0x10] ss:$8 sps:$4 sm:$0xff]  }
  0x30   : > { %771 = vmatpush1.bf16.msra.mxu1 %v1323_v22  ;;  %v1318_v33 = vld [vmem:[%s1492_s11 + $0x4] ss:$8 sps:$4 sm:$0xff]   ;;  %v1341_v34 = vld [vmem:[%s1492_s11 + $0x130] ss:$8 sps:$4 sm:$0xff]   ;;  %v1320_v36 = vld [vmem:[%s1492_s11] ss:$8 sps:$4 sm:$0xff]  }
  0x31   : > { %772 = vmatprep.subr.bf16.mxu1 %v1327_v24  ;;  %v1345_v35 = vld [vmem:[%s1492_s11 + $0x124] ss:$8 sps:$4 sm:$0xff]   ;;  %v1324_v37 = vld [vmem:[%s1492_s11 + $0xf4] ss:$8 sps:$4 sm:$0xff]   ;;  %v1347_v38 = vld [vmem:[%s1492_s11 + $0x120] ss:$8 sps:$4 sm:$0xff]  }
  0x32   : > { %720 = vmatpush1.bf16.msra.mxu0 %v1302_v15  ;;  %v1351_v39 = vld [vmem:[%s1492_s11 + $0x114] ss:$8 sps:$4 sm:$0xff]   ;;  %v1326_v40 = vld [vmem:[%s1492_s11 + $0xf0] ss:$8 sps:$4 sm:$0xff]   ;;  %v1330_v41 = vld [vmem:[%s1492_s11 + $0xe4] ss:$8 sps:$4 sm:$0xff]  }
  0x33   : > { %721 = vmatprep.subr.bf16.mxu0 %v1303_v16  ;;  %v1353_v42 = vld [vmem:[%s1492_s11 + $0x110] ss:$8 sps:$4 sm:$0xff]   ;;  %v1357_v43 = vld [vmem:[%s1492_s11 + $0x104] ss:$8 sps:$4 sm:$0xff]   ;;  %v1332_v45 = vld [vmem:[%s1492_s11 + $0xe0] ss:$8 sps:$4 sm:$0xff]  }
  0x34   : > { %773 = vmatpush1.bf16.msra.mxu1 %v1329_v26  ;;  %v1369_v44 = vld [vmem:[%s1494_s12 + $0x4] ss:$12 sps:$4 sm:$0xff]   ;;  %v1363_v50 = vld [vmem:[%s1494_s12 + $0x8] ss:$12 sps:$4 sm:$0xff]   ;;  %v1370_v55 = vld [vmem:[%s1494_s12 + $0x20] ss:$12 sps:$4 sm:$0xff]  }
  0x35   : > { %774 = vmatprep.subr.bf16.mxu1 %v1333_v27  ;;  %v1336_v46 = vld [vmem:[%s1492_s11 + $0xd4] ss:$8 sps:$4 sm:$0xff]   ;;  %747 = vmatprep.mubr.bf16.mxu0 %v1369_v44  ;;  %v1359_v47 = vld [vmem:[%s1492_s11 + $0x100] ss:$8 sps:$4 sm:$0xff]   ;;  %v1338_v48 = vld [vmem:[%s1492_s11 + $0xd0] ss:$8 sps:$4 sm:$0xff]  }
  0x36   : > { %722 = vmatpush1.bf16.msra.mxu0 %v1305_v19  ;;  %v1342_v49 = vld [vmem:[%s1492_s11 + $0xc4] ss:$8 sps:$4 sm:$0xff]   ;;  %v1344_v51 = vld [vmem:[%s1492_s11 + $0xc0] ss:$8 sps:$4 sm:$0xff]   ;;  %v1348_v52 = vld [vmem:[%s1492_s11 + $0xb4] ss:$8 sps:$4 sm:$0xff]  }
  0x37   : > { %723 = vmatprep.subr.bf16.mxu0 %v1306_v20  ;;  %v1350_v53 = vld [vmem:[%s1492_s11 + $0xb0] ss:$8 sps:$4 sm:$0xff]   ;;  %v1354_v54 = vld [vmem:[%s1492_s11 + $0xa4] ss:$8 sps:$4 sm:$0xff]   ;;  %v1356_v56 = vld [vmem:[%s1492_s11 + $0xa0] ss:$8 sps:$4 sm:$0xff]  }
  0x38   : > { %775 = vmatpush1.bf16.msra.mxu1 %v1335_v30  ;;  %v1360_v57 = vld [vmem:[%s1492_s11 + $0x94] ss:$8 sps:$4 sm:$0xff]   ;;  %v1362_v58 = vld [vmem:[%s1492_s11 + $0x90] ss:$8 sps:$4 sm:$0xff]   ;;  %v1364_v59 = vld [vmem:[%s1492_s11 + $0x84] ss:$8 sps:$4 sm:$0xff]  }
  0x39   : > { %776 = vmatprep.subr.bf16.mxu1 %v1339_v31  ;;  %v1366_v60 = vld [vmem:[%s1492_s11 + $0x80] ss:$8 sps:$4 sm:$0xff]   ;;  %v379_v4 = vld [vmem:[#allocation2 + $0x30] sm:$0xff]  ;;  %v381_v12 = vld [vmem:[#allocation2 + $0x18] sm:$0xff] }
  0x3a   : > { %724 = vmatpush1.bf16.msra.mxu0 %v1308_v23  ;;  %v1367_v61 = vld [vmem:[%s1494_s12] ss:$12 sps:$4 sm:$0xff]   ;;  %v1371_v62 = vld [vmem:[%s1494_s12 + $0x1c] ss:$12 sps:$4 sm:$0xff]   ;;  %v1373_v63 = vld [vmem:[%s1494_s12 + $0x18] ss:$12 sps:$4 sm:$0xff]  }
  0x3b   : > { %725 = vmatprep.subr.bf16.mxu0 %v1309_v25  ;;  %v380_v7 = vld [vmem:[#allocation2] sm:$0xff]  ;;  %v382_v17 = vld [vmem:[#allocation2 + $0x10] sm:$0xff]  ;;  %v383_v21 = vld [vmem:[#allocation2 + $0x8] sm:$0xff] }
  0x3c   : > { %777 = vmatpush1.bf16.msra.mxu1 %v1341_v34  ;;  %v384_v26 = vld [vmem:[#allocation2 + $0x20] sm:$0xff]  ;;  %v385_v30 = vld [vmem:[#allocation2 + $0x28] sm:$0xff] }
  0x3d   : > { %778 = vmatprep.subr.bf16.mxu1 %v1345_v35  ;;  %v386_v35 = vld [vmem:[#allocation2 + $0x38] sm:$0xff] }
  0x3e   : > { %726 = vmatpush1.bf16.msra.mxu0 %v1311_v28 }
  0x3f   : > { %727 = vmatprep.subr.bf16.mxu0 %v1312_v29 }
  0x40   : > { %779 = vmatpush1.bf16.msra.mxu1 %v1347_v38 }
  0x41   : > { %780 = vmatprep.subr.bf16.mxu1 %v1351_v39 }
  0x42   : > { %728 = vmatpush1.bf16.msra.mxu0 %v1314_v32 }
  0x43   : > { %729 = vmatprep.subr.bf16.mxu0 %v1318_v33 }
  0x44   : > { %781 = vmatpush1.bf16.msra.mxu1 %v1353_v42 }
  0x45   : > { %782 = vmatprep.subr.bf16.mxu1 %v1357_v43 }
  0x46   : > { %730 = vmatpush1.bf16.msra.mxu0 %v1320_v36 }
  0x47   : > { %731 = vmatprep.subr.bf16.mxu0 %v1324_v37 }
  0x48   : > { %783 = vmatpush1.bf16.msra.mxu1 %v1359_v47 }
  0x4a   : > { %732 = vmatpush2.bf16.msra.mxu0 %v1326_v40 }
  0x4b   : > { %733 = vmatprep.subr.bf16.mxu0 %v1330_v41  ;;  %801 = vmatmul.mubr.bf16.vlgmr.msra.gmra.mxu1 %v1363_v50 }
  0x4c   : > { %810 = vmatprep.mubr.bf16.mxu1 %v1415_v11 }
  0x4e   : > { %734 = vmatpush2.bf16.msra.mxu0 %v1332_v45 }
  0x4f   : > { %735 = vmatprep.subr.bf16.mxu0 %v1336_v46 }
  0x52   : > { %736 = vmatpush2.bf16.msra.mxu0 %v1338_v48 }
  0x53   : > { %737 = vmatprep.subr.bf16.mxu0 %v1342_v49  ;;  %811 = vmatmul.mubr.bf16.gmra.mxu1 %v1370_v55 }
  0x56   : > { %738 = vmatpush2.bf16.msra.mxu0 %v1344_v51 }
  0x57   : > { %739 = vmatprep.subr.bf16.mxu0 %v1348_v52 }
  0x5a   : > { %740 = vmatpush2.bf16.msra.mxu0 %v1350_v53 }
  0x5b   : > { %741 = vmatprep.subr.bf16.mxu0 %v1354_v54 }
  0x5e   : > { %742 = vmatpush2.bf16.msra.mxu0 %v1356_v56 }
  0x5f   : > { %743 = vmatprep.subr.bf16.mxu0 %v1360_v57 }
  0x62   : > { %744 = vmatpush2.bf16.msra.mxu0 %v1362_v58 }
  0x63   : > { %745 = vmatprep.subr.bf16.mxu0 %v1364_v59 }
  0x66   : > { %746 = vmatpush2.bf16.msra.mxu0 %v1366_v60 }
  0x69   : > { %748 = vmatmul.mubr.bf16.vlgmr.msra.gmra.mxu0 %v1367_v61 }
  0x6a   : > { %757 = vmatprep.mubr.bf16.mxu0 %v1371_v62 }
  0x71   : > { %758 = vmatmul.mubr.bf16.gmra.mxu0 %v1373_v63 }
 0x10b   : > { %v802_v0 = vpop.f32.mrf.mxu1 }
 0x10d   : > { %v804_v1 = vpop.f32.mrf.mxu1 }
 0x10f   : > { %v806_v2 = vpop.f32.mrf.mxu1 }
 0x111   : > { %v808_v3 = vpop.f32.mrf.mxu1 }
 0x113   : > { %v812_v9 = vpop.f32.mrf.mxu1 }
 0x115   : > { %v814_v16 = vpop.f32.mrf.mxu1 }
 0x117   : > { %v816_v25 = vpop.f32.mrf.mxu1 }
 0x119   : > { %v818_v34 = vpop.f32.mrf.mxu1 }
 0x129   : > { %v749_v5 = vpop.f32.mrf.mxu0 }
 0x12a   : > { %v803_v6 = vadd.f32 %v802_v0, %v749_v5 }
 0x12b   : > { %v751_v8 = vpop.f32.mrf.mxu0 }
 0x12c   : > { %v821_v10 = vadd.f32 %v803_v6, %v379_v4  ;;  %v805_v11 = vadd.f32 %v804_v1, %v751_v8 }
 0x12d   : > { %v753_v13 = vpop.f32.mrf.mxu0 }
 0x12e   : > { %829 = vst [vmem:[#allocation2 + $0x30] sm:$0xff] %v821_v10  ;;  %v822_v14 = vadd.f32 %v805_v11, %v380_v7  ;;  %v807_v15 = vadd.f32 %v806_v2, %v753_v13 }
 0x12f   : > { %v755_v18 = vpop.f32.mrf.mxu0 }
 0x130   : > { %830 = vst [vmem:[#allocation2] sm:$0xff] %v822_v14  ;;  %v823_v19 = vadd.f32 %v807_v15, %v381_v12  ;;  %v809_v20 = vadd.f32 %v808_v3, %v755_v18 }
 0x131   : > { %v759_v22 = vpop.f32.mrf.mxu0 }
 0x132   : > { %831 = vst [vmem:[#allocation2 + $0x18] sm:$0xff] %v823_v19  ;;  %v824_v23 = vadd.f32 %v809_v20, %v382_v17  ;;  %v813_v24 = vadd.f32 %v812_v9, %v759_v22 }
 0x133   : > { %v761_v27 = vpop.f32.mrf.mxu0 }
 0x134   : > { %832 = vst [vmem:[#allocation2 + $0x10] sm:$0xff] %v824_v23  ;;  %v825_v28 = vadd.f32 %v813_v24, %v383_v21  ;;  %v815_v29 = vadd.f32 %v814_v16, %v761_v27 }
 0x135   : > { %v763_v31 = vpop.f32.mrf.mxu0 }
 0x136   : > { %833 = vst [vmem:[#allocation2 + $0x8] sm:$0xff] %v825_v28  ;;  %v826_v32 = vadd.f32 %v815_v29, %v384_v26  ;;  %v817_v33 = vadd.f32 %v816_v25, %v763_v31 }
 0x137   : > { %v765_v36 = vpop.f32.mrf.mxu0 }
 0x138   : > { %834 = vst [vmem:[#allocation2 + $0x20] sm:$0xff] %v826_v32  ;;  %v827_v37 = vadd.f32 %v817_v33, %v385_v30  ;;  %v819_v38 = vadd.f32 %v818_v34, %v765_v36  ;;  %840 = sbr.rel (%p1230_p11) target bundleno = 347 (0x15b), region = 62 }
 0x13a   : > { %835 = vst [vmem:[#allocation2 + $0x28] sm:$0xff] %v827_v37  ;;  %v828_v39 = vadd.f32 %v819_v38, %v386_v35 }
 0x13c   : > { %836 = vst [vmem:[#allocation2 + $0x38] sm:$0xff] %v828_v39 }
 0x13d   : > { %v841_v40 = vld [vmem:[#allocation2 + $0x30] sm:$0xff]  ;;  %v842_v41 = vld [vmem:[#allocation2] sm:$0xff]  ;;  %v843_v42 = vld [vmem:[#allocation2 + $0x18] sm:$0xff]  ;;  %v901_v11 = vlaneseq  ;;  %v1416_v15 = vmov 1966171168  }
 0x13e   : > { %v1245_v43 = vpack.c.bf16 %v842_v41, %v841_v40  ;;  %v918_v44 = vmul.f32 %v841_v40, %v841_v40  ;;  %v919_v45 = vmul.f32 %v842_v41, %v842_v41  ;;  %v844_v46 = vld [vmem:[#allocation2 + $0x10] sm:$0xff]  ;;  %v877_v47 = vadd.f32 %v843_v42, %v841_v40  ;;  %v845_v48 = vld [vmem:[#allocation2 + $0x8] sm:$0xff] }
 0x13f   : > { %v846_v49 = vld [vmem:[#allocation2 + $0x20] sm:$0xff]  ;;  %v1246_v50 = vpack.c.bf16 %v844_v46, %v843_v42  ;;  %v886_v51 = vadd.f32 %v844_v46, %v842_v41  ;;  %v920_v52 = vmul.f32 %v843_v42, %v843_v42  ;;  %v921_v53 = vmul.f32 %v844_v46, %v844_v46 }
 0x140   : > { %873 = vst [vmem:[%s1589_s2] sm:$0xff] %v1245_v43  ;;  %v1247_v56 = vpack.c.bf16 %v846_v49, %v845_v48  ;;  %v878_v57 = vadd.f32 %v877_v47, %v845_v48  ;;  %v922_v58 = vmul.f32 %v845_v48, %v845_v48  ;;  %v923_v59 = vmul.f32 %v846_v49, %v846_v49 }
 0x141   : > { %v847_v54 = vld [vmem:[#allocation2 + $0x28] sm:$0xff]  ;;  %874 = vst [vmem:[%s1589_s2 + $0x8] sm:$0xff] %v1246_v50  ;;  %v926_v60 = vadd.f32 %v920_v52, %v918_v44  ;;  %v935_v61 = vadd.f32 %v921_v53, %v919_v45  ;;  %v887_v62 = vadd.f32 %v886_v51, %v846_v49  ;;  %v899_v16 = vunpack.c.l.s4 %v1416_v15 }
 0x142   : > { %875 = vst [vmem:[%s1589_s2 + $0x10] sm:$0xff] %v1247_v56  ;;  %v879_v0 = vadd.f32 %v878_v57, %v847_v54  ;;  %v924_v1 = vmul.f32 %v847_v54, %v847_v54  ;;  %v902_v22 = vshrl.u32 %v901_v11, 7  ;;  %vm915_vm0 = vcmp.lt.s32.totalorder %v901_v11, 256 }
 0x143   : > { %v848_v55 = vld [vmem:[#allocation2 + $0x38] sm:$0xff]  ;;  %v927_v3 = vadd.f32 %v926_v60, %v922_v58  ;;  %v936_v4 = vadd.f32 %v935_v61, %v923_v59  ;;  %v900_v26 = vunpack.c.0.s8 %v899_v16 }
 0x144   : > { %v1248_v63 = vpack.c.bf16 %v848_v55, %v847_v54  ;;  %v925_v2 = vmul.f32 %v848_v55, %v848_v55  ;;  %v888_v5 = vadd.f32 %v887_v62, %v848_v55  ;;  %v880_v6 = vrot.slane %v879_v0, 4 }
 0x145   : > { %v928_v8 = vadd.f32 %v927_v3, %v924_v1  ;;  %v903_v33 = vsub.s32 %v900_v26, %v902_v22 }
 0x146   : > { %876 = vst [vmem:[%s1589_s2 + $0x18] sm:$0xff] %v1248_v63  ;;  %v889_v7 = vrot.slane %v888_v5, 4  ;;  %v937_v9 = vadd.f32 %v936_v4, %v925_v2  ;;  %v881_v10 = vadd.f32 %v880_v6, %v879_v0 }
 0x147   : > { %v929_v13 = vrot.slane %v928_v8, 4 }
 0x148   : > { %v890_v12 = vadd.f32 %v889_v7, %v888_v5  ;;  %v938_v14 = vrot.slane %v937_v9, 4  ;;  %v882_v17 = vrot.slane %v881_v10, 2 }
 0x149   : > { %v930_v19 = vadd.f32 %v929_v13, %v928_v8 }
 0x14a   : > { %v891_v18 = vrot.slane %v890_v12, 2  ;;  %v939_v20 = vadd.f32 %v938_v14, %v937_v9  ;;  %v883_v21 = vadd.f32 %v882_v17, %v881_v10 }
 0x14b   : > { %v931_v24 = vrot.slane %v930_v19, 2 }
 0x14c   : > { %v892_v23 = vadd.f32 %v891_v18, %v890_v12  ;;  %v940_v25 = vrot.slane %v939_v20, 2  ;;  %v884_v27 = vrot.slane %v883_v21, 1 }
 0x14d   : > { %v932_v29 = vadd.f32 %v931_v24, %v930_v19 }
 0x14e   : > { %v893_v28 = vrot.slane %v892_v23, 1  ;;  %v941_v30 = vadd.f32 %v940_v25, %v939_v20  ;;  %v885_v31 = vadd.f32 %v884_v27, %v883_v21 }
 0x14f   : > { %v933_v34 = vrot.slane %v932_v29, 1 }
 0x150   : > { %v894_v32 = vadd.f32 %v893_v28, %v892_v23  ;;  %v942_v35 = vrot.slane %v941_v30, 1 }
 0x151   : > { %v934_v37 = vadd.f32 %v933_v34, %v932_v29 }
 0x152   : > { %v897_v36 = vcombine.low %v885_v31, %v894_v32  ;;  %v943_v38 = vadd.f32 %v942_v35, %v941_v30 }
 0x154   : > { %v904_v39 = vrot.slane %v897_v36, %v903_v33  ;;  %v946_v40 = vcombine.low %v934_v37, %v943_v38 }
 0x156   : > { %v911_v41 = vrot.slane %v904_v39, %v903_v33  ;;  %v953_v42 = vrot.slane %v946_v40, %v903_v33 }
 0x158   : > { %917 = vst.msk [vmem:[%s1590_s3] sm:$0x3] %vm915_vm0, %v911_v41  ;;  %v960_v43 = vrot.slane %v953_v42, %v903_v33 }
 0x15a   : > { %962 = vst.msk [vmem:[%s1591_s4] sm:$0x3] %vm915_vm0, %v960_v43 }
 0x15b PF: > { %s15_s19 = sadd.s32 1, %s1412_s19   ;;  %s1592_s15 = smov %s1400_s16 }
 0x15c   : > { %p12_p12 = scmp.ge.s32.totalorder %s15_s19, 8   ;;  %s1593_s16 = smov %s1477_s23 }
 0x15d   : > { %s1594_s17 = smov %s1408_s18  ;;  %s1595_s18 = smov %s1597_s20 }
 0x15e   :  { %14 = sbr.rel (!%p12_p12) target bundleno = 3 (0x3), region = 130 }

// kernel: _lambda_.45
= control target key start
LH: loop header
LB: loop body
LE: loop exit
PB: predicated region body
PF: predicated region fallthrough
CT: control target
= control target key end

     0   :  { %v28_v0 = vlaneseq  ;;  %s164_s0 = inlined_call_operand.vmem [shape: bf16[32,256], index: 0, kind: input, shape index: {}, may-alias: {0,3}]   ;;  %s165_s1 = inlined_call_operand.vmem [shape: f32[1,256], index: 1, kind: input, shape index: {}]   ;;  %s166_s2 = inlined_call_operand.vmem [shape: f32[1,256], index: 2, kind: input, shape index: {}]   ;;  %s167_s3 = inlined_call_operand.vmem [shape: bf16[32,256], index: 3, kind: output, shape index: {}, may-alias: {0,3}]  }
   0x1   :  { %v14_v1 = vld [vmem:[%s164_s0] sm:$0xff]  ;;  %v15_v3 = vld [vmem:[%s164_s0 + $0x8] sm:$0xff]  ;;  %v16_v4 = vld [vmem:[%s164_s0 + $0x10] sm:$0xff] }
   0x2   :  { %v29_v2 = vshrl.u32 %v28_v0, 7  ;;  %v17_v5 = vld [vmem:[%s164_s0 + $0x18] sm:$0xff]  ;;  %v18_v6 = vunpack.c.l.bf16 %v14_v1  ;;  %v19_v7 = vunpack.c.h.bf16 %v14_v1  ;;  %v26_v8 = vld [vmem:[%s165_s1] sm:$0x3]  ;;  %v20_v12 = vunpack.c.l.bf16 %v15_v3 }
   0x3   :  { %v46_v9 = vld [vmem:[%s166_s2] sm:$0x3]  ;;  %v21_v13 = vunpack.c.h.bf16 %v15_v3  ;;  %v22_v14 = vunpack.c.l.bf16 %v16_v4  ;;  %v23_v15 = vunpack.c.h.bf16 %v16_v4  ;;  %v24_v16 = vunpack.c.l.bf16 %v17_v5 }
   0x4   :  { %v30_v10 = vsub.s32 0, %v29_v2  ;;  %v34_v11 = vsub.s32 1, %v29_v2  ;;  %v25_v17 = vunpack.c.h.bf16 %v17_v5 }
   0x6   :  { %v31_v18 = vrot.slane %v26_v8, %v30_v10  ;;  %v35_v19 = vrot.slane %v26_v8, %v34_v11  ;;  %v51_v20 = vrot.slane %v46_v9, %v30_v10  ;;  %v55_v21 = vrot.slane %v46_v9, %v34_v11 }
   0x8   :  { %v38_v22 = vmul.f32 %v31_v18, %v18_v6  ;;  %v39_v23 = vmul.f32 %v35_v19, %v19_v7  ;;  %v40_v24 = vmul.f32 %v31_v18, %v20_v12  ;;  %v41_v25 = vmul.f32 %v35_v19, %v21_v13 }
   0x9   :  { %v42_v26 = vmul.f32 %v31_v18, %v22_v14  ;;  %v43_v27 = vmul.f32 %v35_v19, %v23_v15  ;;  %v44_v28 = vmul.f32 %v31_v18, %v24_v16  ;;  %v45_v29 = vmul.f32 %v35_v19, %v25_v17 }
   0xa   :  { %v58_v30 = vadd.f32 %v51_v20, %v38_v22  ;;  %v59_v31 = vadd.f32 %v55_v21, %v39_v23  ;;  %v60_v32 = vadd.f32 %v51_v20, %v40_v24  ;;  %v61_v33 = vadd.f32 %v55_v21, %v41_v25 }
   0xb   :  { %v62_v34 = vadd.f32 %v51_v20, %v42_v26  ;;  %v63_v35 = vadd.f32 %v55_v21, %v43_v27  ;;  %v64_v36 = vadd.f32 %v51_v20, %v44_v28  ;;  %v65_v37 = vadd.f32 %v55_v21, %v45_v29 }
   0xc   :  { %v66_v38 = vmax.f32 %v58_v30, 0.0  ;;  %v67_v39 = vmax.f32 %v59_v31, 0.0  ;;  %v68_v40 = vmax.f32 %v60_v32, 0.0  ;;  %v69_v41 = vmax.f32 %v61_v33, 0.0 }
   0xd   :  { %v70_v42 = vmax.f32 %v62_v34, 0.0  ;;  %v71_v43 = vmax.f32 %v63_v35, 0.0  ;;  %v72_v44 = vmax.f32 %v64_v36, 0.0  ;;  %v73_v45 = vmax.f32 %v65_v37, 0.0 }
   0xe   :  { %v110_v46 = vpack.c.bf16 %v67_v39, %v66_v38  ;;  %v111_v47 = vpack.c.bf16 %v69_v41, %v68_v40 }
   0xf   :  { %v112_v48 = vpack.c.bf16 %v71_v43, %v70_v42  ;;  %v113_v49 = vpack.c.bf16 %v73_v45, %v72_v44 }
  0x10   :  { %98 = vst [vmem:[%s167_s3] sm:$0xff] %v110_v46  ;;  %99 = vst [vmem:[%s167_s3 + $0x8] sm:$0xff] %v111_v47 }
  0x11   :  { %100 = vst [vmem:[%s167_s3 + $0x10] sm:$0xff] %v112_v48  ;;  %101 = vst [vmem:[%s167_s3 + $0x18] sm:$0xff] %v113_v49 }

// kernel: _lambda_.47
= control target key start
LH: loop header
LB: loop body
LE: loop exit
PB: predicated region body
PF: predicated region fallthrough
CT: control target
= control target key end

     0   :  { %v28_v0 = vlaneseq  ;;  %s172_s0 = inlined_call_operand.vmem [shape: bf16[32,256], index: 0, kind: input, shape index: {}, may-alias: {0,3}]   ;;  %s173_s1 = inlined_call_operand.vmem [shape: f32[1,256], index: 1, kind: input, shape index: {}]   ;;  %s174_s2 = inlined_call_operand.vmem [shape: f32[1,256], index: 2, kind: input, shape index: {}]   ;;  %s175_s3 = inlined_call_operand.vmem [shape: bf16[32,256], index: 3, kind: output, shape index: {}, may-alias: {0,3}]  }
   0x1   :  { %v14_v1 = vld [vmem:[%s172_s0] sm:$0xff]  ;;  %v15_v3 = vld [vmem:[%s172_s0 + $0x8] sm:$0xff]  ;;  %v16_v4 = vld [vmem:[%s172_s0 + $0x10] sm:$0xff] }
   0x2   :  { %v29_v2 = vshrl.u32 %v28_v0, 7  ;;  %v17_v5 = vld [vmem:[%s172_s0 + $0x18] sm:$0xff]  ;;  %v18_v6 = vunpack.c.l.bf16 %v14_v1  ;;  %v19_v7 = vunpack.c.h.bf16 %v14_v1  ;;  %v26_v8 = vld [vmem:[%s173_s1] sm:$0x3]  ;;  %v20_v12 = vunpack.c.l.bf16 %v15_v3 }
   0x3   :  { %v46_v9 = vld [vmem:[%s174_s2] sm:$0x3]  ;;  %v21_v13 = vunpack.c.h.bf16 %v15_v3  ;;  %v22_v14 = vunpack.c.l.bf16 %v16_v4  ;;  %v23_v15 = vunpack.c.h.bf16 %v16_v4  ;;  %v24_v16 = vunpack.c.l.bf16 %v17_v5 }
   0x4   :  { %v30_v10 = vsub.s32 0, %v29_v2  ;;  %v34_v11 = vsub.s32 1, %v29_v2  ;;  %v25_v17 = vunpack.c.h.bf16 %v17_v5 }
   0x6   :  { %v31_v18 = vrot.slane %v26_v8, %v30_v10  ;;  %v35_v19 = vrot.slane %v26_v8, %v34_v11  ;;  %v51_v20 = vrot.slane %v46_v9, %v30_v10  ;;  %v55_v21 = vrot.slane %v46_v9, %v34_v11 }
   0x8   :  { %v38_v22 = vmul.f32 %v31_v18, %v18_v6  ;;  %v39_v23 = vmul.f32 %v35_v19, %v19_v7  ;;  %v40_v24 = vmul.f32 %v31_v18, %v20_v12  ;;  %v41_v25 = vmul.f32 %v35_v19, %v21_v13 }
   0x9   :  { %v42_v26 = vmul.f32 %v31_v18, %v22_v14  ;;  %v43_v27 = vmul.f32 %v35_v19, %v23_v15  ;;  %v44_v28 = vmul.f32 %v31_v18, %v24_v16  ;;  %v45_v29 = vmul.f32 %v35_v19, %v25_v17 }
   0xa   :  { %v58_v30 = vadd.f32 %v51_v20, %v38_v22  ;;  %v59_v31 = vadd.f32 %v55_v21, %v39_v23  ;;  %v60_v32 = vadd.f32 %v51_v20, %v40_v24  ;;  %v61_v33 = vadd.f32 %v55_v21, %v41_v25 }
   0xb   :  { %v62_v34 = vadd.f32 %v51_v20, %v42_v26  ;;  %v63_v35 = vadd.f32 %v55_v21, %v43_v27  ;;  %v64_v36 = vadd.f32 %v51_v20, %v44_v28  ;;  %v65_v37 = vadd.f32 %v55_v21, %v45_v29 }
   0xc   :  { %v66_v38 = vmax.f32 %v58_v30, 0.0  ;;  %v67_v39 = vmax.f32 %v59_v31, 0.0  ;;  %v68_v40 = vmax.f32 %v60_v32, 0.0  ;;  %v69_v41 = vmax.f32 %v61_v33, 0.0 }
   0xd   :  { %v70_v42 = vmax.f32 %v62_v34, 0.0  ;;  %v71_v43 = vmax.f32 %v63_v35, 0.0  ;;  %v72_v44 = vmax.f32 %v64_v36, 0.0  ;;  %v73_v45 = vmax.f32 %v65_v37, 0.0 }
   0xe   :  { %v74_v46 = vmul.f32 2.0, %v66_v38  ;;  %v75_v47 = vmul.f32 2.0, %v67_v39  ;;  %v76_v48 = vmul.f32 2.0, %v68_v40  ;;  %v77_v49 = vmul.f32 2.0, %v69_v41 }
   0xf   :  { %v78_v50 = vmul.f32 2.0, %v70_v42  ;;  %v79_v51 = vmul.f32 2.0, %v71_v43  ;;  %v80_v52 = vmul.f32 2.0, %v72_v44  ;;  %v81_v53 = vmul.f32 2.0, %v73_v45 }
  0x10   :  { %v118_v54 = vpack.c.bf16 %v75_v47, %v74_v46  ;;  %v119_v55 = vpack.c.bf16 %v77_v49, %v76_v48 }
  0x11   :  { %v120_v56 = vpack.c.bf16 %v79_v51, %v78_v50  ;;  %v121_v57 = vpack.c.bf16 %v81_v53, %v80_v52 }
  0x12   :  { %106 = vst [vmem:[%s175_s3] sm:$0xff] %v118_v54  ;;  %107 = vst [vmem:[%s175_s3 + $0x8] sm:$0xff] %v119_v55 }
  0x13   :  { %108 = vst [vmem:[%s175_s3 + $0x10] sm:$0xff] %v120_v56  ;;  %109 = vst [vmem:[%s175_s3 + $0x18] sm:$0xff] %v121_v57 }

// kernel: _lambda_.46
= control target key start
LH: loop header
LB: loop body
LE: loop exit
PB: predicated region body
PF: predicated region fallthrough
CT: control target
= control target key end

     0   :  { %s739_s1 = inlined_call_operand.vmem [shape: bf16[256,256], index: 1, kind: input, shape index: {}]   ;;  %s740_s0 = inlined_call_operand.vmem [shape: bf16[32,256], index: 0, kind: input, shape index: {}]   ;;  %s741_s2 = inlined_call_operand.vmem [shape: bf16[32,256], index: 2, kind: output, shape index: {0}]   ;;  %s742_s3 = inlined_call_operand.vmem [shape: f32[1,1,256], index: 3, kind: output, shape index: {1}]   ;;  %s743_s4 = inlined_call_operand.vmem [shape: f32[1,1,256], index: 4, kind: output, shape index: {2}]  }
   0x1   :  { %v533_v0 = vld [vmem:[%s739_s1 + $0x74] ss:$8 sps:$4 sm:$0xff]   ;;  %v535_v1 = vld [vmem:[%s739_s1 + $0x70] ss:$8 sps:$4 sm:$0xff]   ;;  %v536_v2 = vld [vmem:[%s739_s1 + $0x64] ss:$8 sps:$4 sm:$0xff]  }
   0x2   :  { %250 = vmatprep.subr.bf16.mxu0 %v533_v0  ;;  %500 = vmatprep.subr.bf16.mxu1 %v533_v0  ;;  %v538_v3 = vld [vmem:[%s739_s1 + $0x60] ss:$8 sps:$4 sm:$0xff]   ;;  %v539_v4 = vld [vmem:[%s739_s1 + $0x54] ss:$8 sps:$4 sm:$0xff]   ;;  %v541_v5 = vld [vmem:[%s739_s1 + $0x50] ss:$8 sps:$4 sm:$0xff]  }
   0x3   :  { %251 = vmatpush1.bf16.msra.mxu0 %v535_v1  ;;  %516 = vmatpush1.bf16.msra.mxu1 %v535_v1  ;;  %v542_v6 = vld [vmem:[%s739_s1 + $0x44] ss:$8 sps:$4 sm:$0xff]   ;;  %v544_v7 = vld [vmem:[%s739_s1 + $0x40] ss:$8 sps:$4 sm:$0xff]   ;;  %v545_v8 = vld [vmem:[%s739_s1 + $0x34] ss:$8 sps:$4 sm:$0xff]  }
   0x4   :  { %252 = vmatprep.subr.bf16.mxu0 %v536_v2  ;;  %501 = vmatprep.subr.bf16.mxu1 %v536_v2  ;;  %v547_v9 = vld [vmem:[%s739_s1 + $0x30] ss:$8 sps:$4 sm:$0xff]   ;;  %v548_v10 = vld [vmem:[%s739_s1 + $0x24] ss:$8 sps:$4 sm:$0xff]   ;;  %v550_v11 = vld [vmem:[%s739_s1 + $0x20] ss:$8 sps:$4 sm:$0xff]  }
   0x5   :  { %v551_v12 = vld [vmem:[%s739_s1 + $0x14] ss:$8 sps:$4 sm:$0xff]   ;;  %v583_v13 = vld [vmem:[%s740_s0 + $0x4] ss:$8 sps:$4 sm:$0xff]   ;;  %v553_v14 = vld [vmem:[%s739_s1 + $0x10] ss:$8 sps:$4 sm:$0xff]  }
   0x6   :  { %v586_v15 = vld [vmem:[%s740_s0 + $0x14] ss:$8 sps:$4 sm:$0xff]   ;;  %v554_v16 = vld [vmem:[%s739_s1 + $0x4] ss:$8 sps:$4 sm:$0xff]   ;;  %282 = vmatprep.mubr.bf16.mxu0 %v583_v13  ;;  %v556_v17 = vld [vmem:[%s739_s1] ss:$8 sps:$4 sm:$0xff]   ;;  %v382_v13 = vlaneseq }
   0x7   :  { %253 = vmatpush1.bf16.msra.mxu0 %v538_v3  ;;  %517 = vmatpush1.bf16.msra.mxu1 %v538_v3  ;;  %v557_v18 = vld [vmem:[%s739_s1 + $0xf4] ss:$8 sps:$4 sm:$0xff]   ;;  %v559_v19 = vld [vmem:[%s739_s1 + $0xf0] ss:$8 sps:$4 sm:$0xff]   ;;  %v560_v20 = vld [vmem:[%s739_s1 + $0xe4] ss:$8 sps:$4 sm:$0xff]  }
   0x8   :  { %254 = vmatprep.subr.bf16.mxu0 %v539_v4  ;;  %502 = vmatprep.subr.bf16.mxu1 %v539_v4  ;;  %v562_v21 = vld [vmem:[%s739_s1 + $0xe0] ss:$8 sps:$4 sm:$0xff]   ;;  %v563_v22 = vld [vmem:[%s739_s1 + $0xd4] ss:$8 sps:$4 sm:$0xff]   ;;  %v565_v23 = vld [vmem:[%s739_s1 + $0xd0] ss:$8 sps:$4 sm:$0xff]  }
   0x9   :  { %292 = vmatprep.mubr.bf16.mxu1 %v586_v15  ;;  %v566_v24 = vld [vmem:[%s739_s1 + $0xc4] ss:$8 sps:$4 sm:$0xff]   ;;  %v568_v25 = vld [vmem:[%s739_s1 + $0xc0] ss:$8 sps:$4 sm:$0xff]   ;;  %v569_v26 = vld [vmem:[%s739_s1 + $0xb4] ss:$8 sps:$4 sm:$0xff]  }
   0xa   :  { %v571_v27 = vld [vmem:[%s739_s1 + $0xb0] ss:$8 sps:$4 sm:$0xff]   ;;  %v572_v28 = vld [vmem:[%s739_s1 + $0xa4] ss:$8 sps:$4 sm:$0xff]   ;;  %v574_v29 = vld [vmem:[%s739_s1 + $0xa0] ss:$8 sps:$4 sm:$0xff]  }
   0xb   :  { %255 = vmatpush1.bf16.msra.mxu0 %v541_v5  ;;  %518 = vmatpush1.bf16.msra.mxu1 %v541_v5  ;;  %v575_v30 = vld [vmem:[%s739_s1 + $0x94] ss:$8 sps:$4 sm:$0xff]   ;;  %v577_v31 = vld [vmem:[%s739_s1 + $0x90] ss:$8 sps:$4 sm:$0xff]   ;;  %v578_v32 = vld [vmem:[%s739_s1 + $0x84] ss:$8 sps:$4 sm:$0xff]  }
   0xc   :  { %256 = vmatprep.subr.bf16.mxu0 %v542_v6  ;;  %503 = vmatprep.subr.bf16.mxu1 %v542_v6  ;;  %v580_v33 = vld [vmem:[%s739_s1 + $0x80] ss:$8 sps:$4 sm:$0xff]   ;;  %v584_v35 = vld [vmem:[%s740_s0 + $0x10] ss:$8 sps:$4 sm:$0xff]   ;;  %vm396_vm0 = vcmp.lt.s32.totalorder %v382_v13, 256 }
   0xd   :  { %v581_v34 = vld [vmem:[%s740_s0] ss:$8 sps:$4 sm:$0xff]  }
   0xf   :  { %257 = vmatpush1.bf16.msra.mxu0 %v544_v7  ;;  %519 = vmatpush1.bf16.msra.mxu1 %v544_v7  ;;  %v587_v7 = vmov 1966171168  }
  0x10   :  { %258 = vmatprep.subr.bf16.mxu0 %v545_v8  ;;  %504 = vmatprep.subr.bf16.mxu1 %v545_v8  ;;  %v380_v8 = vunpack.c.l.s4 %v587_v7 }
  0x13   :  { %259 = vmatpush1.bf16.msra.mxu0 %v547_v9  ;;  %520 = vmatpush1.bf16.msra.mxu1 %v547_v9 }
  0x14   :  { %260 = vmatprep.subr.bf16.mxu0 %v548_v10  ;;  %505 = vmatprep.subr.bf16.mxu1 %v548_v10 }
  0x17   :  { %261 = vmatpush1.bf16.msra.mxu0 %v550_v11  ;;  %521 = vmatpush1.bf16.msra.mxu1 %v550_v11 }
  0x18   :  { %262 = vmatprep.subr.bf16.mxu0 %v551_v12  ;;  %506 = vmatprep.subr.bf16.mxu1 %v551_v12 }
  0x1b   :  { %263 = vmatpush1.bf16.msra.mxu0 %v553_v14  ;;  %522 = vmatpush1.bf16.msra.mxu1 %v553_v14 }
  0x1c   :  { %264 = vmatprep.subr.bf16.mxu0 %v554_v16  ;;  %507 = vmatprep.subr.bf16.mxu1 %v554_v16 }
  0x1f   :  { %265 = vmatpush1.bf16.msra.mxu0 %v556_v17  ;;  %523 = vmatpush1.bf16.msra.mxu1 %v556_v17 }
  0x20   :  { %266 = vmatprep.subr.bf16.mxu0 %v557_v18  ;;  %508 = vmatprep.subr.bf16.mxu1 %v557_v18  ;;  %v381_v18 = vunpack.c.0.s8 %v380_v8 }
  0x23   :  { %267 = vmatpush2.bf16.msra.mxu0 %v559_v19  ;;  %524 = vmatpush2.bf16.msra.mxu1 %v559_v19 }
  0x24   :  { %268 = vmatprep.subr.bf16.mxu0 %v560_v20  ;;  %509 = vmatprep.subr.bf16.mxu1 %v560_v20 }
  0x27   :  { %269 = vmatpush2.bf16.msra.mxu0 %v562_v21  ;;  %525 = vmatpush2.bf16.msra.mxu1 %v562_v21 }
  0x28   :  { %270 = vmatprep.subr.bf16.mxu0 %v563_v22  ;;  %510 = vmatprep.subr.bf16.mxu1 %v563_v22 }
  0x2b   :  { %271 = vmatpush2.bf16.msra.mxu0 %v565_v23  ;;  %526 = vmatpush2.bf16.msra.mxu1 %v565_v23  ;;  %v383_v23 = vshrl.u32 %v382_v13, 7 }
  0x2c   :  { %272 = vmatprep.subr.bf16.mxu0 %v566_v24  ;;  %511 = vmatprep.subr.bf16.mxu1 %v566_v24 }
  0x2f   :  { %273 = vmatpush2.bf16.msra.mxu0 %v568_v25  ;;  %527 = vmatpush2.bf16.msra.mxu1 %v568_v25 }
  0x30   :  { %274 = vmatprep.subr.bf16.mxu0 %v569_v26  ;;  %512 = vmatprep.subr.bf16.mxu1 %v569_v26 }
  0x33   :  { %275 = vmatpush2.bf16.msra.mxu0 %v571_v27  ;;  %528 = vmatpush2.bf16.msra.mxu1 %v571_v27 }
  0x34   :  { %276 = vmatprep.subr.bf16.mxu0 %v572_v28  ;;  %513 = vmatprep.subr.bf16.mxu1 %v572_v28 }
  0x37   :  { %277 = vmatpush2.bf16.msra.mxu0 %v574_v29  ;;  %529 = vmatpush2.bf16.msra.mxu1 %v574_v29 }
  0x38   :  { %278 = vmatprep.subr.bf16.mxu0 %v575_v30  ;;  %514 = vmatprep.subr.bf16.mxu1 %v575_v30  ;;  %v384_v30 = vsub.s32 %v381_v18, %v383_v23 }
  0x3b   :  { %279 = vmatpush2.bf16.msra.mxu0 %v577_v31  ;;  %530 = vmatpush2.bf16.msra.mxu1 %v577_v31 }
  0x3c   :  { %280 = vmatprep.subr.bf16.mxu0 %v578_v32  ;;  %515 = vmatprep.subr.bf16.mxu1 %v578_v32 }
  0x3f   :  { %281 = vmatpush2.bf16.msra.mxu0 %v580_v33  ;;  %531 = vmatpush2.bf16.msra.mxu1 %v580_v33 }
  0x42   :  { %283 = vmatmul.mubr.bf16.vlgmr.msra.gmra.mxu0 %v581_v34  ;;  %293 = vmatmul.mubr.bf16.vlgmr.msra.gmra.mxu1 %v584_v35 }
 0x102   :  { %v284_v36 = vpop.f32.mrf.mxu0  ;;  %v294_v37 = vpop.f32.mrf.mxu1 }
 0x103   :  { %v399_v44 = vmul.f32 %v284_v36, %v284_v36  ;;  %v403_v47 = vmul.f32 %v294_v37, %v294_v37 }
 0x104   :  { %v286_v38 = vpop.f32.mrf.mxu0  ;;  %v296_v39 = vpop.f32.mrf.mxu1 }
 0x105   :  { %v496_v40 = vpack.c.bf16 %v286_v38, %v284_v36  ;;  %v498_v41 = vpack.c.bf16 %v296_v39, %v294_v37  ;;  %v400_v54 = vmul.f32 %v286_v38, %v286_v38  ;;  %v404_v61 = vmul.f32 %v296_v39, %v296_v39 }
 0x106   :  { %v288_v42 = vpop.f32.mrf.mxu0  ;;  %v298_v43 = vpop.f32.mrf.mxu1 }
 0x107   :  { %354 = vst [vmem:[%s741_s2] sm:$0xff] %v496_v40  ;;  %356 = vst [vmem:[%s741_s2 + $0x10] sm:$0xff] %v498_v41  ;;  %v358_v45 = vadd.f32 %v288_v42, %v284_v36  ;;  %v401_v46 = vmul.f32 %v288_v42, %v288_v42  ;;  %v405_v58 = vmul.f32 %v298_v43, %v298_v43 }
 0x108   :  { %v290_v48 = vpop.f32.mrf.mxu0  ;;  %v300_v49 = vpop.f32.mrf.mxu1 }
 0x109   :  { %v407_v50 = vadd.f32 %v401_v46, %v399_v44  ;;  %v359_v51 = vadd.f32 %v358_v45, %v294_v37  ;;  %v497_v52 = vpack.c.bf16 %v290_v48, %v288_v42  ;;  %v367_v53 = vadd.f32 %v290_v48, %v286_v38 }
 0x10a   :  { %v402_v55 = vmul.f32 %v290_v48, %v290_v48  ;;  %v499_v56 = vpack.c.bf16 %v300_v49, %v298_v43  ;;  %v406_v2 = vmul.f32 %v300_v49, %v300_v49 }
 0x10b   :  { %v360_v57 = vadd.f32 %v359_v51, %v298_v43  ;;  %v408_v59 = vadd.f32 %v407_v50, %v403_v47  ;;  %355 = vst [vmem:[%s741_s2 + $0x8] sm:$0xff] %v497_v52  ;;  %v368_v60 = vadd.f32 %v367_v53, %v296_v39 }
 0x10c   :  { %v416_v62 = vadd.f32 %v402_v55, %v400_v54  ;;  %357 = vst [vmem:[%s741_s2 + $0x18] sm:$0xff] %v499_v56 }
 0x10d   :  { %v361_v63 = vrot.slane %v360_v57, 4  ;;  %v409_v0 = vadd.f32 %v408_v59, %v405_v58  ;;  %v369_v1 = vadd.f32 %v368_v60, %v300_v49 }
 0x10e   :  { %v417_v3 = vadd.f32 %v416_v62, %v404_v61 }
 0x10f   :  { %v362_v4 = vadd.f32 %v361_v63, %v360_v57  ;;  %v410_v5 = vrot.slane %v409_v0, 4  ;;  %v370_v6 = vrot.slane %v369_v1, 4 }
 0x110   :  { %v418_v9 = vadd.f32 %v417_v3, %v406_v2 }
 0x111   :  { %v363_v10 = vrot.slane %v362_v4, 2  ;;  %v411_v11 = vadd.f32 %v410_v5, %v409_v0  ;;  %v371_v12 = vadd.f32 %v370_v6, %v369_v1 }
 0x112   :  { %v419_v14 = vrot.slane %v418_v9, 4 }
 0x113   :  { %v364_v15 = vadd.f32 %v363_v10, %v362_v4  ;;  %v412_v16 = vrot.slane %v411_v11, 2  ;;  %v372_v17 = vrot.slane %v371_v12, 2 }
 0x114   :  { %v420_v19 = vadd.f32 %v419_v14, %v418_v9 }
 0x115   :  { %v365_v20 = vrot.slane %v364_v15, 1  ;;  %v413_v21 = vadd.f32 %v412_v16, %v411_v11  ;;  %v373_v22 = vadd.f32 %v372_v17, %v371_v12 }
 0x116   :  { %v421_v24 = vrot.slane %v420_v19, 2 }
 0x117   :  { %v374_v25 = vrot.slane %v373_v22, 1  ;;  %v414_v26 = vrot.slane %v413_v21, 1  ;;  %v366_v28 = vadd.f32 %v365_v20, %v364_v15 }
 0x118   :  { %v422_v27 = vadd.f32 %v421_v24, %v420_v19 }
 0x119   :  { %v375_v29 = vadd.f32 %v374_v25, %v373_v22  ;;  %v415_v33 = vadd.f32 %v414_v26, %v413_v21 }
 0x11a   :  { %v423_v31 = vrot.slane %v422_v27, 1 }
 0x11b   :  { %v378_v32 = vcombine.low %v366_v28, %v375_v29 }
 0x11c   :  { %v424_v34 = vadd.f32 %v423_v31, %v422_v27 }
 0x11d   :  { %v385_v35 = vrot.slane %v378_v32, %v384_v30 }
 0x11e   :  { %v427_v36 = vcombine.low %v415_v33, %v424_v34 }
 0x11f   :  { %v392_v37 = vrot.slane %v385_v35, %v384_v30 }
 0x120   :  { %v434_v38 = vrot.slane %v427_v36, %v384_v30 }
 0x121   :  { %398 = vst.msk [vmem:[%s742_s3] sm:$0x3] %vm396_vm0, %v392_v37 }
 0x122   :  { %v441_v39 = vrot.slane %v434_v38, %v384_v30 }
 0x124   :  { %443 = vst.msk [vmem:[%s743_s4] sm:$0x3] %vm396_vm0, %v441_v39 }

// kernel: _lambda_.48
= control target key start
LH: loop header
LB: loop body
LE: loop exit
PB: predicated region body
PF: predicated region fallthrough
CT: control target
= control target key end

     0   :  { %s1202_s15 = smov 0   ;;  %s1204_s16 = smov 0   ;;  %s1392_s0 = inlined_call_operand.vmem [shape: bf16[32,256], index: 0, kind: input, shape index: {}]   ;;  %s1393_s1 = inlined_call_operand.vmem [shape: bf16[256,640], index: 1, kind: input, shape index: {}]   ;;  %s1394_s2 = inlined_call_operand.vmem [shape: bf16[32,640], index: 2, kind: output, shape index: {0}]   ;;  %s1395_s3 = inlined_call_operand.vmem [shape: f32[1,1,640], index: 3, kind: output, shape index: {1}]   ;;  %s1396_s4 = inlined_call_operand.vmem [shape: f32[1,1,640], index: 4, kind: output, shape index: {2}]  }
   0x1   :  { %s1206_s17 = smov 0   ;;  %s1208_s18 = smov 0  }
   0x2   :  { %s1210_s19 = smov 0  }
   0x3 LB: > { %s30_s20 = sadd.s32 1, %s1171_s18  ;;  %s978_s21 = sadd.s32 4294967295, %s1175_s19   ;;  %s1175_s19 = sphi %s1210_s19, %s15_s19   ;;  %s1171_s18 = sphi %s1208_s18, %s1401_s18   ;;  %s1167_s17 = sphi %s1206_s17, %s1400_s17   ;;  %s1163_s16 = sphi %s1204_s16, %s1399_s16   ;;  %s1159_s15 = sphi %s1202_s15, %s1398_s15  }
   0x4   : > { %p32_p0 = scmp.ge.s32.totalorder %s30_s20, 5  ;;  %p78_p1 = scmp.ne.s32.totalorder %s1163_s16, %s1159_s15 }
   0x5   : > { %p79_p2 = scmp.eq.s32.totalorder %s1175_s19, 0  ;;  %p110_p4 = scmp.eq.s32.totalorder %s978_s21, 4 }
   0x6   : > { %s1403_s20 = smov (%p32_p0, %s30_s20), 0  ;;  %s71_s23 = sadd.s32 1, %s1163_s16 }
   0x7   : > { %p80_p3 = por %p79_p2, %p78_p1  ;;  %s67_s22 = ssub.s32 %s1171_s18, %s1403_s20 }
   0x8   : > { %p69_p5 = scmp.eq.s32.totalorder %s67_s22, 0  ;;  %p1237_p6 = por %p110_p4, %p78_p1 }
   0x9   : > { %p982_p7 = scmp.ge.s32.totalorder %s1175_s19, 5 }
   0xa   : > { %s1242_s25 = scalar_select %p69_p5, %s1163_s16, %s71_s23  }
   0xb   : > { %203 = sbr.rel (%p982_p7) target bundleno = 41 (0x29), region = 20 }
  0x10   : > { %206 = sbr.rel (!%p80_p3) target bundleno = 41 (0x29), region = 24  ;;  %s208_s26 = sand.u32 (%p80_p3), 1, %s1163_s16  }
  0x11   : > { %s984_s27 = sshll.u32 (%p80_p3), %s1171_s18, 2  ;;  %s983_s28 = sshll.u32 (%p80_p3), %s208_s26, 7 }
  0x12   : > { %s1250_s5 = scalar_lea.vmem (%p80_p3), %s1393_s1, %s984_s27  ;;  %s1254_s6 = scalar_lea.vmem (%p80_p3), [#allocation3], %s983_s28 }
  0x13   : > { %v232_v0 = vld [vmem:[%s1250_s5] sm:$0xf] (%p80_p3)  ;;  %v234_v1 = vld [vmem:[%s1250_s5 + $0x14] sm:$0xf] (%p80_p3)  ;;  %v236_v2 = vld [vmem:[%s1250_s5 + $0x28] sm:$0xf] (%p80_p3) }
  0x14   : > { %233 = vst [vmem:[%s1254_s6] sm:$0xf] (%p80_p3), %v232_v0  ;;  %235 = vst [vmem:[%s1254_s6 + $0x4] sm:$0xf] (%p80_p3), %v234_v1  ;;  %v238_v3 = vld [vmem:[%s1250_s5 + $0x3c] sm:$0xf] (%p80_p3) }
  0x15   : > { %v240_v4 = vld [vmem:[%s1250_s5 + $0x50] sm:$0xf]  ;;  %237 = vst [vmem:[%s1254_s6 + $0x8] sm:$0xf] %v236_v2  ;;  %239 = vst [vmem:[%s1254_s6 + $0xc] sm:$0xf] %v238_v3 }
  0x16   : > { %241 = vst [vmem:[%s1254_s6 + $0x10] sm:$0xf] %v240_v4  ;;  %v242_v5 = vld [vmem:[%s1250_s5 + $0x64] sm:$0xf]  ;;  %v244_v6 = vld [vmem:[%s1250_s5 + $0x78] sm:$0xf] }
  0x17   : > { %v246_v7 = vld [vmem:[%s1250_s5 + $0x8c] sm:$0xf]  ;;  %243 = vst [vmem:[%s1254_s6 + $0x14] sm:$0xf] %v242_v5  ;;  %245 = vst [vmem:[%s1254_s6 + $0x18] sm:$0xf] %v244_v6 }
  0x18   : > { %247 = vst [vmem:[%s1254_s6 + $0x1c] sm:$0xf] %v246_v7  ;;  %v248_v8 = vld [vmem:[%s1250_s5 + $0xa0] sm:$0xf]  ;;  %v250_v9 = vld [vmem:[%s1250_s5 + $0xb4] sm:$0xf] }
  0x19   : > { %v252_v10 = vld [vmem:[%s1250_s5 + $0xc8] sm:$0xf]  ;;  %249 = vst [vmem:[%s1254_s6 + $0x20] sm:$0xf] %v248_v8  ;;  %251 = vst [vmem:[%s1254_s6 + $0x24] sm:$0xf] %v250_v9 }
  0x1a   : > { %253 = vst [vmem:[%s1254_s6 + $0x28] sm:$0xf] %v252_v10  ;;  %v254_v11 = vld [vmem:[%s1250_s5 + $0xdc] sm:$0xf]  ;;  %v256_v12 = vld [vmem:[%s1250_s5 + $0xf0] sm:$0xf] }
  0x1b   : > { %v258_v13 = vld [vmem:[%s1250_s5 + $0x104] sm:$0xf]  ;;  %255 = vst [vmem:[%s1254_s6 + $0x2c] sm:$0xf] %v254_v11  ;;  %257 = vst [vmem:[%s1254_s6 + $0x30] sm:$0xf] %v256_v12 }
  0x1c   : > { %259 = vst [vmem:[%s1254_s6 + $0x34] sm:$0xf] %v258_v13  ;;  %v260_v14 = vld [vmem:[%s1250_s5 + $0x118] sm:$0xf]  ;;  %v262_v15 = vld [vmem:[%s1250_s5 + $0x12c] sm:$0xf] }
  0x1d   : > { %v264_v16 = vld [vmem:[%s1250_s5 + $0x140] sm:$0xf]  ;;  %261 = vst [vmem:[%s1254_s6 + $0x38] sm:$0xf] %v260_v14  ;;  %263 = vst [vmem:[%s1254_s6 + $0x3c] sm:$0xf] %v262_v15 }
  0x1e   : > { %265 = vst [vmem:[%s1254_s6 + $0x40] sm:$0xf] %v264_v16  ;;  %v266_v17 = vld [vmem:[%s1250_s5 + $0x154] sm:$0xf]  ;;  %v268_v18 = vld [vmem:[%s1250_s5 + $0x168] sm:$0xf] }
  0x1f   : > { %v270_v19 = vld [vmem:[%s1250_s5 + $0x17c] sm:$0xf]  ;;  %267 = vst [vmem:[%s1254_s6 + $0x44] sm:$0xf] %v266_v17  ;;  %269 = vst [vmem:[%s1254_s6 + $0x48] sm:$0xf] %v268_v18 }
  0x20   : > { %271 = vst [vmem:[%s1254_s6 + $0x4c] sm:$0xf] %v270_v19  ;;  %v272_v20 = vld [vmem:[%s1250_s5 + $0x190] sm:$0xf]  ;;  %v274_v21 = vld [vmem:[%s1250_s5 + $0x1a4] sm:$0xf] }
  0x21   : > { %v276_v22 = vld [vmem:[%s1250_s5 + $0x1b8] sm:$0xf]  ;;  %273 = vst [vmem:[%s1254_s6 + $0x50] sm:$0xf] %v272_v20  ;;  %275 = vst [vmem:[%s1254_s6 + $0x54] sm:$0xf] %v274_v21 }
  0x22   : > { %277 = vst [vmem:[%s1254_s6 + $0x58] sm:$0xf] %v276_v22  ;;  %v278_v23 = vld [vmem:[%s1250_s5 + $0x1cc] sm:$0xf]  ;;  %v280_v24 = vld [vmem:[%s1250_s5 + $0x1e0] sm:$0xf] }
  0x23   : > { %v282_v25 = vld [vmem:[%s1250_s5 + $0x1f4] sm:$0xf]  ;;  %279 = vst [vmem:[%s1254_s6 + $0x5c] sm:$0xf] %v278_v23  ;;  %281 = vst [vmem:[%s1254_s6 + $0x60] sm:$0xf] %v280_v24 }
  0x24   : > { %283 = vst [vmem:[%s1254_s6 + $0x64] sm:$0xf] %v282_v25  ;;  %v284_v26 = vld [vmem:[%s1250_s5 + $0x208] sm:$0xf]  ;;  %v286_v27 = vld [vmem:[%s1250_s5 + $0x21c] sm:$0xf] }
  0x25   : > { %v288_v28 = vld [vmem:[%s1250_s5 + $0x230] sm:$0xf]  ;;  %285 = vst [vmem:[%s1254_s6 + $0x68] sm:$0xf] %v284_v26  ;;  %287 = vst [vmem:[%s1254_s6 + $0x6c] sm:$0xf] %v286_v27 }
  0x26   : > { %289 = vst [vmem:[%s1254_s6 + $0x70] sm:$0xf] %v288_v28  ;;  %v290_v29 = vld [vmem:[%s1250_s5 + $0x244] sm:$0xf]  ;;  %v292_v30 = vld [vmem:[%s1250_s5 + $0x258] sm:$0xf] }
  0x27   : > { %v294_v31 = vld [vmem:[%s1250_s5 + $0x26c] sm:$0xf]  ;;  %291 = vst [vmem:[%s1254_s6 + $0x74] sm:$0xf] %v290_v29  ;;  %293 = vst [vmem:[%s1254_s6 + $0x78] sm:$0xf] %v292_v30 }
  0x28   : > { %295 = vst [vmem:[%s1254_s6 + $0x7c] sm:$0xf] %v294_v31 }
  0x29 PF: > { %p985_p8 = scmp.ge.s32.totalorder %s1175_s19, 1  ;;  %p382_p9 = scmp.lt.s32.totalorder %s1175_s19, 6 }
  0x2b   : > { %p383_p10 = pnand %p985_p8, %p382_p9 }
  0x2c   : > { %s389_s7 = sand.u32 (!%p383_p10), 1, %s1159_s15   ;;  %p453_p11 = scmp.lt.s32.totalorder (!%p383_p10), %s1167_s17, 4 }
  0x2d   : > { %386 = sbr.rel (%p383_p10) target bundleno = 306 (0x132), region = 65  ;;  %s986_s8 = sshll.u32 (!%p383_p10), %s389_s7, 7 }
  0x2e   : > { %s1329_s13 = scalar_lea.vmem (!%p383_p10), [#allocation3], %s986_s8  ;;  %s987_s26 = sshll.u32 (!%p383_p10), %s389_s7, 4 }
  0x2f   : > { %s1355_s27 = scalar_lea.vmem (!%p383_p10), [#allocation4], %s987_s26 }
  0x32   : > { %v1133_v32 = vld [vmem:[%s1392_s0 + $0x4] ss:$8 sps:$4 sm:$0xff]   ;;  %v1136_v33 = vld [vmem:[%s1392_s0 + $0x14] ss:$8 sps:$4 sm:$0xff]   ;;  %v1131_v50 = vld [vmem:[%s1392_s0] ss:$8 sps:$4 sm:$0xff]  }
  0x33   : > { %v1115_v34 = vld [vmem:[%s1329_s13 + $0x78] sm:$0xff]   ;;  %662 = vmatprep.mubr.bf16.mxu0 %v1133_v32  ;;  %670 = vmatprep.mubr.bf16.mxu1 %v1136_v33  ;;  %v1117_v36 = vld [vmem:[%s1329_s13 + $0x70] sm:$0xff]   ;;  %v1119_v38 = vld [vmem:[%s1329_s13 + $0x68] sm:$0xff]   ;;  %s454_s15 = scalar_select %p453_p11, %s1167_s17, 4 }
  0x34   : > { %v1116_v35 = vld [vmem:[%s1329_s13 + $0x38] sm:$0xff]   ;;  %1031 = vmatprep.subr.bf16.mxu0 %v1115_v34  ;;  %1059 = vmatprep.subr.bf16.mxu1 %v1115_v34  ;;  %v1118_v37 = vld [vmem:[%s1329_s13 + $0x30] sm:$0xff]   ;;  %v1120_v39 = vld [vmem:[%s1329_s13 + $0x28] sm:$0xff]   ;;  %s1013_s8 = sshll.u32 (%p1237_p6), %s1167_s17, 2 }
  0x35   : > { %1032 = vmatpush3.bf16.msra.mxu0 %v1116_v35  ;;  %1067 = vmatpush3.bf16.msra.mxu1 %v1116_v35  ;;  %v1121_v40 = vld [vmem:[%s1329_s13 + $0x60] sm:$0xff]   ;;  %v1123_v42 = vld [vmem:[%s1329_s13 + $0x58] sm:$0xff]   ;;  %v1125_v44 = vld [vmem:[%s1329_s13 + $0x50] sm:$0xff]   ;;  %s457_s30 = scalar_lea.vmem %s1395_s3, %s454_s15  ;;  %s464_s7 = scalar_lea.vmem %s1396_s4, %s454_s15 }
  0x36   : > { %1033 = vmatprep.subr.bf16.mxu0 %v1117_v36  ;;  %1060 = vmatprep.subr.bf16.mxu1 %v1117_v36  ;;  %v1122_v41 = vld [vmem:[%s1329_s13 + $0x20] sm:$0xff]   ;;  %v1124_v43 = vld [vmem:[%s1329_s13 + $0x18] sm:$0xff]   ;;  %v1126_v45 = vld [vmem:[%s1329_s13 + $0x10] sm:$0xff]   ;;  %s763_s11 = scalar_lea.vmem (%p1237_p6), %s1394_s2, %s1013_s8 }
  0x37   : > { %v1127_v46 = vld [vmem:[%s1329_s13 + $0x48] sm:$0xff]   ;;  %v1129_v48 = vld [vmem:[%s1329_s13 + $0x40] sm:$0xff]   ;;  %v1134_v51 = vld [vmem:[%s1392_s0 + $0x10] ss:$8 sps:$4 sm:$0xff]  }
  0x38   : > { %v1128_v47 = vld [vmem:[%s1329_s13 + $0x8] sm:$0xff]   ;;  %v1130_v49 = vld [vmem:[%s1329_s13] sm:$0xff]  }
  0x39   : > { %1034 = vmatpush3.bf16.msra.mxu0 %v1118_v37  ;;  %1068 = vmatpush3.bf16.msra.mxu1 %v1118_v37 }
  0x3a   : > { %1035 = vmatprep.subr.bf16.mxu0 %v1119_v38  ;;  %1061 = vmatprep.subr.bf16.mxu1 %v1119_v38 }
  0x3d   : > { %1036 = vmatpush3.bf16.msra.mxu0 %v1120_v39  ;;  %1069 = vmatpush3.bf16.msra.mxu1 %v1120_v39 }
  0x3e   : > { %1037 = vmatprep.subr.bf16.mxu0 %v1121_v40  ;;  %1062 = vmatprep.subr.bf16.mxu1 %v1121_v40 }
  0x41   : > { %1038 = vmatpush3.bf16.msra.mxu0 %v1122_v41  ;;  %1070 = vmatpush3.bf16.msra.mxu1 %v1122_v41 }
  0x42   : > { %1039 = vmatprep.subr.bf16.mxu0 %v1123_v42  ;;  %1063 = vmatprep.subr.bf16.mxu1 %v1123_v42 }
  0x45   : > { %1040 = vmatpush3.bf16.msra.mxu0 %v1124_v43  ;;  %1071 = vmatpush3.bf16.msra.mxu1 %v1124_v43 }
  0x46   : > { %1041 = vmatprep.subr.bf16.mxu0 %v1125_v44  ;;  %1064 = vmatprep.subr.bf16.mxu1 %v1125_v44 }
  0x49   : > { %1042 = vmatpush3.bf16.msra.mxu0 %v1126_v45  ;;  %1072 = vmatpush3.bf16.msra.mxu1 %v1126_v45 }
  0x4a   : > { %1043 = vmatprep.subr.bf16.mxu0 %v1127_v46  ;;  %1065 = vmatprep.subr.bf16.mxu1 %v1127_v46 }
  0x4d   : > { %1044 = vmatpush3.bf16.msra.mxu0 %v1128_v47  ;;  %1073 = vmatpush3.bf16.msra.mxu1 %v1128_v47 }
  0x4e   : > { %1045 = vmatprep.subr.bf16.mxu0 %v1129_v48  ;;  %1066 = vmatprep.subr.bf16.mxu1 %v1129_v48 }
  0x51   : > { %1046 = vmatpush3.bf16.msra.mxu0 %v1130_v49  ;;  %1074 = vmatpush3.bf16.msra.mxu1 %v1130_v49 }
  0x54   : > { %663 = vmatmul.mubr.bf16.vlgmr.msra.gmra.mxu0 %v1131_v50  ;;  %671 = vmatmul.mubr.bf16.vlgmr.msra.gmra.mxu1 %v1134_v51 }
 0x114   : > { %v1047_v52 = vpop.f32.mrf.mxu0  ;;  %v1053_v53 = vpop.f32.mrf.mxu1 }
 0x116   : > { %v1048_v54 = vpop.f32.mrf.mxu0  ;;  %v1054_v55 = vpop.f32.mrf.mxu1 }
 0x117   : > { %v1049_v56 = vadd.f32 %v1048_v54, %v1047_v52  ;;  %v1055_v61 = vadd.f32 %v1054_v55, %v1053_v53 }
 0x118   : > { %v1050_v57 = vpop.f32.mrf.mxu0  ;;  %v1056_v58 = vpop.f32.mrf.mxu1 }
 0x119   : > { %v724_v0 = vmul.f32 %v1049_v56, %v1049_v56  ;;  %v726_v5 = vmul.f32 %v1055_v61, %v1055_v61 }
 0x11a   : > { %v1051_v59 = vpop.f32.mrf.mxu0  ;;  %v1057_v60 = vpop.f32.mrf.mxu1 }
 0x11b   : > { %v1052_v62 = vadd.f32 %v1051_v59, %v1050_v57  ;;  %v1058_v63 = vadd.f32 %v1057_v60, %v1056_v58 }
 0x11d   : > { %v1023_v1 = vpack.c.bf16 %v1052_v62, %v1049_v56  ;;  %v714_v2 = vadd.f32 %v1052_v62, %v1049_v56  ;;  %v725_v3 = vmul.f32 %v1052_v62, %v1052_v62  ;;  %v1028_v4 = vpack.c.bf16 %v1058_v63, %v1055_v61 }
 0x11e   : > { %v727_v9 = vmul.f32 %v1058_v63, %v1058_v63 }
 0x11f   : > { %1024 = vst [vmem:[%s1355_s27] sm:$0xff] %v1023_v1   ;;  %v728_v6 = vadd.f32 %v725_v3, %v724_v0  ;;  %1030 = vst [vmem:[%s1355_s27 + $0x8] sm:$0xff] %v1028_v4   ;;  %v715_v7 = vadd.f32 %v1055_v61, %v714_v2 }
 0x121   : > { %v716_v8 = vadd.f32 %v1058_v63, %v715_v7  ;;  %v729_v10 = vadd.f32 %v728_v6, %v726_v5 }
 0x123   : > { %v717_v11 = vrot.slane %v716_v8, 4  ;;  %v730_v12 = vadd.f32 %v729_v10, %v727_v9 }
 0x125   : > { %v718_v13 = vadd.f32 %v717_v11, %v716_v8  ;;  %v731_v14 = vrot.slane %v730_v12, 4 }
 0x126   : > { %v780_v24 = vld [vmem:[%s1355_s27] sm:$0xf] (%p1237_p6)  ;;  %v782_v25 = vld [vmem:[%s1355_s27 + $0x4] sm:$0xf] (%p1237_p6)  ;;  %v784_v26 = vld [vmem:[%s1355_s27 + $0x8] sm:$0xf] (%p1237_p6) }
 0x127   : > { %v719_v15 = vrot.slane %v718_v13, 2  ;;  %v732_v16 = vadd.f32 %v731_v14, %v730_v12  ;;  %v786_v27 = vld [vmem:[%s1355_s27 + $0xc] sm:$0xf] (%p1237_p6)  ;;  %781 = vst [vmem:[%s763_s11] sm:$0xf] (%p1237_p6), %v780_v24  ;;  %783 = vst [vmem:[%s763_s11 + $0x14] sm:$0xf] (%p1237_p6), %v782_v25 }
 0x128   : > { %785 = vst [vmem:[%s763_s11 + $0x28] sm:$0xf] (%p1237_p6), %v784_v26  ;;  %787 = vst [vmem:[%s763_s11 + $0x3c] sm:$0xf] (%p1237_p6), %v786_v27 }
 0x129   : > { %v720_v17 = vadd.f32 %v719_v15, %v718_v13  ;;  %v733_v18 = vrot.slane %v732_v16, 2 }
 0x12b   : > { %v721_v19 = vrot.slane %v720_v17, 1  ;;  %v734_v20 = vadd.f32 %v733_v18, %v732_v16 }
 0x12d   : > { %v722_v21 = vadd.f32 %v721_v19, %v720_v17  ;;  %v735_v22 = vrot.slane %v734_v20, 1  ;;  %758 = sbr.rel (!%p1237_p6) target bundleno = 306 (0x132), region = 81 }
 0x12f   : > { %723 = vst [vmem:[%s457_s30] sm:$0x1] %v722_v21  ;;  %v736_v23 = vadd.f32 %v735_v22, %v734_v20 }
 0x131   : > { %737 = vst [vmem:[%s464_s7] sm:$0x1] %v736_v23 }
 0x132 PF: > { %s15_s19 = sadd.s32 1, %s1175_s19   ;;  %s1398_s15 = smov %s1163_s16 }
 0x133   : > { %p12_p12 = scmp.ge.s32.totalorder %s15_s19, 7   ;;  %s1399_s16 = smov %s1242_s25 }
 0x134   : > { %s1400_s17 = smov %s1171_s18  ;;  %s1401_s18 = smov %s1403_s20 }
 0x135   :  { %14 = sbr.rel (!%p12_p12) target bundleno = 3 (0x3), region = 180 }

// kernel: _lambda_.49
= control target key start
LH: loop header
LB: loop body
LE: loop exit
PB: predicated region body
PF: predicated region fallthrough
CT: control target
= control target key end

     0   :  { %v48_v0 = vlaneseq  ;;  %s422_s0 = inlined_call_operand.vmem [shape: bf16[32,640], index: 0, kind: input, shape index: {}, may-alias: {0,3}]   ;;  %s423_s1 = inlined_call_operand.vmem [shape: f32[1,640], index: 1, kind: input, shape index: {}]   ;;  %s424_s2 = inlined_call_operand.vmem [shape: f32[1,640], index: 2, kind: input, shape index: {}]   ;;  %s425_s3 = inlined_call_operand.vmem [shape: bf16[32,640], index: 3, kind: output, shape index: {}, may-alias: {0,3}]  }
   0x1   :  { %v14_v1 = vld [vmem:[%s422_s0] sm:$0xff]  ;;  %v15_v5 = vld [vmem:[%s422_s0 + $0x8] sm:$0xff]  ;;  %v16_v6 = vld [vmem:[%s422_s0 + $0x10] sm:$0xf] }
   0x2   :  { %v26_v2 = vunpack.c.l.bf16 %v14_v1  ;;  %v27_v3 = vunpack.c.h.bf16 %v14_v1  ;;  %v49_v4 = vshrl.u32 %v48_v0, 7  ;;  %v17_v7 = vld [vmem:[%s422_s0 + $0x14] sm:$0xff]  ;;  %v46_v8 = vld [vmem:[%s423_s1] sm:$0x1f]  ;;  %v28_v10 = vunpack.c.l.bf16 %v15_v5  ;;  %v20_v52 = vld [vmem:[%s422_s0 + $0x28] sm:$0xff] }
   0x3   :  { %v93_v9 = vld [vmem:[%s424_s2] sm:$0x1f]  ;;  %v29_v11 = vunpack.c.h.bf16 %v15_v5  ;;  %v30_v12 = vunpack.c.l.bf16 %v16_v6  ;;  %v31_v13 = vunpack.c.l.bf16 %v17_v7  ;;  %v32_v20 = vunpack.c.h.bf16 %v17_v7  ;;  %v21_v61 = vld [vmem:[%s422_s0 + $0x30] sm:$0xff] }
   0x4   :  { %v18_v14 = vld [vmem:[%s422_s0 + $0x1c] sm:$0xff]  ;;  %v50_v15 = vsub.s32 0, %v49_v4  ;;  %v54_v16 = vsub.s32 1, %v49_v4  ;;  %v58_v17 = vsub.s32 2, %v49_v4  ;;  %v62_v18 = vsub.s32 3, %v49_v4 }
   0x5   :  { %v66_v19 = vsub.s32 4, %v49_v4  ;;  %v33_v21 = vunpack.c.l.bf16 %v18_v14  ;;  %v34_v22 = vunpack.c.h.bf16 %v18_v14  ;;  %v19_v51 = vld [vmem:[%s422_s0 + $0x24] sm:$0xf]  ;;  %v36_v1 = vunpack.c.l.bf16 %v20_v52 }
   0x6   :  { %v305_v23 = vrot.slane %v46_v8, %v50_v15  ;;  %v307_v24 = vrot.slane %v46_v8, %v54_v16  ;;  %v309_v25 = vrot.slane %v93_v9, %v50_v15  ;;  %v311_v26 = vrot.slane %v93_v9, %v54_v16 }
   0x7   :  { %v313_v27 = vrot.slane %v46_v8, %v58_v17  ;;  %v315_v28 = vrot.slane %v46_v8, %v62_v18  ;;  %v317_v29 = vrot.slane %v93_v9, %v58_v17  ;;  %v319_v30 = vrot.slane %v93_v9, %v62_v18 }
   0x8   :  { %v73_v31 = vmul.f32 %v305_v23, %v26_v2  ;;  %v74_v32 = vmul.f32 %v307_v24, %v27_v3  ;;  %v323_v33 = vrot.slane %v46_v8, %v66_v19  ;;  %v325_v34 = vrot.slane %v93_v9, %v66_v19  ;;  %v22_v2 = vld [vmem:[%s422_s0 + $0x38] sm:$0xf]  ;;  %v23_v3 = vld [vmem:[%s422_s0 + $0x3c] sm:$0xff] }
   0x9   :  { %v75_v35 = vmul.f32 %v313_v27, %v28_v10  ;;  %v76_v36 = vmul.f32 %v315_v28, %v29_v11  ;;  %v78_v37 = vmul.f32 %v305_v23, %v31_v13  ;;  %v79_v38 = vmul.f32 %v307_v24, %v32_v20 }
   0xa   :  { %v120_v39 = vadd.f32 %v309_v25, %v73_v31  ;;  %v121_v40 = vadd.f32 %v311_v26, %v74_v32  ;;  %v77_v41 = vmul.f32 %v323_v33, %v30_v12  ;;  %v80_v42 = vmul.f32 %v313_v27, %v33_v21 }
   0xb   :  { %v122_v43 = vadd.f32 %v317_v29, %v75_v35  ;;  %v123_v44 = vadd.f32 %v319_v30, %v76_v36  ;;  %v125_v45 = vadd.f32 %v309_v25, %v78_v37  ;;  %v126_v46 = vadd.f32 %v311_v26, %v79_v38 }
   0xc   :  { %v140_v47 = vmax.f32 %v120_v39, 0.0  ;;  %v141_v48 = vmax.f32 %v121_v40, 0.0  ;;  %v124_v49 = vadd.f32 %v325_v34, %v77_v41  ;;  %v81_v50 = vmul.f32 %v315_v28, %v34_v22 }
   0xd   :  { %v142_v53 = vmax.f32 %v122_v43, 0.0  ;;  %v143_v54 = vmax.f32 %v123_v44, 0.0  ;;  %v145_v55 = vmax.f32 %v125_v45, 0.0  ;;  %v146_v56 = vmax.f32 %v126_v46, 0.0 }
   0xe   :  { %v252_v57 = vpack.c.bf16 %v141_v48, %v140_v47  ;;  %v144_v58 = vmax.f32 %v124_v49, 0.0  ;;  %v127_v59 = vadd.f32 %v317_v29, %v80_v42  ;;  %v128_v60 = vadd.f32 %v319_v30, %v81_v50 }
   0xf   :  { %v253_v62 = vpack.c.bf16 %v143_v54, %v142_v53  ;;  %v255_v63 = vpack.c.bf16 %v146_v56, %v145_v55  ;;  %v35_v0 = vunpack.c.l.bf16 %v19_v51  ;;  %v37_v7 = vunpack.c.h.bf16 %v20_v52 }
  0x10   :  { %224 = vst [vmem:[%s425_s3] sm:$0xff] %v252_v57  ;;  %v254_v4 = vpack.c.bf16 %v144_v58, %v144_v58  ;;  %v147_v5 = vmax.f32 %v127_v59, 0.0  ;;  %v148_v6 = vmax.f32 %v128_v60, 0.0  ;;  %v83_v9 = vmul.f32 %v305_v23, %v36_v1 }
  0x11   :  { %225 = vst [vmem:[%s425_s3 + $0x8] sm:$0xff] %v253_v62  ;;  %227 = vst [vmem:[%s425_s3 + $0x14] sm:$0xff] %v255_v63  ;;  %v82_v8 = vmul.f32 %v323_v33, %v35_v0  ;;  %v38_v10 = vunpack.c.l.bf16 %v21_v61  ;;  %v39_v11 = vunpack.c.h.bf16 %v21_v61  ;;  %v84_v13 = vmul.f32 %v307_v24, %v37_v7 }
  0x12   :  { %226 = vst [vmem:[%s425_s3 + $0x10] sm:$0xf] %v254_v4  ;;  %v256_v12 = vpack.c.bf16 %v148_v6, %v147_v5  ;;  %v40_v14 = vunpack.c.l.bf16 %v22_v2  ;;  %v41_v15 = vunpack.c.l.bf16 %v23_v3  ;;  %v130_v17 = vadd.f32 %v309_v25, %v83_v9 }
  0x13   :  { %v129_v16 = vadd.f32 %v325_v34, %v82_v8  ;;  %v85_v18 = vmul.f32 %v313_v27, %v38_v10  ;;  %v86_v19 = vmul.f32 %v315_v28, %v39_v11  ;;  %v131_v20 = vadd.f32 %v311_v26, %v84_v13 }
  0x14   :  { %228 = vst [vmem:[%s425_s3 + $0x1c] sm:$0xff] %v256_v12  ;;  %v87_v21 = vmul.f32 %v323_v33, %v40_v14  ;;  %v42_v22 = vunpack.c.h.bf16 %v23_v3  ;;  %v88_v31 = vmul.f32 %v305_v23, %v41_v15  ;;  %v150_v36 = vmax.f32 %v130_v17, 0.0 }
  0x15   :  { %v149_v35 = vmax.f32 %v129_v16, 0.0  ;;  %v132_v37 = vadd.f32 %v317_v29, %v85_v18  ;;  %v133_v38 = vadd.f32 %v319_v30, %v86_v19  ;;  %v151_v39 = vmax.f32 %v131_v20, 0.0 }
  0x16   :  { %v134_v40 = vadd.f32 %v325_v34, %v87_v21  ;;  %v89_v41 = vmul.f32 %v307_v24, %v42_v22  ;;  %v135_v42 = vadd.f32 %v309_v25, %v88_v31 }
  0x17   :  { %v257_v43 = vpack.c.bf16 %v149_v35, %v149_v35  ;;  %v152_v44 = vmax.f32 %v132_v37, 0.0  ;;  %v153_v45 = vmax.f32 %v133_v38, 0.0  ;;  %v258_v47 = vpack.c.bf16 %v151_v39, %v150_v36 }
  0x18   :  { %v154_v48 = vmax.f32 %v134_v40, 0.0  ;;  %v136_v49 = vadd.f32 %v311_v26, %v89_v41  ;;  %v155_v50 = vmax.f32 %v135_v42, 0.0 }
  0x19   :  { %v259_v24 = vpack.c.bf16 %v153_v45, %v152_v44 }
  0x1a   :  { %v260_v53 = vpack.c.bf16 %v154_v48, %v154_v48  ;;  %v156_v54 = vmax.f32 %v136_v49, 0.0 }
  0x1b   :  { %v24_v32 = vld [vmem:[%s422_s0 + $0x44] sm:$0xff]  ;;  %v25_v23 = vld [vmem:[%s422_s0 + $0x4c] sm:$0xf] }
  0x1c   :  { %v43_v46 = vunpack.c.l.bf16 %v24_v32  ;;  %229 = vst [vmem:[%s425_s3 + $0x24] sm:$0xf] %v257_v43  ;;  %v44_v51 = vunpack.c.h.bf16 %v24_v32  ;;  %v45_v52 = vunpack.c.l.bf16 %v25_v23  ;;  %230 = vst [vmem:[%s425_s3 + $0x28] sm:$0xff] %v258_v47 }
  0x1d   :  { %231 = vst [vmem:[%s425_s3 + $0x30] sm:$0xff] %v259_v24  ;;  %232 = vst [vmem:[%s425_s3 + $0x38] sm:$0xf] %v260_v53 }
  0x1e   :  { %v90_v25 = vmul.f32 %v313_v27, %v43_v46  ;;  %v91_v26 = vmul.f32 %v315_v28, %v44_v51  ;;  %v92_v56 = vmul.f32 %v323_v33, %v45_v52  ;;  %v261_v27 = vpack.c.bf16 %v156_v54, %v155_v50 }
  0x20   :  { %v137_v55 = vadd.f32 %v317_v29, %v90_v25  ;;  %v138_v57 = vadd.f32 %v319_v30, %v91_v26  ;;  %v139_v59 = vadd.f32 %v325_v34, %v92_v56  ;;  %233 = vst [vmem:[%s425_s3 + $0x3c] sm:$0xff] %v261_v27 }
  0x22   :  { %v157_v58 = vmax.f32 %v137_v55, 0.0  ;;  %v158_v60 = vmax.f32 %v138_v57, 0.0  ;;  %v159_v28 = vmax.f32 %v139_v59, 0.0 }
  0x24   :  { %v262_v61 = vpack.c.bf16 %v158_v60, %v157_v58  ;;  %v263_v29 = vpack.c.bf16 %v159_v28, %v159_v28 }
  0x26   :  { %234 = vst [vmem:[%s425_s3 + $0x44] sm:$0xff] %v262_v61  ;;  %235 = vst [vmem:[%s425_s3 + $0x4c] sm:$0xf] %v263_v29 }

// kernel: _lambda_.51
= control target key start
LH: loop header
LB: loop body
LE: loop exit
PB: predicated region body
PF: predicated region fallthrough
CT: control target
= control target key end

     0   :  { %v32_v0 = vlaneseq  ;;  %s230_s0 = inlined_call_operand.vmem [shape: bf16[16,640], index: 0, kind: input, shape index: {}, may-alias: {0,3}]   ;;  %s231_s1 = inlined_call_operand.vmem [shape: f32[1,640], index: 1, kind: input, shape index: {}]   ;;  %s232_s2 = inlined_call_operand.vmem [shape: f32[1,640], index: 2, kind: input, shape index: {}]   ;;  %s233_s3 = inlined_call_operand.vmem [shape: bf16[16,640], index: 3, kind: output, shape index: {}, may-alias: {0,3}]  }
   0x1   :  { %v14_v1 = vld [vmem:[%s230_s0] sm:$0xff]  ;;  %v15_v5 = vld [vmem:[%s230_s0 + $0x8] sm:$0xff]  ;;  %v16_v6 = vld [vmem:[%s230_s0 + $0x10] sm:$0xf] }
   0x2   :  { %v20_v2 = vunpack.c.l.bf16 %v14_v1  ;;  %v21_v3 = vunpack.c.h.bf16 %v14_v1  ;;  %v33_v4 = vshrl.u32 %v32_v0, 7  ;;  %v17_v7 = vld [vmem:[%s230_s0 + $0x14] sm:$0xff]  ;;  %v30_v8 = vld [vmem:[%s231_s1] sm:$0x1f]  ;;  %v22_v10 = vunpack.c.l.bf16 %v15_v5 }
   0x3   :  { %v67_v9 = vld [vmem:[%s232_s2] sm:$0x1f]  ;;  %v23_v11 = vunpack.c.h.bf16 %v15_v5  ;;  %v24_v12 = vunpack.c.l.bf16 %v16_v6  ;;  %v25_v13 = vunpack.c.l.bf16 %v17_v7  ;;  %v26_v20 = vunpack.c.h.bf16 %v17_v7 }
   0x4   :  { %v18_v14 = vld [vmem:[%s230_s0 + $0x1c] sm:$0xff]  ;;  %v34_v15 = vsub.s32 0, %v33_v4  ;;  %v38_v16 = vsub.s32 1, %v33_v4  ;;  %v42_v17 = vsub.s32 2, %v33_v4  ;;  %v46_v18 = vsub.s32 3, %v33_v4 }
   0x5   :  { %v50_v19 = vsub.s32 4, %v33_v4  ;;  %v27_v21 = vunpack.c.l.bf16 %v18_v14  ;;  %v28_v22 = vunpack.c.h.bf16 %v18_v14  ;;  %v19_v51 = vld [vmem:[%s230_s0 + $0x24] sm:$0xf] }
   0x6   :  { %v35_v23 = vrot.slane %v30_v8, %v34_v15  ;;  %v39_v24 = vrot.slane %v30_v8, %v38_v16  ;;  %v72_v25 = vrot.slane %v67_v9, %v34_v15  ;;  %v76_v26 = vrot.slane %v67_v9, %v38_v16 }
   0x7   :  { %v43_v27 = vrot.slane %v30_v8, %v42_v17  ;;  %v47_v28 = vrot.slane %v30_v8, %v46_v18  ;;  %v80_v29 = vrot.slane %v67_v9, %v42_v17  ;;  %v84_v30 = vrot.slane %v67_v9, %v46_v18 }
   0x8   :  { %v57_v31 = vmul.f32 %v35_v23, %v20_v2  ;;  %v58_v32 = vmul.f32 %v39_v24, %v21_v3  ;;  %v51_v33 = vrot.slane %v30_v8, %v50_v19  ;;  %v88_v34 = vrot.slane %v67_v9, %v50_v19 }
   0x9   :  { %v59_v35 = vmul.f32 %v43_v27, %v22_v10  ;;  %v60_v36 = vmul.f32 %v47_v28, %v23_v11  ;;  %v62_v37 = vmul.f32 %v35_v23, %v25_v13  ;;  %v63_v38 = vmul.f32 %v39_v24, %v26_v20 }
   0xa   :  { %v94_v39 = vadd.f32 %v72_v25, %v57_v31  ;;  %v95_v40 = vadd.f32 %v76_v26, %v58_v32  ;;  %v61_v41 = vmul.f32 %v51_v33, %v24_v12  ;;  %v64_v42 = vmul.f32 %v43_v27, %v27_v21 }
   0xb   :  { %v96_v43 = vadd.f32 %v80_v29, %v59_v35  ;;  %v97_v44 = vadd.f32 %v84_v30, %v60_v36  ;;  %v99_v45 = vadd.f32 %v72_v25, %v62_v37  ;;  %v100_v46 = vadd.f32 %v76_v26, %v63_v38 }
   0xc   :  { %v104_v47 = vmax.f32 %v94_v39, 0.0  ;;  %v105_v48 = vmax.f32 %v95_v40, 0.0  ;;  %v98_v49 = vadd.f32 %v88_v34, %v61_v41  ;;  %v65_v50 = vmul.f32 %v47_v28, %v28_v22 }
   0xd   :  { %v106_v52 = vmax.f32 %v96_v43, 0.0  ;;  %v107_v53 = vmax.f32 %v97_v44, 0.0  ;;  %v109_v54 = vmax.f32 %v99_v45, 0.0  ;;  %v110_v55 = vmax.f32 %v100_v46, 0.0 }
   0xe   :  { %v162_v56 = vpack.c.bf16 %v105_v48, %v104_v47  ;;  %v108_v57 = vmax.f32 %v98_v49, 0.0  ;;  %v101_v58 = vadd.f32 %v80_v29, %v64_v42  ;;  %v102_v59 = vadd.f32 %v84_v30, %v65_v50 }
   0xf   :  { %v163_v60 = vpack.c.bf16 %v107_v53, %v106_v52  ;;  %v165_v61 = vpack.c.bf16 %v110_v55, %v109_v54  ;;  %v29_v62 = vunpack.c.l.bf16 %v19_v51 }
  0x10   :  { %146 = vst [vmem:[%s233_s3] sm:$0xff] %v162_v56  ;;  %v164_v63 = vpack.c.bf16 %v108_v57, %v108_v57  ;;  %v111_v0 = vmax.f32 %v101_v58, 0.0  ;;  %v112_v1 = vmax.f32 %v102_v59, 0.0 }
  0x11   :  { %147 = vst [vmem:[%s233_s3 + $0x8] sm:$0xff] %v163_v60  ;;  %149 = vst [vmem:[%s233_s3 + $0x14] sm:$0xff] %v165_v61  ;;  %v66_v2 = vmul.f32 %v51_v33, %v29_v62 }
  0x12   :  { %148 = vst [vmem:[%s233_s3 + $0x10] sm:$0xf] %v164_v63  ;;  %v166_v3 = vpack.c.bf16 %v112_v1, %v111_v0 }
  0x13   :  { %v103_v4 = vadd.f32 %v88_v34, %v66_v2 }
  0x14   :  { %150 = vst [vmem:[%s233_s3 + $0x1c] sm:$0xff] %v166_v3 }
  0x15   :  { %v113_v5 = vmax.f32 %v103_v4, 0.0 }
  0x17   :  { %v167_v6 = vpack.c.bf16 %v113_v5, %v113_v5 }
  0x19   :  { %151 = vst [vmem:[%s233_s3 + $0x24] sm:$0xf] %v167_v6 }

// kernel: _lambda_.52
= control target key start
LH: loop header
LB: loop body
LE: loop exit
PB: predicated region body
PF: predicated region fallthrough
CT: control target
= control target key end

     0   :  { %s1111_s15 = smov 0   ;;  %s1113_s16 = smov 0   ;;  %s1331_s0 = inlined_call_operand.vmem [shape: bf16[16,640], index: 0, kind: input, shape index: {}]   ;;  %s1332_s1 = inlined_call_operand.vmem [shape: bf16[640,640], index: 1, kind: input, shape index: {}]   ;;  %s1333_s2 = inlined_call_operand.vmem [shape: bf16[16,640], index: 2, kind: output, shape index: {0}]   ;;  %s1334_s3 = inlined_call_operand.vmem [shape: f32[1,1,640], index: 3, kind: output, shape index: {1}]   ;;  %s1335_s4 = inlined_call_operand.vmem [shape: f32[1,1,640], index: 4, kind: output, shape index: {2}]  }
   0x1   :  { %s1115_s17 = smov 0   ;;  %s1117_s18 = smov 0  }
   0x2   :  { %s1119_s19 = smov 0   ;;  %s1121_s20 = smov 0  }
   0x3   :  { %s1123_s21 = smov 0   ;;  %s1125_s22 = smov 0  }
   0x4   :  { %s1127_s23 = smov 0   ;;  %s1129_s24 = smov 0  }
   0x5   :  { %s1131_s25 = smov 0  }
   0x6 LB: > { %1339 = sst [smem:[#allocation6_spill]] %s1061_s20  ;;  %s827_s26 = sadd.s32 4294967295, %s1081_s25   ;;  %s1081_s25 = sphi %s1131_s25, %s15_s25   ;;  %s1077_s24 = sphi %s1129_s24, %s1357_s24   ;;  %s1073_s23 = sphi %s1127_s23, %s1356_s23   ;;  %s1069_s22 = sphi %s1125_s22, %s1355_s22   ;;  %s1065_s21 = sphi %s1123_s21, %s1354_s21   ;;  %s1061_s20 = sphi %s1121_s20, %s1347_s20   ;;  %s1057_s19 = sphi %s1119_s19, %s1346_s19   ;;  %s1053_s18 = sphi %s1117_s18, %s1353_s18   ;;  %s1049_s17 = sphi %s1115_s17, %s1352_s17   ;;  %s1045_s16 = sphi %s1113_s16, %s1351_s16   ;;  %s1041_s15 = sphi %s1111_s15, %s1350_s15  }
   0x7   : > { %s27_s27 = sadd.s32 1, %s1073_s23  ;;  %s30_s28 = sadd.s32 1, %s1077_s24 }
   0x8   : > { %p28_p0 = scmp.ge.s32.totalorder %s27_s27, 5  ;;  %s43_s29 = sadd.s32 1, %s1061_s20 }
   0x9   : > { %p50_p1 = scmp.ne.s32.totalorder %s1061_s20, %s1057_s19  ;;  %p51_p2 = scmp.eq.s32.totalorder %s1081_s25, 0 }
   0xa   : > { %s1359_s27 = smov (%p28_p0, %s27_s27), 0  ;;  %s1361_s28 = smov (!%p28_p0, %s30_s28), %s1077_s24 }
   0xb   : > { %1340 = sst [smem:[#allocation7_spill]] %s1359_s27  ;;  %s39_s30 = ssub.s32 %s1073_s23, %s1359_s27 }
   0xc   : > { %p32_p3 = scmp.ge.s32.totalorder %s1361_s28, 5  ;;  %p41_p4 = scmp.eq.s32.totalorder %s39_s30, 0 }
   0xd   : > { %p1178_p5 = por %p51_p2, %p50_p1  ;;  %s71_s6 = sadd.s32 1, %s1053_s18 }
   0xe   : > { %s1363_s28 = smov (%p32_p3, %s1361_s28), 0  ;;  %p78_p6 = scmp.ne.s32.totalorder %s1053_s18, %s1049_s17 }
   0xf   : > { %1342 = sst [smem:[#allocation8_spill]] %s1363_s28  ;;  %s67_s8 = ssub.s32 %s1077_s24, %s1363_s28 }
  0x10   : > { %s1186_s7 = scalar_select %p41_p4, %s1061_s20, %s43_s29  }
  0x11   : > { %s68_s9 = sor.u32 %s67_s8, %s39_s30  ;;  %p97_p7 = scmp.eq.s32.totalorder %s67_s8, 0 }
  0x12   : > { %1343 = sst [smem:[#allocation9_spill]] %s1186_s7  ;;  %p69_p8 = scmp.eq.s32.totalorder %s68_s9, 0 }
  0x13   : > { %p1192_p9 = por %p78_p6, %p51_p2  ;;  %s99_s11 = sadd.s32 1, %s1045_s16 }
  0x14   : > { %p109_p10 = scmp.ne.s32.totalorder %s1045_s16, %s1041_s15  ;;  %p110_p11 = scmp.eq.s32.totalorder %s827_s26, 24 }
  0x15   : > { %s1200_s12 = scalar_select %p69_p8, %s1053_s18, %s71_s6  }
  0x16   : > { %s1203_s13 = scalar_select %p97_p7, %s1045_s16, %s99_s11  }
  0x17   : > { %p1205_p12 = por %p110_p11, %p109_p10  ;;  %p830_p13 = scmp.ge.s32.totalorder %s1081_s25, 25 }
  0x19   : > { %188 = sbr.rel (%p830_p13) target bundleno = 52 (0x34), region = 16 }
  0x1e   : > { %191 = sbr.rel (!%p1178_p5) target bundleno = 35 (0x23), region = 20  ;;  %s193_s29 = sand.u32 (%p1178_p5), 1, %s1061_s20  }
  0x1f   : > { %s832_s30 = sshll.u32 (%p1178_p5), %s1073_s23, 2  ;;  %s831_s8 = sshll.u32 (%p1178_p5), %s193_s29, 3 }
  0x20   : > { %s200_s11 = scalar_lea.vmem (%p1178_p5), %s1331_s0, %s832_s30  ;;  %s195_s26 = scalar_lea.vmem (%p1178_p5), [#allocation3], %s831_s8 }
  0x21   : > { %v217_v0 = vld [vmem:[%s200_s11] sm:$0xf] (%p1178_p5)  ;;  %v219_v1 = vld [vmem:[%s200_s11 + $0x14] sm:$0xf] (%p1178_p5) }
  0x22   : > { %218 = vst [vmem:[%s195_s26] sm:$0xf] (%p1178_p5), %v217_v0  ;;  %220 = vst [vmem:[%s195_s26 + $0x4] sm:$0xf] (%p1178_p5), %v219_v1 }
  0x23 PF: > { %248 = sbr.rel (!%p1192_p9) target bundleno = 52 (0x34), region = 61  ;;  %s250_s5 = sand.u32 (%p1192_p9), 1, %s1053_s18  }
  0x24   : > { %s894_s28 = smul.u32 (%p1192_p9), 80, %s1073_s23  ;;  %s833_s27 = sshll.u32 (%p1192_p9), %s250_s5, 6 }
  0x25   : > { %s252_s10 = scalar_lea.vmem (%p1192_p9), [#allocation4], %s833_s27 }
  0x26   : > { %s255_s29 = sadd.s32 (%p1192_p9), %s1077_s24, %s894_s28 }
  0x27   : > { %s836_s7 = sshll.u32 (%p1192_p9), %s255_s29, 2 }
  0x28   : > { %s1225_s30 = scalar_lea.vmem %s1332_s1, %s836_s7 }
  0x29   : > { %v274_v2 = vld [vmem:[%s1225_s30] sm:$0xf]  ;;  %v276_v3 = vld [vmem:[%s1225_s30 + $0x14] sm:$0xf]  ;;  %v278_v4 = vld [vmem:[%s1225_s30 + $0x28] sm:$0xf] }
  0x2a   : > { %275 = vst [vmem:[%s252_s10] sm:$0xf] %v274_v2  ;;  %277 = vst [vmem:[%s252_s10 + $0x4] sm:$0xf] %v276_v3  ;;  %v280_v5 = vld [vmem:[%s1225_s30 + $0x3c] sm:$0xf] }
  0x2b   : > { %279 = vst [vmem:[%s252_s10 + $0x8] sm:$0xf] %v278_v4  ;;  %v282_v6 = vld [vmem:[%s1225_s30 + $0x50] sm:$0xf]  ;;  %v284_v7 = vld [vmem:[%s1225_s30 + $0x64] sm:$0xf] }
  0x2c   : > { %281 = vst [vmem:[%s252_s10 + $0xc] sm:$0xf] %v280_v5  ;;  %283 = vst [vmem:[%s252_s10 + $0x10] sm:$0xf] %v282_v6  ;;  %v286_v8 = vld [vmem:[%s1225_s30 + $0x78] sm:$0xf] }
  0x2d   : > { %285 = vst [vmem:[%s252_s10 + $0x14] sm:$0xf] %v284_v7  ;;  %v288_v9 = vld [vmem:[%s1225_s30 + $0x8c] sm:$0xf]  ;;  %v290_v10 = vld [vmem:[%s1225_s30 + $0xa0] sm:$0xf] }
  0x2e   : > { %287 = vst [vmem:[%s252_s10 + $0x18] sm:$0xf] %v286_v8  ;;  %289 = vst [vmem:[%s252_s10 + $0x1c] sm:$0xf] %v288_v9  ;;  %v292_v11 = vld [vmem:[%s1225_s30 + $0xb4] sm:$0xf] }
  0x2f   : > { %291 = vst [vmem:[%s252_s10 + $0x20] sm:$0xf] %v290_v10  ;;  %v294_v12 = vld [vmem:[%s1225_s30 + $0xc8] sm:$0xf]  ;;  %v296_v13 = vld [vmem:[%s1225_s30 + $0xdc] sm:$0xf] }
  0x30   : > { %293 = vst [vmem:[%s252_s10 + $0x24] sm:$0xf] %v292_v11  ;;  %295 = vst [vmem:[%s252_s10 + $0x28] sm:$0xf] %v294_v12  ;;  %v298_v14 = vld [vmem:[%s1225_s30 + $0xf0] sm:$0xf] }
  0x31   : > { %297 = vst [vmem:[%s252_s10 + $0x2c] sm:$0xf] %v296_v13  ;;  %v300_v15 = vld [vmem:[%s1225_s30 + $0x104] sm:$0xf]  ;;  %v302_v16 = vld [vmem:[%s1225_s30 + $0x118] sm:$0xf] }
  0x32   : > { %299 = vst [vmem:[%s252_s10 + $0x30] sm:$0xf] %v298_v14  ;;  %301 = vst [vmem:[%s252_s10 + $0x34] sm:$0xf] %v300_v15  ;;  %v304_v17 = vld [vmem:[%s1225_s30 + $0x12c] sm:$0xf] }
  0x33   : > { %303 = vst [vmem:[%s252_s10 + $0x38] sm:$0xf] %v302_v16  ;;  %305 = vst [vmem:[%s252_s10 + $0x3c] sm:$0xf] %v304_v17 }
  0x34 PF: > { %p837_p0 = scmp.ge.s32.totalorder %s1081_s25, 1  ;;  %p360_p1 = scmp.lt.s32.totalorder %s1081_s25, 26 }
  0x36   : > { %p361_p2 = pnand %p837_p0, %p360_p1 }
  0x37   : > { %s367_s20 = sand.u32 (!%p361_p2), 1, %s1057_s19   ;;  %s374_s27 = sand.u32 (!%p361_p2), 1, %s1049_s17  }
  0x38   : > { %364 = sbr.rel (%p361_p2) target bundleno = 331 (0x14b), region = 102  ;;  %s1247_s28 = sshll.u32 (!%p361_p2), %s367_s20, 3 }
  0x39   : > { %s839_s7 = sshll.u32 (!%p361_p2), %s374_s27, 6  ;;  %s395_s8 = sand.u32 (!%p361_p2), 1, %s1041_s15  }
  0x3a   : > { %p421_p3 = scmp.lt.s32.totalorder (!%p361_p2), %s1069_s22, 4  ;;  %s840_s9 = sshll.u32 (!%p361_p2), %s395_s8, 3 }
  0x3b   : > { %s369_s17 = scalar_lea.vmem (!%p361_p2), [#allocation3], %s1247_s28  ;;  %s1263_s10 = scalar_lea.vmem (!%p361_p2), [#allocation4], %s839_s7 }
  0x3c   : > { %s1265_s20 = scalar_lea.vmem (!%p361_p2), [#allocation5], %s840_s9  ;;  %p841_p4 = scmp.ne.s32.totalorder (!%p361_p2), %s1065_s21, 0 }
  0x3d   : > { %s1252_s11 = scalar_select %p421_p3, %s1069_s22, 4 }
  0x3e   : > { %437 = sbr.rel (%p841_p4) target bundleno = 69 (0x45), region = 114 }
  0x3f   : > { %s425_s29 = scalar_lea.vmem %s1334_s3, %s1252_s11  ;;  %s432_s19 = scalar_lea.vmem %s1335_s4, %s1252_s11 }
  0x43   : > { %v1083_v18 = vmov 0.0  }
  0x44   : > { %438 = vst [vmem:[#allocation2] sm:$0xff] %v1083_v18  ;;  %439 = vst [vmem:[#allocation2 + $0x8] sm:$0xff] %v1083_v18 }
  0x45 PF: > { %v986_v19 = vld [vmem:[%s1263_s10 + $0x38] sm:$0xff]   ;;  %v1084_v20 = vmov 0.0   ;;  %v987_v21 = vld [vmem:[%s1263_s10 + $0x30] sm:$0xff]   ;;  %vm1085_vm0 = vmmov 0   ;;  %v988_v22 = vld [vmem:[%s1263_s10 + $0x28] sm:$0xff]   ;;  %p851_p5 = scmp.ne.s32.totalorder %s1065_s21, 4 }
  0x46   : > { %874 = vmatprep.subr.bf16.mxu0 %v1084_v20  ;;  %890 = vmatprep.mubr.msk.bf16.mxu0 %vm1085_vm0, %v1084_v20  ;;  %v989_v23 = vld [vmem:[%s1263_s10 + $0x20] sm:$0xff]   ;;  %v990_v24 = vld [vmem:[%s1263_s10 + $0x18] sm:$0xff]   ;;  %v991_v25 = vld [vmem:[%s1263_s10 + $0x10] sm:$0xff]  }
  0x47   : > { %875 = vmatpush3.bf16.msra.mxu0 %v986_v19  ;;  %v992_v26 = vld [vmem:[%s1263_s10 + $0x8] sm:$0xff]   ;;  %v993_v27 = vld [vmem:[%s1263_s10] sm:$0xff]   ;;  %v994_v28 = vld [vmem:[%s369_s17] sm:$0xff]  }
  0x48   : > { %876 = vmatprep.subr.bf16.mxu0 %v1084_v20 }
  0x4b   : > { %877 = vmatpush3.bf16.msra.mxu0 %v987_v21  ;;  %v440_v29 = vld [vmem:[#allocation2] sm:$0xff]  ;;  %v441_v33 = vld [vmem:[#allocation2 + $0x8] sm:$0xff] }
  0x4c   : > { %878 = vmatprep.subr.bf16.mxu0 %v1084_v20 }
  0x4f   : > { %879 = vmatpush3.bf16.msra.mxu0 %v988_v22 }
  0x50   : > { %880 = vmatprep.subr.bf16.mxu0 %v1084_v20 }
  0x53   : > { %881 = vmatpush3.bf16.msra.mxu0 %v989_v23 }
  0x54   : > { %882 = vmatprep.subr.bf16.mxu0 %v1084_v20 }
  0x57   : > { %883 = vmatpush3.bf16.msra.mxu0 %v990_v24 }
  0x58   : > { %884 = vmatprep.subr.bf16.mxu0 %v1084_v20 }
  0x5b   : > { %885 = vmatpush3.bf16.msra.mxu0 %v991_v25 }
  0x5c   : > { %886 = vmatprep.subr.bf16.mxu0 %v1084_v20 }
  0x5f   : > { %887 = vmatpush3.bf16.msra.mxu0 %v992_v26 }
  0x60   : > { %888 = vmatprep.subr.bf16.mxu0 %v1084_v20 }
  0x63   : > { %889 = vmatpush3.bf16.msra.mxu0 %v993_v27 }
  0x66   : > { %891 = vmatmul.mubr.bf16.vlgmr.msra.gmra.mxu0 %v994_v28 }
 0x126   : > { %v548_v30 = vpop.f32.mrf.mxu0 }
 0x127   : > { %v555_v31 = vadd.f32 %v548_v30, %v440_v29 }
 0x128   : > { %v892_v32 = vpop.f32.mrf.mxu0 }
 0x129   : > { %557 = vst [vmem:[#allocation2] sm:$0xff] %v555_v31  ;;  %562 = sbr.rel (%p851_p5) target bundleno = 326 (0x146), region = 118 }
 0x12a   : > { %v551_v34 = vpop.f32.mrf.mxu0 }
 0x12b   : > { %v556_v35 = vadd.f32 %v551_v34, %v441_v33 }
 0x12c   : > { %v893_v36 = vpop.f32.mrf.mxu0 }
 0x12d   : > { %558 = vst [vmem:[#allocation2 + $0x8] sm:$0xff] %v556_v35 }
 0x130   : > { %v563_v37 = vld [vmem:[#allocation2] sm:$0xff] }
 0x131   : > { %v583_v41 = vmul.f32 %v563_v37, %v563_v37 }
 0x134   : > { %v564_v38 = vld [vmem:[#allocation2 + $0x8] sm:$0xff] }
 0x135   : > { %v863_v39 = vpack.c.bf16 %v564_v38, %v563_v37  ;;  %v575_v40 = vadd.f32 %v564_v38, %v563_v37  ;;  %v584_v42 = vmul.f32 %v564_v38, %v564_v38 }
 0x137   : > { %864 = vst [vmem:[%s1265_s20] sm:$0xff] %v863_v39   ;;  %v576_v43 = vrot.slane %v575_v40, 4  ;;  %v585_v44 = vadd.f32 %v584_v42, %v583_v41 }
 0x139   : > { %v577_v45 = vadd.f32 %v576_v43, %v575_v40  ;;  %v586_v46 = vrot.slane %v585_v44, 4 }
 0x13b   : > { %v578_v47 = vrot.slane %v577_v45, 2  ;;  %v587_v48 = vadd.f32 %v586_v46, %v585_v44 }
 0x13d   : > { %v579_v49 = vadd.f32 %v578_v47, %v577_v45  ;;  %v588_v50 = vrot.slane %v587_v48, 2 }
 0x13f   : > { %v580_v51 = vrot.slane %v579_v49, 1  ;;  %v589_v52 = vadd.f32 %v588_v50, %v587_v48 }
 0x141   : > { %v581_v53 = vadd.f32 %v580_v51, %v579_v49  ;;  %v590_v54 = vrot.slane %v589_v52, 1 }
 0x143   : > { %582 = vst [vmem:[%s425_s29] sm:$0x1] %v581_v53  ;;  %v591_v55 = vadd.f32 %v590_v54, %v589_v52 }
 0x145   : > { %592 = vst [vmem:[%s432_s19] sm:$0x1] %v591_v55 }
 0x146 PF: > { %613 = sbr.rel (!%p1205_p12) target bundleno = 331 (0x14b), region = 122  ;;  %s855_s7 = sshll.u32 (%p1205_p12), %s1069_s22, 2  ;;  %v635_v56 = vld [vmem:[%s1265_s20] sm:$0xf] (%p1205_p12)  ;;  %v637_v57 = vld [vmem:[%s1265_s20 + $0x4] sm:$0xf] (%p1205_p12) }
 0x147   : > { %s618_s26 = scalar_lea.vmem (%p1205_p12), %s1333_s2, %s855_s7 }
 0x148   : > { %636 = vst [vmem:[%s618_s26] sm:$0xf] (%p1205_p12), %v635_v56  ;;  %638 = vst [vmem:[%s618_s26 + $0x14] sm:$0xf] (%p1205_p12), %v637_v57 }
 0x14b PF: > { %s15_s25 = sadd.s32 1, %s1081_s25   ;;  %s1346_s19 = sld [smem:[#allocation6_spill]] }
 0x14c   : > { %p12_p6 = scmp.ge.s32.totalorder %s15_s25, 27   ;;  %s1347_s20 = sld [smem:[#allocation9_spill]] }
 0x14d   : > { %s1348_s14 = sld [smem:[#allocation7_spill]]  ;;  %s1350_s15 = smov %s1045_s16 }
 0x14e   : > { %s1349_s11 = sld [smem:[#allocation8_spill]]  ;;  %s1351_s16 = smov %s1203_s13 }
 0x14f   : > { %s1352_s17 = smov %s1053_s18  ;;  %s1353_s18 = smov %s1200_s12 }
 0x150   : > { %s1354_s21 = smov %s1073_s23  ;;  %s1355_s22 = smov %s1077_s24 }
 0x151   :  { %14 = sbr.rel (!%p12_p6) target bundleno = 6 (0x6), region = 226 }
 0x153   : > { %s1356_s23 = smov %s1348_s14 }
 0x154   : > { %s1357_s24 = smov %s1349_s11 }

// kernel: _lambda_.50
= control target key start
LH: loop header
LB: loop body
LE: loop exit
PB: predicated region body
PF: predicated region fallthrough
CT: control target
= control target key end

     0   :  { %s1796_s0 = inlined_call_operand.vmem [shape: bf16[16,5760], index: 0, kind: input, shape index: {}]   ;;  %s1797_s1 = inlined_call_operand.vmem [shape: bf16[5760,640], index: 1, kind: input, shape index: {}]   ;;  %s1798_s2 = inlined_call_operand.vmem [shape: bf16[16,640], index: 2, kind: output, shape index: {0}]   ;;  %s1799_s3 = inlined_call_operand.vmem [shape: f32[1,1,640], index: 3, kind: output, shape index: {1}]   ;;  %s1800_s4 = inlined_call_operand.vmem [shape: f32[1,1,640], index: 4, kind: output, shape index: {2}]  }
   0x1   :  { %1804 = sst [smem:[#allocation9_spill]] %s1796_s0 }
   0x2   :  { %1805 = sst [smem:[#allocation10_spill]] %s1797_s1 }
   0x3   :  { %s1478_s15 = smov 0   ;;  %s1480_s16 = smov 0  }
   0x4   :  { %s1482_s17 = smov 0   ;;  %s1484_s18 = smov 0  }
   0x5   :  { %s1486_s19 = smov 0   ;;  %s1488_s20 = smov 0  }
   0x6   :  { %s1490_s21 = smov 0   ;;  %s1492_s22 = smov 0  }
   0x7   :  { %s1494_s23 = smov 0   ;;  %s1496_s24 = smov 0  }
   0x8   :  { %s1498_s25 = smov 0  }
   0x9 LB: > { %1806 = sst [smem:[#allocation6_spill]] %s1444_s24  ;;  %s1131_s26 = sadd.s32 4294967295, %s1448_s25   ;;  %s1448_s25 = sphi %s1498_s25, %s15_s25   ;;  %s1444_s24 = sphi %s1496_s24, %s1816_s24   ;;  %s1440_s23 = sphi %s1494_s23, %s1824_s23   ;;  %s1436_s22 = sphi %s1492_s22, %s1814_s22   ;;  %s1432_s21 = sphi %s1490_s21, %s1823_s21   ;;  %s1428_s20 = sphi %s1488_s20, %s1822_s20   ;;  %s1424_s19 = sphi %s1486_s19, %s1821_s19   ;;  %s1420_s18 = sphi %s1484_s18, %s1820_s18   ;;  %s1416_s17 = sphi %s1482_s17, %s1819_s17   ;;  %s1412_s16 = sphi %s1480_s16, %s1818_s16   ;;  %s1408_s15 = sphi %s1478_s15, %s1817_s15  }
   0xa   : > { %s27_s27 = sadd.s32 1, %s1440_s23  ;;  %s30_s28 = sadd.s32 1, %s1444_s24 }
   0xb   : > { %p28_p0 = scmp.ge.s32.totalorder %s27_s27, 15  ;;  %s43_s29 = sadd.s32 1, %s1428_s20 }
   0xc   : > { %p50_p1 = scmp.ne.s32.totalorder %s1428_s20, %s1424_s19  ;;  %p51_p2 = scmp.eq.s32.totalorder %s1448_s25, 0 }
   0xd   : > { %s1826_s27 = smov (%p28_p0, %s27_s27), 0  ;;  %s1828_s28 = smov (!%p28_p0, %s30_s28), %s1444_s24 }
   0xe   : > { %1807 = sst [smem:[#allocation7_spill]] %s1826_s27  ;;  %s39_s30 = ssub.s32 %s1440_s23, %s1826_s27 }
   0xf   : > { %p32_p3 = scmp.ge.s32.totalorder %s1828_s28, 5  ;;  %p41_p4 = scmp.eq.s32.totalorder %s39_s30, 0 }
  0x10   : > { %p1545_p5 = por %p51_p2, %p50_p1  ;;  %s71_s6 = sadd.s32 1, %s1420_s18 }
  0x11   : > { %s1830_s28 = smov (%p32_p3, %s1828_s28), 0  ;;  %p78_p6 = scmp.ne.s32.totalorder %s1420_s18, %s1416_s17 }
  0x12   : > { %1809 = sst [smem:[#allocation8_spill]] %s1830_s28  ;;  %s67_s8 = ssub.s32 %s1444_s24, %s1830_s28 }
  0x13   : > { %s1553_s7 = scalar_select %p41_p4, %s1428_s20, %s43_s29  }
  0x14   : > { %s68_s9 = sor.u32 %s67_s8, %s39_s30  ;;  %p97_p7 = scmp.eq.s32.totalorder %s67_s8, 0 }
  0x15   : > { %p69_p8 = scmp.eq.s32.totalorder %s68_s9, 0  ;;  %p1559_p9 = por %p78_p6, %p51_p2 }
  0x16   : > { %s99_s11 = sadd.s32 1, %s1412_s16  ;;  %p109_p10 = scmp.ne.s32.totalorder %s1412_s16, %s1408_s15 }
  0x17   : > { %s1567_s12 = scalar_select %p69_p8, %s1420_s18, %s71_s6  }
  0x18   : > { %s1570_s13 = scalar_select %p97_p7, %s1412_s16, %s99_s11  }
  0x19   : > { %p110_p11 = scmp.eq.s32.totalorder %s1131_s26, 74  ;;  %p1134_p13 = scmp.ge.s32.totalorder %s1448_s25, 75 }
  0x1b   : > { %p1572_p12 = por %p110_p11, %p109_p10  ;;  %188 = sbr.rel (%p1134_p13) target bundleno = 84 (0x54), region = 16 }
  0x20   : > { %191 = sbr.rel (!%p1545_p5) target bundleno = 43 (0x2b), region = 20  ;;  %s193_s29 = sand.u32 (%p1545_p5), 1, %s1428_s20  }
  0x21   : > { %s1178_s30 = smul.u32 (%p1545_p5), 12, %s1440_s23  ;;  %s1812_s0 = sld [smem:[#allocation9_spill]] (%p1545_p5) }
  0x22   : > { %s1237_s8 = smul.u32 (%p1545_p5), 24, %s193_s29 }
  0x24   : > { %s195_s26 = scalar_lea.vmem (%p1545_p5), [#allocation3], %s1237_s8 }
  0x27   : > { %s201_s11 = scalar_lea.vmem %s1812_s0, %s1178_s30 }
  0x28   : > { %v216_v0 = vld [vmem:[%s201_s11] sm:$0xff]  ;;  %v218_v1 = vld [vmem:[%s201_s11 + $0xb4] sm:$0xff]  ;;  %v1136_v2 = vld [vmem:[%s201_s11 + $0x8] sm:$0xf] }
  0x29   : > { %217 = vst [vmem:[%s195_s26] sm:$0xff] %v216_v0  ;;  %219 = vst [vmem:[%s195_s26 + $0xc] sm:$0xff] %v218_v1  ;;  %v1138_v3 = vld [vmem:[%s201_s11 + $0xbc] sm:$0xf] }
  0x2a   : > { %1137 = vst [vmem:[%s195_s26 + $0x8] sm:$0xf] %v1136_v2  ;;  %1139 = vst [vmem:[%s195_s26 + $0x14] sm:$0xf] %v1138_v3 }
  0x2b PF: > { %237 = sbr.rel (!%p1559_p9) target bundleno = 84 (0x54), region = 46  ;;  %s239_s5 = sand.u32 (%p1559_p9), 1, %s1420_s18  }
  0x2c   : > { %s1238_s29 = smul.u32 (%p1559_p9), 192, %s239_s5  ;;  %s1813_s1 = sld [smem:[#allocation10_spill]] (%p1559_p9) }
  0x2d   : > { %s1242_s6 = smul.u32 (%p1559_p9), 240, %s1440_s23 }
  0x2e   : > { %s1597_s10 = scalar_lea.vmem (%p1559_p9), [#allocation4], %s1238_s29 }
  0x2f   : > { %s244_s30 = sadd.s32 (%p1559_p9), %s1444_s24, %s1242_s6 }
  0x30   : > { %s1140_s9 = sshll.u32 %s244_s30, 2 }
  0x32   : > { %s1592_s8 = scalar_lea.vmem %s1813_s1, %s1140_s9 }
  0x33   : > { %v263_v4 = vld [vmem:[%s1592_s8] sm:$0xf]  ;;  %v265_v5 = vld [vmem:[%s1592_s8 + $0x14] sm:$0xf]  ;;  %v267_v6 = vld [vmem:[%s1592_s8 + $0x28] sm:$0xf] }
  0x34   : > { %264 = vst [vmem:[%s1597_s10] sm:$0xf] %v263_v4  ;;  %266 = vst [vmem:[%s1597_s10 + $0x4] sm:$0xf] %v265_v5  ;;  %v269_v7 = vld [vmem:[%s1592_s8 + $0x3c] sm:$0xf] }
  0x35   : > { %268 = vst [vmem:[%s1597_s10 + $0x8] sm:$0xf] %v267_v6  ;;  %v271_v8 = vld [vmem:[%s1592_s8 + $0x50] sm:$0xf]  ;;  %v273_v9 = vld [vmem:[%s1592_s8 + $0x64] sm:$0xf] }
  0x36   : > { %270 = vst [vmem:[%s1597_s10 + $0xc] sm:$0xf] %v269_v7  ;;  %272 = vst [vmem:[%s1597_s10 + $0x10] sm:$0xf] %v271_v8  ;;  %v275_v10 = vld [vmem:[%s1592_s8 + $0x78] sm:$0xf] }
  0x37   : > { %274 = vst [vmem:[%s1597_s10 + $0x14] sm:$0xf] %v273_v9  ;;  %v277_v11 = vld [vmem:[%s1592_s8 + $0x8c] sm:$0xf]  ;;  %v279_v12 = vld [vmem:[%s1592_s8 + $0xa0] sm:$0xf] }
  0x38   : > { %276 = vst [vmem:[%s1597_s10 + $0x18] sm:$0xf] %v275_v10  ;;  %278 = vst [vmem:[%s1597_s10 + $0x1c] sm:$0xf] %v277_v11  ;;  %v281_v13 = vld [vmem:[%s1592_s8 + $0xb4] sm:$0xf] }
  0x39   : > { %280 = vst [vmem:[%s1597_s10 + $0x20] sm:$0xf] %v279_v12  ;;  %v283_v14 = vld [vmem:[%s1592_s8 + $0xc8] sm:$0xf]  ;;  %v285_v15 = vld [vmem:[%s1592_s8 + $0xdc] sm:$0xf] }
  0x3a   : > { %282 = vst [vmem:[%s1597_s10 + $0x24] sm:$0xf] %v281_v13  ;;  %284 = vst [vmem:[%s1597_s10 + $0x28] sm:$0xf] %v283_v14  ;;  %v287_v16 = vld [vmem:[%s1592_s8 + $0xf0] sm:$0xf] }
  0x3b   : > { %286 = vst [vmem:[%s1597_s10 + $0x2c] sm:$0xf] %v285_v15  ;;  %v289_v17 = vld [vmem:[%s1592_s8 + $0x104] sm:$0xf]  ;;  %v291_v18 = vld [vmem:[%s1592_s8 + $0x118] sm:$0xf] }
  0x3c   : > { %288 = vst [vmem:[%s1597_s10 + $0x30] sm:$0xf] %v287_v16  ;;  %290 = vst [vmem:[%s1597_s10 + $0x34] sm:$0xf] %v289_v17  ;;  %v293_v19 = vld [vmem:[%s1592_s8 + $0x12c] sm:$0xf] }
  0x3d   : > { %292 = vst [vmem:[%s1597_s10 + $0x38] sm:$0xf] %v291_v18  ;;  %v295_v20 = vld [vmem:[%s1592_s8 + $0x140] sm:$0xf]  ;;  %v297_v21 = vld [vmem:[%s1592_s8 + $0x154] sm:$0xf] }
  0x3e   : > { %294 = vst [vmem:[%s1597_s10 + $0x3c] sm:$0xf] %v293_v19  ;;  %296 = vst [vmem:[%s1597_s10 + $0x40] sm:$0xf] %v295_v20  ;;  %v299_v22 = vld [vmem:[%s1592_s8 + $0x168] sm:$0xf] }
  0x3f   : > { %298 = vst [vmem:[%s1597_s10 + $0x44] sm:$0xf] %v297_v21  ;;  %v301_v23 = vld [vmem:[%s1592_s8 + $0x17c] sm:$0xf]  ;;  %v303_v24 = vld [vmem:[%s1592_s8 + $0x190] sm:$0xf] }
  0x40   : > { %300 = vst [vmem:[%s1597_s10 + $0x48] sm:$0xf] %v299_v22  ;;  %302 = vst [vmem:[%s1597_s10 + $0x4c] sm:$0xf] %v301_v23  ;;  %v305_v25 = vld [vmem:[%s1592_s8 + $0x1a4] sm:$0xf] }
  0x41   : > { %304 = vst [vmem:[%s1597_s10 + $0x50] sm:$0xf] %v303_v24  ;;  %v307_v26 = vld [vmem:[%s1592_s8 + $0x1b8] sm:$0xf]  ;;  %v309_v27 = vld [vmem:[%s1592_s8 + $0x1cc] sm:$0xf] }
  0x42   : > { %306 = vst [vmem:[%s1597_s10 + $0x54] sm:$0xf] %v305_v25  ;;  %308 = vst [vmem:[%s1597_s10 + $0x58] sm:$0xf] %v307_v26  ;;  %v311_v28 = vld [vmem:[%s1592_s8 + $0x1e0] sm:$0xf] }
  0x43   : > { %310 = vst [vmem:[%s1597_s10 + $0x5c] sm:$0xf] %v309_v27  ;;  %v313_v29 = vld [vmem:[%s1592_s8 + $0x1f4] sm:$0xf]  ;;  %v315_v30 = vld [vmem:[%s1592_s8 + $0x208] sm:$0xf] }
  0x44   : > { %312 = vst [vmem:[%s1597_s10 + $0x60] sm:$0xf] %v311_v28  ;;  %314 = vst [vmem:[%s1597_s10 + $0x64] sm:$0xf] %v313_v29  ;;  %v317_v31 = vld [vmem:[%s1592_s8 + $0x21c] sm:$0xf] }
  0x45   : > { %316 = vst [vmem:[%s1597_s10 + $0x68] sm:$0xf] %v315_v30  ;;  %v319_v32 = vld [vmem:[%s1592_s8 + $0x230] sm:$0xf]  ;;  %v321_v33 = vld [vmem:[%s1592_s8 + $0x244] sm:$0xf] }
  0x46   : > { %318 = vst [vmem:[%s1597_s10 + $0x6c] sm:$0xf] %v317_v31  ;;  %320 = vst [vmem:[%s1597_s10 + $0x70] sm:$0xf] %v319_v32  ;;  %v323_v34 = vld [vmem:[%s1592_s8 + $0x258] sm:$0xf] }
  0x47   : > { %322 = vst [vmem:[%s1597_s10 + $0x74] sm:$0xf] %v321_v33  ;;  %v325_v35 = vld [vmem:[%s1592_s8 + $0x26c] sm:$0xf]  ;;  %v327_v36 = vld [vmem:[%s1592_s8 + $0x280] sm:$0xf] }
  0x48   : > { %324 = vst [vmem:[%s1597_s10 + $0x78] sm:$0xf] %v323_v34  ;;  %326 = vst [vmem:[%s1597_s10 + $0x7c] sm:$0xf] %v325_v35  ;;  %v329_v37 = vld [vmem:[%s1592_s8 + $0x294] sm:$0xf] }
  0x49   : > { %328 = vst [vmem:[%s1597_s10 + $0x80] sm:$0xf] %v327_v36  ;;  %v331_v38 = vld [vmem:[%s1592_s8 + $0x2a8] sm:$0xf]  ;;  %v333_v39 = vld [vmem:[%s1592_s8 + $0x2bc] sm:$0xf] }
  0x4a   : > { %330 = vst [vmem:[%s1597_s10 + $0x84] sm:$0xf] %v329_v37  ;;  %332 = vst [vmem:[%s1597_s10 + $0x88] sm:$0xf] %v331_v38  ;;  %v335_v40 = vld [vmem:[%s1592_s8 + $0x2d0] sm:$0xf] }
  0x4b   : > { %334 = vst [vmem:[%s1597_s10 + $0x8c] sm:$0xf] %v333_v39  ;;  %v337_v41 = vld [vmem:[%s1592_s8 + $0x2e4] sm:$0xf]  ;;  %v339_v42 = vld [vmem:[%s1592_s8 + $0x2f8] sm:$0xf] }
  0x4c   : > { %336 = vst [vmem:[%s1597_s10 + $0x90] sm:$0xf] %v335_v40  ;;  %338 = vst [vmem:[%s1597_s10 + $0x94] sm:$0xf] %v337_v41  ;;  %v341_v43 = vld [vmem:[%s1592_s8 + $0x30c] sm:$0xf] }
  0x4d   : > { %340 = vst [vmem:[%s1597_s10 + $0x98] sm:$0xf] %v339_v42  ;;  %v343_v44 = vld [vmem:[%s1592_s8 + $0x320] sm:$0xf]  ;;  %v345_v45 = vld [vmem:[%s1592_s8 + $0x334] sm:$0xf] }
  0x4e   : > { %342 = vst [vmem:[%s1597_s10 + $0x9c] sm:$0xf] %v341_v43  ;;  %344 = vst [vmem:[%s1597_s10 + $0xa0] sm:$0xf] %v343_v44  ;;  %v347_v46 = vld [vmem:[%s1592_s8 + $0x348] sm:$0xf] }
  0x4f   : > { %346 = vst [vmem:[%s1597_s10 + $0xa4] sm:$0xf] %v345_v45  ;;  %v349_v47 = vld [vmem:[%s1592_s8 + $0x35c] sm:$0xf]  ;;  %v351_v48 = vld [vmem:[%s1592_s8 + $0x370] sm:$0xf] }
  0x50   : > { %348 = vst [vmem:[%s1597_s10 + $0xa8] sm:$0xf] %v347_v46  ;;  %350 = vst [vmem:[%s1597_s10 + $0xac] sm:$0xf] %v349_v47  ;;  %v353_v49 = vld [vmem:[%s1592_s8 + $0x384] sm:$0xf] }
  0x51   : > { %352 = vst [vmem:[%s1597_s10 + $0xb0] sm:$0xf] %v351_v48  ;;  %v355_v50 = vld [vmem:[%s1592_s8 + $0x398] sm:$0xf]  ;;  %v357_v51 = vld [vmem:[%s1592_s8 + $0x3ac] sm:$0xf] }
  0x52   : > { %354 = vst [vmem:[%s1597_s10 + $0xb4] sm:$0xf] %v353_v49  ;;  %356 = vst [vmem:[%s1597_s10 + $0xb8] sm:$0xf] %v355_v50 }
  0x53   : > { %358 = vst [vmem:[%s1597_s10 + $0xbc] sm:$0xf] %v357_v51 }
  0x54 PF: > { %p1141_p0 = scmp.ge.s32.totalorder %s1448_s25, 1  ;;  %p477_p1 = scmp.lt.s32.totalorder %s1448_s25, 76 }
  0x56   : > { %p478_p2 = pnand %p1141_p0, %p477_p1 }
  0x57   : > { %s484_s0 = sand.u32 (!%p478_p2), 1, %s1424_s19   ;;  %s491_s28 = sand.u32 (!%p478_p2), 1, %s1416_s17  }
  0x58   : > { %481 = sbr.rel (%p478_p2) target bundleno = 370 (0x172), region = 87  ;;  %s512_s26 = sand.u32 (!%p478_p2), 1, %s1408_s15  }
  0x59   : > { %s1240_s11 = smul.u32 (!%p478_p2), 24, %s484_s0  ;;  %s1142_s29 = sshll.u32 (!%p478_p2), %s512_s26, 3 }
  0x5a   : > { %s1241_s5 = smul.u32 (!%p478_p2), 192, %s491_s28  ;;  %p539_p3 = scmp.lt.s32.totalorder (!%p478_p2), %s1436_s22, 4 }
  0x5b   : > { %s1709_s24 = scalar_lea.vmem (!%p478_p2), [#allocation3], %s1240_s11  ;;  %s1713_s15 = scalar_lea.vmem (!%p478_p2), [#allocation5], %s1142_s29 }
  0x5c   : > { %s1711_s17 = scalar_lea.vmem (!%p478_p2), [#allocation4], %s1241_s5  ;;  %p1143_p4 = scmp.ne.s32.totalorder (!%p478_p2), %s1432_s21, 0 }
  0x5d   : > { %s1699_s6 = scalar_select %p539_p3, %s1436_s22, 4 }
  0x5e   : > { %555 = sbr.rel (%p1143_p4) target bundleno = 101 (0x65), region = 99 }
  0x5f   : > { %s543_s8 = scalar_lea.vmem %s1799_s3, %s1699_s6  ;;  %s550_s27 = scalar_lea.vmem %s1800_s4, %s1699_s6 }
  0x63   : > { %v1450_v52 = vmov 0.0  }
  0x64   : > { %556 = vst [vmem:[#allocation2] sm:$0xff] %v1450_v52  ;;  %557 = vst [vmem:[#allocation2 + $0x8] sm:$0xff] %v1450_v52 }
  0x65 PF: > { %v1334_v53 = vld [vmem:[%s1711_s17 + $0x78] sm:$0xff]   ;;  %v1451_v54 = vmov 0.0   ;;  %vm1452_vm0 = vmmov 0   ;;  %v1337_v57 = vld [vmem:[%s1711_s17 + $0x70] sm:$0xff]   ;;  %v1340_v60 = vld [vmem:[%s1711_s17 + $0x68] sm:$0xff]   ;;  %p1171_p5 = scmp.ne.s32.totalorder %s1432_s21, 14 }
  0x66   : > { %1217 = vmatprep.subr.bf16.mxu1 %v1451_v54  ;;  %v1335_v55 = vld [vmem:[%s1711_s17 + $0xb8] sm:$0xff]   ;;  %1186 = vmatprep.subr.bf16.mxu0 %v1334_v53  ;;  %v1338_v58 = vld [vmem:[%s1711_s17 + $0xb0] sm:$0xff]   ;;  %v1341_v61 = vld [vmem:[%s1711_s17 + $0xa8] sm:$0xff]  }
  0x67   : > { %v1336_v56 = vld [vmem:[%s1711_s17 + $0x38] sm:$0xff]   ;;  %1233 = vmatprep.mubr.msk.bf16.mxu1 %vm1452_vm0, %v1451_v54  ;;  %1218 = vmatpush3.bf16.msra.mxu1 %v1335_v55  ;;  %v1339_v59 = vld [vmem:[%s1711_s17 + $0x30] sm:$0xff]   ;;  %v1342_v62 = vld [vmem:[%s1711_s17 + $0x28] sm:$0xff]  }
  0x68   : > { %1187 = vmatpush3.bf16.msra.mxu0 %v1336_v56  ;;  %1219 = vmatprep.subr.bf16.mxu1 %v1451_v54  ;;  %v1343_v63 = vld [vmem:[%s1711_s17 + $0x60] sm:$0xff]   ;;  %v1346_v2 = vld [vmem:[%s1711_s17 + $0x58] sm:$0xff]   ;;  %v1349_v5 = vld [vmem:[%s1711_s17 + $0x50] sm:$0xff]  }
  0x69   : > { %1188 = vmatprep.subr.bf16.mxu0 %v1337_v57  ;;  %v1344_v0 = vld [vmem:[%s1711_s17 + $0xa0] sm:$0xff]   ;;  %v1347_v3 = vld [vmem:[%s1711_s17 + $0x98] sm:$0xff]   ;;  %v1350_v6 = vld [vmem:[%s1711_s17 + $0x90] sm:$0xff]  }
  0x6a   : > { %v1345_v1 = vld [vmem:[%s1711_s17 + $0x20] sm:$0xff]   ;;  %v1348_v4 = vld [vmem:[%s1711_s17 + $0x18] sm:$0xff]   ;;  %v1351_v7 = vld [vmem:[%s1711_s17 + $0x10] sm:$0xff]  }
  0x6b   : > { %1220 = vmatpush3.bf16.msra.mxu1 %v1338_v58  ;;  %v1352_v8 = vld [vmem:[%s1711_s17 + $0x48] sm:$0xff]   ;;  %v1355_v11 = vld [vmem:[%s1711_s17 + $0x40] sm:$0xff]  }
  0x6c   : > { %1189 = vmatpush3.bf16.msra.mxu0 %v1339_v59  ;;  %1221 = vmatprep.subr.bf16.mxu1 %v1451_v54  ;;  %v1353_v9 = vld [vmem:[%s1711_s17 + $0x88] sm:$0xff]   ;;  %v1356_v13 = vld [vmem:[%s1711_s17 + $0x80] sm:$0xff]  }
  0x6d   : > { %1190 = vmatprep.subr.bf16.mxu0 %v1340_v60  ;;  %v1354_v10 = vld [vmem:[%s1711_s17 + $0x8] sm:$0xff]   ;;  %v1357_v14 = vld [vmem:[%s1711_s17] sm:$0xff]  }
  0x6e   : > { %v1360_v12 = vld [vmem:[%s1709_s24 + $0x4] ss:$12 sps:$4 sm:$0xff]   ;;  %v1361_v15 = vld [vmem:[%s1709_s24 + $0x8] ss:$12 sps:$4 sm:$0xff]   ;;  %v1358_v16 = vld [vmem:[%s1709_s24] ss:$12 sps:$4 sm:$0xff]  }
  0x6f   : > { %1222 = vmatpush3.bf16.msra.mxu1 %v1341_v61  ;;  %804 = vmatprep.mubr.bf16.mxu0 %v1360_v12  ;;  %v558_v23 = vld [vmem:[#allocation2] sm:$0xff]  ;;  %v559_v30 = vld [vmem:[#allocation2 + $0x8] sm:$0xff] }
  0x70   : > { %1191 = vmatpush3.bf16.msra.mxu0 %v1342_v62  ;;  %1223 = vmatprep.subr.bf16.mxu1 %v1451_v54 }
  0x71   : > { %1192 = vmatprep.subr.bf16.mxu0 %v1343_v63 }
  0x73   : > { %1224 = vmatpush3.bf16.msra.mxu1 %v1344_v0 }
  0x74   : > { %1193 = vmatpush3.bf16.msra.mxu0 %v1345_v1  ;;  %1225 = vmatprep.subr.bf16.mxu1 %v1451_v54 }
  0x75   : > { %1194 = vmatprep.subr.bf16.mxu0 %v1346_v2 }
  0x77   : > { %1226 = vmatpush3.bf16.msra.mxu1 %v1347_v3 }
  0x78   : > { %1195 = vmatpush3.bf16.msra.mxu0 %v1348_v4  ;;  %1227 = vmatprep.subr.bf16.mxu1 %v1451_v54 }
  0x79   : > { %1196 = vmatprep.subr.bf16.mxu0 %v1349_v5 }
  0x7b   : > { %1228 = vmatpush3.bf16.msra.mxu1 %v1350_v6 }
  0x7c   : > { %1197 = vmatpush3.bf16.msra.mxu0 %v1351_v7  ;;  %1229 = vmatprep.subr.bf16.mxu1 %v1451_v54 }
  0x7d   : > { %1198 = vmatprep.subr.bf16.mxu0 %v1352_v8 }
  0x7f   : > { %1230 = vmatpush3.bf16.msra.mxu1 %v1353_v9 }
  0x80   : > { %1199 = vmatpush3.bf16.msra.mxu0 %v1354_v10  ;;  %1231 = vmatprep.subr.bf16.mxu1 %v1451_v54 }
  0x81   : > { %1200 = vmatprep.subr.bf16.mxu0 %v1355_v11 }
  0x83   : > { %1232 = vmatpush3.bf16.msra.mxu1 %v1356_v13 }
  0x84   : > { %1201 = vmatpush3.bf16.msra.mxu0 %v1357_v14 }
  0x86   : > { %1234 = vmatmul.mubr.bf16.vlgmr.msra.gmra.mxu1 %v1361_v15 }
  0x87   : > { %805 = vmatmul.mubr.bf16.vlgmr.msra.gmra.mxu0 %v1358_v16 }
 0x146   : > { %v847_v17 = vpop.f32.mrf.mxu1 }
 0x147   : > { %v1202_v18 = vpop.f32.mrf.mxu0 }
 0x148   : > { %v1235_v19 = vpop.f32.mrf.mxu1 }
 0x149   : > { %v1203_v20 = vpop.f32.mrf.mxu0 }
 0x14a   : > { %v1204_v21 = vadd.f32 %v1203_v20, %v1202_v18  ;;  %v850_v22 = vpop.f32.mrf.mxu1 }
 0x14b   : > { %v1205_v24 = vpop.f32.mrf.mxu0 }
 0x14c   : > { %v848_v25 = vadd.f32 %v1204_v21, %v847_v17  ;;  %v1236_v26 = vpop.f32.mrf.mxu1 }
 0x14d   : > { %v1206_v27 = vpop.f32.mrf.mxu0 }
 0x14e   : > { %v854_v28 = vadd.f32 %v848_v25, %v558_v23  ;;  %v1207_v29 = vadd.f32 %v1206_v27, %v1205_v24 }
 0x150   : > { %856 = vst [vmem:[#allocation2] sm:$0xff] %v854_v28  ;;  %v851_v31 = vadd.f32 %v1207_v29, %v850_v22  ;;  %861 = sbr.rel (%p1171_p5) target bundleno = 365 (0x16d), region = 103 }
 0x152   : > { %v855_v32 = vadd.f32 %v851_v31, %v559_v30 }
 0x154   : > { %857 = vst [vmem:[#allocation2 + $0x8] sm:$0xff] %v855_v32 }
 0x157   : > { %v862_v33 = vld [vmem:[#allocation2] sm:$0xff] }
 0x158   : > { %v882_v37 = vmul.f32 %v862_v33, %v862_v33 }
 0x15b   : > { %v863_v34 = vld [vmem:[#allocation2 + $0x8] sm:$0xff] }
 0x15c   : > { %v1184_v35 = vpack.c.bf16 %v863_v34, %v862_v33  ;;  %v874_v36 = vadd.f32 %v863_v34, %v862_v33  ;;  %v883_v38 = vmul.f32 %v863_v34, %v863_v34 }
 0x15e   : > { %1185 = vst [vmem:[%s1713_s15] sm:$0xff] %v1184_v35   ;;  %v875_v39 = vrot.slane %v874_v36, 4  ;;  %v884_v40 = vadd.f32 %v883_v38, %v882_v37 }
 0x160   : > { %v876_v41 = vadd.f32 %v875_v39, %v874_v36  ;;  %v885_v42 = vrot.slane %v884_v40, 4 }
 0x162   : > { %v877_v43 = vrot.slane %v876_v41, 2  ;;  %v886_v44 = vadd.f32 %v885_v42, %v884_v40 }
 0x164   : > { %v878_v45 = vadd.f32 %v877_v43, %v876_v41  ;;  %v887_v46 = vrot.slane %v886_v44, 2 }
 0x166   : > { %v879_v47 = vrot.slane %v878_v45, 1  ;;  %v888_v48 = vadd.f32 %v887_v46, %v886_v44 }
 0x168   : > { %v880_v49 = vadd.f32 %v879_v47, %v878_v45  ;;  %v889_v50 = vrot.slane %v888_v48, 1 }
 0x16a   : > { %881 = vst [vmem:[%s543_s8] sm:$0x1] %v880_v49  ;;  %v890_v51 = vadd.f32 %v889_v50, %v888_v48 }
 0x16c   : > { %891 = vst [vmem:[%s550_s27] sm:$0x1] %v890_v51 }
 0x16d PF: > { %912 = sbr.rel (!%p1572_p12) target bundleno = 370 (0x172), region = 107  ;;  %s1175_s0 = sshll.u32 (%p1572_p12), %s1436_s22, 2  ;;  %v934_v52 = vld [vmem:[%s1713_s15] sm:$0xf] (%p1572_p12)  ;;  %v936_v53 = vld [vmem:[%s1713_s15 + $0x4] sm:$0xf] (%p1572_p12) }
 0x16e   : > { %s917_s26 = scalar_lea.vmem (%p1572_p12), %s1798_s2, %s1175_s0 }
 0x16f   : > { %935 = vst [vmem:[%s917_s26] sm:$0xf] (%p1572_p12), %v934_v52  ;;  %937 = vst [vmem:[%s917_s26 + $0x14] sm:$0xf] (%p1572_p12), %v936_v53 }
 0x172 PF: > { %s15_s25 = sadd.s32 1, %s1448_s25   ;;  %s1814_s22 = sld [smem:[#allocation6_spill]] }
 0x173   : > { %p12_p6 = scmp.ge.s32.totalorder %s15_s25, 77   ;;  %s1815_s27 = sld [smem:[#allocation7_spill]] }
 0x174   : > { %s1816_s24 = sld [smem:[#allocation8_spill]]  ;;  %s1817_s15 = smov %s1412_s16 }
 0x175   : > { %s1818_s16 = smov %s1570_s13  ;;  %s1819_s17 = smov %s1420_s18 }
 0x176   : > { %s1820_s18 = smov %s1567_s12  ;;  %s1821_s19 = smov %s1428_s20 }
 0x177   : > { %s1822_s20 = smov %s1553_s7  ;;  %s1823_s21 = smov %s1440_s23 }
 0x178   :  { %14 = sbr.rel (!%p12_p6) target bundleno = 9 (0x9), region = 217 }
 0x179   : > { %s1824_s23 = smov %s1815_s27 }

// kernel: _lambda_.53
= control target key start
LH: loop header
LB: loop body
LE: loop exit
PB: predicated region body
PF: predicated region fallthrough
CT: control target
= control target key end

     0   :  { %v32_v0 = vlaneseq  ;;  %s240_s0 = inlined_call_operand.vmem [shape: bf16[16,640], index: 0, kind: input, shape index: {}, may-alias: {0,3}]   ;;  %s241_s1 = inlined_call_operand.vmem [shape: f32[1,640], index: 1, kind: input, shape index: {}]   ;;  %s242_s2 = inlined_call_operand.vmem [shape: f32[1,640], index: 2, kind: input, shape index: {}]   ;;  %s243_s3 = inlined_call_operand.vmem [shape: bf16[16,640], index: 3, kind: output, shape index: {}, may-alias: {0,3}]  }
   0x1   :  { %v14_v1 = vld [vmem:[%s240_s0] sm:$0xff]  ;;  %v15_v5 = vld [vmem:[%s240_s0 + $0x8] sm:$0xff]  ;;  %v16_v6 = vld [vmem:[%s240_s0 + $0x10] sm:$0xf] }
   0x2   :  { %v20_v2 = vunpack.c.l.bf16 %v14_v1  ;;  %v21_v3 = vunpack.c.h.bf16 %v14_v1  ;;  %v33_v4 = vshrl.u32 %v32_v0, 7  ;;  %v17_v7 = vld [vmem:[%s240_s0 + $0x14] sm:$0xff]  ;;  %v30_v8 = vld [vmem:[%s241_s1] sm:$0x1f]  ;;  %v22_v10 = vunpack.c.l.bf16 %v15_v5 }
   0x3   :  { %v67_v9 = vld [vmem:[%s242_s2] sm:$0x1f]  ;;  %v23_v11 = vunpack.c.h.bf16 %v15_v5  ;;  %v24_v12 = vunpack.c.l.bf16 %v16_v6  ;;  %v25_v13 = vunpack.c.l.bf16 %v17_v7  ;;  %v26_v20 = vunpack.c.h.bf16 %v17_v7 }
   0x4   :  { %v18_v14 = vld [vmem:[%s240_s0 + $0x1c] sm:$0xff]  ;;  %v34_v15 = vsub.s32 0, %v33_v4  ;;  %v38_v16 = vsub.s32 1, %v33_v4  ;;  %v42_v17 = vsub.s32 2, %v33_v4  ;;  %v46_v18 = vsub.s32 3, %v33_v4 }
   0x5   :  { %v50_v19 = vsub.s32 4, %v33_v4  ;;  %v27_v21 = vunpack.c.l.bf16 %v18_v14  ;;  %v28_v22 = vunpack.c.h.bf16 %v18_v14  ;;  %v19_v59 = vld [vmem:[%s240_s0 + $0x24] sm:$0xf] }
   0x6   :  { %v35_v23 = vrot.slane %v30_v8, %v34_v15  ;;  %v39_v24 = vrot.slane %v30_v8, %v38_v16  ;;  %v72_v25 = vrot.slane %v67_v9, %v34_v15  ;;  %v76_v26 = vrot.slane %v67_v9, %v38_v16 }
   0x7   :  { %v43_v27 = vrot.slane %v30_v8, %v42_v17  ;;  %v47_v28 = vrot.slane %v30_v8, %v46_v18  ;;  %v80_v29 = vrot.slane %v67_v9, %v42_v17  ;;  %v84_v30 = vrot.slane %v67_v9, %v46_v18 }
   0x8   :  { %v57_v31 = vmul.f32 %v35_v23, %v20_v2  ;;  %v58_v32 = vmul.f32 %v39_v24, %v21_v3  ;;  %v51_v33 = vrot.slane %v30_v8, %v50_v19  ;;  %v88_v34 = vrot.slane %v67_v9, %v50_v19 }
   0x9   :  { %v59_v35 = vmul.f32 %v43_v27, %v22_v10  ;;  %v60_v36 = vmul.f32 %v47_v28, %v23_v11  ;;  %v62_v37 = vmul.f32 %v35_v23, %v25_v13  ;;  %v63_v38 = vmul.f32 %v39_v24, %v26_v20 }
   0xa   :  { %v94_v39 = vadd.f32 %v72_v25, %v57_v31  ;;  %v95_v40 = vadd.f32 %v76_v26, %v58_v32  ;;  %v61_v41 = vmul.f32 %v51_v33, %v24_v12  ;;  %v64_v42 = vmul.f32 %v43_v27, %v27_v21 }
   0xb   :  { %v96_v43 = vadd.f32 %v80_v29, %v59_v35  ;;  %v97_v44 = vadd.f32 %v84_v30, %v60_v36  ;;  %v99_v45 = vadd.f32 %v72_v25, %v62_v37  ;;  %v100_v46 = vadd.f32 %v76_v26, %v63_v38 }
   0xc   :  { %v104_v47 = vmax.f32 %v94_v39, 0.0  ;;  %v105_v48 = vmax.f32 %v95_v40, 0.0  ;;  %v98_v49 = vadd.f32 %v88_v34, %v61_v41  ;;  %v65_v50 = vmul.f32 %v47_v28, %v28_v22 }
   0xd   :  { %v106_v51 = vmax.f32 %v96_v43, 0.0  ;;  %v107_v52 = vmax.f32 %v97_v44, 0.0  ;;  %v109_v53 = vmax.f32 %v99_v45, 0.0  ;;  %v110_v54 = vmax.f32 %v100_v46, 0.0 }
   0xe   :  { %v114_v55 = vmul.f32 2.0, %v104_v47  ;;  %v115_v56 = vmul.f32 2.0, %v105_v48  ;;  %v108_v57 = vmax.f32 %v98_v49, 0.0  ;;  %v101_v58 = vadd.f32 %v80_v29, %v64_v42 }
   0xf   :  { %v116_v60 = vmul.f32 2.0, %v106_v51  ;;  %v117_v61 = vmul.f32 2.0, %v107_v52  ;;  %v119_v62 = vmul.f32 2.0, %v109_v53  ;;  %v120_v63 = vmul.f32 2.0, %v110_v54 }
  0x10   :  { %v172_v0 = vpack.c.bf16 %v115_v56, %v114_v55  ;;  %v118_v1 = vmul.f32 2.0, %v108_v57  ;;  %v102_v2 = vadd.f32 %v84_v30, %v65_v50  ;;  %v111_v3 = vmax.f32 %v101_v58, 0.0 }
  0x11   :  { %v173_v4 = vpack.c.bf16 %v117_v61, %v116_v60  ;;  %v175_v5 = vpack.c.bf16 %v120_v63, %v119_v62  ;;  %v29_v6 = vunpack.c.l.bf16 %v19_v59 }
  0x12   :  { %156 = vst [vmem:[%s243_s3] sm:$0xff] %v172_v0  ;;  %v174_v7 = vpack.c.bf16 %v118_v1, %v118_v1  ;;  %v112_v8 = vmax.f32 %v102_v2, 0.0  ;;  %v121_v9 = vmul.f32 2.0, %v111_v3 }
  0x13   :  { %157 = vst [vmem:[%s243_s3 + $0x8] sm:$0xff] %v173_v4  ;;  %159 = vst [vmem:[%s243_s3 + $0x14] sm:$0xff] %v175_v5  ;;  %v66_v10 = vmul.f32 %v51_v33, %v29_v6 }
  0x14   :  { %158 = vst [vmem:[%s243_s3 + $0x10] sm:$0xf] %v174_v7  ;;  %v122_v11 = vmul.f32 2.0, %v112_v8 }
  0x15   :  { %v103_v12 = vadd.f32 %v88_v34, %v66_v10 }
  0x16   :  { %v176_v13 = vpack.c.bf16 %v122_v11, %v121_v9 }
  0x17   :  { %v113_v14 = vmax.f32 %v103_v12, 0.0 }
  0x18   :  { %160 = vst [vmem:[%s243_s3 + $0x1c] sm:$0xff] %v176_v13 }
  0x19   :  { %v123_v15 = vmul.f32 2.0, %v113_v14 }
  0x1b   :  { %v177_v16 = vpack.c.bf16 %v123_v15, %v123_v15 }
  0x1d   :  { %161 = vst [vmem:[%s243_s3 + $0x24] sm:$0xf] %v177_v16 }

// kernel: _lambda_.54
= control target key start
LH: loop header
LB: loop body
LE: loop exit
PB: predicated region body
PF: predicated region fallthrough
CT: control target
= control target key end

     0   :  { %s332_s6 = smov 0   ;;  %s373_s0 = inlined_call_operand.vmem [shape: bf16[2,4,640], index: 0, kind: input, shape index: {}]   ;;  %s374_s1 = inlined_call_operand.vmem [shape: bf16[2,1,640], index: 1, kind: output, shape index: {}]  }
   0x1 LB: > { %s292_s7 = sadd.s32 4294967295, %s319_s6   ;;  %p296_p0 = scmp.ge.s32.totalorder %s319_s6, 1  ;;  %s319_s6 = sphi %s332_s6, %s11_s6  }
   0x2   : > { %p87_p1 = scmp.lt.s32.totalorder %s319_s6, 3 }
   0x4   : > { %p88_p2 = pnand %p296_p0, %p87_p1 }
   0x5   : > { %p106_p3 = scmp.lt.s32.totalorder (!%p88_p2), %s292_s7, 1 }
   0x6   : > { %91 = sbr.rel (%p88_p2) target bundleno = 47 (0x2f), region = 24 }
   0xb   : > { %s382_s7 = smov (!%p106_p3, %s292_s7), 1  ;;  %vm126_vm0 = vcmask 1043456   ;;  %v182_v20 = vlaneseq  ;;  %vm217_vm1 = vcmask 1040384   ;;  %vm218_vm2 = vsmask.f32 256 }
   0xc   : > { %s302_s8 = smul.u32 10, %s382_s7  ;;  %v321_v26 = vmov 1966171168   ;;  %vm220_vm3 = vcmask 1041409   ;;  %vm221_vm4 = vsmask.f32 1280  ;;  %vm348_vm5 = vmand %vm217_vm1, %vm218_vm2 }
   0xd   : > { %v180_v27 = vunpack.c.l.s4 %v321_v26  ;;  %v183_v33 = vshrl.u32 %v182_v20, 7  ;;  %vm352_vm6 = vmand %vm220_vm3, %vm221_vm4  ;;  %vm224_vm7 = vcmask 1042434   ;;  %vm225_vm8 = vsmask.f32 2304  ;;  %s303_s12 = smul.u32 5, %s382_s7 }
   0xe   : > { %s110_s11 = scalar_lea.vmem %s373_s0, %s302_s8  ;;  %vm223_vm9 = vmor %vm352_vm6, %vm348_vm5  ;;  %vm228_vm11 = vcmask 1043459   ;;  %vm229_vm12 = vsmask.f32 3328  ;;  %vm232_vm15 = vcmask 1044484  }
   0xf   : > { %v115_v0 = vld [vmem:[%s110_s11] sm:$0xff]  ;;  %v116_v1 = vld [vmem:[%s110_s11 + $0x8] sm:$0x3]  ;;  %v181_v41 = vunpack.c.0.s8 %v180_v27  ;;  %vm226_vm10 = vmand %vm224_vm7, %vm225_vm8  ;;  %s114_s15 = scalar_lea.vmem %s374_s1, %s303_s12 }
  0x10   : > { %v117_v2 = vunpack.c.l.bf16 %v115_v0  ;;  %v118_v3 = vunpack.c.h.bf16 %v115_v0  ;;  %v119_v4 = vunpack.c.l.bf16 %v116_v1  ;;  %vm360_vm13 = vmor %vm226_vm10, %vm223_vm9  ;;  %v236_v1 = vld [vmem:[%s114_s15] sm:$0x1f] }
  0x11   : > { %v184_v54 = vsub.s32 %v181_v41, %v183_v33  ;;  %vm230_vm14 = vmand %vm228_vm11, %vm229_vm12 }
  0x12   : > { %v122_v5 = vcombine.high %v117_v2, %v117_v2  ;;  %v123_v6 = vcombine.high %v118_v3, %v118_v3  ;;  %v127_v7 = vsel %vm126_vm0, %v117_v2, 0.0  ;;  %v141_v8 = vsel %vm126_vm0, %v118_v3, 0.0  ;;  %vm231_vm1 = vmor %vm230_vm14, %vm360_vm13 }
  0x13   : > { %v128_v9 = vrot.slane %v127_v7, 4  ;;  %v142_v10 = vrot.slane %v141_v8, 4  ;;  %v155_v11 = vsel %vm126_vm0, %v119_v4, 0.0 }
  0x14   : > { %v134_v12 = vsel %vm126_vm0, %v122_v5, 0.0  ;;  %v148_v13 = vsel %vm126_vm0, %v123_v6, 0.0  ;;  %v156_v14 = vrot.slane %v155_v11, 4  ;;  %vm233_vm0 = vsmask.f32 4352 }
  0x15   : > { %v129_v15 = vadd.f32 %v128_v9, %v127_v7  ;;  %v135_v16 = vrot.slane %v134_v12, 4  ;;  %v143_v17 = vadd.f32 %v142_v10, %v141_v8  ;;  %v149_v18 = vrot.slane %v148_v13, 4  ;;  %vm234_vm2 = vmand %vm232_vm15, %vm233_vm0 }
  0x16   : > { %v157_v19 = vadd.f32 %v156_v14, %v155_v11  ;;  %vm235_vm3 = vmor %vm234_vm2, %vm231_vm1 }
  0x17   : > { %v130_v21 = vrot.slane %v129_v15, 2  ;;  %v136_v22 = vadd.f32 %v135_v16, %v134_v12  ;;  %v144_v23 = vrot.slane %v143_v17, 2  ;;  %v150_v24 = vadd.f32 %v149_v18, %v148_v13 }
  0x18   : > { %v158_v25 = vrot.slane %v157_v19, 2 }
  0x19   : > { %v131_v28 = vadd.f32 %v130_v21, %v129_v15  ;;  %v137_v29 = vrot.slane %v136_v22, 2  ;;  %v145_v30 = vadd.f32 %v144_v23, %v143_v17  ;;  %v151_v31 = vrot.slane %v150_v24, 2 }
  0x1a   : > { %v159_v32 = vadd.f32 %v158_v25, %v157_v19 }
  0x1b   : > { %v132_v35 = vrot.slane %v131_v28, 1  ;;  %v138_v36 = vadd.f32 %v137_v29, %v136_v22  ;;  %v146_v37 = vrot.slane %v145_v30, 1  ;;  %v152_v38 = vadd.f32 %v151_v31, %v150_v24 }
  0x1c   : > { %v160_v40 = vrot.slane %v159_v32, 1 }
  0x1d   : > { %v133_v42 = vadd.f32 %v132_v35, %v131_v28  ;;  %v139_v43 = vrot.slane %v138_v36, 1  ;;  %v147_v44 = vadd.f32 %v146_v37, %v145_v30  ;;  %v153_v45 = vrot.slane %v152_v38, 1 }
  0x1e   : > { %v161_v46 = vadd.f32 %v160_v40, %v159_v32 }
  0x1f   : > { %v140_v47 = vadd.f32 %v139_v43, %v138_v36  ;;  %v154_v48 = vadd.f32 %v153_v45, %v152_v38  ;;  %v162_v49 = vmul.f32 0.25, %v133_v42  ;;  %v164_v50 = vmul.f32 0.25, %v147_v44 }
  0x20   : > { %v166_v51 = vmul.f32 0.25, %v161_v46 }
  0x21   : > { %v163_v52 = vmul.f32 0.25, %v140_v47  ;;  %v165_v53 = vmul.f32 0.25, %v154_v48 }
  0x22   : > { %v171_v55 = vpack.c.bf16 %v166_v51, %v166_v51 }
  0x23   : > { %v298_v57 = vpack.c.bf16 %v163_v52, %v162_v49  ;;  %v299_v58 = vpack.c.bf16 %v165_v53, %v164_v50 }
  0x24   : > { %v199_v59 = vrot.slane %v171_v55, %v184_v54 }
  0x25   : > { %v185_v60 = vrot.slane %v298_v57, %v184_v54  ;;  %v192_v61 = vrot.slane %v299_v58, %v184_v54 }
  0x26   : > { %v214_v63 = vrot.slane %v199_v59, %v184_v54 }
  0x27   : > { %v200_v62 = vcombine.low %v185_v60, %v192_v61 }
  0x29   : > { %v207_v0 = vrot.slane %v200_v62, %v184_v54 }
  0x2b   : > { %v215_v2 = vcombine.low %v207_v0, %v214_v63 }
  0x2d   : > { %v237_v3 = vsel %vm235_vm3, %v215_v2, %v236_v1 }
  0x2e   : > { %238 = vst [vmem:[%s114_s15] sm:$0x1f] %v237_v3 }
  0x2f PF: > { %s11_s6 = sadd.s32 1, %s319_s6  }
  0x30   : > { %p8_p4 = scmp.ge.s32.totalorder %s11_s6, 4  }
  0x32   :  { %10 = sbr.rel (!%p8_p4) target bundleno = 1 (0x1), region = 54 }

// kernel: _lambda_.55
= control target key start
LH: loop header
LB: loop body
LE: loop exit
PB: predicated region body
PF: predicated region fallthrough
CT: control target
= control target key end

     0   :  { %s988_s12 = smov 0   ;;  %s990_s13 = smov 0   ;;  %s1211_s0 = inlined_call_operand.vmem [shape: bf16[16,640], index: 0, kind: input, shape index: {}]   ;;  %s1212_s1 = inlined_call_operand.vmem [shape: bf16[640,1024], index: 1, kind: input, shape index: {}]   ;;  %s1213_s2 = inlined_call_operand.vmem [shape: f32[1,1024], index: 2, kind: input, shape index: {}]   ;;  %s1214_s3 = inlined_call_operand.vmem [shape: f32[16,1024], index: 3, kind: output, shape index: {}]  }
   0x1   :  { %s992_s14 = smov 0   ;;  %s994_s15 = smov 0  }
   0x2   :  { %s996_s16 = smov 0   ;;  %s998_s17 = smov 0  }
   0x3   :  { %s1000_s18 = smov 0   ;;  %s1002_s19 = smov 0  }
   0x4   :  { %s1004_s20 = smov 0   ;;  %s1006_s21 = smov 0  }
   0x5   :  { %s1008_s22 = smov 0  }
   0x6 LB: > { %s721_s23 = sadd.s32 4294967295, %s964_s22   ;;  %s25_s24 = sadd.s32 1, %s956_s20  ;;  %s964_s22 = sphi %s1008_s22, %s13_s22   ;;  %s960_s21 = sphi %s1006_s21, %s1235_s21   ;;  %s956_s20 = sphi %s1004_s20, %s1234_s20   ;;  %s952_s19 = sphi %s1002_s19, %s1233_s19   ;;  %s948_s18 = sphi %s1000_s18, %s1232_s18   ;;  %s944_s17 = sphi %s998_s17, %s1231_s17   ;;  %s940_s16 = sphi %s996_s16, %s1230_s16   ;;  %s936_s15 = sphi %s994_s15, %s1229_s15   ;;  %s932_s14 = sphi %s992_s14, %s1228_s14   ;;  %s928_s13 = sphi %s990_s13, %s1227_s13   ;;  %s924_s12 = sphi %s988_s12, %s1226_s12  }
   0x7   : > { %p26_p0 = scmp.ge.s32.totalorder %s25_s24, 5  ;;  %s28_s25 = sadd.s32 1, %s960_s21 }
   0x8   : > { %s41_s26 = sadd.s32 1, %s944_s17  ;;  %p48_p1 = scmp.ne.s32.totalorder %s944_s17, %s940_s16 }
   0x9   : > { %s1237_s24 = smov (%p26_p0, %s25_s24), 0  ;;  %s1239_s25 = smov (!%p26_p0, %s28_s25), %s960_s21 }
   0xa   : > { %1217 = sst [smem:[#allocation6_spill]] %s1237_s24  ;;  %s37_s27 = ssub.s32 %s956_s20, %s1237_s24 }
   0xb   : > { %p49_p2 = scmp.eq.s32.totalorder %s964_s22, 0  ;;  %p30_p3 = scmp.ge.s32.totalorder %s1239_s25, 4 }
   0xc   : > { %p39_p4 = scmp.eq.s32.totalorder %s37_s27, 0  ;;  %s69_s29 = sadd.s32 1, %s936_s15 }
   0xd   : > { %p1055_p5 = por %p49_p2, %p48_p1  ;;  %s1241_s25 = smov (%p30_p3, %s1239_s25), 0 }
   0xe   : > { %1219 = sst [smem:[#allocation7_spill]] %s1241_s25  ;;  %s65_s4 = ssub.s32 %s960_s21, %s1241_s25 }
   0xf   : > { %s1063_s30 = scalar_select %p39_p4, %s944_s17, %s41_s26  }
  0x10   : > { %p76_p6 = scmp.ne.s32.totalorder %s936_s15, %s932_s14  ;;  %s66_s5 = sor.u32 %s65_s4, %s37_s27 }
  0x11   : > { %1220 = sst [smem:[#allocation8_spill]] %s1063_s30  ;;  %p121_p7 = scmp.eq.s32.totalorder %s65_s4, 0 }
  0x12   : > { %p67_p8 = scmp.eq.s32.totalorder %s66_s5, 0  ;;  %p1069_p9 = por %p76_p6, %p49_p2 }
  0x13   : > { %s123_s7 = sadd.s32 1, %s928_s13  ;;  %p133_p10 = scmp.ne.s32.totalorder %s928_s13, %s924_s12 }
  0x14   : > { %s1077_s8 = scalar_select %p67_p8, %s936_s15, %s69_s29  }
  0x15   : > { %s1080_s9 = scalar_select %p121_p7, %s928_s13, %s123_s7  }
  0x16   : > { %p134_p11 = scmp.eq.s32.totalorder %s721_s23, 19  ;;  %p724_p13 = scmp.ge.s32.totalorder %s964_s22, 20 }
  0x18   : > { %p1082_p12 = por %p134_p11, %p133_p10  ;;  %156 = sbr.rel (%p724_p13) target bundleno = 57 (0x39), region = 16 }
  0x1d   : > { %159 = sbr.rel (!%p1055_p5) target bundleno = 34 (0x22), region = 20  ;;  %s161_s11 = sand.u32 (%p1055_p5), 1, %s944_s17  }
  0x1e   : > { %s726_s26 = sshll.u32 (%p1055_p5), %s956_s20, 2  ;;  %s725_s27 = sshll.u32 (%p1055_p5), %s161_s11, 3 }
  0x1f   : > { %s168_s5 = scalar_lea.vmem (%p1055_p5), %s1211_s0, %s726_s26  ;;  %s163_s23 = scalar_lea.vmem (%p1055_p5), [#allocation3], %s725_s27 }
  0x20   : > { %v185_v0 = vld [vmem:[%s168_s5] sm:$0xf] (%p1055_p5)  ;;  %v187_v1 = vld [vmem:[%s168_s5 + $0x14] sm:$0xf] (%p1055_p5) }
  0x21   : > { %186 = vst [vmem:[%s163_s23] sm:$0xf] (%p1055_p5), %v185_v0  ;;  %188 = vst [vmem:[%s163_s23 + $0x4] sm:$0xf] (%p1055_p5), %v187_v1 }
  0x22 PF: > { %216 = sbr.rel (!%p1069_p9) target bundleno = 57 (0x39), region = 61  ;;  %s218_s28 = sand.u32 (%p1069_p9), 1, %s936_s15  }
  0x23   : > { %s729_s7 = sshll.u32 (%p1069_p9), %s960_s21, 1  ;;  %s727_s25 = sshll.u32 (%p1069_p9), %s218_s28, 7 }
  0x24   : > { %s761_s11 = sshll.u32 (%p1069_p9), %s956_s20, 7  ;;  %s220_s6 = scalar_lea.vmem (%p1069_p9), [#allocation4], %s727_s25 }
  0x25   : > { %s224_s24 = sadd.s32 (%p1069_p9), %s761_s11, %s729_s7 }
  0x26   : > { %s731_s30 = sshll.u32 (%p1069_p9), %s224_s24, 2 }
  0x27   : > { %s1102_s4 = scalar_lea.vmem %s1212_s1, %s731_s30 }
  0x28   : > { %v285_v2 = vld [vmem:[%s1102_s4] sm:$0xff] }
  0x29   : > { %v287_v3 = vld [vmem:[%s1102_s4 + $0x20] sm:$0xff]  ;;  %286 = vst [vmem:[%s220_s6] sm:$0xff] %v285_v2 }
  0x2a   : > { %v289_v4 = vld [vmem:[%s1102_s4 + $0x40] sm:$0xff]  ;;  %288 = vst [vmem:[%s220_s6 + $0x8] sm:$0xff] %v287_v3 }
  0x2b   : > { %290 = vst [vmem:[%s220_s6 + $0x10] sm:$0xff] %v289_v4  ;;  %v291_v5 = vld [vmem:[%s1102_s4 + $0x60] sm:$0xff] }
  0x2c   : > { %v293_v6 = vld [vmem:[%s1102_s4 + $0x80] sm:$0xff]  ;;  %292 = vst [vmem:[%s220_s6 + $0x18] sm:$0xff] %v291_v5 }
  0x2d   : > { %v295_v7 = vld [vmem:[%s1102_s4 + $0xa0] sm:$0xff]  ;;  %294 = vst [vmem:[%s220_s6 + $0x20] sm:$0xff] %v293_v6 }
  0x2e   : > { %296 = vst [vmem:[%s220_s6 + $0x28] sm:$0xff] %v295_v7  ;;  %v297_v8 = vld [vmem:[%s1102_s4 + $0xc0] sm:$0xff] }
  0x2f   : > { %v299_v9 = vld [vmem:[%s1102_s4 + $0xe0] sm:$0xff]  ;;  %298 = vst [vmem:[%s220_s6 + $0x30] sm:$0xff] %v297_v8 }
  0x30   : > { %v301_v10 = vld [vmem:[%s1102_s4 + $0x100] sm:$0xff]  ;;  %300 = vst [vmem:[%s220_s6 + $0x38] sm:$0xff] %v299_v9 }
  0x31   : > { %302 = vst [vmem:[%s220_s6 + $0x40] sm:$0xff] %v301_v10  ;;  %v303_v11 = vld [vmem:[%s1102_s4 + $0x120] sm:$0xff] }
  0x32   : > { %v305_v12 = vld [vmem:[%s1102_s4 + $0x140] sm:$0xff]  ;;  %304 = vst [vmem:[%s220_s6 + $0x48] sm:$0xff] %v303_v11 }
  0x33   : > { %v307_v13 = vld [vmem:[%s1102_s4 + $0x160] sm:$0xff]  ;;  %306 = vst [vmem:[%s220_s6 + $0x50] sm:$0xff] %v305_v12 }
  0x34   : > { %308 = vst [vmem:[%s220_s6 + $0x58] sm:$0xff] %v307_v13  ;;  %v309_v14 = vld [vmem:[%s1102_s4 + $0x180] sm:$0xff] }
  0x35   : > { %v311_v15 = vld [vmem:[%s1102_s4 + $0x1a0] sm:$0xff]  ;;  %310 = vst [vmem:[%s220_s6 + $0x60] sm:$0xff] %v309_v14 }
  0x36   : > { %v313_v16 = vld [vmem:[%s1102_s4 + $0x1c0] sm:$0xff]  ;;  %312 = vst [vmem:[%s220_s6 + $0x68] sm:$0xff] %v311_v15 }
  0x37   : > { %314 = vst [vmem:[%s220_s6 + $0x70] sm:$0xff] %v313_v16  ;;  %v315_v17 = vld [vmem:[%s1102_s4 + $0x1e0] sm:$0xff] }
  0x38   : > { %316 = vst [vmem:[%s220_s6 + $0x78] sm:$0xff] %v315_v17 }
  0x39 PF: > { %p732_p0 = scmp.ge.s32.totalorder %s964_s22, 1  ;;  %p329_p1 = scmp.lt.s32.totalorder %s964_s22, 21 }
  0x3b   : > { %p330_p2 = pnand %p732_p0, %p329_p1 }
  0x3c   : > { %s336_s24 = sand.u32 (!%p330_p2), 1, %s940_s16   ;;  %s343_s25 = sand.u32 (!%p330_p2), 1, %s932_s14  }
  0x3d   : > { %333 = sbr.rel (%p330_p2) target bundleno = 331 (0x14b), region = 103  ;;  %s1124_s30 = sshll.u32 (!%p330_p2), %s336_s24, 3 }
  0x3e   : > { %s734_s27 = sshll.u32 (!%p330_p2), %s343_s25, 7  ;;  %s370_s5 = sand.u32 (!%p330_p2), 1, %s924_s12  }
  0x3f   : > { %s736_s23 = sshll.u32 (!%p330_p2), %s952_s19, 1  ;;  %s735_s28 = sshll.u32 (!%p330_p2), %s370_s5, 5 }
  0x40   : > { %p377_p3 = scmp.lt.s32.totalorder (!%p330_p2), %s736_s23, 7  ;;  %s338_s26 = scalar_lea.vmem (!%p330_p2), [#allocation3], %s1124_s30 }
  0x41   : > { %s1135_s4 = scalar_lea.vmem (!%p330_p2), [#allocation4], %s734_s27  ;;  %s1137_s16 = scalar_lea.vmem (!%p330_p2), [#allocation5], %s735_s28 }
  0x42   : > { %s1243_s23 = smov (!%p377_p3, %s736_s23), 7  ;;  %p737_p4 = scmp.ne.s32.totalorder %s948_s18, 0 }
  0x43   : > { %s379_s29 = scalar_lea.vmem %s1213_s2, %s1243_s23 }
  0x44   : > { %387 = sbr.rel (%p737_p4) target bundleno = 76 (0x4c), region = 115 }
  0x49   : > { %v966_v18 = vmov 0.0  }
  0x4a   : > { %388 = vst [vmem:[#allocation2 + $0x10] sm:$0xff] %v966_v18  ;;  %389 = vst [vmem:[#allocation2] sm:$0xff] %v966_v18 }
  0x4b   : > { %390 = vst [vmem:[#allocation2 + $0x18] sm:$0xff] %v966_v18  ;;  %391 = vst [vmem:[#allocation2 + $0x8] sm:$0xff] %v966_v18 }
  0x4c PF: > { %v853_v19 = vld [vmem:[%s1135_s4 + $0x74] ss:$8 sps:$4 sm:$0xff]   ;;  %v855_v20 = vld [vmem:[%s1135_s4 + $0x70] ss:$8 sps:$4 sm:$0xff]   ;;  %v967_v21 = vmov 0   ;;  %p755_p5 = scmp.ne.s32.totalorder %s948_s18, 4 }
  0x4d   : > { %532 = vmatprep.mubr.bf16.mxu0 %v967_v21  ;;  %500 = vmatprep.subr.bf16.mxu0 %v853_v19  ;;  %v856_v22 = vld [vmem:[%s1135_s4 + $0x64] ss:$8 sps:$4 sm:$0xff]   ;;  %v858_v23 = vld [vmem:[%s1135_s4 + $0x60] ss:$8 sps:$4 sm:$0xff]   ;;  %v859_v24 = vld [vmem:[%s1135_s4 + $0x54] ss:$8 sps:$4 sm:$0xff]  }
  0x4e   : > { %501 = vmatpush1.bf16.msra.mxu0 %v855_v20  ;;  %v861_v25 = vld [vmem:[%s1135_s4 + $0x50] ss:$8 sps:$4 sm:$0xff]   ;;  %v862_v26 = vld [vmem:[%s1135_s4 + $0x44] ss:$8 sps:$4 sm:$0xff]   ;;  %v864_v27 = vld [vmem:[%s1135_s4 + $0x40] ss:$8 sps:$4 sm:$0xff]  }
  0x4f   : > { %502 = vmatprep.subr.bf16.mxu0 %v856_v22  ;;  %v865_v28 = vld [vmem:[%s1135_s4 + $0x34] ss:$8 sps:$4 sm:$0xff]   ;;  %v867_v29 = vld [vmem:[%s1135_s4 + $0x30] ss:$8 sps:$4 sm:$0xff]   ;;  %v868_v30 = vld [vmem:[%s1135_s4 + $0x24] ss:$8 sps:$4 sm:$0xff]  }
  0x50   : > { %v870_v31 = vld [vmem:[%s1135_s4 + $0x20] ss:$8 sps:$4 sm:$0xff]   ;;  %v871_v32 = vld [vmem:[%s1135_s4 + $0x14] ss:$8 sps:$4 sm:$0xff]   ;;  %v873_v33 = vld [vmem:[%s1135_s4 + $0x10] ss:$8 sps:$4 sm:$0xff]  }
  0x51   : > { %v874_v34 = vld [vmem:[%s1135_s4 + $0x4] ss:$8 sps:$4 sm:$0xff]   ;;  %v876_v35 = vld [vmem:[%s1135_s4] ss:$8 sps:$4 sm:$0xff]   ;;  %v877_v36 = vld [vmem:[%s338_s26] sm:$0xff]  }
  0x52   : > { %503 = vmatpush1.bf16.msra.mxu0 %v858_v23  ;;  %v392_v37 = vld [vmem:[#allocation2 + $0x10] sm:$0xff]  ;;  %v393_v39 = vld [vmem:[#allocation2] sm:$0xff]  ;;  %v394_v42 = vld [vmem:[#allocation2 + $0x18] sm:$0xff] }
  0x53   : > { %504 = vmatprep.subr.bf16.mxu0 %v859_v24  ;;  %v395_v45 = vld [vmem:[#allocation2 + $0x8] sm:$0xff] }
  0x56   : > { %505 = vmatpush1.bf16.msra.mxu0 %v861_v25 }
  0x57   : > { %506 = vmatprep.subr.bf16.mxu0 %v862_v26 }
  0x5a   : > { %507 = vmatpush1.bf16.msra.mxu0 %v864_v27 }
  0x5b   : > { %508 = vmatprep.subr.bf16.mxu0 %v865_v28 }
  0x5e   : > { %509 = vmatpush1.bf16.msra.mxu0 %v867_v29 }
  0x5f   : > { %510 = vmatprep.subr.bf16.mxu0 %v868_v30 }
  0x62   : > { %511 = vmatpush1.bf16.msra.mxu0 %v870_v31 }
  0x63   : > { %512 = vmatprep.subr.bf16.mxu0 %v871_v32 }
  0x66   : > { %513 = vmatpush1.bf16.msra.mxu0 %v873_v33 }
  0x67   : > { %514 = vmatprep.subr.bf16.mxu0 %v874_v34 }
  0x6a   : > { %515 = vmatpush1.bf16.msra.mxu0 %v876_v35 }
  0x6d   : > { %533 = vmatmul.mubr.bf16.vlgmr.msra.gmra.mxu0 %v877_v36 }
 0x12d   : > { %v534_v38 = vpop.f32.mrf.mxu0 }
 0x12e   : > { %v543_v40 = vadd.f32 %v534_v38, %v392_v37 }
 0x12f   : > { %v536_v41 = vpop.f32.mrf.mxu0 }
 0x130   : > { %547 = vst [vmem:[#allocation2 + $0x10] sm:$0xff] %v543_v40  ;;  %v544_v43 = vadd.f32 %v536_v41, %v393_v39 }
 0x131   : > { %v538_v44 = vpop.f32.mrf.mxu0 }
 0x132   : > { %548 = vst [vmem:[#allocation2] sm:$0xff] %v544_v43  ;;  %v545_v46 = vadd.f32 %v538_v44, %v394_v42  ;;  %554 = sbr.rel (%p755_p5) target bundleno = 323 (0x143), region = 119 }
 0x133   : > { %v540_v47 = vpop.f32.mrf.mxu0 }
 0x134   : > { %549 = vst [vmem:[#allocation2 + $0x18] sm:$0xff] %v545_v46  ;;  %v546_v48 = vadd.f32 %v540_v47, %v395_v45 }
 0x136   : > { %550 = vst [vmem:[#allocation2 + $0x8] sm:$0xff] %v546_v48 }
 0x137   : > { %v561_v49 = vlaneseq  ;;  %v559_v51 = vld [vmem:[%s379_s29] sm:$0x3]  ;;  %v555_v52 = vld [vmem:[#allocation2 + $0x10] sm:$0xff] }
 0x139   : > { %v562_v50 = vshrl.u32 %v561_v49, 7  ;;  %v556_v55 = vld [vmem:[#allocation2] sm:$0xff] }
 0x13b   : > { %v563_v53 = vsub.s32 0, %v562_v50  ;;  %v567_v54 = vsub.s32 1, %v562_v50  ;;  %v557_v56 = vld [vmem:[#allocation2 + $0x18] sm:$0xff] }
 0x13d   : > { %v558_v57 = vld [vmem:[#allocation2 + $0x8] sm:$0xff]  ;;  %v564_v58 = vrot.slane %v559_v51, %v563_v53  ;;  %v568_v59 = vrot.slane %v559_v51, %v567_v54 }
 0x13f   : > { %v571_v60 = vadd.f32 %v564_v58, %v555_v52  ;;  %v572_v61 = vadd.f32 %v568_v59, %v556_v55  ;;  %v573_v62 = vadd.f32 %v564_v58, %v557_v56  ;;  %v574_v63 = vadd.f32 %v568_v59, %v558_v57 }
 0x141   : > { %575 = vst [vmem:[%s1137_s16] sm:$0xff] %v571_v60  ;;  %576 = vst [vmem:[%s1137_s16 + $0x8] sm:$0xff] %v572_v61 }
 0x142   : > { %577 = vst [vmem:[%s1137_s16 + $0x10] sm:$0xff] %v573_v62  ;;  %578 = vst [vmem:[%s1137_s16 + $0x18] sm:$0xff] %v574_v63 }
 0x143 PF: > { %585 = sbr.rel (!%p1082_p12) target bundleno = 331 (0x14b), region = 123  ;;  %s762_s18 = sshll.u32 (%p1082_p12), %s952_s19, 4 }
 0x144   : > { %s591_s25 = scalar_lea.vmem (%p1082_p12), %s1214_s3, %s762_s18 }
 0x148   : > { %v604_v0 = vld [vmem:[%s1137_s16] sm:$0xff]  ;;  %v606_v1 = vld [vmem:[%s1137_s16 + $0x8] sm:$0xff] }
 0x149   : > { %v608_v2 = vld [vmem:[%s1137_s16 + $0x10] sm:$0xff]  ;;  %v610_v3 = vld [vmem:[%s1137_s16 + $0x18] sm:$0xff]  ;;  %605 = vst [vmem:[%s591_s25] sm:$0xff] %v604_v0  ;;  %607 = vst [vmem:[%s591_s25 + $0x8] sm:$0xff] %v606_v1 }
 0x14a   : > { %609 = vst [vmem:[%s591_s25 + $0x40] sm:$0xff] %v608_v2  ;;  %611 = vst [vmem:[%s591_s25 + $0x48] sm:$0xff] %v610_v3 }
 0x14b PF: > { %s13_s22 = sadd.s32 1, %s964_s22   ;;  %s1223_s19 = sld [smem:[#allocation8_spill]] }
 0x14c   : > { %p10_p6 = scmp.ge.s32.totalorder %s13_s22, 22   ;;  %s1224_s10 = sld [smem:[#allocation6_spill]] }
 0x14d   : > { %s1225_s30 = sld [smem:[#allocation7_spill]]  ;;  %s1226_s12 = smov %s928_s13 }
 0x14e   : > { %s1227_s13 = smov %s1080_s9  ;;  %s1228_s14 = smov %s936_s15 }
 0x14f   : > { %s1229_s15 = smov %s1077_s8  ;;  %s1230_s16 = smov %s944_s17 }
 0x150   : > { %s1232_s18 = smov %s956_s20  ;;  %12 = sbr.rel (!%p10_p6) target bundleno = 6 (0x6), region = 188 }
 0x151   : > { %s1231_s17 = smov %s1223_s19  ;;  %s1233_s19 = smov %s960_s21 }
 0x152   : > { %s1234_s20 = smov %s1224_s10 }
 0x153   : > { %s1235_s21 = smov %s1225_s30 }

</bundles_post_ra>
